<compile_context>
chip_gen: v5e
topology: v5e:2x2
jax: 0.10.0
libtpu: 0.0.40
codegen_flags: <defaults>
</compile_context>

<pallas_src>
import functools

import jax
import jax.numpy as jnp
from jax import lax
from jax.experimental import pallas as pl
from jax.experimental.pallas import tpu as pltpu

_EPS = 1e-5
_TM_TARGET = 512  # lane-dense spatial tile target (multiple of 128)


# ---------------------------------------------------------------------------
# In-kernel interior-mask generation (no mask arrays / streams).
# ---------------------------------------------------------------------------
def _divmod_exact(q, d):
    """Exact (quotient, remainder) of a non-negative int32 vector by a positive
    Python int, via float estimate + correction (avoids vector integer div)."""
    est = (q.astype(jnp.float32) * (1.0 / float(d))).astype(jnp.int32)
    r = q - est * d
    for _ in range(2):  # two rounds cover estimates off by up to +-2
        under = r < 0
        est = jnp.where(under, est - 1, est)
        r = jnp.where(under, r + d, r)
        over = r >= d
        est = jnp.where(over, est + 1, est)
        r = jnp.where(over, r - d, r)
    return est, r


def _interior_mask(q0, width, *, wp, sp, mp, p, h, w):
    """(1, width) bool mask: True where flattened padded-spatial index q0 + l is
    a valid (non-padding, in-range) output position."""
    l = lax.broadcasted_iota(jnp.int32, (1, width), 1)
    q = q0 + l
    in_range = jnp.logical_and(q >= 0, q < mp)
    qc = jnp.clip(q, 0, mp - 1)
    _, r = _divmod_exact(qc, sp)          # position within one padded image
    ypos, xpos = _divmod_exact(r, wp)
    ok_y = jnp.logical_and(ypos >= p, ypos < p + h)
    ok_x = jnp.logical_and(xpos >= p, xpos < p + w)
    return jnp.logical_and(in_range, jnp.logical_and(ok_y, ok_x))


# ---------------------------------------------------------------------------
# Pallas kernels
# ---------------------------------------------------------------------------
def _expand_kernel(x_ref, w_ref, b_ref, y_ref, mu_ref, iv_ref, s_ref, ss_ref,
                   *, tm, inv_count, eps, wp, sp, mp, p, h, w):
    """1x1 expand conv + bias, masked to the interior, with fused per-channel
    sum / sum^2 accumulation (feeds the first ResBlock's BatchNorm)."""
    i = pl.program_id(0)

    @pl.when(i == 0)
    def _init():
        s_ref[...] = jnp.zeros_like(s_ref)
        ss_ref[...] = jnp.zeros_like(ss_ref)

    x = x_ref[...].astype(jnp.bfloat16)                        # (Cin, TM)
    acc = jnp.dot(w_ref[...], x, preferred_element_type=jnp.float32)
    mask = _interior_mask(i * tm, tm, wp=wp, sp=sp, mp=mp, p=p, h=h, w=w)
    y = jnp.where(mask, acc + b_ref[...], 0.0)                 # (Cout, TM) f32
    y_ref[...] = y.astype(y_ref.dtype)                         # bf16 storage

    s_ref[...] += jnp.sum(y, axis=1, keepdims=True)
    ss_ref[...] += jnp.sum(y * y, axis=1, keepdims=True)

    @pl.when(i == pl.num_programs(0) - 1)
    def _fin():
        m = s_ref[...] * inv_count
        v = jnp.maximum(ss_ref[...] * inv_count - m * m, 0.0)
        mu_ref[...] = m
        iv_ref[...] = lax.rsqrt(v + eps)


def _resblock_kernel(xl_ref, xc_ref, xr_ref, w_ref, b_ref, mu_ref, iv_ref,
                     y_ref, mu_o_ref, iv_o_ref, s_ref, ss_ref,
                     *, tm, g_pad, offsets, inv_count, eps, wp, sp, mp, p, h, w):
    """Fused ResBlock (mode='BRC'): y = x + Conv_k(ReLU(BN(x))) + bias, plus
    accumulation of the next block's BatchNorm statistics."""
    i = pl.program_id(0)

    @pl.when(i == 0)
    def _init():
        s_ref[...] = jnp.zeros_like(s_ref)
        ss_ref[...] = jnp.zeros_like(ss_ref)

    # Halo window: g_pad | TM | g_pad columns (bf16, VMEM only, no HBM im2col).
    xw = jnp.concatenate([xl_ref[...], xc_ref[...], xr_ref[...]], axis=1)

    # Interior mask over the window, generated in-kernel (no mask streams).
    mw = _interior_mask(i * tm - g_pad, tm + 2 * g_pad,
                        wp=wp, sp=sp, mp=mp, p=p, h=h, w=w)

    # BatchNorm (stats from the producing kernel) + ReLU fused on the load
    # path; non-interior columns (conv zero padding, cross-image, guards) are
    # re-zeroed so the conv sees nn.Conv2d's exact zero padding.
    xn = jnp.where(
        mw,
        jnp.maximum((xw.astype(jnp.float32) - mu_ref[...]) * iv_ref[...], 0.0),
        0.0).astype(jnp.bfloat16)

    # Fuse the k*k taps along the contraction axis: one (Cout, k*k*C) x
    # (k*k*C, TM) MXU matmul (K = k*k*C) instead of k*k small-K matmuls.
    xstack = jnp.concatenate(
        [xn[:, g_pad + off: g_pad + off + tm] for off in offsets], axis=0)
    acc = jnp.dot(w_ref[...], xstack, preferred_element_type=jnp.float32)

    # bias + residual (previous activations = center tile) + interior mask.
    mc = mw[:, g_pad:g_pad + tm]
    y = acc + b_ref[...] + xc_ref[...].astype(jnp.float32)
    y = jnp.where(mc, y, 0.0)
    y_ref[...] = y.astype(y_ref.dtype)                          # bf16 storage

    # Next block's BN statistics, f32 from the pre-cast values; non-interior
    # columns contribute exact zeros so no count masking is needed.
    s_ref[...] += jnp.sum(y, axis=1, keepdims=True)
    ss_ref[...] += jnp.sum(y * y, axis=1, keepdims=True)

    @pl.when(i == pl.num_programs(0) - 1)
    def _fin():
        m = s_ref[...] * inv_count
        v = jnp.maximum(ss_ref[...] * inv_count - m * m, 0.0)
        mu_o_ref[...] = m
        iv_o_ref[...] = lax.rsqrt(v + eps)


# ---------------------------------------------------------------------------
# pallas_call wrappers
# ---------------------------------------------------------------------------
def _expand_call(xs, w2, b2, *, tm, nt, count, geom):
    cin, length = xs.shape
    cout = w2.shape[0]
    wp, sp, mp, p, h, w = geom
    kern = functools.partial(_expand_kernel, tm=tm, inv_count=1.0 / count,
                             eps=_EPS, wp=wp, sp=sp, mp=mp, p=p, h=h, w=w)
    out_shape = (jax.ShapeDtypeStruct((cout, length), jnp.bfloat16),
                 jax.ShapeDtypeStruct((cout, 1), jnp.float32),
                 jax.ShapeDtypeStruct((cout, 1), jnp.float32))
    grid_spec = pltpu.PrefetchScalarGridSpec(
        num_scalar_prefetch=0,
        grid=(nt,),
        in_specs=[
            pl.BlockSpec((cin, tm), lambda i: (0, i + 1)),      # center tile
            pl.BlockSpec((cout, cin), lambda i: (0, 0)),        # resident weights
            pl.BlockSpec((cout, 1), lambda i: (0, 0)),          # resident bias
        ],
        out_specs=(
            pl.BlockSpec((cout, tm), lambda i: (0, i + 1)),
            pl.BlockSpec((cout, 1), lambda i: (0, 0)),
            pl.BlockSpec((cout, 1), lambda i: (0, 0)),
        ),
        scratch_shapes=[pltpu.VMEM((cout, 1), jnp.float32),
                        pltpu.VMEM((cout, 1), jnp.float32)],
    )
    return pl.pallas_call(
        kern,
        out_shape=out_shape,
        grid_spec=grid_spec,
        compiler_params=pltpu.CompilerParams(
            dimension_semantics=("arbitrary",),
            vmem_limit_bytes=32 * 1024 * 1024),
    )(xs, w2, b2)


def _resblock_call(xs, wmat, b2, mu, iv, *, tm, g_pad, nt, count, offsets, geom):
    c, length = xs.shape
    cout, kkc = wmat.shape
    wp, sp, mp, p, h, w = geom
    r = tm // g_pad                      # halo-sliver blocks per center tile
    kern = functools.partial(_resblock_kernel, tm=tm, g_pad=g_pad,
                             offsets=offsets, inv_count=1.0 / count, eps=_EPS,
                             wp=wp, sp=sp, mp=mp, p=p, h=h, w=w)
    out_shape = (jax.ShapeDtypeStruct((cout, length), jnp.bfloat16),
                 jax.ShapeDtypeStruct((cout, 1), jnp.float32),
                 jax.ShapeDtypeStruct((cout, 1), jnp.float32))
    grid_spec = pltpu.PrefetchScalarGridSpec(
        num_scalar_prefetch=0,
        grid=(nt,),
        in_specs=[
            pl.BlockSpec((c, g_pad), lambda i: (0, (i + 1) * r - 1)),  # left halo sliver
            pl.BlockSpec((c, tm), lambda i: (0, i + 1)),               # center (= residual)
            pl.BlockSpec((c, g_pad), lambda i: (0, (i + 2) * r)),      # right halo sliver
            pl.BlockSpec((cout, kkc), lambda i: (0, 0)),               # resident fused weights
            pl.BlockSpec((cout, 1), lambda i: (0, 0)),                 # resident bias
            pl.BlockSpec((c, 1), lambda i: (0, 0)),                    # BN mean
            pl.BlockSpec((c, 1), lambda i: (0, 0)),                    # BN rsqrt(var+eps)
        ],
        out_specs=(
            pl.BlockSpec((cout, tm), lambda i: (0, i + 1)),
            pl.BlockSpec((cout, 1), lambda i: (0, 0)),
            pl.BlockSpec((cout, 1), lambda i: (0, 0)),
        ),
        scratch_shapes=[pltpu.VMEM((cout, 1), jnp.float32),
                        pltpu.VMEM((cout, 1), jnp.float32)],
    )
    return pl.pallas_call(
        kern,
        out_shape=out_shape,
        grid_spec=grid_spec,
        compiler_params=pltpu.CompilerParams(
            dimension_semantics=("arbitrary",),
            vmem_limit_bytes=32 * 1024 * 1024),
    )(xs, xs, xs, wmat, b2, mu, iv)


# ---------------------------------------------------------------------------
# ResBlocks forward (NCHW in / NCHW out)
# ---------------------------------------------------------------------------
def res_blocks_forward(x, params, *, ksize):
    n, cin, h, w = x.shape
    p = ksize // 2
    hp, wp = h + 2 * p, w + 2 * p
    sp = hp * wp
    mp = n * sp                               # flattened padded spatial size
    g = p * wp + p                            # max |tap offset| in flat coords
    g_pad = ((g + 127) // 128) * 128          # lane-aligned halo sliver width
    tm = g_pad * max(1, (_TM_TARGET + g_pad - 1) // g_pad)   # multiple of g_pad
    nt = -(-mp // tm)                         # number of spatial tiles
    length = (nt + 2) * tm                    # + one guard tile on each side
    count = n * h * w                         # BN reduction size
    geom = (wp, sp, mp, p, h, w)

    # Storage layout (C, L): zero conv halo inside each padded image, guards.
    xpad = jnp.pad(x, ((0, 0), (0, 0), (p, p), (p, p)))
    xf = jnp.transpose(xpad, (1, 0, 2, 3)).reshape(cin, mp)
    xs = jnp.pad(xf, ((0, 0), (tm, length - tm - mp)))

    # 1x1 expand conv (+ fused stats for the first block's BatchNorm).
    we, be = params["expand"]                 # (Cout, Cin), (Cout,)
    cout = we.shape[0]
    y, mu, iv = _expand_call(xs, we.astype(jnp.bfloat16),
                             be.reshape(cout, 1),
                             tm=tm, nt=nt, count=count, geom=geom)

    offsets = tuple((dy - p) * wp + (dx - p)
                    for dy in range(ksize) for dx in range(ksize))
    for wb, bb in params["blocks"]:           # each: x + Conv(ReLU(BN(x)))
        # (O, C, k, k) -> (O, k*k*C), matching the in-kernel tap stacking order.
        wmat = jnp.transpose(wb, (0, 2, 3, 1)).reshape(
            cout, ksize * ksize * cout).astype(jnp.bfloat16)
        y, mu, iv = _resblock_call(y, wmat, bb.reshape(cout, 1), mu, iv,
                                   tm=tm, g_pad=g_pad, nt=nt, count=count,
                                   offsets=offsets, geom=geom)

    # Back to NCHW (f32).
    yc = y[:, tm:tm + mp].astype(jnp.float32).reshape(cout, n, hp, wp)
    yc = yc[:, :, p:p + h, p:p + w]
    return jnp.transpose(yc, (1, 0, 2, 3))


# ---------------------------------------------------------------------------
# Pure-JAX reference (mirrors the PyTorch module) and synthetic init
# ---------------------------------------------------------------------------
def reference_res_blocks(x, params, ksize):
    we, be = params["expand"]
    y = jnp.einsum("oc,nchw->nohw", we, x) + be[None, :, None, None]
    for wb, bb in params["blocks"]:
        mean = jnp.mean(y, axis=(0, 2, 3), keepdims=True)
        var = jnp.mean((y - mean) ** 2, axis=(0, 2, 3), keepdims=True)
        hidden = jnp.maximum((y - mean) * lax.rsqrt(var + _EPS), 0.0)
        conv = lax.conv_general_dilated(
            hidden, wb, window_strides=(1, 1), padding="SAME",
            dimension_numbers=("NCHW", "OIHW", "NCHW"))
        y = y + conv + bb[None, :, None, None]
    return y


def _init_conv(key, k, cin, cout):
    kw, kb = jax.random.split(key)
    bound = 1.0 / float(k * k * cin) ** 0.5
    wgt = jax.random.uniform(kw, (cout, cin, k, k), jnp.float32, -bound, bound)
    bias = jax.random.uniform(kb, (cout,), jnp.float32, -bound, bound)
    return wgt, bias


def init_res_blocks(key, depth, cin, cout, k):
    keys = jax.random.split(key, depth + 1)
    we, be = _init_conv(keys[0], 1, cin, cout)
    blocks = [_init_conv(keys[i + 1], k, cout, cout) for i in range(depth)]
    return {"expand": (we.reshape(cout, cin), be), "blocks": blocks}


# ---------------------------------------------------------------------------
if __name__ == "__main__":
    N, CIN, H, W = 2, 4, 16, 16
    COUT, DEPTH, KSIZE = 32, 2, 3

    key = jax.random.PRNGKey(0)
    kp, kx = jax.random.split(key)
    params = init_res_blocks(kp, DEPTH, CIN, COUT, KSIZE)
    x = jax.random.normal(kx, (N, CIN, H, W), jnp.float32)

    fwd = jax.jit(functools.partial(res_blocks_forward, ksize=KSIZE))
    out = fwd(x, params)
    jax.block_until_ready(out)

    assert out.shape == (N, COUT, H, W), out.shape
    assert bool(jnp.all(jnp.isfinite(out)))

    ref = reference_res_blocks(x, params, KSIZE)
    err = float(jnp.max(jnp.abs(out - ref)))
    assert err < 5e-2, f"max abs err vs reference: {err}"  # bf16 storage/MXU tolerance

    print("KERNEL_OK")
</pallas_src>

<mosaic_0001>
module attributes {stable_mosaic.version = 11 : i64} {
  func.func @_expand_kernel(%arg0: i32, %arg1: memref<4x512xf32, #tpu.memory_space<vmem>>, %arg2: memref<32x4xbf16, #tpu.memory_space<vmem>>, %arg3: memref<32x1xf32, #tpu.memory_space<vmem>>, %arg4: memref<32x512xbf16, #tpu.memory_space<vmem>>, %arg5: memref<32x1xf32, #tpu.memory_space<vmem>>, %arg6: memref<32x1xf32, #tpu.memory_space<vmem>>, %arg7: memref<32x1xf32, #tpu.memory_space<vmem>>, %arg8: memref<32x1xf32, #tpu.memory_space<vmem>>) attributes {dimension_semantics = [#tpu.dimension_semantics<arbitrary>], iteration_bounds = array<i64: 2>, scalar_prefetch = 0 : i64, scratch_operands = 2 : i64, tpu.core_type = #tpu.core_type<tc>, window_params = [{transform_indices = @transform_0, window_bounds = array<i64: 4, 512>}, {pipeline_mode = #tpu.pipeline_mode<synchronous>, transform_indices = @transform_1, window_bounds = array<i64: 32, 4>}, {pipeline_mode = #tpu.pipeline_mode<synchronous>, transform_indices = @transform_2, window_bounds = array<i64: 32, 1>}, {transform_indices = @transform_3, window_bounds = array<i64: 32, 512>}, {pipeline_mode = #tpu.pipeline_mode<synchronous>, transform_indices = @transform_4, window_bounds = array<i64: 32, 1>}, {pipeline_mode = #tpu.pipeline_mode<synchronous>, transform_indices = @transform_5, window_bounds = array<i64: 32, 1>}]} {
    %c0_i32 = arith.constant 0 : i32
    %0 = arith.cmpi eq, %arg0, %c0_i32 : i32
    %1 = arith.extui %0 : i1 to i32
    %c0_i32_0 = arith.constant 0 : i32
    %2 = arith.cmpi ne, %1, %c0_i32_0 : i32
    scf.if %2 {
      %cst_47 = arith.constant 0.000000e+00 : f32
      %121 = vector.broadcast %cst_47 : f32 to vector<32x1xf32>
      %c0_48 = arith.constant 0 : index
      %c0_49 = arith.constant 0 : index
      %122 = vector.load %arg7[%c0_48, %c0_49] : memref<32x1xf32, #tpu.memory_space<vmem>>, vector<32x1xf32>
      tpu.vector_store %arg7[%c0_48, %c0_49], %121 {strides = array<i32>} : memref<32x1xf32, #tpu.memory_space<vmem>>, vector<32x1xf32>,
      %cst_50 = arith.constant 0.000000e+00 : f32
      %123 = vector.broadcast %cst_50 : f32 to vector<32x1xf32>
      %c0_51 = arith.constant 0 : index
      %c0_52 = arith.constant 0 : index
      %124 = vector.load %arg8[%c0_51, %c0_52] : memref<32x1xf32, #tpu.memory_space<vmem>>, vector<32x1xf32>
      tpu.vector_store %arg8[%c0_51, %c0_52], %123 {strides = array<i32>} : memref<32x1xf32, #tpu.memory_space<vmem>>, vector<32x1xf32>,
    } else {
    }
    %c0 = arith.constant 0 : index
    %c0_1 = arith.constant 0 : index
    %3 = vector.load %arg1[%c0, %c0_1] : memref<4x512xf32, #tpu.memory_space<vmem>>, vector<4x512xf32>
    %4 = arith.truncf %3 : vector<4x512xf32> to vector<4x512xbf16>
    %c0_2 = arith.constant 0 : index
    %c0_3 = arith.constant 0 : index
    %5 = vector.load %arg2[%c0_2, %c0_3] : memref<32x4xbf16, #tpu.memory_space<vmem>>, vector<32x4xbf16>
    %cst = arith.constant dense<0.000000e+00> : vector<32x512xf32>
    %6 = tpu.matmul %5, %4, %cst {dimension_numbers = #tpu.dot_dimension_numbers<[1], [0], [0], [1], [0, 0, 1, 1], [], []>} : vector<32x4xbf16>, vector<4x512xbf16>, vector<32x512xf32> -> vector<32x512xf32>
    %c512_i32 = arith.constant 512 : i32
    %7 = arith.muli %arg0, %c512_i32 : i32
    %8 = tpu.iota {dimensions = array<i32: 1>} : vector<1x512xi32>
    %9 = vector.broadcast %7 : i32 to vector<1x512xi32>
    %10 = arith.addi %9, %8 : vector<1x512xi32>
    %c0_i32_4 = arith.constant 0 : i32
    %11 = vector.broadcast %c0_i32_4 : i32 to vector<1x512xi32>
    %12 = arith.cmpi sge, %10, %11 : vector<1x512xi32>
    %c648_i32 = arith.constant 648 : i32
    %13 = vector.broadcast %c648_i32 : i32 to vector<1x512xi32>
    %14 = arith.cmpi slt, %10, %13 : vector<1x512xi32>
    %15 = arith.andi %12, %14 : vector<1x512xi1>
    %c0_i32_5 = arith.constant 0 : i32
    %c647_i32 = arith.constant 647 : i32
    %16 = vector.broadcast %c0_i32_5 : i32 to vector<1x512xi32>
    %17 = arith.maxsi %16, %10 : vector<1x512xi32>
    %18 = vector.broadcast %c647_i32 : i32 to vector<1x512xi32>
    %19 = arith.minsi %18, %17 : vector<1x512xi32>
    %20 = arith.sitofp %19 : vector<1x512xi32> to vector<1x512xf32>
    %cst_6 = arith.constant 0.00308641978 : f32
    %21 = vector.broadcast %cst_6 : f32 to vector<1x512xf32>
    %22 = arith.mulf %20, %21 : vector<1x512xf32>
    %23 = arith.fptosi %22 : vector<1x512xf32> to vector<1x512xi32>
    %c324_i32 = arith.constant 324 : i32
    %24 = vector.broadcast %c324_i32 : i32 to vector<1x512xi32>
    %25 = arith.muli %23, %24 : vector<1x512xi32>
    %26 = arith.subi %19, %25 : vector<1x512xi32>
    %c0_i32_7 = arith.constant 0 : i32
    %27 = vector.broadcast %c0_i32_7 : i32 to vector<1x512xi32>
    %28 = arith.cmpi slt, %26, %27 : vector<1x512xi32>
    %c324_i32_8 = arith.constant 324 : i32
    %29 = vector.broadcast %c324_i32_8 : i32 to vector<1x512xi32>
    %30 = arith.addi %26, %29 : vector<1x512xi32>
    %31 = arith.select %28, %30, %26 : vector<1x512xi1>, vector<1x512xi32>
    %c324_i32_9 = arith.constant 324 : i32
    %32 = vector.broadcast %c324_i32_9 : i32 to vector<1x512xi32>
    %33 = arith.cmpi sge, %31, %32 : vector<1x512xi32>
    %c324_i32_10 = arith.constant 324 : i32
    %34 = vector.broadcast %c324_i32_10 : i32 to vector<1x512xi32>
    %35 = arith.subi %31, %34 : vector<1x512xi32>
    %36 = arith.select %33, %35, %31 : vector<1x512xi1>, vector<1x512xi32>
    %c0_i32_11 = arith.constant 0 : i32
    %37 = vector.broadcast %c0_i32_11 : i32 to vector<1x512xi32>
    %38 = arith.cmpi slt, %36, %37 : vector<1x512xi32>
    %c324_i32_12 = arith.constant 324 : i32
    %39 = vector.broadcast %c324_i32_12 : i32 to vector<1x512xi32>
    %40 = arith.addi %36, %39 : vector<1x512xi32>
    %41 = arith.select %38, %40, %36 : vector<1x512xi1>, vector<1x512xi32>
    %c324_i32_13 = arith.constant 324 : i32
    %42 = vector.broadcast %c324_i32_13 : i32 to vector<1x512xi32>
    %43 = arith.cmpi sge, %41, %42 : vector<1x512xi32>
    %c324_i32_14 = arith.constant 324 : i32
    %44 = vector.broadcast %c324_i32_14 : i32 to vector<1x512xi32>
    %45 = arith.subi %41, %44 : vector<1x512xi32>
    %46 = arith.select %43, %45, %41 : vector<1x512xi1>, vector<1x512xi32>
    %47 = arith.sitofp %46 : vector<1x512xi32> to vector<1x512xf32>
    %cst_15 = arith.constant 0.055555556 : f32
    %48 = vector.broadcast %cst_15 : f32 to vector<1x512xf32>
    %49 = arith.mulf %47, %48 : vector<1x512xf32>
    %50 = arith.fptosi %49 : vector<1x512xf32> to vector<1x512xi32>
    %c18_i32 = arith.constant 18 : i32
    %51 = vector.broadcast %c18_i32 : i32 to vector<1x512xi32>
    %52 = arith.muli %50, %51 : vector<1x512xi32>
    %53 = arith.subi %46, %52 : vector<1x512xi32>
    %c0_i32_16 = arith.constant 0 : i32
    %54 = vector.broadcast %c0_i32_16 : i32 to vector<1x512xi32>
    %55 = arith.cmpi slt, %53, %54 : vector<1x512xi32>
    %c1_i32 = arith.constant 1 : i32
    %56 = vector.broadcast %c1_i32 : i32 to vector<1x512xi32>
    %57 = arith.subi %50, %56 : vector<1x512xi32>
    %58 = arith.select %55, %57, %50 : vector<1x512xi1>, vector<1x512xi32>
    %c18_i32_17 = arith.constant 18 : i32
    %59 = vector.broadcast %c18_i32_17 : i32 to vector<1x512xi32>
    %60 = arith.addi %53, %59 : vector<1x512xi32>
    %61 = arith.select %55, %60, %53 : vector<1x512xi1>, vector<1x512xi32>
    %c18_i32_18 = arith.constant 18 : i32
    %62 = vector.broadcast %c18_i32_18 : i32 to vector<1x512xi32>
    %63 = arith.cmpi sge, %61, %62 : vector<1x512xi32>
    %c1_i32_19 = arith.constant 1 : i32
    %64 = vector.broadcast %c1_i32_19 : i32 to vector<1x512xi32>
    %65 = arith.addi %58, %64 : vector<1x512xi32>
    %66 = arith.select %63, %65, %58 : vector<1x512xi1>, vector<1x512xi32>
    %c18_i32_20 = arith.constant 18 : i32
    %67 = vector.broadcast %c18_i32_20 : i32 to vector<1x512xi32>
    %68 = arith.subi %61, %67 : vector<1x512xi32>
    %69 = arith.select %63, %68, %61 : vector<1x512xi1>, vector<1x512xi32>
    %c0_i32_21 = arith.constant 0 : i32
    %70 = vector.broadcast %c0_i32_21 : i32 to vector<1x512xi32>
    %71 = arith.cmpi slt, %69, %70 : vector<1x512xi32>
    %c1_i32_22 = arith.constant 1 : i32
    %72 = vector.broadcast %c1_i32_22 : i32 to vector<1x512xi32>
    %73 = arith.subi %66, %72 : vector<1x512xi32>
    %74 = arith.select %71, %73, %66 : vector<1x512xi1>, vector<1x512xi32>
    %c18_i32_23 = arith.constant 18 : i32
    %75 = vector.broadcast %c18_i32_23 : i32 to vector<1x512xi32>
    %76 = arith.addi %69, %75 : vector<1x512xi32>
    %77 = arith.select %71, %76, %69 : vector<1x512xi1>, vector<1x512xi32>
    %c18_i32_24 = arith.constant 18 : i32
    %78 = vector.broadcast %c18_i32_24 : i32 to vector<1x512xi32>
    %79 = arith.cmpi sge, %77, %78 : vector<1x512xi32>
    %c1_i32_25 = arith.constant 1 : i32
    %80 = vector.broadcast %c1_i32_25 : i32 to vector<1x512xi32>
    %81 = arith.addi %74, %80 : vector<1x512xi32>
    %82 = arith.select %79, %81, %74 : vector<1x512xi1>, vector<1x512xi32>
    %c18_i32_26 = arith.constant 18 : i32
    %83 = vector.broadcast %c18_i32_26 : i32 to vector<1x512xi32>
    %84 = arith.subi %77, %83 : vector<1x512xi32>
    %85 = arith.select %79, %84, %77 : vector<1x512xi1>, vector<1x512xi32>
    %c1_i32_27 = arith.constant 1 : i32
    %86 = vector.broadcast %c1_i32_27 : i32 to vector<1x512xi32>
    %87 = arith.cmpi sge, %82, %86 : vector<1x512xi32>
    %c17_i32 = arith.constant 17 : i32
    %88 = vector.broadcast %c17_i32 : i32 to vector<1x512xi32>
    %89 = arith.cmpi slt, %82, %88 : vector<1x512xi32>
    %90 = arith.andi %87, %89 : vector<1x512xi1>
    %c1_i32_28 = arith.constant 1 : i32
    %91 = vector.broadcast %c1_i32_28 : i32 to vector<1x512xi32>
    %92 = arith.cmpi sge, %85, %91 : vector<1x512xi32>
    %c17_i32_29 = arith.constant 17 : i32
    %93 = vector.broadcast %c17_i32_29 : i32 to vector<1x512xi32>
    %94 = arith.cmpi slt, %85, %93 : vector<1x512xi32>
    %95 = arith.andi %92, %94 : vector<1x512xi1>
    %96 = arith.andi %90, %95 : vector<1x512xi1>
    %97 = arith.andi %15, %96 : vector<1x512xi1>
    %c0_30 = arith.constant 0 : index
    %c0_31 = arith.constant 0 : index
    %98 = vector.load %arg3[%c0_30, %c0_31] : memref<32x1xf32, #tpu.memory_space<vmem>>, vector<32x1xf32>
    %99 = vector.broadcast %98 : vector<32x1xf32> to vector<32x512xf32>
    %100 = arith.addf %6, %99 : vector<32x512xf32>
    %cst_32 = arith.constant 0.000000e+00 : f32
    %101 = vector.shape_cast %97 : vector<1x512xi1> to vector<1x512xi1>
    %102 = vector.broadcast %101 : vector<1x512xi1> to vector<32x512xi1>
    %103 = vector.broadcast %cst_32 : f32 to vector<32x512xf32>
    %104 = arith.select %102, %100, %103 : vector<32x512xi1>, vector<32x512xf32>
    %105 = arith.truncf %104 : vector<32x512xf32> to vector<32x512xbf16>
    %c0_33 = arith.constant 0 : index
    %c0_34 = arith.constant 0 : index
    %106 = vector.load %arg4[%c0_33, %c0_34] : memref<32x512xbf16, #tpu.memory_space<vmem>>, vector<32x512xbf16>
    tpu.vector_store %arg4[%c0_33, %c0_34], %105 {strides = array<i32>} : memref<32x512xbf16, #tpu.memory_space<vmem>>, vector<32x512xbf16>,
    %c0_35 = arith.constant 0 : index
    %c0_36 = arith.constant 0 : index
    %107 = vector.load %arg7[%c0_35, %c0_36] : memref<32x1xf32, #tpu.memory_space<vmem>>, vector<32x1xf32>
    %cst_37 = arith.constant dense<0.000000e+00> : vector<32xf32>
    %108 = vector.multi_reduction <add>, %104, %cst_37 [1] : vector<32x512xf32> to vector<32xf32>
    %109 = vector.shape_cast %108 : vector<32xf32> to vector<32x1xf32>
    %110 = arith.addf %107, %109 : vector<32x1xf32>
    %c0_38 = arith.constant 0 : index
    %c0_39 = arith.constant 0 : index
    %111 = vector.load %arg7[%c0_38, %c0_39] : memref<32x1xf32, #tpu.memory_space<vmem>>, vector<32x1xf32>
    tpu.vector_store %arg7[%c0_38, %c0_39], %110 {strides = array<i32>} : memref<32x1xf32, #tpu.memory_space<vmem>>, vector<32x1xf32>,
    %c0_40 = arith.constant 0 : index
    %c0_41 = arith.constant 0 : index
    %112 = vector.load %arg8[%c0_40, %c0_41] : memref<32x1xf32, #tpu.memory_space<vmem>>, vector<32x1xf32>
    %113 = arith.mulf %104, %104 : vector<32x512xf32>
    %cst_42 = arith.constant dense<0.000000e+00> : vector<32xf32>
    %114 = vector.multi_reduction <add>, %113, %cst_42 [1] : vector<32x512xf32> to vector<32xf32>
    %115 = vector.shape_cast %114 : vector<32xf32> to vector<32x1xf32>
    %116 = arith.addf %112, %115 : vector<32x1xf32>
    %c0_43 = arith.constant 0 : index
    %c0_44 = arith.constant 0 : index
    %117 = vector.load %arg8[%c0_43, %c0_44] : memref<32x1xf32, #tpu.memory_space<vmem>>, vector<32x1xf32>
    tpu.vector_store %arg8[%c0_43, %c0_44], %116 {strides = array<i32>} : memref<32x1xf32, #tpu.memory_space<vmem>>, vector<32x1xf32>,
    %c1_i32_45 = arith.constant 1 : i32
    %118 = arith.cmpi eq, %arg0, %c1_i32_45 : i32
    %119 = arith.extui %118 : i1 to i32
    %c0_i32_46 = arith.constant 0 : i32
    %120 = arith.cmpi ne, %119, %c0_i32_46 : i32
    scf.if %120 {
      %c0_47 = arith.constant 0 : index
      %c0_48 = arith.constant 0 : index
      %121 = vector.load %arg7[%c0_47, %c0_48] : memref<32x1xf32, #tpu.memory_space<vmem>>, vector<32x1xf32>
      %cst_49 = arith.constant 0.001953125 : f32
      %122 = vector.broadcast %cst_49 : f32 to vector<32x1xf32>
      %123 = arith.mulf %121, %122 : vector<32x1xf32>
      %c0_50 = arith.constant 0 : index
      %c0_51 = arith.constant 0 : index
      %124 = vector.load %arg8[%c0_50, %c0_51] : memref<32x1xf32, #tpu.memory_space<vmem>>, vector<32x1xf32>
      %cst_52 = arith.constant 0.001953125 : f32
      %125 = vector.broadcast %cst_52 : f32 to vector<32x1xf32>
      %126 = arith.mulf %124, %125 : vector<32x1xf32>
      %127 = arith.mulf %123, %123 : vector<32x1xf32>
      %128 = arith.subf %126, %127 : vector<32x1xf32>
      %cst_53 = arith.constant 0.000000e+00 : f32
      %129 = vector.broadcast %cst_53 : f32 to vector<32x1xf32>
      %130 = arith.maximumf %128, %129 : vector<32x1xf32>
      %c0_54 = arith.constant 0 : index
      %c0_55 = arith.constant 0 : index
      %131 = vector.load %arg5[%c0_54, %c0_55] : memref<32x1xf32, #tpu.memory_space<vmem>>, vector<32x1xf32>
      tpu.vector_store %arg5[%c0_54, %c0_55], %123 {strides = array<i32>} : memref<32x1xf32, #tpu.memory_space<vmem>>, vector<32x1xf32>,
      %cst_56 = arith.constant 9.99999974E-6 : f32
      %132 = vector.broadcast %cst_56 : f32 to vector<32x1xf32>
      %133 = arith.addf %130, %132 : vector<32x1xf32>
      %134 = math.rsqrt %133 : vector<32x1xf32>
      %c0_57 = arith.constant 0 : index
      %c0_58 = arith.constant 0 : index
      %135 = vector.load %arg6[%c0_57, %c0_58] : memref<32x1xf32, #tpu.memory_space<vmem>>, vector<32x1xf32>
      tpu.vector_store %arg6[%c0_57, %c0_58], %134 {strides = array<i32>} : memref<32x1xf32, #tpu.memory_space<vmem>>, vector<32x1xf32>,
    } else {
    }
    return
  }
  func.func @transform_0(%arg0: i32) -> (i32, i32) {
    %c1_i32 = arith.constant 1 : i32
    %0 = arith.addi %arg0, %c1_i32 : i32
    %c0_i32 = arith.constant 0 : i32
    %c0_i32_0 = arith.constant 0 : i32
    return %c0_i32, %0 : i32, i32
  }
  func.func @transform_1(%arg0: i32) -> (i32, i32) {
    %c0_i32 = arith.constant 0 : i32
    %c0_i32_0 = arith.constant 0 : i32
    %c0_i32_1 = arith.constant 0 : i32
    return %c0_i32, %c0_i32_0 : i32, i32
  }
  func.func @transform_2(%arg0: i32) -> (i32, i32) {
    %c0_i32 = arith.constant 0 : i32
    %c0_i32_0 = arith.constant 0 : i32
    %c0_i32_1 = arith.constant 0 : i32
    return %c0_i32, %c0_i32_0 : i32, i32
  }
  func.func @transform_3(%arg0: i32) -> (i32, i32) {
    %c1_i32 = arith.constant 1 : i32
    %0 = arith.addi %arg0, %c1_i32 : i32
    %c0_i32 = arith.constant 0 : i32
    %c0_i32_0 = arith.constant 0 : i32
    return %c0_i32, %0 : i32, i32
  }
  func.func @transform_4(%arg0: i32) -> (i32, i32) {
    %c0_i32 = arith.constant 0 : i32
    %c0_i32_0 = arith.constant 0 : i32
    %c0_i32_1 = arith.constant 0 : i32
    return %c0_i32, %c0_i32_0 : i32, i32
  }
  func.func @transform_5(%arg0: i32) -> (i32, i32) {
    %c0_i32 = arith.constant 0 : i32
    %c0_i32_0 = arith.constant 0 : i32
    %c0_i32_1 = arith.constant 0 : i32
    return %c0_i32, %c0_i32_0 : i32, i32
  }
}

module attributes {stable_mosaic.version = 11 : i64} {
  func.func @_resblock_kernel(%arg0: i32, %arg1: memref<32x128xbf16, #tpu.memory_space<vmem>>, %arg2: memref<32x512xbf16, #tpu.memory_space<vmem>>, %arg3: memref<32x128xbf16, #tpu.memory_space<vmem>>, %arg4: memref<32x288xbf16, #tpu.memory_space<vmem>>, %arg5: memref<32x1xf32, #tpu.memory_space<vmem>>, %arg6: memref<32x1xf32, #tpu.memory_space<vmem>>, %arg7: memref<32x1xf32, #tpu.memory_space<vmem>>, %arg8: memref<32x512xbf16, #tpu.memory_space<vmem>>, %arg9: memref<32x1xf32, #tpu.memory_space<vmem>>, %arg10: memref<32x1xf32, #tpu.memory_space<vmem>>, %arg11: memref<32x1xf32, #tpu.memory_space<vmem>>, %arg12: memref<32x1xf32, #tpu.memory_space<vmem>>) attributes {dimension_semantics = [#tpu.dimension_semantics<arbitrary>], iteration_bounds = array<i64: 2>, scalar_prefetch = 0 : i64, scratch_operands = 2 : i64, tpu.core_type = #tpu.core_type<tc>, window_params = [{transform_indices = @transform_0, window_bounds = array<i64: 32, 128>}, {transform_indices = @transform_1, window_bounds = array<i64: 32, 512>}, {transform_indices = @transform_2, window_bounds = array<i64: 32, 128>}, {pipeline_mode = #tpu.pipeline_mode<synchronous>, transform_indices = @transform_3, window_bounds = array<i64: 32, 288>}, {pipeline_mode = #tpu.pipeline_mode<synchronous>, transform_indices = @transform_4, window_bounds = array<i64: 32, 1>}, {pipeline_mode = #tpu.pipeline_mode<synchronous>, transform_indices = @transform_5, window_bounds = array<i64: 32, 1>}, {pipeline_mode = #tpu.pipeline_mode<synchronous>, transform_indices = @transform_6, window_bounds = array<i64: 32, 1>}, {transform_indices = @transform_7, window_bounds = array<i64: 32, 512>}, {pipeline_mode = #tpu.pipeline_mode<synchronous>, transform_indices = @transform_8, window_bounds = array<i64: 32, 1>}, {pipeline_mode = #tpu.pipeline_mode<synchronous>, transform_indices = @transform_9, window_bounds = array<i64: 32, 1>}]} {
    %c0_i32 = arith.constant 0 : i32
    %0 = arith.cmpi eq, %arg0, %c0_i32 : i32
    %1 = arith.extui %0 : i1 to i32
    %c0_i32_0 = arith.constant 0 : i32
    %2 = arith.cmpi ne, %1, %c0_i32_0 : i32
    scf.if %2 {
      %cst_59 = arith.constant 0.000000e+00 : f32
      %152 = vector.broadcast %cst_59 : f32 to vector<32x1xf32>
      %c0_60 = arith.constant 0 : index
      %c0_61 = arith.constant 0 : index
      %153 = vector.load %arg11[%c0_60, %c0_61] : memref<32x1xf32, #tpu.memory_space<vmem>>, vector<32x1xf32>
      tpu.vector_store %arg11[%c0_60, %c0_61], %152 {strides = array<i32>} : memref<32x1xf32, #tpu.memory_space<vmem>>, vector<32x1xf32>,
      %cst_62 = arith.constant 0.000000e+00 : f32
      %154 = vector.broadcast %cst_62 : f32 to vector<32x1xf32>
      %c0_63 = arith.constant 0 : index
      %c0_64 = arith.constant 0 : index
      %155 = vector.load %arg12[%c0_63, %c0_64] : memref<32x1xf32, #tpu.memory_space<vmem>>, vector<32x1xf32>
      tpu.vector_store %arg12[%c0_63, %c0_64], %154 {strides = array<i32>} : memref<32x1xf32, #tpu.memory_space<vmem>>, vector<32x1xf32>,
    } else {
    }
    %c0 = arith.constant 0 : index
    %c0_1 = arith.constant 0 : index
    %3 = vector.load %arg1[%c0, %c0_1] : memref<32x128xbf16, #tpu.memory_space<vmem>>, vector<32x128xbf16>
    %c0_2 = arith.constant 0 : index
    %c0_3 = arith.constant 0 : index
    %4 = vector.load %arg2[%c0_2, %c0_3] : memref<32x512xbf16, #tpu.memory_space<vmem>>, vector<32x512xbf16>
    %c0_4 = arith.constant 0 : index
    %c0_5 = arith.constant 0 : index
    %5 = vector.load %arg3[%c0_4, %c0_5] : memref<32x128xbf16, #tpu.memory_space<vmem>>, vector<32x128xbf16>
    %6 = tpu.concatenate %3, %4, %5 in 1 : vector<32x128xbf16>, vector<32x512xbf16>, vector<32x128xbf16> -> vector<32x768xbf16>
    %c512_i32 = arith.constant 512 : i32
    %7 = arith.muli %arg0, %c512_i32 : i32
    %c128_i32 = arith.constant 128 : i32
    %8 = arith.subi %7, %c128_i32 : i32
    %9 = tpu.iota {dimensions = array<i32: 1>} : vector<1x768xi32>
    %10 = vector.broadcast %8 : i32 to vector<1x768xi32>
    %11 = arith.addi %10, %9 : vector<1x768xi32>
    %c0_i32_6 = arith.constant 0 : i32
    %12 = vector.broadcast %c0_i32_6 : i32 to vector<1x768xi32>
    %13 = arith.cmpi sge, %11, %12 : vector<1x768xi32>
    %c648_i32 = arith.constant 648 : i32
    %14 = vector.broadcast %c648_i32 : i32 to vector<1x768xi32>
    %15 = arith.cmpi slt, %11, %14 : vector<1x768xi32>
    %16 = arith.andi %13, %15 : vector<1x768xi1>
    %c0_i32_7 = arith.constant 0 : i32
    %c647_i32 = arith.constant 647 : i32
    %17 = vector.broadcast %c0_i32_7 : i32 to vector<1x768xi32>
    %18 = arith.maxsi %17, %11 : vector<1x768xi32>
    %19 = vector.broadcast %c647_i32 : i32 to vector<1x768xi32>
    %20 = arith.minsi %19, %18 : vector<1x768xi32>
    %21 = arith.sitofp %20 : vector<1x768xi32> to vector<1x768xf32>
    %cst = arith.constant 0.00308641978 : f32
    %22 = vector.broadcast %cst : f32 to vector<1x768xf32>
    %23 = arith.mulf %21, %22 : vector<1x768xf32>
    %24 = arith.fptosi %23 : vector<1x768xf32> to vector<1x768xi32>
    %c324_i32 = arith.constant 324 : i32
    %25 = vector.broadcast %c324_i32 : i32 to vector<1x768xi32>
    %26 = arith.muli %24, %25 : vector<1x768xi32>
    %27 = arith.subi %20, %26 : vector<1x768xi32>
    %c0_i32_8 = arith.constant 0 : i32
    %28 = vector.broadcast %c0_i32_8 : i32 to vector<1x768xi32>
    %29 = arith.cmpi slt, %27, %28 : vector<1x768xi32>
    %c324_i32_9 = arith.constant 324 : i32
    %30 = vector.broadcast %c324_i32_9 : i32 to vector<1x768xi32>
    %31 = arith.addi %27, %30 : vector<1x768xi32>
    %32 = arith.select %29, %31, %27 : vector<1x768xi1>, vector<1x768xi32>
    %c324_i32_10 = arith.constant 324 : i32
    %33 = vector.broadcast %c324_i32_10 : i32 to vector<1x768xi32>
    %34 = arith.cmpi sge, %32, %33 : vector<1x768xi32>
    %c324_i32_11 = arith.constant 324 : i32
    %35 = vector.broadcast %c324_i32_11 : i32 to vector<1x768xi32>
    %36 = arith.subi %32, %35 : vector<1x768xi32>
    %37 = arith.select %34, %36, %32 : vector<1x768xi1>, vector<1x768xi32>
    %c0_i32_12 = arith.constant 0 : i32
    %38 = vector.broadcast %c0_i32_12 : i32 to vector<1x768xi32>
    %39 = arith.cmpi slt, %37, %38 : vector<1x768xi32>
    %c324_i32_13 = arith.constant 324 : i32
    %40 = vector.broadcast %c324_i32_13 : i32 to vector<1x768xi32>
    %41 = arith.addi %37, %40 : vector<1x768xi32>
    %42 = arith.select %39, %41, %37 : vector<1x768xi1>, vector<1x768xi32>
    %c324_i32_14 = arith.constant 324 : i32
    %43 = vector.broadcast %c324_i32_14 : i32 to vector<1x768xi32>
    %44 = arith.cmpi sge, %42, %43 : vector<1x768xi32>
    %c324_i32_15 = arith.constant 324 : i32
    %45 = vector.broadcast %c324_i32_15 : i32 to vector<1x768xi32>
    %46 = arith.subi %42, %45 : vector<1x768xi32>
    %47 = arith.select %44, %46, %42 : vector<1x768xi1>, vector<1x768xi32>
    %48 = arith.sitofp %47 : vector<1x768xi32> to vector<1x768xf32>
    %cst_16 = arith.constant 0.055555556 : f32
    %49 = vector.broadcast %cst_16 : f32 to vector<1x768xf32>
    %50 = arith.mulf %48, %49 : vector<1x768xf32>
    %51 = arith.fptosi %50 : vector<1x768xf32> to vector<1x768xi32>
    %c18_i32 = arith.constant 18 : i32
    %52 = vector.broadcast %c18_i32 : i32 to vector<1x768xi32>
    %53 = arith.muli %51, %52 : vector<1x768xi32>
    %54 = arith.subi %47, %53 : vector<1x768xi32>
    %c0_i32_17 = arith.constant 0 : i32
    %55 = vector.broadcast %c0_i32_17 : i32 to vector<1x768xi32>
    %56 = arith.cmpi slt, %54, %55 : vector<1x768xi32>
    %c1_i32 = arith.constant 1 : i32
    %57 = vector.broadcast %c1_i32 : i32 to vector<1x768xi32>
    %58 = arith.subi %51, %57 : vector<1x768xi32>
    %59 = arith.select %56, %58, %51 : vector<1x768xi1>, vector<1x768xi32>
    %c18_i32_18 = arith.constant 18 : i32
    %60 = vector.broadcast %c18_i32_18 : i32 to vector<1x768xi32>
    %61 = arith.addi %54, %60 : vector<1x768xi32>
    %62 = arith.select %56, %61, %54 : vector<1x768xi1>, vector<1x768xi32>
    %c18_i32_19 = arith.constant 18 : i32
    %63 = vector.broadcast %c18_i32_19 : i32 to vector<1x768xi32>
    %64 = arith.cmpi sge, %62, %63 : vector<1x768xi32>
    %c1_i32_20 = arith.constant 1 : i32
    %65 = vector.broadcast %c1_i32_20 : i32 to vector<1x768xi32>
    %66 = arith.addi %59, %65 : vector<1x768xi32>
    %67 = arith.select %64, %66, %59 : vector<1x768xi1>, vector<1x768xi32>
    %c18_i32_21 = arith.constant 18 : i32
    %68 = vector.broadcast %c18_i32_21 : i32 to vector<1x768xi32>
    %69 = arith.subi %62, %68 : vector<1x768xi32>
    %70 = arith.select %64, %69, %62 : vector<1x768xi1>, vector<1x768xi32>
    %c0_i32_22 = arith.constant 0 : i32
    %71 = vector.broadcast %c0_i32_22 : i32 to vector<1x768xi32>
    %72 = arith.cmpi slt, %70, %71 : vector<1x768xi32>
    %c1_i32_23 = arith.constant 1 : i32
    %73 = vector.broadcast %c1_i32_23 : i32 to vector<1x768xi32>
    %74 = arith.subi %67, %73 : vector<1x768xi32>
    %75 = arith.select %72, %74, %67 : vector<1x768xi1>, vector<1x768xi32>
    %c18_i32_24 = arith.constant 18 : i32
    %76 = vector.broadcast %c18_i32_24 : i32 to vector<1x768xi32>
    %77 = arith.addi %70, %76 : vector<1x768xi32>
    %78 = arith.select %72, %77, %70 : vector<1x768xi1>, vector<1x768xi32>
    %c18_i32_25 = arith.constant 18 : i32
    %79 = vector.broadcast %c18_i32_25 : i32 to vector<1x768xi32>
    %80 = arith.cmpi sge, %78, %79 : vector<1x768xi32>
    %c1_i32_26 = arith.constant 1 : i32
    %81 = vector.broadcast %c1_i32_26 : i32 to vector<1x768xi32>
    %82 = arith.addi %75, %81 : vector<1x768xi32>
    %83 = arith.select %80, %82, %75 : vector<1x768xi1>, vector<1x768xi32>
    %c18_i32_27 = arith.constant 18 : i32
    %84 = vector.broadcast %c18_i32_27 : i32 to vector<1x768xi32>
    %85 = arith.subi %78, %84 : vector<1x768xi32>
    %86 = arith.select %80, %85, %78 : vector<1x768xi1>, vector<1x768xi32>
    %c1_i32_28 = arith.constant 1 : i32
    %87 = vector.broadcast %c1_i32_28 : i32 to vector<1x768xi32>
    %88 = arith.cmpi sge, %83, %87 : vector<1x768xi32>
    %c17_i32 = arith.constant 17 : i32
    %89 = vector.broadcast %c17_i32 : i32 to vector<1x768xi32>
    %90 = arith.cmpi slt, %83, %89 : vector<1x768xi32>
    %91 = arith.andi %88, %90 : vector<1x768xi1>
    %c1_i32_29 = arith.constant 1 : i32
    %92 = vector.broadcast %c1_i32_29 : i32 to vector<1x768xi32>
    %93 = arith.cmpi sge, %86, %92 : vector<1x768xi32>
    %c17_i32_30 = arith.constant 17 : i32
    %94 = vector.broadcast %c17_i32_30 : i32 to vector<1x768xi32>
    %95 = arith.cmpi slt, %86, %94 : vector<1x768xi32>
    %96 = arith.andi %93, %95 : vector<1x768xi1>
    %97 = arith.andi %91, %96 : vector<1x768xi1>
    %98 = arith.andi %16, %97 : vector<1x768xi1>
    %99 = arith.extf %6 : vector<32x768xbf16> to vector<32x768xf32>
    %c0_31 = arith.constant 0 : index
    %c0_32 = arith.constant 0 : index
    %100 = vector.load %arg6[%c0_31, %c0_32] : memref<32x1xf32, #tpu.memory_space<vmem>>, vector<32x1xf32>
    %101 = vector.broadcast %100 : vector<32x1xf32> to vector<32x768xf32>
    %102 = arith.subf %99, %101 : vector<32x768xf32>
    %c0_33 = arith.constant 0 : index
    %c0_34 = arith.constant 0 : index
    %103 = vector.load %arg7[%c0_33, %c0_34] : memref<32x1xf32, #tpu.memory_space<vmem>>, vector<32x1xf32>
    %104 = vector.broadcast %103 : vector<32x1xf32> to vector<32x768xf32>
    %105 = arith.mulf %102, %104 : vector<32x768xf32>
    %cst_35 = arith.constant 0.000000e+00 : f32
    %106 = vector.broadcast %cst_35 : f32 to vector<32x768xf32>
    %107 = arith.maximumf %105, %106 : vector<32x768xf32>
    %cst_36 = arith.constant 0.000000e+00 : f32
    %108 = vector.shape_cast %98 : vector<1x768xi1> to vector<1x768xi1>
    %109 = vector.broadcast %108 : vector<1x768xi1> to vector<32x768xi1>
    %110 = vector.broadcast %cst_36 : f32 to vector<32x768xf32>
    %111 = arith.select %109, %107, %110 : vector<32x768xi1>, vector<32x768xf32>
    %112 = arith.truncf %111 : vector<32x768xf32> to vector<32x768xbf16>
    %113 = vector.extract_strided_slice %112 {offsets = [0, 109], sizes = [32, 512], strides = [1, 1]} : vector<32x768xbf16> to vector<32x512xbf16>
    %114 = vector.extract_strided_slice %112 {offsets = [0, 110], sizes = [32, 512], strides = [1, 1]} : vector<32x768xbf16> to vector<32x512xbf16>
    %115 = vector.extract_strided_slice %112 {offsets = [0, 111], sizes = [32, 512], strides = [1, 1]} : vector<32x768xbf16> to vector<32x512xbf16>
    %116 = vector.extract_strided_slice %112 {offsets = [0, 127], sizes = [32, 512], strides = [1, 1]} : vector<32x768xbf16> to vector<32x512xbf16>
    %117 = vector.extract_strided_slice %112 {offsets = [0, 128], sizes = [32, 512], strides = [1, 1]} : vector<32x768xbf16> to vector<32x512xbf16>
    %118 = vector.extract_strided_slice %112 {offsets = [0, 129], sizes = [32, 512], strides = [1, 1]} : vector<32x768xbf16> to vector<32x512xbf16>
    %119 = vector.extract_strided_slice %112 {offsets = [0, 145], sizes = [32, 512], strides = [1, 1]} : vector<32x768xbf16> to vector<32x512xbf16>
    %120 = vector.extract_strided_slice %112 {offsets = [0, 146], sizes = [32, 512], strides = [1, 1]} : vector<32x768xbf16> to vector<32x512xbf16>
    %121 = vector.extract_strided_slice %112 {offsets = [0, 147], sizes = [32, 512], strides = [1, 1]} : vector<32x768xbf16> to vector<32x512xbf16>
    %122 = tpu.concatenate %113, %114, %115, %116, %117, %118, %119, %120, %121 in 0 : vector<32x512xbf16>, vector<32x512xbf16>, vector<32x512xbf16>, vector<32x512xbf16>, vector<32x512xbf16>, vector<32x512xbf16>, vector<32x512xbf16>, vector<32x512xbf16>, vector<32x512xbf16> -> vector<288x512xbf16>
    %c0_37 = arith.constant 0 : index
    %c0_38 = arith.constant 0 : index
    %123 = vector.load %arg4[%c0_37, %c0_38] : memref<32x288xbf16, #tpu.memory_space<vmem>>, vector<32x288xbf16>
    %cst_39 = arith.constant dense<0.000000e+00> : vector<32x512xf32>
    %124 = tpu.matmul %123, %122, %cst_39 {dimension_numbers = #tpu.dot_dimension_numbers<[1], [0], [0], [1], [0, 0, 1, 1], [], []>} : vector<32x288xbf16>, vector<288x512xbf16>, vector<32x512xf32> -> vector<32x512xf32>
    %125 = vector.extract_strided_slice %98 {offsets = [0, 128], sizes = [1, 512], strides = [1, 1]} : vector<1x768xi1> to vector<1x512xi1>
    %c0_40 = arith.constant 0 : index
    %c0_41 = arith.constant 0 : index
    %126 = vector.load %arg5[%c0_40, %c0_41] : memref<32x1xf32, #tpu.memory_space<vmem>>, vector<32x1xf32>
    %127 = vector.broadcast %126 : vector<32x1xf32> to vector<32x512xf32>
    %128 = arith.addf %124, %127 : vector<32x512xf32>
    %c0_42 = arith.constant 0 : index
    %c0_43 = arith.constant 0 : index
    %129 = vector.load %arg2[%c0_42, %c0_43] : memref<32x512xbf16, #tpu.memory_space<vmem>>, vector<32x512xbf16>
    %130 = arith.extf %129 : vector<32x512xbf16> to vector<32x512xf32>
    %131 = arith.addf %128, %130 : vector<32x512xf32>
    %cst_44 = arith.constant 0.000000e+00 : f32
    %132 = vector.shape_cast %125 : vector<1x512xi1> to vector<1x512xi1>
    %133 = vector.broadcast %132 : vector<1x512xi1> to vector<32x512xi1>
    %134 = vector.broadcast %cst_44 : f32 to vector<32x512xf32>
    %135 = arith.select %133, %131, %134 : vector<32x512xi1>, vector<32x512xf32>
    %136 = arith.truncf %135 : vector<32x512xf32> to vector<32x512xbf16>
    %c0_45 = arith.constant 0 : index
    %c0_46 = arith.constant 0 : index
    %137 = vector.load %arg8[%c0_45, %c0_46] : memref<32x512xbf16, #tpu.memory_space<vmem>>, vector<32x512xbf16>
    tpu.vector_store %arg8[%c0_45, %c0_46], %136 {strides = array<i32>} : memref<32x512xbf16, #tpu.memory_space<vmem>>, vector<32x512xbf16>,
    %c0_47 = arith.constant 0 : index
    %c0_48 = arith.constant 0 : index
    %138 = vector.load %arg11[%c0_47, %c0_48] : memref<32x1xf32, #tpu.memory_space<vmem>>, vector<32x1xf32>
    %cst_49 = arith.constant dense<0.000000e+00> : vector<32xf32>
    %139 = vector.multi_reduction <add>, %135, %cst_49 [1] : vector<32x512xf32> to vector<32xf32>
    %140 = vector.shape_cast %139 : vector<32xf32> to vector<32x1xf32>
    %141 = arith.addf %138, %140 : vector<32x1xf32>
    %c0_50 = arith.constant 0 : index
    %c0_51 = arith.constant 0 : index
    %142 = vector.load %arg11[%c0_50, %c0_51] : memref<32x1xf32, #tpu.memory_space<vmem>>, vector<32x1xf32>
    tpu.vector_store %arg11[%c0_50, %c0_51], %141 {strides = array<i32>} : memref<32x1xf32, #tpu.memory_space<vmem>>, vector<32x1xf32>,
    %c0_52 = arith.constant 0 : index
    %c0_53 = arith.constant 0 : index
    %143 = vector.load %arg12[%c0_52, %c0_53] : memref<32x1xf32, #tpu.memory_space<vmem>>, vector<32x1xf32>
    %144 = arith.mulf %135, %135 : vector<32x512xf32>
    %cst_54 = arith.constant dense<0.000000e+00> : vector<32xf32>
    %145 = vector.multi_reduction <add>, %144, %cst_54 [1] : vector<32x512xf32> to vector<32xf32>
    %146 = vector.shape_cast %145 : vector<32xf32> to vector<32x1xf32>
    %147 = arith.addf %143, %146 : vector<32x1xf32>
    %c0_55 = arith.constant 0 : index
    %c0_56 = arith.constant 0 : index
    %148 = vector.load %arg12[%c0_55, %c0_56] : memref<32x1xf32, #tpu.memory_space<vmem>>, vector<32x1xf32>
    tpu.vector_store %arg12[%c0_55, %c0_56], %147 {strides = array<i32>} : memref<32x1xf32, #tpu.memory_space<vmem>>, vector<32x1xf32>,
    %c1_i32_57 = arith.constant 1 : i32
    %149 = arith.cmpi eq, %arg0, %c1_i32_57 : i32
    %150 = arith.extui %149 : i1 to i32
    %c0_i32_58 = arith.constant 0 : i32
    %151 = arith.cmpi ne, %150, %c0_i32_58 : i32
    scf.if %151 {
      %c0_59 = arith.constant 0 : index
      %c0_60 = arith.constant 0 : index
      %152 = vector.load %arg11[%c0_59, %c0_60] : memref<32x1xf32, #tpu.memory_space<vmem>>, vector<32x1xf32>
      %cst_61 = arith.constant 0.001953125 : f32
      %153 = vector.broadcast %cst_61 : f32 to vector<32x1xf32>
      %154 = arith.mulf %152, %153 : vector<32x1xf32>
      %c0_62 = arith.constant 0 : index
      %c0_63 = arith.constant 0 : index
      %155 = vector.load %arg12[%c0_62, %c0_63] : memref<32x1xf32, #tpu.memory_space<vmem>>, vector<32x1xf32>
      %cst_64 = arith.constant 0.001953125 : f32
      %156 = vector.broadcast %cst_64 : f32 to vector<32x1xf32>
      %157 = arith.mulf %155, %156 : vector<32x1xf32>
      %158 = arith.mulf %154, %154 : vector<32x1xf32>
      %159 = arith.subf %157, %158 : vector<32x1xf32>
      %cst_65 = arith.constant 0.000000e+00 : f32
      %160 = vector.broadcast %cst_65 : f32 to vector<32x1xf32>
      %161 = arith.maximumf %159, %160 : vector<32x1xf32>
      %c0_66 = arith.constant 0 : index
      %c0_67 = arith.constant 0 : index
      %162 = vector.load %arg9[%c0_66, %c0_67] : memref<32x1xf32, #tpu.memory_space<vmem>>, vector<32x1xf32>
      tpu.vector_store %arg9[%c0_66, %c0_67], %154 {strides = array<i32>} : memref<32x1xf32, #tpu.memory_space<vmem>>, vector<32x1xf32>,
      %cst_68 = arith.constant 9.99999974E-6 : f32
      %163 = vector.broadcast %cst_68 : f32 to vector<32x1xf32>
      %164 = arith.addf %161, %163 : vector<32x1xf32>
      %165 = math.rsqrt %164 : vector<32x1xf32>
      %c0_69 = arith.constant 0 : index
      %c0_70 = arith.constant 0 : index
      %166 = vector.load %arg10[%c0_69, %c0_70] : memref<32x1xf32, #tpu.memory_space<vmem>>, vector<32x1xf32>
      tpu.vector_store %arg10[%c0_69, %c0_70], %165 {strides = array<i32>} : memref<32x1xf32, #tpu.memory_space<vmem>>, vector<32x1xf32>,
    } else {
    }
    return
  }
  func.func @transform_0(%arg0: i32) -> (i32, i32) {
    %c1_i32 = arith.constant 1 : i32
    %0 = arith.addi %arg0, %c1_i32 : i32
    %c4_i32 = arith.constant 4 : i32
    %1 = arith.muli %0, %c4_i32 : i32
    %c1_i32_0 = arith.constant 1 : i32
    %2 = arith.subi %1, %c1_i32_0 : i32
    %c0_i32 = arith.constant 0 : i32
    %c0_i32_1 = arith.constant 0 : i32
    return %c0_i32, %2 : i32, i32
  }
  func.func @transform_1(%arg0: i32) -> (i32, i32) {
    %c1_i32 = arith.constant 1 : i32
    %0 = arith.addi %arg0, %c1_i32 : i32
    %c0_i32 = arith.constant 0 : i32
    %c0_i32_0 = arith.constant 0 : i32
    return %c0_i32, %0 : i32, i32
  }
  func.func @transform_2(%arg0: i32) -> (i32, i32) {
    %c2_i32 = arith.constant 2 : i32
    %0 = arith.addi %arg0, %c2_i32 : i32
    %c4_i32 = arith.constant 4 : i32
    %1 = arith.muli %0, %c4_i32 : i32
    %c0_i32 = arith.constant 0 : i32
    %c0_i32_0 = arith.constant 0 : i32
    return %c0_i32, %1 : i32, i32
  }
  func.func @transform_3(%arg0: i32) -> (i32, i32) {
    %c0_i32 = arith.constant 0 : i32
    %c0_i32_0 = arith.constant 0 : i32
    %c0_i32_1 = arith.constant 0 : i32
    return %c0_i32, %c0_i32_0 : i32, i32
  }
  func.func @transform_4(%arg0: i32) -> (i32, i32) {
    %c0_i32 = arith.constant 0 : i32
    %c0_i32_0 = arith.constant 0 : i32
    %c0_i32_1 = arith.constant 0 : i32
    return %c0_i32, %c0_i32_0 : i32, i32
  }
  func.func @transform_5(%arg0: i32) -> (i32, i32) {
    %c0_i32 = arith.constant 0 : i32
    %c0_i32_0 = arith.constant 0 : i32
    %c0_i32_1 = arith.constant 0 : i32
    return %c0_i32, %c0_i32_0 : i32, i32
  }
  func.func @transform_6(%arg0: i32) -> (i32, i32) {
    %c0_i32 = arith.constant 0 : i32
    %c0_i32_0 = arith.constant 0 : i32
    %c0_i32_1 = arith.constant 0 : i32
    return %c0_i32, %c0_i32_0 : i32, i32
  }
  func.func @transform_7(%arg0: i32) -> (i32, i32) {
    %c1_i32 = arith.constant 1 : i32
    %0 = arith.addi %arg0, %c1_i32 : i32
    %c0_i32 = arith.constant 0 : i32
    %c0_i32_0 = arith.constant 0 : i32
    return %c0_i32, %0 : i32, i32
  }
  func.func @transform_8(%arg0: i32) -> (i32, i32) {
    %c0_i32 = arith.constant 0 : i32
    %c0_i32_0 = arith.constant 0 : i32
    %c0_i32_1 = arith.constant 0 : i32
    return %c0_i32, %c0_i32_0 : i32, i32
  }
  func.func @transform_9(%arg0: i32) -> (i32, i32) {
    %c0_i32 = arith.constant 0 : i32
    %c0_i32_0 = arith.constant 0 : i32
    %c0_i32_1 = arith.constant 0 : i32
    return %c0_i32, %c0_i32_0 : i32, i32
  }
}

module attributes {stable_mosaic.version = 11 : i64} {
  func.func @_resblock_kernel(%arg0: i32, %arg1: memref<32x128xbf16, #tpu.memory_space<vmem>>, %arg2: memref<32x512xbf16, #tpu.memory_space<vmem>>, %arg3: memref<32x128xbf16, #tpu.memory_space<vmem>>, %arg4: memref<32x288xbf16, #tpu.memory_space<vmem>>, %arg5: memref<32x1xf32, #tpu.memory_space<vmem>>, %arg6: memref<32x1xf32, #tpu.memory_space<vmem>>, %arg7: memref<32x1xf32, #tpu.memory_space<vmem>>, %arg8: memref<32x512xbf16, #tpu.memory_space<vmem>>, %arg9: memref<32x1xf32, #tpu.memory_space<vmem>>, %arg10: memref<32x1xf32, #tpu.memory_space<vmem>>, %arg11: memref<32x1xf32, #tpu.memory_space<vmem>>, %arg12: memref<32x1xf32, #tpu.memory_space<vmem>>) attributes {dimension_semantics = [#tpu.dimension_semantics<arbitrary>], iteration_bounds = array<i64: 2>, scalar_prefetch = 0 : i64, scratch_operands = 2 : i64, tpu.core_type = #tpu.core_type<tc>, window_params = [{transform_indices = @transform_0, window_bounds = array<i64: 32, 128>}, {transform_indices = @transform_1, window_bounds = array<i64: 32, 512>}, {transform_indices = @transform_2, window_bounds = array<i64: 32, 128>}, {pipeline_mode = #tpu.pipeline_mode<synchronous>, transform_indices = @transform_3, window_bounds = array<i64: 32, 288>}, {pipeline_mode = #tpu.pipeline_mode<synchronous>, transform_indices = @transform_4, window_bounds = array<i64: 32, 1>}, {pipeline_mode = #tpu.pipeline_mode<synchronous>, transform_indices = @transform_5, window_bounds = array<i64: 32, 1>}, {pipeline_mode = #tpu.pipeline_mode<synchronous>, transform_indices = @transform_6, window_bounds = array<i64: 32, 1>}, {transform_indices = @transform_7, window_bounds = array<i64: 32, 512>}, {pipeline_mode = #tpu.pipeline_mode<synchronous>, transform_indices = @transform_8, window_bounds = array<i64: 32, 1>}, {pipeline_mode = #tpu.pipeline_mode<synchronous>, transform_indices = @transform_9, window_bounds = array<i64: 32, 1>}]} {
    %c0_i32 = arith.constant 0 : i32
    %0 = arith.cmpi eq, %arg0, %c0_i32 : i32
    %1 = arith.extui %0 : i1 to i32
    %c0_i32_0 = arith.constant 0 : i32
    %2 = arith.cmpi ne, %1, %c0_i32_0 : i32
    scf.if %2 {
      %cst_59 = arith.constant 0.000000e+00 : f32
      %152 = vector.broadcast %cst_59 : f32 to vector<32x1xf32>
      %c0_60 = arith.constant 0 : index
      %c0_61 = arith.constant 0 : index
      %153 = vector.load %arg11[%c0_60, %c0_61] : memref<32x1xf32, #tpu.memory_space<vmem>>, vector<32x1xf32>
      tpu.vector_store %arg11[%c0_60, %c0_61], %152 {strides = array<i32>} : memref<32x1xf32, #tpu.memory_space<vmem>>, vector<32x1xf32>,
      %cst_62 = arith.constant 0.000000e+00 : f32
      %154 = vector.broadcast %cst_62 : f32 to vector<32x1xf32>
      %c0_63 = arith.constant 0 : index
      %c0_64 = arith.constant 0 : index
      %155 = vector.load %arg12[%c0_63, %c0_64] : memref<32x1xf32, #tpu.memory_space<vmem>>, vector<32x1xf32>
      tpu.vector_store %arg12[%c0_63, %c0_64], %154 {strides = array<i32>} : memref<32x1xf32, #tpu.memory_space<vmem>>, vector<32x1xf32>,
    } else {
    }
    %c0 = arith.constant 0 : index
    %c0_1 = arith.constant 0 : index
    %3 = vector.load %arg1[%c0, %c0_1] : memref<32x128xbf16, #tpu.memory_space<vmem>>, vector<32x128xbf16>
    %c0_2 = arith.constant 0 : index
    %c0_3 = arith.constant 0 : index
    %4 = vector.load %arg2[%c0_2, %c0_3] : memref<32x512xbf16, #tpu.memory_space<vmem>>, vector<32x512xbf16>
    %c0_4 = arith.constant 0 : index
    %c0_5 = arith.constant 0 : index
    %5 = vector.load %arg3[%c0_4, %c0_5] : memref<32x128xbf16, #tpu.memory_space<vmem>>, vector<32x128xbf16>
    %6 = tpu.concatenate %3, %4, %5 in 1 : vector<32x128xbf16>, vector<32x512xbf16>, vector<32x128xbf16> -> vector<32x768xbf16>
    %c512_i32 = arith.constant 512 : i32
    %7 = arith.muli %arg0, %c512_i32 : i32
    %c128_i32 = arith.constant 128 : i32
    %8 = arith.subi %7, %c128_i32 : i32
    %9 = tpu.iota {dimensions = array<i32: 1>} : vector<1x768xi32>
    %10 = vector.broadcast %8 : i32 to vector<1x768xi32>
    %11 = arith.addi %10, %9 : vector<1x768xi32>
    %c0_i32_6 = arith.constant 0 : i32
    %12 = vector.broadcast %c0_i32_6 : i32 to vector<1x768xi32>
    %13 = arith.cmpi sge, %11, %12 : vector<1x768xi32>
    %c648_i32 = arith.constant 648 : i32
    %14 = vector.broadcast %c648_i32 : i32 to vector<1x768xi32>
    %15 = arith.cmpi slt, %11, %14 : vector<1x768xi32>
    %16 = arith.andi %13, %15 : vector<1x768xi1>
    %c0_i32_7 = arith.constant 0 : i32
    %c647_i32 = arith.constant 647 : i32
    %17 = vector.broadcast %c0_i32_7 : i32 to vector<1x768xi32>
    %18 = arith.maxsi %17, %11 : vector<1x768xi32>
    %19 = vector.broadcast %c647_i32 : i32 to vector<1x768xi32>
    %20 = arith.minsi %19, %18 : vector<1x768xi32>
    %21 = arith.sitofp %20 : vector<1x768xi32> to vector<1x768xf32>
    %cst = arith.constant 0.00308641978 : f32
    %22 = vector.broadcast %cst : f32 to vector<1x768xf32>
    %23 = arith.mulf %21, %22 : vector<1x768xf32>
    %24 = arith.fptosi %23 : vector<1x768xf32> to vector<1x768xi32>
    %c324_i32 = arith.constant 324 : i32
    %25 = vector.broadcast %c324_i32 : i32 to vector<1x768xi32>
    %26 = arith.muli %24, %25 : vector<1x768xi32>
    %27 = arith.subi %20, %26 : vector<1x768xi32>
    %c0_i32_8 = arith.constant 0 : i32
    %28 = vector.broadcast %c0_i32_8 : i32 to vector<1x768xi32>
    %29 = arith.cmpi slt, %27, %28 : vector<1x768xi32>
    %c324_i32_9 = arith.constant 324 : i32
    %30 = vector.broadcast %c324_i32_9 : i32 to vector<1x768xi32>
    %31 = arith.addi %27, %30 : vector<1x768xi32>
    %32 = arith.select %29, %31, %27 : vector<1x768xi1>, vector<1x768xi32>
    %c324_i32_10 = arith.constant 324 : i32
    %33 = vector.broadcast %c324_i32_10 : i32 to vector<1x768xi32>
    %34 = arith.cmpi sge, %32, %33 : vector<1x768xi32>
    %c324_i32_11 = arith.constant 324 : i32
    %35 = vector.broadcast %c324_i32_11 : i32 to vector<1x768xi32>
    %36 = arith.subi %32, %35 : vector<1x768xi32>
    %37 = arith.select %34, %36, %32 : vector<1x768xi1>, vector<1x768xi32>
    %c0_i32_12 = arith.constant 0 : i32
    %38 = vector.broadcast %c0_i32_12 : i32 to vector<1x768xi32>
    %39 = arith.cmpi slt, %37, %38 : vector<1x768xi32>
    %c324_i32_13 = arith.constant 324 : i32
    %40 = vector.broadcast %c324_i32_13 : i32 to vector<1x768xi32>
    %41 = arith.addi %37, %40 : vector<1x768xi32>
    %42 = arith.select %39, %41, %37 : vector<1x768xi1>, vector<1x768xi32>
    %c324_i32_14 = arith.constant 324 : i32
    %43 = vector.broadcast %c324_i32_14 : i32 to vector<1x768xi32>
    %44 = arith.cmpi sge, %42, %43 : vector<1x768xi32>
    %c324_i32_15 = arith.constant 324 : i32
    %45 = vector.broadcast %c324_i32_15 : i32 to vector<1x768xi32>
    %46 = arith.subi %42, %45 : vector<1x768xi32>
    %47 = arith.select %44, %46, %42 : vector<1x768xi1>, vector<1x768xi32>
    %48 = arith.sitofp %47 : vector<1x768xi32> to vector<1x768xf32>
    %cst_16 = arith.constant 0.055555556 : f32
    %49 = vector.broadcast %cst_16 : f32 to vector<1x768xf32>
    %50 = arith.mulf %48, %49 : vector<1x768xf32>
    %51 = arith.fptosi %50 : vector<1x768xf32> to vector<1x768xi32>
    %c18_i32 = arith.constant 18 : i32
    %52 = vector.broadcast %c18_i32 : i32 to vector<1x768xi32>
    %53 = arith.muli %51, %52 : vector<1x768xi32>
    %54 = arith.subi %47, %53 : vector<1x768xi32>
    %c0_i32_17 = arith.constant 0 : i32
    %55 = vector.broadcast %c0_i32_17 : i32 to vector<1x768xi32>
    %56 = arith.cmpi slt, %54, %55 : vector<1x768xi32>
    %c1_i32 = arith.constant 1 : i32
    %57 = vector.broadcast %c1_i32 : i32 to vector<1x768xi32>
    %58 = arith.subi %51, %57 : vector<1x768xi32>
    %59 = arith.select %56, %58, %51 : vector<1x768xi1>, vector<1x768xi32>
    %c18_i32_18 = arith.constant 18 : i32
    %60 = vector.broadcast %c18_i32_18 : i32 to vector<1x768xi32>
    %61 = arith.addi %54, %60 : vector<1x768xi32>
    %62 = arith.select %56, %61, %54 : vector<1x768xi1>, vector<1x768xi32>
    %c18_i32_19 = arith.constant 18 : i32
    %63 = vector.broadcast %c18_i32_19 : i32 to vector<1x768xi32>
    %64 = arith.cmpi sge, %62, %63 : vector<1x768xi32>
    %c1_i32_20 = arith.constant 1 : i32
    %65 = vector.broadcast %c1_i32_20 : i32 to vector<1x768xi32>
    %66 = arith.addi %59, %65 : vector<1x768xi32>
    %67 = arith.select %64, %66, %59 : vector<1x768xi1>, vector<1x768xi32>
    %c18_i32_21 = arith.constant 18 : i32
    %68 = vector.broadcast %c18_i32_21 : i32 to vector<1x768xi32>
    %69 = arith.subi %62, %68 : vector<1x768xi32>
    %70 = arith.select %64, %69, %62 : vector<1x768xi1>, vector<1x768xi32>
    %c0_i32_22 = arith.constant 0 : i32
    %71 = vector.broadcast %c0_i32_22 : i32 to vector<1x768xi32>
    %72 = arith.cmpi slt, %70, %71 : vector<1x768xi32>
    %c1_i32_23 = arith.constant 1 : i32
    %73 = vector.broadcast %c1_i32_23 : i32 to vector<1x768xi32>
    %74 = arith.subi %67, %73 : vector<1x768xi32>
    %75 = arith.select %72, %74, %67 : vector<1x768xi1>, vector<1x768xi32>
    %c18_i32_24 = arith.constant 18 : i32
    %76 = vector.broadcast %c18_i32_24 : i32 to vector<1x768xi32>
    %77 = arith.addi %70, %76 : vector<1x768xi32>
    %78 = arith.select %72, %77, %70 : vector<1x768xi1>, vector<1x768xi32>
    %c18_i32_25 = arith.constant 18 : i32
    %79 = vector.broadcast %c18_i32_25 : i32 to vector<1x768xi32>
    %80 = arith.cmpi sge, %78, %79 : vector<1x768xi32>
    %c1_i32_26 = arith.constant 1 : i32
    %81 = vector.broadcast %c1_i32_26 : i32 to vector<1x768xi32>
    %82 = arith.addi %75, %81 : vector<1x768xi32>
    %83 = arith.select %80, %82, %75 : vector<1x768xi1>, vector<1x768xi32>
    %c18_i32_27 = arith.constant 18 : i32
    %84 = vector.broadcast %c18_i32_27 : i32 to vector<1x768xi32>
    %85 = arith.subi %78, %84 : vector<1x768xi32>
    %86 = arith.select %80, %85, %78 : vector<1x768xi1>, vector<1x768xi32>
    %c1_i32_28 = arith.constant 1 : i32
    %87 = vector.broadcast %c1_i32_28 : i32 to vector<1x768xi32>
    %88 = arith.cmpi sge, %83, %87 : vector<1x768xi32>
    %c17_i32 = arith.constant 17 : i32
    %89 = vector.broadcast %c17_i32 : i32 to vector<1x768xi32>
    %90 = arith.cmpi slt, %83, %89 : vector<1x768xi32>
    %91 = arith.andi %88, %90 : vector<1x768xi1>
    %c1_i32_29 = arith.constant 1 : i32
    %92 = vector.broadcast %c1_i32_29 : i32 to vector<1x768xi32>
    %93 = arith.cmpi sge, %86, %92 : vector<1x768xi32>
    %c17_i32_30 = arith.constant 17 : i32
    %94 = vector.broadcast %c17_i32_30 : i32 to vector<1x768xi32>
    %95 = arith.cmpi slt, %86, %94 : vector<1x768xi32>
    %96 = arith.andi %93, %95 : vector<1x768xi1>
    %97 = arith.andi %91, %96 : vector<1x768xi1>
    %98 = arith.andi %16, %97 : vector<1x768xi1>
    %99 = arith.extf %6 : vector<32x768xbf16> to vector<32x768xf32>
    %c0_31 = arith.constant 0 : index
    %c0_32 = arith.constant 0 : index
    %100 = vector.load %arg6[%c0_31, %c0_32] : memref<32x1xf32, #tpu.memory_space<vmem>>, vector<32x1xf32>
    %101 = vector.broadcast %100 : vector<32x1xf32> to vector<32x768xf32>
    %102 = arith.subf %99, %101 : vector<32x768xf32>
    %c0_33 = arith.constant 0 : index
    %c0_34 = arith.constant 0 : index
    %103 = vector.load %arg7[%c0_33, %c0_34] : memref<32x1xf32, #tpu.memory_space<vmem>>, vector<32x1xf32>
    %104 = vector.broadcast %103 : vector<32x1xf32> to vector<32x768xf32>
    %105 = arith.mulf %102, %104 : vector<32x768xf32>
    %cst_35 = arith.constant 0.000000e+00 : f32
    %106 = vector.broadcast %cst_35 : f32 to vector<32x768xf32>
    %107 = arith.maximumf %105, %106 : vector<32x768xf32>
    %cst_36 = arith.constant 0.000000e+00 : f32
    %108 = vector.shape_cast %98 : vector<1x768xi1> to vector<1x768xi1>
    %109 = vector.broadcast %108 : vector<1x768xi1> to vector<32x768xi1>
    %110 = vector.broadcast %cst_36 : f32 to vector<32x768xf32>
    %111 = arith.select %109, %107, %110 : vector<32x768xi1>, vector<32x768xf32>
    %112 = arith.truncf %111 : vector<32x768xf32> to vector<32x768xbf16>
    %113 = vector.extract_strided_slice %112 {offsets = [0, 109], sizes = [32, 512], strides = [1, 1]} : vector<32x768xbf16> to vector<32x512xbf16>
    %114 = vector.extract_strided_slice %112 {offsets = [0, 110], sizes = [32, 512], strides = [1, 1]} : vector<32x768xbf16> to vector<32x512xbf16>
    %115 = vector.extract_strided_slice %112 {offsets = [0, 111], sizes = [32, 512], strides = [1, 1]} : vector<32x768xbf16> to vector<32x512xbf16>
    %116 = vector.extract_strided_slice %112 {offsets = [0, 127], sizes = [32, 512], strides = [1, 1]} : vector<32x768xbf16> to vector<32x512xbf16>
    %117 = vector.extract_strided_slice %112 {offsets = [0, 128], sizes = [32, 512], strides = [1, 1]} : vector<32x768xbf16> to vector<32x512xbf16>
    %118 = vector.extract_strided_slice %112 {offsets = [0, 129], sizes = [32, 512], strides = [1, 1]} : vector<32x768xbf16> to vector<32x512xbf16>
    %119 = vector.extract_strided_slice %112 {offsets = [0, 145], sizes = [32, 512], strides = [1, 1]} : vector<32x768xbf16> to vector<32x512xbf16>
    %120 = vector.extract_strided_slice %112 {offsets = [0, 146], sizes = [32, 512], strides = [1, 1]} : vector<32x768xbf16> to vector<32x512xbf16>
    %121 = vector.extract_strided_slice %112 {offsets = [0, 147], sizes = [32, 512], strides = [1, 1]} : vector<32x768xbf16> to vector<32x512xbf16>
    %122 = tpu.concatenate %113, %114, %115, %116, %117, %118, %119, %120, %121 in 0 : vector<32x512xbf16>, vector<32x512xbf16>, vector<32x512xbf16>, vector<32x512xbf16>, vector<32x512xbf16>, vector<32x512xbf16>, vector<32x512xbf16>, vector<32x512xbf16>, vector<32x512xbf16> -> vector<288x512xbf16>
    %c0_37 = arith.constant 0 : index
    %c0_38 = arith.constant 0 : index
    %123 = vector.load %arg4[%c0_37, %c0_38] : memref<32x288xbf16, #tpu.memory_space<vmem>>, vector<32x288xbf16>
    %cst_39 = arith.constant dense<0.000000e+00> : vector<32x512xf32>
    %124 = tpu.matmul %123, %122, %cst_39 {dimension_numbers = #tpu.dot_dimension_numbers<[1], [0], [0], [1], [0, 0, 1, 1], [], []>} : vector<32x288xbf16>, vector<288x512xbf16>, vector<32x512xf32> -> vector<32x512xf32>
    %125 = vector.extract_strided_slice %98 {offsets = [0, 128], sizes = [1, 512], strides = [1, 1]} : vector<1x768xi1> to vector<1x512xi1>
    %c0_40 = arith.constant 0 : index
    %c0_41 = arith.constant 0 : index
    %126 = vector.load %arg5[%c0_40, %c0_41] : memref<32x1xf32, #tpu.memory_space<vmem>>, vector<32x1xf32>
    %127 = vector.broadcast %126 : vector<32x1xf32> to vector<32x512xf32>
    %128 = arith.addf %124, %127 : vector<32x512xf32>
    %c0_42 = arith.constant 0 : index
    %c0_43 = arith.constant 0 : index
    %129 = vector.load %arg2[%c0_42, %c0_43] : memref<32x512xbf16, #tpu.memory_space<vmem>>, vector<32x512xbf16>
    %130 = arith.extf %129 : vector<32x512xbf16> to vector<32x512xf32>
    %131 = arith.addf %128, %130 : vector<32x512xf32>
    %cst_44 = arith.constant 0.000000e+00 : f32
    %132 = vector.shape_cast %125 : vector<1x512xi1> to vector<1x512xi1>
    %133 = vector.broadcast %132 : vector<1x512xi1> to vector<32x512xi1>
    %134 = vector.broadcast %cst_44 : f32 to vector<32x512xf32>
    %135 = arith.select %133, %131, %134 : vector<32x512xi1>, vector<32x512xf32>
    %136 = arith.truncf %135 : vector<32x512xf32> to vector<32x512xbf16>
    %c0_45 = arith.constant 0 : index
    %c0_46 = arith.constant 0 : index
    %137 = vector.load %arg8[%c0_45, %c0_46] : memref<32x512xbf16, #tpu.memory_space<vmem>>, vector<32x512xbf16>
    tpu.vector_store %arg8[%c0_45, %c0_46], %136 {strides = array<i32>} : memref<32x512xbf16, #tpu.memory_space<vmem>>, vector<32x512xbf16>,
    %c0_47 = arith.constant 0 : index
    %c0_48 = arith.constant 0 : index
    %138 = vector.load %arg11[%c0_47, %c0_48] : memref<32x1xf32, #tpu.memory_space<vmem>>, vector<32x1xf32>
    %cst_49 = arith.constant dense<0.000000e+00> : vector<32xf32>
    %139 = vector.multi_reduction <add>, %135, %cst_49 [1] : vector<32x512xf32> to vector<32xf32>
    %140 = vector.shape_cast %139 : vector<32xf32> to vector<32x1xf32>
    %141 = arith.addf %138, %140 : vector<32x1xf32>
    %c0_50 = arith.constant 0 : index
    %c0_51 = arith.constant 0 : index
    %142 = vector.load %arg11[%c0_50, %c0_51] : memref<32x1xf32, #tpu.memory_space<vmem>>, vector<32x1xf32>
    tpu.vector_store %arg11[%c0_50, %c0_51], %141 {strides = array<i32>} : memref<32x1xf32, #tpu.memory_space<vmem>>, vector<32x1xf32>,
    %c0_52 = arith.constant 0 : index
    %c0_53 = arith.constant 0 : index
    %143 = vector.load %arg12[%c0_52, %c0_53] : memref<32x1xf32, #tpu.memory_space<vmem>>, vector<32x1xf32>
    %144 = arith.mulf %135, %135 : vector<32x512xf32>
    %cst_54 = arith.constant dense<0.000000e+00> : vector<32xf32>
    %145 = vector.multi_reduction <add>, %144, %cst_54 [1] : vector<32x512xf32> to vector<32xf32>
    %146 = vector.shape_cast %145 : vector<32xf32> to vector<32x1xf32>
    %147 = arith.addf %143, %146 : vector<32x1xf32>
    %c0_55 = arith.constant 0 : index
    %c0_56 = arith.constant 0 : index
    %148 = vector.load %arg12[%c0_55, %c0_56] : memref<32x1xf32, #tpu.memory_space<vmem>>, vector<32x1xf32>
    tpu.vector_store %arg12[%c0_55, %c0_56], %147 {strides = array<i32>} : memref<32x1xf32, #tpu.memory_space<vmem>>, vector<32x1xf32>,
    %c1_i32_57 = arith.constant 1 : i32
    %149 = arith.cmpi eq, %arg0, %c1_i32_57 : i32
    %150 = arith.extui %149 : i1 to i32
    %c0_i32_58 = arith.constant 0 : i32
    %151 = arith.cmpi ne, %150, %c0_i32_58 : i32
    scf.if %151 {
      %c0_59 = arith.constant 0 : index
      %c0_60 = arith.constant 0 : index
      %152 = vector.load %arg11[%c0_59, %c0_60] : memref<32x1xf32, #tpu.memory_space<vmem>>, vector<32x1xf32>
      %cst_61 = arith.constant 0.001953125 : f32
      %153 = vector.broadcast %cst_61 : f32 to vector<32x1xf32>
      %154 = arith.mulf %152, %153 : vector<32x1xf32>
      %c0_62 = arith.constant 0 : index
      %c0_63 = arith.constant 0 : index
      %155 = vector.load %arg12[%c0_62, %c0_63] : memref<32x1xf32, #tpu.memory_space<vmem>>, vector<32x1xf32>
      %cst_64 = arith.constant 0.001953125 : f32
      %156 = vector.broadcast %cst_64 : f32 to vector<32x1xf32>
      %157 = arith.mulf %155, %156 : vector<32x1xf32>
      %158 = arith.mulf %154, %154 : vector<32x1xf32>
      %159 = arith.subf %157, %158 : vector<32x1xf32>
      %cst_65 = arith.constant 0.000000e+00 : f32
      %160 = vector.broadcast %cst_65 : f32 to vector<32x1xf32>
      %161 = arith.maximumf %159, %160 : vector<32x1xf32>
      %c0_66 = arith.constant 0 : index
      %c0_67 = arith.constant 0 : index
      %162 = vector.load %arg9[%c0_66, %c0_67] : memref<32x1xf32, #tpu.memory_space<vmem>>, vector<32x1xf32>
      tpu.vector_store %arg9[%c0_66, %c0_67], %154 {strides = array<i32>} : memref<32x1xf32, #tpu.memory_space<vmem>>, vector<32x1xf32>,
      %cst_68 = arith.constant 9.99999974E-6 : f32
      %163 = vector.broadcast %cst_68 : f32 to vector<32x1xf32>
      %164 = arith.addf %161, %163 : vector<32x1xf32>
      %165 = math.rsqrt %164 : vector<32x1xf32>
      %c0_69 = arith.constant 0 : index
      %c0_70 = arith.constant 0 : index
      %166 = vector.load %arg10[%c0_69, %c0_70] : memref<32x1xf32, #tpu.memory_space<vmem>>, vector<32x1xf32>
      tpu.vector_store %arg10[%c0_69, %c0_70], %165 {strides = array<i32>} : memref<32x1xf32, #tpu.memory_space<vmem>>, vector<32x1xf32>,
    } else {
    }
    return
  }
  func.func @transform_0(%arg0: i32) -> (i32, i32) {
    %c1_i32 = arith.constant 1 : i32
    %0 = arith.addi %arg0, %c1_i32 : i32
    %c4_i32 = arith.constant 4 : i32
    %1 = arith.muli %0, %c4_i32 : i32
    %c1_i32_0 = arith.constant 1 : i32
    %2 = arith.subi %1, %c1_i32_0 : i32
    %c0_i32 = arith.constant 0 : i32
    %c0_i32_1 = arith.constant 0 : i32
    return %c0_i32, %2 : i32, i32
  }
  func.func @transform_1(%arg0: i32) -> (i32, i32) {
    %c1_i32 = arith.constant 1 : i32
    %0 = arith.addi %arg0, %c1_i32 : i32
    %c0_i32 = arith.constant 0 : i32
    %c0_i32_0 = arith.constant 0 : i32
    return %c0_i32, %0 : i32, i32
  }
  func.func @transform_2(%arg0: i32) -> (i32, i32) {
    %c2_i32 = arith.constant 2 : i32
    %0 = arith.addi %arg0, %c2_i32 : i32
    %c4_i32 = arith.constant 4 : i32
    %1 = arith.muli %0, %c4_i32 : i32
    %c0_i32 = arith.constant 0 : i32
    %c0_i32_0 = arith.constant 0 : i32
    return %c0_i32, %1 : i32, i32
  }
  func.func @transform_3(%arg0: i32) -> (i32, i32) {
    %c0_i32 = arith.constant 0 : i32
    %c0_i32_0 = arith.constant 0 : i32
    %c0_i32_1 = arith.constant 0 : i32
    return %c0_i32, %c0_i32_0 : i32, i32
  }
  func.func @transform_4(%arg0: i32) -> (i32, i32) {
    %c0_i32 = arith.constant 0 : i32
    %c0_i32_0 = arith.constant 0 : i32
    %c0_i32_1 = arith.constant 0 : i32
    return %c0_i32, %c0_i32_0 : i32, i32
  }
  func.func @transform_5(%arg0: i32) -> (i32, i32) {
    %c0_i32 = arith.constant 0 : i32
    %c0_i32_0 = arith.constant 0 : i32
    %c0_i32_1 = arith.constant 0 : i32
    return %c0_i32, %c0_i32_0 : i32, i32
  }
  func.func @transform_6(%arg0: i32) -> (i32, i32) {
    %c0_i32 = arith.constant 0 : i32
    %c0_i32_0 = arith.constant 0 : i32
    %c0_i32_1 = arith.constant 0 : i32
    return %c0_i32, %c0_i32_0 : i32, i32
  }
  func.func @transform_7(%arg0: i32) -> (i32, i32) {
    %c1_i32 = arith.constant 1 : i32
    %0 = arith.addi %arg0, %c1_i32 : i32
    %c0_i32 = arith.constant 0 : i32
    %c0_i32_0 = arith.constant 0 : i32
    return %c0_i32, %0 : i32, i32
  }
  func.func @transform_8(%arg0: i32) -> (i32, i32) {
    %c0_i32 = arith.constant 0 : i32
    %c0_i32_0 = arith.constant 0 : i32
    %c0_i32_1 = arith.constant 0 : i32
    return %c0_i32, %c0_i32_0 : i32, i32
  }
  func.func @transform_9(%arg0: i32) -> (i32, i32) {
    %c0_i32 = arith.constant 0 : i32
    %c0_i32_0 = arith.constant 0 : i32
    %c0_i32_1 = arith.constant 0 : i32
    return %c0_i32, %c0_i32_0 : i32, i32
  }
}

</mosaic_0001>

<bundles_post_ra>
// kernel: res_blocks_forward.3
= control target key start
LH: loop header
LB: loop body
LE: loop exit
PB: predicated region body
PF: predicated region fallthrough
CT: control target
= control target key end

     0   :  { %s1142_s18 = smov 0   ;;  %s1144_s19 = smov 0   ;;  %s1412_s0 = inlined_call_operand.vmem [shape: f32[4,2048], index: 0, kind: input, shape index: {}]   ;;  %s1413_s1 = inlined_call_operand.vmem [shape: bf16[32,4], index: 1, kind: input, shape index: {}]   ;;  %s1414_s2 = inlined_call_operand.vmem [shape: f32[32,1], index: 2, kind: input, shape index: {}]   ;;  %s1415_s3 = inlined_call_operand.vmem [shape: bf16[32,2048], index: 3, kind: output, shape index: {0}]   ;;  %s1416_s4 = inlined_call_operand.vmem [shape: f32[32,1], index: 4, kind: output, shape index: {1}]   ;;  %s1417_s5 = inlined_call_operand.vmem [shape: f32[32,1], index: 5, kind: output, shape index: {2}]  }
   0x1   :  { %s1146_s20 = smov 0  }
   0x2 LB: > { %s1153_s21 = sadd.s32 4294967295, %s1108_s20   ;;  %s1155_s22 = sadd.s32 1, %s1108_s20   ;;  %s1108_s20 = sphi %s1146_s20, %s1451_s20   ;;  %s1104_s19 = sphi %s1144_s19, %s1450_s19   ;;  %s1100_s18 = sphi %s1142_s18, %s1449_s18  }
   0x3   : > { %s91_s23 = sadd.s32 1, %s1155_s22  ;;  %s95_s24 = sadd.s32 1, %s1104_s19 }
   0x4   : > { %s92_s25 = ssub.s32 %s1155_s22, %s91_s23  ;;  %p105_p0 = scmp.ne.s32.totalorder %s1104_s19, %s1100_s18 }
   0x5   : > { %p93_p1 = scmp.eq.s32.totalorder %s92_s25, 0  ;;  %p106_p2 = scmp.eq.s32.totalorder %s1153_s21, 1 }
   0x6   : > { %p947_p3 = scmp.ge.s32.totalorder %s1108_s20, 1  ;;  %p189_p4 = scmp.lt.s32.totalorder %s1108_s20, 3 }
   0x7   : > { %s1163_s26 = scalar_select %p93_p1, %s1104_s19, %s95_s24  }
   0x8   : > { %p1165_p5 = por %p106_p2, %p105_p0  ;;  %p190_p6 = pnand %p947_p3, %p189_p4 }
   0x9   : > { %s210_s28 = sand.u32 (!%p190_p6), 1, %s1100_s18   ;;  %s1006_s29 = sshll.u32 (!%p190_p6), %s1153_s21, 2 }
   0xa   : > { %193 = sbr.rel (%p190_p6) target bundleno = 387 (0x183), region = 32  ;;  %s948_s30 = sshll.u32 (!%p190_p6), %s210_s28, 6 }
   0xb   : > { %s1007_s6 = sadd.s32 (!%p190_p6), 4, %s1006_s29  ;;  %s1173_s11 = scalar_lea.vmem (!%p190_p6), [#allocation4], %s948_s30 }
   0xc   : > { %p219_p7 = scmp.lt.s32.totalorder (!%p190_p6), %s1007_s6, 15  ;;  %p951_p8 = scmp.ne.s32.totalorder (!%p190_p6), %s1153_s21, 0 }
   0xf   : > { %s1453_s6 = smov (!%p219_p7, %s1007_s6), 15  ;;  %231 = sbr.rel (%p951_p8) target bundleno = 29 (0x1d), region = 36 }
  0x10   : > { %s950_s7 = sshll.u32 %s1453_s6, 2 }
  0x11   : > { %s222_s10 = scalar_lea.vmem %s1412_s0, %s950_s7 }
  0x14   : > { %vm232_vm0 = vcmask 7168   ;;  %v1110_v0 = vmov 0.0  }
  0x15   : > { %233 = vst.msk [vmem:[#allocation2] sm:$0xff] %vm232_vm0, %v1110_v0 }
  0x16   : > { %234 = vst.msk [vmem:[#allocation2 + $0x8] sm:$0xff] %vm232_vm0, %v1110_v0 }
  0x17   : > { %235 = vst.msk [vmem:[#allocation2 + $0x10] sm:$0xff] %vm232_vm0, %v1110_v0 }
  0x18   : > { %236 = vst.msk [vmem:[#allocation2 + $0x18] sm:$0xff] %vm232_vm0, %v1110_v0 }
  0x19   : > { %237 = vst.msk [vmem:[#allocation3] sm:$0xff] %vm232_vm0, %v1110_v0 }
  0x1a   : > { %238 = vst.msk [vmem:[#allocation3 + $0x8] sm:$0xff] %vm232_vm0, %v1110_v0 }
  0x1b   : > { %239 = vst.msk [vmem:[#allocation3 + $0x10] sm:$0xff] %vm232_vm0, %v1110_v0 }
  0x1c   : > { %240 = vst.msk [vmem:[#allocation3 + $0x18] sm:$0xff] %vm232_vm0, %v1110_v0 }
  0x1d PF: > { %v241_v1 = vld [vmem:[%s222_s10] sm:$0xff]  ;;  %v242_v2 = vld [vmem:[%s222_s10 + $0x8] sm:$0xff]  ;;  %v1111_v3 = vmov 0   ;;  %v505_v5 = vld [vmem:[%s1414_s2 + $0x10] sm:$0xff]  ;;  %vm544_vm1 = vcmask 1041408   ;;  %vm537_vm2 = vcmask 31744   ;;  %v265_v22 = vlaneseq }
  0x1e   : > { %245 = vst [vmem:[#allocation1] ss:$2 sm:$0xff] %v241_v1  ;;  %1076 = vset.pattern.permute.xlu0 %v1111_v3  ;;  %v503_v4 = vld [vmem:[%s1414_s2] sm:$0xff]  ;;  %1077 = vset.pattern.permute.xlu1 %v1111_v3  ;;  %v504_v6 = vld [vmem:[%s1414_s2 + $0x8] sm:$0xff]  ;;  %v506_v7 = vld [vmem:[%s1414_s2 + $0x18] sm:$0xff]  ;;  %s952_s29 = sshll.u32 %s1153_s21, 9 }
  0x1f   : > { %247 = vst [vmem:[#allocation1 + $0x10] ss:$2 sm:$0xff] %v242_v2  ;;  %509 = vperm.xlu0 %1076, %v503_v4   ;;  %519 = vperm.xlu1 %1077, %v505_v5   ;;  %v1008_v18 = vld [vmem:[%s1413_s1] sm:$0xff]  ;;  %v1009_v21 = vld [vmem:[%s1413_s1 + $0x8] sm:$0xff]  ;;  %v266_v23 = vand.u32 127, %v265_v22  ;;  %v270_v25 = vstv %s952_s29  ;;  %p993_p9 = scmp.ne.s32.totalorder %s1153_s21, 1 }
  0x21   : > { %v267_v24 = vadd.s32 128, %v266_v23  ;;  %v1199_v26 = vadd.s32 %v270_v25, %v266_v23  ;;  %v268_v28 = vadd.s32 256, %v266_v23  ;;  %v269_v29 = vadd.s32 384, %v266_v23 }
  0x23   : > { %v1201_v27 = vadd.s32 %v270_v25, %v267_v24  ;;  %vm287_vm3 = vcmp.gt.s32.totalorder %v1199_v26, 0  ;;  %v1205_v30 = vadd.s32 %v270_v25, %v268_v28  ;;  %v1207_v31 = vadd.s32 %v270_v25, %v269_v29 }
  0x24   : > { %v288_v32 = vsel %vm287_vm3, %v1199_v26, 0 }
  0x25   : > { %v248_v8 = vld.sshfl [vmem:[#allocation1] sm:$0xff pattern:$0x75316420]  ;;  %v249_v9 = vld.sshfl [vmem:[#allocation1 + $0x8] sm:$0xff pattern:$0x75316420] }
  0x26   : > { %v256_v10 = vpack.c.bf16 %v248_v8, %v248_v8  ;;  %v257_v11 = vpack.c.bf16 %v249_v9, %v249_v9  ;;  %v250_v12 = vld.sshfl [vmem:[#allocation1 + $0x10] sm:$0xff pattern:$0x75316420]  ;;  %v251_v13 = vld.sshfl [vmem:[#allocation1 + $0x18] sm:$0xff pattern:$0x75316420] }
  0x27   : > { %v258_v14 = vpack.c.bf16 %v250_v12, %v250_v12  ;;  %v259_v15 = vpack.c.bf16 %v251_v13, %v251_v13  ;;  %514 = vperm.xlu0 %1076, %v504_v6   ;;  %524 = vperm.xlu1 %1077, %v506_v7   ;;  %vm289_vm4 = vcmp.gt.s32.totalorder %v1201_v27, 0  ;;  %vm295_vm5 = vcmp.lt.s32.totalorder %v288_v32, 647 }
  0x28   : > { %v546_v16 = vsel %vm544_vm1, %v256_v10, 0  ;;  %v549_v17 = vsel %vm544_vm1, %v257_v11, 0  ;;  %v290_v33 = vsel %vm289_vm4, %v1201_v27, 0  ;;  %vm291_vm7 = vcmp.gt.s32.totalorder %v1205_v30, 0 }
  0x29   : > { %564 = vmatpush.bf16.msra.mxu0 %v546_v16  ;;  %583 = vmatpush.bf16.msra.mxu1 %v549_v17  ;;  %v552_v19 = vsel %vm544_vm1, %v258_v14, 0  ;;  %v555_v20 = vsel %vm544_vm1, %v259_v15, 0  ;;  %vm297_vm6 = vcmp.lt.s32.totalorder %v290_v33, 647  ;;  %vm293_vm8 = vcmp.gt.s32.totalorder %v1207_v31, 0 }
  0x2a   : > { %602 = vmatpush.bf16.msra.mxu2 %v552_v19  ;;  %621 = vmatpush.bf16.msra.mxu3 %v555_v20  ;;  %v296_v34 = vsel %vm295_vm5, %v288_v32, 647  ;;  %v298_v35 = vsel %vm297_vm6, %v290_v33, 647  ;;  %v292_v36 = vsel %vm291_vm7, %v1205_v30, 0  ;;  %v294_v37 = vsel %vm293_vm8, %v1207_v31, 0 }
  0x2b   : > { %v303_v38 = vcvt.s32.f32 %v296_v34  ;;  %v304_v39 = vcvt.s32.f32 %v298_v35  ;;  %vm299_vm9 = vcmp.lt.s32.totalorder %v292_v36, 647  ;;  %vm301_vm10 = vcmp.lt.s32.totalorder %v294_v37, 647 }
  0x2c   : > { %985 = vmatmul.msk.bf16.vlgmr.msra.gmra.mxu0 %vm537_vm2, %v1008_v18  ;;  %987 = vmatmul.msk.bf16.vlgmr.msra.gmra.mxu1 %vm537_vm2, %v1008_v18  ;;  %v300_v40 = vsel %vm299_vm9, %v292_v36, 647  ;;  %v302_v41 = vsel %vm301_vm10, %v294_v37, 647 }
  0x2d   : > { %989 = vmatmul.msk.bf16.vlgmr.msra.gmra.mxu2 %vm537_vm2, %v1008_v18  ;;  %991 = vmatmul.msk.bf16.vlgmr.msra.gmra.mxu3 %vm537_vm2, %v1008_v18  ;;  %v307_v42 = vmul.f32 0.0030864198, %v303_v38  ;;  %v308_v43 = vmul.f32 0.0030864198, %v304_v39  ;;  %v305_v44 = vcvt.s32.f32 %v300_v40  ;;  %v306_v45 = vcvt.s32.f32 %v302_v41 }
  0x2f   : > { %v1011_v46 = vceil.f32 %v307_v42  ;;  %v1012_v47 = vfloor.f32 %v307_v42  ;;  %v1016_v48 = vceil.f32 %v308_v43  ;;  %v1017_v49 = vfloor.f32 %v308_v43 }
  0x30   : > { %vm1010_vm11 = vcmp.lt.s32.totalorder %v307_v42, 0  ;;  %vm1015_vm12 = vcmp.lt.s32.totalorder %v308_v43, 0  ;;  %v309_v50 = vmul.f32 0.0030864198, %v305_v44  ;;  %v310_v51 = vmul.f32 0.0030864198, %v306_v45 }
  0x31   : > { %v1013_v52 = vsel %vm1010_vm11, %v1011_v46, %v1012_v47  ;;  %v1018_v53 = vsel %vm1015_vm12, %v1016_v48, %v1017_v49 }
  0x32   : > { %v1014_v54 = vcvt.f32.s32 %v1013_v52  ;;  %v1019_v55 = vcvt.f32.s32 %v1018_v53  ;;  %vm1020_vm13 = vcmp.lt.s32.totalorder %v309_v50, 0  ;;  %v1021_v56 = vceil.f32 %v309_v50 }
  0x33   : > { %v1022_v57 = vfloor.f32 %v309_v50  ;;  %vm1025_vm14 = vcmp.lt.s32.totalorder %v310_v51, 0  ;;  %v1026_v58 = vceil.f32 %v310_v51  ;;  %v1027_v59 = vfloor.f32 %v310_v51 }
  0x34   : > { %v315_v60 = vmul.u32 324, %v1014_v54  ;;  %v316_v61 = vmul.u32 324, %v1019_v55 }
  0x35   : > { %v1023_v62 = vsel %vm1020_vm13, %v1021_v56, %v1022_v57  ;;  %v1028_v63 = vsel %vm1025_vm14, %v1026_v58, %v1027_v59 }
  0x36   : > { %v319_v0 = vsub.s32 %v296_v34, %v315_v60  ;;  %v320_v1 = vsub.s32 %v298_v35, %v316_v61  ;;  %v1024_v2 = vcvt.f32.s32 %v1023_v62  ;;  %v1029_v3 = vcvt.f32.s32 %v1028_v63 }
  0x38   : > { %v327_v4 = vadd.s32 324, %v319_v0  ;;  %v328_v5 = vadd.s32 324, %v320_v1  ;;  %v317_v6 = vmul.u32 324, %v1024_v2  ;;  %v318_v7 = vmul.u32 324, %v1029_v3 }
  0x39   : > { %vm323_vm15 = vcmp.lt.s32.totalorder %v319_v0, 0  ;;  %vm324_vm0 = vcmp.lt.s32.totalorder %v320_v1, 0 }
  0x3a   : > { %v331_v8 = vsel %vm323_vm15, %v327_v4, %v319_v0  ;;  %v332_v9 = vsel %vm324_vm0, %v328_v5, %v320_v1  ;;  %v321_v10 = vsub.s32 %v300_v40, %v317_v6  ;;  %v322_v11 = vsub.s32 %v302_v41, %v318_v7 }
  0x3b   : > { %v953_v12 = vadd.s32 4294966972, %v331_v8  ;;  %v954_v13 = vadd.s32 4294966972, %v332_v9  ;;  %vm335_vm1 = vcmp.ge.s32.totalorder %v331_v8, 324 }
  0x3c   : > { %986 = vmatmul.msk.bf16.gmra.mxu0 %vm537_vm2, %v1009_v21  ;;  %988 = vmatmul.msk.bf16.gmra.mxu1 %vm537_vm2, %v1009_v21  ;;  %vm325_vm3 = vcmp.lt.s32.totalorder %v321_v10, 0  ;;  %v329_v14 = vadd.s32 324, %v321_v10  ;;  %vm326_vm4 = vcmp.lt.s32.totalorder %v322_v11, 0  ;;  %v330_v17 = vadd.s32 324, %v322_v11 }
  0x3d   : > { %990 = vmatmul.msk.bf16.gmra.mxu2 %vm537_vm2, %v1009_v21  ;;  %992 = vmatmul.msk.bf16.gmra.mxu3 %vm537_vm2, %v1009_v21  ;;  %vm336_vm2 = vcmp.ge.s32.totalorder %v332_v9, 324  ;;  %v343_v15 = vsel %vm335_vm1, %v953_v12, %v331_v8 }
  0x3e   : > { %v344_v16 = vsel %vm336_vm2, %v954_v13, %v332_v9  ;;  %v351_v18 = vadd.s32 324, %v343_v15  ;;  %v333_v20 = vsel %vm325_vm3, %v329_v14, %v321_v10  ;;  %vm347_vm5 = vcmp.lt.s32.totalorder %v343_v15, 0 }
  0x3f   : > { %v352_v19 = vadd.s32 324, %v344_v16  ;;  %vm348_vm6 = vcmp.lt.s32.totalorder %v344_v16, 0  ;;  %vm337_vm7 = vcmp.ge.s32.totalorder %v333_v20, 324  ;;  %v955_v21 = vadd.s32 4294966972, %v333_v20 }
  0x40   : > { %v355_v22 = vsel %vm347_vm5, %v351_v18, %v343_v15  ;;  %v334_v24 = vsel %vm326_vm4, %v330_v17, %v322_v11 }
  0x41   : > { %v356_v23 = vsel %vm348_vm6, %v352_v19, %v344_v16  ;;  %vm359_vm8 = vcmp.ge.s32.totalorder %v355_v22, 324  ;;  %v957_v25 = vadd.s32 4294966972, %v355_v22  ;;  %v345_v29 = vsel %vm337_vm7, %v955_v21, %v333_v20 }
  0x42   : > { %vm360_vm9 = vcmp.ge.s32.totalorder %v356_v23, 324  ;;  %v958_v28 = vadd.s32 4294966972, %v356_v23  ;;  %vm349_vm10 = vcmp.lt.s32.totalorder %v345_v29, 0  ;;  %v353_v33 = vadd.s32 324, %v345_v29 }
  0x43   : > { %v367_v32 = vsel %vm359_vm8, %v957_v25, %v355_v22  ;;  %v956_v34 = vadd.s32 4294966972, %v334_v24  ;;  %vm338_vm11 = vcmp.ge.s32.totalorder %v334_v24, 324 }
  0x44   : > { %v371_v35 = vcvt.s32.f32 %v367_v32  ;;  %v368_v36 = vsel %vm360_vm9, %v958_v28, %v356_v23  ;;  %v357_v38 = vsel %vm349_vm10, %v353_v33, %v345_v29 }
  0x45   : > { %v372_v37 = vcvt.s32.f32 %v368_v36  ;;  %vm361_vm12 = vcmp.ge.s32.totalorder %v357_v38, 324  ;;  %v959_v40 = vadd.s32 4294966972, %v357_v38  ;;  %v346_v42 = vsel %vm338_vm11, %v956_v34, %v334_v24 }
  0x46   : > { %v375_v39 = vmul.f32 0.055555556, %v371_v35  ;;  %v354_v53 = vadd.s32 324, %v346_v42  ;;  %vm350_vm15 = vcmp.lt.s32.totalorder %v346_v42, 0 }
  0x47   : > { %v376_v41 = vmul.f32 0.055555556, %v372_v37  ;;  %v369_v45 = vsel %vm361_vm12, %v959_v40, %v357_v38 }
  0x48   : > { %vm1030_vm13 = vcmp.lt.s32.totalorder %v375_v39, 0  ;;  %v1031_v43 = vceil.f32 %v375_v39  ;;  %v1032_v44 = vfloor.f32 %v375_v39  ;;  %v373_v48 = vcvt.s32.f32 %v369_v45 }
  0x49   : > { %vm1035_vm14 = vcmp.lt.s32.totalorder %v376_v41, 0  ;;  %v1036_v46 = vceil.f32 %v376_v41  ;;  %v1037_v47 = vfloor.f32 %v376_v41  ;;  %v358_v61 = vsel %vm350_vm15, %v354_v53, %v346_v42 }
  0x4a   : > { %v1033_v49 = vsel %vm1030_vm13, %v1031_v43, %v1032_v44  ;;  %v377_v52 = vmul.f32 0.055555556, %v373_v48  ;;  %v960_v5 = vadd.s32 4294966972, %v358_v61  ;;  %vm362_vm3 = vcmp.ge.s32.totalorder %v358_v61, 324 }
  0x4b   : > { %v1034_v50 = vcvt.f32.s32 %v1033_v49  ;;  %v1038_v51 = vsel %vm1035_vm14, %v1036_v46, %v1037_v47  ;;  %vm275_vm14 = vcmp.ge.s32.totalorder %v1199_v26, 0  ;;  %vm279_vm15 = vcmp.lt.s32.totalorder %v1199_v26, 648 }
  0x4c   : > { %v1039_v54 = vcvt.f32.s32 %v1038_v51  ;;  %vm1040_vm0 = vcmp.lt.s32.totalorder %v377_v52, 0  ;;  %v1041_v56 = vceil.f32 %v377_v52  ;;  %v1042_v59 = vfloor.f32 %v377_v52 }
  0x4d   : > { %v383_v55 = vmul.u32 18, %v1034_v50  ;;  %v961_v57 = vadd.s32 4294967295, %v1034_v50  ;;  %v370_v14 = vsel %vm362_vm3, %v960_v5, %v358_v61 }
  0x4e   : > { %v384_v58 = vmul.u32 18, %v1039_v54  ;;  %v1043_v63 = vsel %vm1040_vm0, %v1041_v56, %v1042_v59  ;;  %v962_v1 = vadd.s32 4294967295, %v1039_v54  ;;  %v374_v19 = vcvt.s32.f32 %v370_v14 }
  0x4f   : > { %v387_v60 = vsub.s32 %v367_v32, %v383_v55  ;;  %v1044_v2 = vcvt.f32.s32 %v1043_v63 }
  0x50   : > { %v388_v62 = vsub.s32 %v368_v36, %v384_v58  ;;  %v378_v29 = vmul.f32 0.055555556, %v374_v19 }
  0x51   : > { %vm391_vm1 = vcmp.lt.s32.totalorder %v387_v60, 0  ;;  %v403_v0 = vadd.s32 18, %v387_v60  ;;  %v385_v8 = vmul.u32 18, %v1044_v2  ;;  %v963_v18 = vadd.s32 4294967295, %v1044_v2 }
  0x52   : > { %v399_v3 = vsel %vm391_vm1, %v961_v57, %v1034_v50  ;;  %vm392_vm2 = vcmp.lt.s32.totalorder %v388_v62, 0  ;;  %v404_v4 = vadd.s32 18, %v388_v62  ;;  %vm1045_vm10 = vcmp.lt.s32.totalorder %v378_v29, 0 }
  0x53   : > { %v407_v6 = vsel %vm391_vm1, %v403_v0, %v387_v60  ;;  %v400_v7 = vsel %vm392_vm2, %v962_v1, %v1039_v54  ;;  %v415_v9 = vadd.s32 1, %v399_v3  ;;  %v389_v13 = vsub.s32 %v369_v45, %v385_v8 }
  0x54   : > { %v965_v10 = vadd.s32 4294967278, %v407_v6  ;;  %v408_v11 = vsel %vm392_vm2, %v404_v4, %v388_v62  ;;  %vm411_vm4 = vcmp.ge.s32.totalorder %v407_v6, 18  ;;  %v416_v12 = vadd.s32 1, %v400_v7 }
  0x55   : > { %vm412_vm5 = vcmp.ge.s32.totalorder %v408_v11, 18  ;;  %v966_v15 = vadd.s32 4294967278, %v408_v11  ;;  %v419_v16 = vsel %vm411_vm4, %v415_v9, %v399_v3  ;;  %vm393_vm6 = vcmp.lt.s32.totalorder %v389_v13, 0 }
  0x56   : > { %v427_v17 = vsel %vm411_vm4, %v965_v10, %v407_v6  ;;  %v420_v20 = vsel %vm412_vm5, %v416_v12, %v400_v7  ;;  %v969_v21 = vadd.s32 4294967295, %v419_v16  ;;  %v405_v24 = vadd.s32 18, %v389_v13 }
  0x57   : > { %v443_v22 = vadd.s32 18, %v427_v17  ;;  %v428_v23 = vsel %vm412_vm5, %v966_v15, %v408_v11  ;;  %vm431_vm7 = vcmp.lt.s32.totalorder %v427_v17, 0  ;;  %v970_v25 = vadd.s32 4294967295, %v420_v20  ;;  %vm1220_vm5 = vmand %vm275_vm14, %vm279_vm15 }
  0x58   : > { %v401_v28 = vsel %vm393_vm6, %v963_v18, %v1044_v2  ;;  %vm432_vm8 = vcmp.lt.s32.totalorder %v428_v23, 0  ;;  %v444_v32 = vadd.s32 18, %v428_v23  ;;  %v409_v33 = vsel %vm393_vm6, %v405_v24, %v389_v13 }
  0x59   : > { %v439_v34 = vsel %vm431_vm7, %v969_v21, %v419_v16  ;;  %v447_v35 = vsel %vm431_vm7, %v443_v22, %v427_v17  ;;  %vm413_vm9 = vcmp.ge.s32.totalorder %v409_v33, 18  ;;  %v417_v36 = vadd.s32 1, %v401_v28 }
  0x5a   : > { %v967_v37 = vadd.s32 4294967278, %v409_v33  ;;  %v440_v38 = vsel %vm432_vm8, %v970_v25, %v420_v20  ;;  %v1046_v39 = vceil.f32 %v378_v29  ;;  %v1047_v40 = vfloor.f32 %v378_v29 }
  0x5b   : > { %v455_v41 = vadd.s32 1, %v439_v34  ;;  %v973_v42 = vadd.s32 4294967278, %v447_v35  ;;  %v448_v43 = vsel %vm432_vm8, %v444_v32, %v428_v23  ;;  %vm451_vm11 = vcmp.ge.s32.totalorder %v447_v35, 18 }
  0x5c   : > { %v421_v44 = vsel %vm413_vm9, %v417_v36, %v401_v28  ;;  %v1048_v45 = vsel %vm1045_vm10, %v1046_v39, %v1047_v40  ;;  %v456_v46 = vadd.s32 1, %v440_v38  ;;  %v429_v47 = vsel %vm413_vm9, %v967_v37, %v409_v33 }
  0x5d   : > { %v1049_v48 = vcvt.f32.s32 %v1048_v45  ;;  %vm452_vm12 = vcmp.ge.s32.totalorder %v448_v43, 18  ;;  %v974_v49 = vadd.s32 4294967278, %v448_v43  ;;  %v459_v50 = vsel %vm451_vm11, %v455_v41, %v439_v34 }
  0x5e   : > { %v467_v51 = vsel %vm451_vm11, %v973_v42, %v447_v35  ;;  %v971_v52 = vadd.s32 4294967295, %v421_v44  ;;  %vm433_vm13 = vcmp.lt.s32.totalorder %v429_v47, 0  ;;  %v445_v54 = vadd.s32 18, %v429_v47 }
  0x5f   : > { %v386_v53 = vmul.u32 18, %v1049_v48  ;;  %v964_v55 = vadd.s32 4294967295, %v1049_v48  ;;  %v460_v56 = vsel %vm452_vm12, %v456_v46, %v440_v38  ;;  %vm471_vm0 = vcmp.ge.s32.totalorder %v459_v50, 1 }
  0x60   : > { %vm475_vm1 = vcmp.lt.s32.totalorder %v459_v50, 17  ;;  %vm483_vm2 = vcmp.ge.s32.totalorder %v467_v51, 1  ;;  %v468_v58 = vsel %vm452_vm12, %v974_v49, %v448_v43  ;;  %vm487_vm3 = vcmp.lt.s32.totalorder %v467_v51, 17 }
  0x61   : > { %v390_v57 = vsub.s32 %v370_v14, %v386_v53  ;;  %v441_v59 = vsel %vm433_vm13, %v971_v52, %v421_v44  ;;  %vm472_vm6 = vcmp.ge.s32.totalorder %v460_v56, 1  ;;  %vm476_vm7 = vcmp.lt.s32.totalorder %v460_v56, 17  ;;  %vm1225_vm8 = vmand %vm471_vm0, %vm475_vm1 }
  0x62   : > { %v449_v26 = vsel %vm433_vm13, %v445_v54, %v429_v47  ;;  %vm484_vm9 = vcmp.ge.s32.totalorder %v468_v58, 1  ;;  %vm488_vm10 = vcmp.lt.s32.totalorder %v468_v58, 17  ;;  %vm1230_vm11 = vmand %vm483_vm2, %vm487_vm3  ;;  %vm276_vm12 = vcmp.ge.s32.totalorder %v1201_v27, 0 }
  0x63   : > { %vm394_vm4 = vcmp.lt.s32.totalorder %v390_v57, 0  ;;  %v406_v60 = vadd.s32 18, %v390_v57  ;;  %v457_v3 = vadd.s32 1, %v441_v59  ;;  %vm280_vm13 = vcmp.lt.s32.totalorder %v1201_v27, 648  ;;  %vm1237_vm15 = vmand %vm472_vm6, %vm476_vm7 }
  0x64   : > { %v402_v62 = vsel %vm394_vm4, %v964_v55, %v1049_v48  ;;  %vm453_vm0 = vcmp.ge.s32.totalorder %v449_v26, 18  ;;  %v975_v6 = vadd.s32 4294967278, %v449_v26  ;;  %vm1241_vm1 = vmand %vm484_vm9, %vm488_vm10  ;;  %vm277_vm7 = vcmp.ge.s32.totalorder %v1205_v30, 0 }
  0x65   : > { %v410_v0 = vsel %vm394_vm4, %v406_v60, %v390_v57  ;;  %v418_v1 = vadd.s32 1, %v402_v62  ;;  %vm495_vm2 = vmand %vm1225_vm8, %vm1230_vm11  ;;  %v461_v13 = vsel %vm453_vm0, %v457_v3, %v441_v59  ;;  %vm281_vm8 = vcmp.lt.s32.totalorder %v1205_v30, 648 }
  0x66   : > { %vm414_vm14 = vcmp.ge.s32.totalorder %v410_v0, 18  ;;  %v968_v4 = vadd.s32 4294967278, %v410_v0  ;;  %vm1251_vm4 = vmand %vm276_vm12, %vm280_vm13  ;;  %v469_v15 = vsel %vm453_vm0, %v975_v6, %v449_v26  ;;  %v1432_v18 = vmov 0 }
  0x67   : > { %v422_v7 = vsel %vm414_vm14, %v418_v1, %v402_v62  ;;  %vm496_vm6 = vmand %vm1237_vm15, %vm1241_vm1  ;;  %vm473_vm11 = vcmp.ge.s32.totalorder %v461_v13, 1  ;;  %vm477_vm12 = vcmp.lt.s32.totalorder %v461_v13, 17  ;;  %vm485_vm13 = vcmp.ge.s32.totalorder %v469_v15, 1 }
  0x68   : > { %v430_v9 = vsel %vm414_vm14, %v968_v4, %v410_v0  ;;  %v972_v10 = vadd.s32 4294967295, %v422_v7  ;;  %vm1263_vm10 = vmand %vm1220_vm5, %vm495_vm2  ;;  %vm489_vm15 = vcmp.lt.s32.totalorder %v469_v15, 17 }
  0x69   : > { %vm434_vm3 = vcmp.lt.s32.totalorder %v430_v9, 0  ;;  %v446_v11 = vadd.s32 18, %v430_v9  ;;  %v1433_v18 = vsel %vm1263_vm10, 4294967295, %v1432_v18  ;;  %vm1269_vm14 = vmand %vm1251_vm4, %vm496_vm6  ;;  %vm278_vm6 = vcmp.ge.s32.totalorder %v1207_v31, 0 }
  0x6a   : > { %v442_v14 = vsel %vm434_vm3, %v972_v10, %v422_v7  ;;  %vm1273_vm0 = vmand %vm277_vm7, %vm281_vm8  ;;  %vm282_vm7 = vcmp.lt.s32.totalorder %v1207_v31, 648 }
  0x6b   : > { %v450_v16 = vsel %vm434_vm3, %v446_v11, %v430_v9  ;;  %v458_v17 = vadd.s32 1, %v442_v14  ;;  %vm1277_vm2 = vmand %vm473_vm11, %vm477_vm12  ;;  %vm1444_vm12 = vnez %v1433_v18 }
  0x6c   : > { %vm454_vm9 = vcmp.ge.s32.totalorder %v450_v16, 18  ;;  %v976_v27 = vadd.s32 4294967278, %v450_v16  ;;  %vm1281_vm4 = vmand %vm485_vm13, %vm489_vm15 }
  0x6d   : > { %v462_v19 = vsel %vm454_vm9, %v458_v17, %v442_v14  ;;  %vm286_vm11 = vmand %vm278_vm6, %vm282_vm7 }
  0x6e   : > { %v470_v30 = vsel %vm454_vm9, %v976_v27, %v450_v16  ;;  %vm474_vm5 = vcmp.ge.s32.totalorder %v462_v19, 1  ;;  %vm478_vm1 = vcmp.lt.s32.totalorder %v462_v19, 17  ;;  %vm497_vm13 = vmand %vm1277_vm2, %vm1281_vm4 }
  0x6f   : > { %vm486_vm3 = vcmp.ge.s32.totalorder %v470_v30, 1  ;;  %vm490_vm10 = vcmp.lt.s32.totalorder %v470_v30, 17  ;;  %vm1287_vm8 = vmand %vm474_vm5, %vm478_vm1 }
  0x70   : > { %vm494_vm9 = vmand %vm486_vm3, %vm490_vm10 }
  0x71   : > { %vm498_vm15 = vmand %vm1287_vm8, %vm494_vm9 }
  0x72   : > { %vm1304_vm10 = vmand %vm1273_vm0, %vm497_vm13 }
  0x73   : > { %vm1308_vm5 = vmand %vm286_vm11, %vm498_vm15 }
  0x91   : > { %v510_v20 = vpop.permute.xlu0 %509  ;;  %v520_v54 = vpop.permute.xlu1 %519 }
  0x99   : > { %v515_v36 = vpop.permute.xlu0 %514  ;;  %v525_v10 = vpop.permute.xlu1 %524 }
  0xa9   : > { %v566_v25 = vpop.f32.mrf.mxu0  ;;  %v585_v28 = vpop.f32.mrf.mxu1 }
  0xaa   : > { %v567_v32 = vadd.f32 %v566_v25, %v510_v20  ;;  %v586_v33 = vadd.f32 %v585_v28, %v510_v20 }
  0xac   : > { %v641_v34 = vsel %vm1444_vm12, %v567_v32, 0.0  ;;  %v642_v35 = vsel %vm1269_vm14, %v586_v33, 0.0 }
  0xad   : > { %v657_v31 = vpack.c.bf16 %v642_v35, %v641_v34  ;;  %v677_v47 = vadd.f32 %v642_v35, %v641_v34  ;;  %v710_v0 = vmul.f32 %v641_v34, %v641_v34  ;;  %v711_v1 = vmul.f32 %v642_v35, %v642_v35 }
  0xaf   : > { %665 = vst [vmem:[%s1173_s11] sm:$0xff] %v657_v31  ;;  %v726_v15 = vadd.f32 %v711_v1, %v710_v0  ;;  %v673_v1 = vld [vmem:[#allocation2] sm:$0xff] }
  0xb0   : > { %v604_v38 = vpop.f32.mrf.mxu2  ;;  %v623_v39 = vpop.f32.mrf.mxu3 }
  0xb1   : > { %v605_v41 = vadd.f32 %v604_v38, %v510_v20  ;;  %v624_v42 = vadd.f32 %v623_v39, %v510_v20  ;;  %v568_v43 = vpop.f32.mrf.mxu0  ;;  %v587_v44 = vpop.f32.mrf.mxu1 }
  0xb2   : > { %v569_v45 = vadd.f32 %v568_v43, %v515_v36  ;;  %v588_v46 = vadd.f32 %v587_v44, %v515_v36 }
  0xb3   : > { %v643_v48 = vsel %vm1304_vm10, %v605_v41, 0.0  ;;  %v644_v49 = vsel %vm1308_vm5, %v624_v42, 0.0 }
  0xb4   : > { %v645_v50 = vsel %vm1444_vm12, %v569_v45, 0.0  ;;  %v646_v51 = vsel %vm1269_vm14, %v588_v46, 0.0  ;;  %v658_v52 = vpack.c.bf16 %v644_v49, %v643_v48  ;;  %v678_v55 = vadd.f32 %v677_v47, %v643_v48 }
  0xb5   : > { %v659_v53 = vpack.c.bf16 %v646_v51, %v645_v50  ;;  %v682_v4 = vadd.f32 %v646_v51, %v645_v50  ;;  %v712_v11 = vmul.f32 %v643_v48, %v643_v48  ;;  %v714_v34 = vmul.f32 %v645_v50, %v645_v50 }
  0xb6   : > { %666 = vst [vmem:[%s1173_s11 + $0x8] sm:$0xff] %v658_v52  ;;  %v679_v58 = vadd.f32 %v678_v55, %v644_v49  ;;  %v715_v35 = vmul.f32 %v646_v51, %v646_v51  ;;  %v713_v31 = vmul.f32 %v644_v49, %v644_v49 }
  0xb7   : > { %667 = vst [vmem:[%s1173_s11 + $0x10] sm:$0xff] %v659_v53  ;;  %v727_v32 = vadd.f32 %v726_v15, %v712_v11 }
  0xb8   : > { %v606_v56 = vpop.f32.mrf.mxu2  ;;  %v625_v57 = vpop.f32.mrf.mxu3  ;;  %680 = vadd.xlane.f32.xlu2 %v679_v58  ;;  %v731_v21 = vadd.f32 %v715_v35, %v714_v34 }
  0xb9   : > { %v607_v59 = vadd.f32 %v606_v56, %v515_v36  ;;  %v626_v60 = vadd.f32 %v625_v57, %v515_v36  ;;  %v571_v61 = vpop.f32.mrf.mxu0  ;;  %v590_v26 = vpop.f32.mrf.mxu1  ;;  %v728_v41 = vadd.f32 %v727_v32, %v713_v31 }
  0xba   : > { %v572_v62 = vadd.f32 %v571_v61, %v520_v54  ;;  %v591_v63 = vadd.f32 %v590_v26, %v520_v54 }
  0xbb   : > { %v647_v2 = vsel %vm1304_vm10, %v607_v59, 0.0  ;;  %v648_v3 = vsel %vm1308_vm5, %v626_v60, 0.0 }
  0xbc   : > { %v660_v5 = vpack.c.bf16 %v648_v3, %v647_v2  ;;  %v649_v6 = vsel %vm1444_vm12, %v572_v62, 0.0  ;;  %v650_v7 = vsel %vm1269_vm14, %v591_v63, 0.0  ;;  %v683_v9 = vadd.f32 %v682_v4, %v647_v2  ;;  %v674_v4 = vld [vmem:[#allocation2 + $0x8] sm:$0xff] }
  0xbd   : > { %v661_v8 = vpack.c.bf16 %v650_v7, %v649_v6  ;;  %v687_v20 = vadd.f32 %v650_v7, %v649_v6  ;;  %v716_v38 = vmul.f32 %v647_v2, %v647_v2  ;;  %v718_v46 = vmul.f32 %v649_v6, %v649_v6 }
  0xbe   : > { %668 = vst [vmem:[%s1173_s11 + $0x18] sm:$0xff] %v660_v5  ;;  %v684_v12 = vadd.f32 %v683_v9, %v648_v3  ;;  %v719_v49 = vmul.f32 %v650_v7, %v650_v7  ;;  %v717_v53 = vmul.f32 %v648_v3, %v648_v3  ;;  %v706_v7 = vld [vmem:[#allocation3] sm:$0xff] }
  0xbf   : > { %669 = vst [vmem:[%s1173_s11 + $0x20] sm:$0xff] %v661_v8  ;;  %v732_v51 = vadd.f32 %v731_v21, %v716_v38  ;;  %v675_v8 = vld [vmem:[#allocation2 + $0x10] sm:$0xff] }
  0xc0   : > { %v609_v13 = vpop.f32.mrf.mxu2  ;;  %v628_v14 = vpop.f32.mrf.mxu3  ;;  %685 = vadd.xlane.f32.xlu2 %v684_v12  ;;  %v736_v57 = vadd.f32 %v719_v49, %v718_v46 }
  0xc1   : > { %v610_v16 = vadd.f32 %v609_v13, %v520_v54  ;;  %v629_v17 = vadd.f32 %v628_v14, %v520_v54  ;;  %v573_v27 = vpop.f32.mrf.mxu0  ;;  %v592_v19 = vpop.f32.mrf.mxu1  ;;  %v733_v56 = vadd.f32 %v732_v51, %v717_v53  ;;  %v676_v13 = vld [vmem:[#allocation2 + $0x18] sm:$0xff]  ;;  %v707_v14 = vld [vmem:[#allocation3 + $0x8] sm:$0xff] }
  0xc2   : > { %v574_v30 = vadd.f32 %v573_v27, %v525_v10  ;;  %v593_v22 = vadd.f32 %v592_v19, %v525_v10  ;;  %v708_v19 = vld [vmem:[#allocation3 + $0x10] sm:$0xff] }
  0xc3   : > { %v651_v23 = vsel %vm1304_vm10, %v610_v16, 0.0  ;;  %v652_v24 = vsel %vm1308_vm5, %v629_v17, 0.0 }
  0xc4   : > { %v662_v25 = vpack.c.bf16 %v652_v24, %v651_v23  ;;  %v653_v28 = vsel %vm1444_vm12, %v574_v30, 0.0  ;;  %v654_v29 = vsel %vm1269_vm14, %v593_v22, 0.0  ;;  %v688_v36 = vadd.f32 %v687_v20, %v651_v23  ;;  %v709_v22 = vld [vmem:[#allocation3 + $0x18] sm:$0xff] }
  0xc5   : > { %v663_v33 = vpack.c.bf16 %v654_v29, %v653_v28  ;;  %v692_v39 = vadd.f32 %v654_v29, %v653_v28  ;;  %v720_v55 = vmul.f32 %v651_v23, %v651_v23  ;;  %v722_v58 = vmul.f32 %v653_v28, %v653_v28 }
  0xc6   : > { %670 = vst [vmem:[%s1173_s11 + $0x28] sm:$0xff] %v662_v25  ;;  %v689_v44 = vadd.f32 %v688_v36, %v652_v24  ;;  %v723_v59 = vmul.f32 %v654_v29, %v654_v29  ;;  %v721_v60 = vmul.f32 %v652_v24, %v652_v24  ;;  %vm701_vm14 = vcmask 7168  }
  0xc7   : > { %671 = vst [vmem:[%s1173_s11 + $0x30] sm:$0xff] %v663_v33  ;;  %v737_v37 = vadd.f32 %v736_v57, %v720_v55 }
  0xc8   : > { %v611_v42 = vpop.f32.mrf.mxu2  ;;  %v630_v43 = vpop.f32.mrf.mxu3  ;;  %729 = vadd.xlane.f32.xlu2 %v728_v41  ;;  %690 = vadd.xlane.f32.xlu0 %v689_v44  ;;  %v741_v40 = vadd.f32 %v723_v59, %v722_v58 }
  0xc9   : > { %v612_v18 = vadd.f32 %v611_v42, %v525_v10  ;;  %v631_v45 = vadd.f32 %v630_v43, %v525_v10  ;;  %v738_v26 = vadd.f32 %v737_v37, %v721_v60 }
  0xcb   : > { %v655_v47 = vsel %vm1304_vm10, %v612_v18, 0.0  ;;  %v656_v48 = vsel %vm1308_vm5, %v631_v45, 0.0 }
  0xcc   : > { %v664_v50 = vpack.c.bf16 %v656_v48, %v655_v47  ;;  %v693_v52 = vadd.f32 %v692_v39, %v655_v47  ;;  %v724_v61 = vmul.f32 %v655_v47, %v655_v47  ;;  %v725_v62 = vmul.f32 %v656_v48, %v656_v48 }
  0xce   : > { %672 = vst [vmem:[%s1173_s11 + $0x38] sm:$0xff] %v664_v50  ;;  %v694_v54 = vadd.f32 %v693_v52, %v656_v48  ;;  %v742_v63 = vadd.f32 %v741_v40, %v724_v61 }
  0xd0   : > { %695 = vadd.xlane.f32.xlu1 %v694_v54  ;;  %734 = vadd.xlane.f32.xlu2 %v733_v56  ;;  %v743_v0 = vadd.f32 %v742_v63, %v725_v62 }
  0xd8   : > { %739 = vadd.xlane.f32.xlu2 %v738_v26 }
  0xe0   : > { %744 = vadd.xlane.f32.xlu2 %v743_v0 }
 0x12b   : > { %v681_v2 = vpop.xlane.xlu2 %680 }
 0x12c   : > { %v697_v3 = vadd.f32 %v681_v2, %v673_v1 }
 0x12e   : > { %702 = vst.msk [vmem:[#allocation2] sm:$0xff] %vm701_vm14, %v697_v3 }
 0x133   : > { %v686_v5 = vpop.xlane.xlu2 %685 }
 0x134   : > { %v698_v6 = vadd.f32 %v686_v5, %v674_v4 }
 0x136   : > { %703 = vst.msk [vmem:[#allocation2 + $0x8] sm:$0xff] %vm701_vm14, %v698_v6 }
 0x13b   : > { %v730_v9 = vpop.xlane.xlu2 %729  ;;  %v691_v10 = vpop.xlane.xlu0 %690 }
 0x13c   : > { %v746_v11 = vadd.f32 %v730_v9, %v706_v7  ;;  %v699_v12 = vadd.f32 %v691_v10, %v675_v8 }
 0x13e   : > { %750 = vst.msk [vmem:[#allocation3] sm:$0xff] %vm701_vm14, %v746_v11 }
 0x13f   : > { %704 = vst.msk [vmem:[#allocation2 + $0x10] sm:$0xff] %vm701_vm14, %v699_v12 }
 0x143   : > { %v696_v15 = vpop.xlane.xlu1 %695  ;;  %v735_v17 = vpop.xlane.xlu2 %734 }
 0x144   : > { %v700_v16 = vadd.f32 %v696_v15, %v676_v13  ;;  %v747_v27 = vadd.f32 %v735_v17, %v707_v14 }
 0x146   : > { %705 = vst.msk [vmem:[#allocation2 + $0x18] sm:$0xff] %vm701_vm14, %v700_v16 }
 0x147   : > { %751 = vst.msk [vmem:[#allocation3 + $0x8] sm:$0xff] %vm701_vm14, %v747_v27 }
 0x14b   : > { %v740_v20 = vpop.xlane.xlu2 %739 }
 0x14c   : > { %v748_v30 = vadd.f32 %v740_v20, %v708_v19 }
 0x14e   : > { %752 = vst.msk [vmem:[#allocation3 + $0x10] sm:$0xff] %vm701_vm14, %v748_v30 }
 0x152   : > { %757 = sbr.rel (%p993_p9) target bundleno = 377 (0x179), region = 40 }
 0x153   : > { %v745_v23 = vpop.xlane.xlu2 %744 }
 0x154   : > { %v749_v24 = vadd.f32 %v745_v23, %v709_v22 }
 0x156   : > { %753 = vst.msk [vmem:[#allocation3 + $0x18] sm:$0xff] %vm701_vm14, %v749_v24 }
 0x157   : > { %v758_v25 = vld [vmem:[#allocation2] sm:$0xff]  ;;  %v759_v29 = vld [vmem:[#allocation2 + $0x8] sm:$0xff]  ;;  %v760_v31 = vld [vmem:[#allocation2 + $0x10] sm:$0xff] }
 0x158   : > { %v766_v28 = vld [vmem:[#allocation3] sm:$0xff]  ;;  %v762_v32 = vmul.f32 0.001953125, %v758_v25  ;;  %v763_v34 = vmul.f32 0.001953125, %v759_v29  ;;  %v767_v35 = vld [vmem:[#allocation3 + $0x8] sm:$0xff]  ;;  %v768_v36 = vld [vmem:[#allocation3 + $0x10] sm:$0xff]  ;;  %v764_v39 = vmul.f32 0.001953125, %v760_v31 }
 0x159   : > { %v770_v33 = vmul.f32 0.001953125, %v766_v28  ;;  %v771_v38 = vmul.f32 0.001953125, %v767_v35  ;;  %v772_v41 = vmul.f32 0.001953125, %v768_v36  ;;  %v761_v42 = vld [vmem:[#allocation2 + $0x18] sm:$0xff] }
 0x15a   : > { %v774_v44 = vmul.f32 %v762_v32, %v762_v32  ;;  %786 = vst.msk [vmem:[%s1416_s4] sm:$0xff] %vm701_vm14, %v762_v32  ;;  %v775_v18 = vmul.f32 %v763_v34, %v763_v34  ;;  %v765_v45 = vmul.f32 0.001953125, %v761_v42  ;;  %v776_v46 = vmul.f32 %v764_v39, %v764_v39 }
 0x15b   : > { %787 = vst.msk [vmem:[%s1416_s4 + $0x8] sm:$0xff] %vm701_vm14, %v763_v34 }
 0x15c   : > { %v778_v47 = vsub.f32 %v770_v33, %v774_v44  ;;  %v779_v48 = vsub.f32 %v771_v38, %v775_v18  ;;  %788 = vst.msk [vmem:[%s1416_s4 + $0x10] sm:$0xff] %vm701_vm14, %v764_v39  ;;  %v777_v49 = vmul.f32 %v765_v45, %v765_v45  ;;  %v780_v50 = vsub.f32 %v772_v41, %v776_v46 }
 0x15d   : > { %v769_v43 = vld [vmem:[#allocation3 + $0x18] sm:$0xff]  ;;  %789 = vst.msk [vmem:[%s1416_s4 + $0x18] sm:$0xff] %vm701_vm14, %v765_v45 }
 0x15e   : > { %v773_v21 = vmul.f32 0.001953125, %v769_v43  ;;  %v782_v51 = vmax.f32 %v778_v47, 0.0  ;;  %v783_v52 = vmax.f32 %v779_v48, 0.0  ;;  %v784_v54 = vmax.f32 %v780_v50, 0.0 }
 0x160   : > { %v781_v53 = vsub.f32 %v773_v21, %v777_v49  ;;  %v790_v55 = vadd.f32 1e-05, %v782_v51  ;;  %v791_v56 = vadd.f32 1e-05, %v783_v52  ;;  %v792_v58 = vadd.f32 1e-05, %v784_v54 }
 0x162   : > { %v785_v57 = vmax.f32 %v781_v53, 0.0  ;;  %1078 = vrsqrt.f32 %v790_v55  ;;  %vm800_vm0 = vweird.f32 %v790_v55  ;;  %vm810_vm2 = vweird.f32 %v791_v56 }
 0x163   : > { %1080 = vrsqrt.f32 %v791_v56  ;;  %vm820_vm4 = vweird.f32 %v792_v58 }
 0x164   : > { %v793_v59 = vadd.f32 1e-05, %v785_v57  ;;  %1082 = vrsqrt.f32 %v792_v58 }
 0x166   : > { %1084 = vrsqrt.f32 %v793_v59  ;;  %vm830_vm8 = vweird.f32 %v793_v59 }
 0x168   : > { %v1079_v60 = vpop.eup %1078 }
 0x169   : > { %v1081_v37 = vpop.eup %1080  ;;  %v795_v61 = vmul.f32 %v1079_v60, %v790_v55  ;;  %vm801_vm1 = vweird.f32 %v1079_v60 }
 0x16a   : > { %v1083_v26 = vpop.eup %1082  ;;  %v805_v40 = vmul.f32 %v1081_v37, %v791_v56  ;;  %vm811_vm3 = vweird.f32 %v1081_v37  ;;  %vm802_vm7 = vmor %vm800_vm0, %vm801_vm1 }
 0x16b   : > { %v796_v63 = vmul.f32 %v1079_v60, %v795_v61  ;;  %v815_v0 = vmul.f32 %v1083_v26, %v792_v58  ;;  %vm821_vm6 = vweird.f32 %v1083_v26  ;;  %vm812_vm11 = vmor %vm810_vm2, %vm811_vm3 }
 0x16c   : > { %v1085_v62 = vpop.eup %1084  ;;  %v806_v1 = vmul.f32 %v1081_v37, %v805_v40  ;;  %vm822_vm12 = vmor %vm820_vm4, %vm821_vm6 }
 0x16d   : > { %v825_v2 = vmul.f32 %v1085_v62, %v793_v59  ;;  %v797_v3 = vmul.f32 0.5, %v796_v63  ;;  %v816_v4 = vmul.f32 %v1083_v26, %v815_v0  ;;  %vm831_vm9 = vweird.f32 %v1085_v62 }
 0x16e   : > { %v807_v5 = vmul.f32 0.5, %v806_v1  ;;  %vm832_vm13 = vmor %vm830_vm8, %vm831_vm9 }
 0x16f   : > { %v826_v6 = vmul.f32 %v1085_v62, %v825_v2  ;;  %v798_v7 = vsub.f32 1.5, %v797_v3  ;;  %v817_v8 = vmul.f32 0.5, %v816_v4 }
 0x170   : > { %v808_v9 = vsub.f32 1.5, %v807_v5 }
 0x171   : > { %v827_v10 = vmul.f32 0.5, %v826_v6  ;;  %v799_v11 = vmul.f32 %v1079_v60, %v798_v7  ;;  %v818_v12 = vsub.f32 1.5, %v817_v8 }
 0x172   : > { %v809_v13 = vmul.f32 %v1081_v37, %v808_v9 }
 0x173   : > { %v828_v14 = vsub.f32 1.5, %v827_v10  ;;  %v803_v15 = vsel %vm802_vm7, %v1079_v60, %v799_v11  ;;  %v819_v16 = vmul.f32 %v1083_v26, %v818_v12 }
 0x174   : > { %834 = vst.msk [vmem:[%s1417_s5] sm:$0xff] %vm701_vm14, %v803_v15  ;;  %v813_v17 = vsel %vm812_vm11, %v1081_v37, %v809_v13 }
 0x175   : > { %v829_v27 = vmul.f32 %v1085_v62, %v828_v14  ;;  %835 = vst.msk [vmem:[%s1417_s5 + $0x8] sm:$0xff] %vm701_vm14, %v813_v17  ;;  %v823_v19 = vsel %vm822_vm12, %v1083_v26, %v819_v16 }
 0x176   : > { %836 = vst.msk [vmem:[%s1417_s5 + $0x10] sm:$0xff] %vm701_vm14, %v823_v19 }
 0x177   : > { %v833_v20 = vsel %vm832_vm13, %v1085_v62, %v829_v27 }
 0x178   : > { %837 = vst.msk [vmem:[%s1417_s5 + $0x18] sm:$0xff] %vm701_vm14, %v833_v20 }
 0x179 PF: > { %844 = sbr.rel (!%p1165_p5) target bundleno = 387 (0x183), region = 44  ;;  %s995_s25 = sshll.u32 (%p1165_p5), %s1153_s21, 4  ;;  %v861_v30 = vld [vmem:[%s1173_s11] sm:$0xff] (%p1165_p5)  ;;  %v863_v22 = vld [vmem:[%s1173_s11 + $0x8] sm:$0xff] (%p1165_p5)  ;;  %v865_v23 = vld [vmem:[%s1173_s11 + $0x10] sm:$0xff] (%p1165_p5) }
 0x17a   : > { %s915_s30 = scalar_lea.vmem (%p1165_p5), %s1415_s3, %s995_s25  ;;  %v867_v24 = vld [vmem:[%s1173_s11 + $0x18] sm:$0xff] (%p1165_p5)  ;;  %v869_v25 = vld [vmem:[%s1173_s11 + $0x20] sm:$0xff] (%p1165_p5)  ;;  %v871_v28 = vld [vmem:[%s1173_s11 + $0x28] sm:$0xff] (%p1165_p5) }
 0x17b   : > { %996 = vst [vmem:[%s915_s30 + $0x10] sm:$0xff] (%p1165_p5), %v861_v30  ;;  %v873_v29 = vld [vmem:[%s1173_s11 + $0x30] sm:$0xff] (%p1165_p5)  ;;  %v875_v32 = vld [vmem:[%s1173_s11 + $0x38] sm:$0xff] (%p1165_p5) }
 0x17c   : > { %997 = vst [vmem:[%s915_s30 + $0x18] sm:$0xff] (%p1165_p5), %v863_v22 }
 0x17d   : > { %998 = vst [vmem:[%s915_s30 + $0x50] sm:$0xff] (%p1165_p5), %v865_v23 }
 0x17e   : > { %999 = vst [vmem:[%s915_s30 + $0x58] sm:$0xff] %v867_v24 }
 0x17f   : > { %1000 = vst [vmem:[%s915_s30 + $0x90] sm:$0xff] %v869_v25 }
 0x180   : > { %1001 = vst [vmem:[%s915_s30 + $0x98] sm:$0xff] %v871_v28 }
 0x181   : > { %1002 = vst [vmem:[%s915_s30 + $0xd0] sm:$0xff] %v873_v29 }
 0x182   : > { %1003 = vst [vmem:[%s915_s30 + $0xd8] sm:$0xff] %v875_v32 }
 0x183 PF: > { %p13_p10 = scmp.ge.s32.totalorder %s1155_s22, 4   ;;  %s1449_s18 = smov %s1104_s19 }
 0x184   : > { %s1450_s19 = smov %s1163_s26  ;;  %s1451_s20 = smov %s1155_s22 }
 0x185   :  { %15 = sbr.rel (!%p13_p10) target bundleno = 2 (0x2), region = 110 }

// kernel: res_blocks_forward.5
= control target key start
LH: loop header
LB: loop body
LE: loop exit
PB: predicated region body
PF: predicated region fallthrough
CT: control target
= control target key end

     0   :  { %s4823_s0 = inlined_call_operand.vmem [shape: bf16[32,2048], index: 0, kind: input, shape index: {}, may-alias: {0,1,2}]   ;;  %s4824_s1 = inlined_call_operand.vmem [shape: bf16[32,2048], index: 1, kind: input, shape index: {}, may-alias: {0,1,2}]   ;;  %s4825_s2 = inlined_call_operand.vmem [shape: bf16[32,2048], index: 2, kind: input, shape index: {}, may-alias: {0,1,2}]   ;;  %s4826_s3 = inlined_call_operand.vmem [shape: bf16[32,288], index: 3, kind: input, shape index: {}]   ;;  %s4827_s4 = inlined_call_operand.vmem [shape: f32[32,1], index: 4, kind: input, shape index: {}]   ;;  %s4828_s5 = inlined_call_operand.vmem [shape: f32[32,1], index: 5, kind: input, shape index: {}]   ;;  %s4829_s6 = inlined_call_operand.vmem [shape: f32[32,1], index: 6, kind: input, shape index: {}]   ;;  %s4830_s7 = inlined_call_operand.vmem [shape: bf16[32,2048], index: 7, kind: output, shape index: {0}]   ;;  %s4831_s8 = inlined_call_operand.hbm [shape: f32[32,1], index: 8, kind: output, shape index: {1}]   ;;  %s4832_s9 = inlined_call_operand.hbm [shape: f32[32,1], index: 9, kind: output, shape index: {2}]  }
   0x1   :  { %4859 = sst [smem:[#allocation43_spill]] %s4830_s7 }
   0x2   :  { %4860 = sst [smem:[#allocation44_spill]] %s4831_s8 }
   0x3   :  { %4861 = sst [smem:[#allocation45_spill]] %s4832_s9 }
   0x4   :  { %15 = vsyncpa [#allocation9], 0 }
   0x5   :  { %16 = vsyncpa [#allocation11], 0  ;;  %s3047_s30 = smov 0   ;;  %s3049_s10 = smov 0  }
   0x6   :  { %s3051_s11 = smov 0   ;;  %s3053_s12 = smov 0  }
   0x7   :  { %s3055_s13 = smov 0   ;;  %s3057_s14 = smov 0  }
   0x8   :  { %s3059_s15 = smov 0  }
   0x9 LB: > { %s3083_s16 = sadd.s32 4294967295, %s2980_s15   ;;  %s3086_s17 = sadd.s32 1, %s2980_s15   ;;  %s2980_s15 = sphi %s3059_s15, %s5023_s15   ;;  %s2976_s14 = sphi %s3057_s14, %s5022_s14   ;;  %s2972_s13 = sphi %s3055_s13, %s5021_s13   ;;  %s2968_s12 = sphi %s3053_s12, %s5020_s12   ;;  %s2964_s11 = sphi %s3051_s11, %s5019_s11   ;;  %s2960_s10 = sphi %s3049_s10, %s5018_s10   ;;  %s2956_s30 = sphi %s3047_s30, %s5017_s30  }
   0xa   : > { %s2668_s18 = sshll.u32 %s2980_s15, 2  ;;  %s35_s19 = sadd.s32 1, %s2976_s14 }
   0xb   : > { %s3090_s20 = sadd.s32 4, %s2668_s18  ;;  %p42_p0 = scmp.ne.s32.totalorder %s2976_s14, %s2972_s13 }
   0xc   : > { %s2500_s21 = sadd.s32 4294967295, %s3090_s20  ;;  %s2671_s22 = sadd.s32 4, %s3090_s20 }
   0xd   : > { %s2502_s23 = sadd.s32 4294967295, %s2671_s22  ;;  %p43_p1 = scmp.eq.s32.totalorder %s2980_s15, 0 }
   0xe   : > { %s32_s24 = ssub.s32 %s2500_s21, %s2502_s23  ;;  %s59_s25 = sadd.s32 1, %s3086_s17 }
   0xf   : > { %p33_p2 = scmp.eq.s32.totalorder %s32_s24, 0  ;;  %p3100_p3 = por %p43_p1, %p42_p0 }
  0x10   : > { %s60_s27 = ssub.s32 %s3086_s17, %s59_s25  ;;  %s63_s28 = sadd.s32 1, %s2968_s12 }
  0x11   : > { %s3107_s29 = scalar_select %p33_p2, %s2976_s14, %s35_s19  }
  0x12   : > { %p61_p4 = scmp.eq.s32.totalorder %s60_s27, 0  ;;  %p70_p5 = scmp.ne.s32.totalorder %s2968_s12, %s2964_s11 }
  0x13   : > { %s2673_s22 = sadd.s32 8, %s2668_s18  ;;  %s2675_s23 = sadd.s32 8, %s3090_s20 }
  0x14   : > { %s3113_s9 = scalar_select %p61_p4, %s2968_s12, %s63_s28  }
  0x15   : > { %p3117_p6 = por %p70_p5, %p43_p1  ;;  %s90_s8 = ssub.s32 %s2673_s22, %s2675_s23 }
  0x16   : > { %p91_p7 = scmp.eq.s32.totalorder %s90_s8, 0  ;;  %s93_s7 = sadd.s32 1, %s2960_s10 }
  0x17   : > { %p100_p8 = scmp.ne.s32.totalorder %s2960_s10, %s2956_s30  ;;  %p216_p9 = scmp.eq.s32.totalorder %s3083_s16, 1 }
  0x18   : > { %s3126_s25 = scalar_select %p91_p7, %s2960_s10, %s93_s7  }
  0x19   : > { %p3130_p10 = por %p100_p8, %p43_p1  ;;  %p3136_p11 = por %p216_p9, %p70_p5 }
  0x1a   : > { %p2506_p12 = scmp.ge.s32.totalorder %s2980_s15, 2 }
  0x1c   : > { %292 = sbr.rel (%p2506_p12) target bundleno = 61 (0x3d), region = 32 }
  0x21   : > { %295 = sbr.rel (!%p3100_p3) target bundleno = 41 (0x29), region = 36  ;;  %s297_s8 = sand.u32 (%p3100_p3), 1, %s2976_s14  }
  0x22   : > { %s2510_s7 = sshll.u32 (%p3100_p3), %s2500_s21, 2  ;;  %s2507_s20 = sshll.u32 (%p3100_p3), %s297_s8, 4 }
  0x23   : > { %s304_s22 = scalar_lea.vmem (%p3100_p3), %s4823_s0, %s2510_s7  ;;  %s299_s23 = scalar_lea.vmem (%p3100_p3), [#allocation4], %s2507_s20 }
  0x24   : > { %v321_v0 = vld [vmem:[%s304_s22] sm:$0xf] (%p3100_p3) }
  0x25   : > { %v323_v1 = vld [vmem:[%s304_s22 + $0x40] sm:$0xf] (%p3100_p3)  ;;  %322 = vst [vmem:[%s299_s23] sm:$0xf] (%p3100_p3), %v321_v0 }
  0x26   : > { %v325_v2 = vld [vmem:[%s304_s22 + $0x80] sm:$0xf]  ;;  %324 = vst [vmem:[%s299_s23 + $0x4] sm:$0xf] %v323_v1 }
  0x27   : > { %v327_v3 = vld [vmem:[%s304_s22 + $0xc0] sm:$0xf]  ;;  %326 = vst [vmem:[%s299_s23 + $0x8] sm:$0xf] %v325_v2 }
  0x28   : > { %328 = vst [vmem:[%s299_s23 + $0xc] sm:$0xf] %v327_v3 }
  0x29 PF: > { %360 = sbr.rel (!%p3117_p6) target bundleno = 53 (0x35), region = 77  ;;  %s362_s21 = sand.u32 (%p3117_p6), 1, %s2968_s12  }
  0x2a   : > { %s2512_s26 = sshll.u32 (%p3117_p6), %s2980_s15, 4  ;;  %s2511_s8 = sshll.u32 (%p3117_p6), %s362_s21, 6 }
  0x2b   : > { %s2409_s28 = scalar_lea.vmem (%p3117_p6), %s4824_s1, %s2512_s26  ;;  %s364_s20 = scalar_lea.vmem (%p3117_p6), [#allocation5], %s2511_s8 }
  0x2c   : > { %v2513_v4 = vld [vmem:[%s2409_s28 + $0x10] sm:$0xff] (%p3117_p6)  ;;  %v2514_v5 = vld [vmem:[%s2409_s28 + $0x18] sm:$0xff] (%p3117_p6) }
  0x2d   : > { %v2515_v6 = vld [vmem:[%s2409_s28 + $0x50] sm:$0xff] (%p3117_p6)  ;;  %382 = vst [vmem:[%s364_s20] sm:$0xff] (%p3117_p6), %v2513_v4  ;;  %v2516_v7 = vld [vmem:[%s2409_s28 + $0x58] sm:$0xff] (%p3117_p6) }
  0x2e   : > { %384 = vst [vmem:[%s364_s20 + $0x8] sm:$0xff] %v2514_v5  ;;  %v2517_v8 = vld [vmem:[%s2409_s28 + $0x90] sm:$0xff]  ;;  %v2518_v9 = vld [vmem:[%s2409_s28 + $0x98] sm:$0xff] }
  0x2f   : > { %386 = vst [vmem:[%s364_s20 + $0x10] sm:$0xff] %v2515_v6  ;;  %v2519_v10 = vld [vmem:[%s2409_s28 + $0xd0] sm:$0xff]  ;;  %v2520_v11 = vld [vmem:[%s2409_s28 + $0xd8] sm:$0xff] }
  0x30   : > { %388 = vst [vmem:[%s364_s20 + $0x18] sm:$0xff] %v2516_v7 }
  0x31   : > { %390 = vst [vmem:[%s364_s20 + $0x20] sm:$0xff] %v2517_v8 }
  0x32   : > { %392 = vst [vmem:[%s364_s20 + $0x28] sm:$0xff] %v2518_v9 }
  0x33   : > { %394 = vst [vmem:[%s364_s20 + $0x30] sm:$0xff] %v2519_v10 }
  0x34   : > { %396 = vst [vmem:[%s364_s20 + $0x38] sm:$0xff] %v2520_v11 }
  0x35 PF: > { %402 = sbr.rel (!%p3130_p10) target bundleno = 61 (0x3d), region = 100  ;;  %s404_s24 = sand.u32 (%p3130_p10), 1, %s2960_s10  }
  0x36   : > { %s2522_s22 = sshll.u32 (%p3130_p10), %s2980_s15, 4  ;;  %s2521_s23 = sshll.u32 (%p3130_p10), %s404_s24, 4 }
  0x37   : > { %s2414_s8 = scalar_lea.vmem (%p3130_p10), %s4825_s2, %s2522_s22  ;;  %s406_s27 = scalar_lea.vmem (%p3130_p10), [#allocation6], %s2521_s23 }
  0x38   : > { %v2523_v12 = vld [vmem:[%s2414_s8 + $0x20] sm:$0xf] (%p3130_p10) }
  0x39   : > { %v2524_v13 = vld [vmem:[%s2414_s8 + $0x60] sm:$0xf] (%p3130_p10)  ;;  %428 = vst [vmem:[%s406_s27] sm:$0xf] (%p3130_p10), %v2523_v12 }
  0x3a   : > { %v2525_v14 = vld [vmem:[%s2414_s8 + $0xa0] sm:$0xf]  ;;  %430 = vst [vmem:[%s406_s27 + $0x4] sm:$0xf] %v2524_v13 }
  0x3b   : > { %v2526_v15 = vld [vmem:[%s2414_s8 + $0xe0] sm:$0xf]  ;;  %432 = vst [vmem:[%s406_s27 + $0x8] sm:$0xf] %v2525_v14 }
  0x3c   : > { %434 = vst [vmem:[%s406_s27 + $0xc] sm:$0xf] %v2526_v15 }
  0x3d PF: > { %p2527_p13 = scmp.ge.s32.totalorder %s2980_s15, 1  ;;  %p465_p0 = scmp.lt.s32.totalorder %s2980_s15, 3 }
  0x3f   : > { %p466_p1 = pnand %p2527_p13, %p465_p0 }
  0x41   : > { %469 = sbr.rel (%p466_p1) target bundleno = 1261 (0x4ed), region = 141 }
  0x46   : > { %s472_s19 = sand.u32 1, %s2972_s13   ;;  %s479_s7 = sand.u32 1, %s2964_s11  }
  0x47   : > { %s3165_s28 = sshll.u32 %s472_s19, 4  ;;  %s2529_s20 = sshll.u32 %s479_s7, 6 }
  0x48   : > { %s486_s24 = sand.u32 1, %s2956_s30   ;;  %s474_s23 = scalar_lea.vmem [#allocation4], %s3165_s28 }
  0x49   : > { %s3168_s22 = sshll.u32 %s486_s24, 4  ;;  %s3171_s21 = scalar_lea.vmem [#allocation5], %s2529_s20 }
  0x4a   : > { %s3174_s15 = scalar_lea.vmem [#allocation7], %s2529_s20  ;;  %p2532_p2 = scmp.ne.s32.totalorder %s3083_s16, 0 }
  0x4c   : > { %541 = sbr.rel (%p2532_p2) target bundleno = 90 (0x5a), region = 157 }
  0x51   : > { %vm542_vm0 = vcmask 7168   ;;  %v2982_v16 = vmov 0.0  }
  0x52   : > { %543 = vst.msk [vmem:[#allocation2] sm:$0xff] %vm542_vm0, %v2982_v16 }
  0x53   : > { %544 = vst.msk [vmem:[#allocation2 + $0x8] sm:$0xff] %vm542_vm0, %v2982_v16 }
  0x54   : > { %545 = vst.msk [vmem:[#allocation2 + $0x10] sm:$0xff] %vm542_vm0, %v2982_v16 }
  0x55   : > { %546 = vst.msk [vmem:[#allocation2 + $0x18] sm:$0xff] %vm542_vm0, %v2982_v16 }
  0x56   : > { %547 = vst.msk [vmem:[#allocation3] sm:$0xff] %vm542_vm0, %v2982_v16 }
  0x57   : > { %548 = vst.msk [vmem:[#allocation3 + $0x8] sm:$0xff] %vm542_vm0, %v2982_v16 }
  0x58   : > { %549 = vst.msk [vmem:[#allocation3 + $0x10] sm:$0xff] %vm542_vm0, %v2982_v16 }
  0x59   : > { %550 = vst.msk [vmem:[#allocation3 + $0x18] sm:$0xff] %vm542_vm0, %v2982_v16 }
  0x5a PF: > { %v1015_v17 = vld [vmem:[%s4828_s5 + $0x10] sm:$0xff]  ;;  %v1013_v18 = vld [vmem:[%s4828_s5] sm:$0xff]  ;;  %v2983_v19 = vmov 0   ;;  %v1016_v21 = vld [vmem:[%s4828_s5 + $0x18] sm:$0xff]  ;;  %s2581_s7 = sshll.u32 %s3083_s16, 9  ;;  %v633_v26 = vlaneseq  ;;  %s4866_s26 = scalar_lea.vmem [#allocation6], %s3168_s22 }
  0x5b   : > { %2852 = vset.pattern.permute.xlu1 %v2983_v19  ;;  %2851 = vset.pattern.permute.xlu0 %v2983_v19  ;;  %v1061_v20 = vld [vmem:[%s4829_s6] sm:$0xff]  ;;  %v1014_v22 = vld [vmem:[%s4828_s5 + $0x8] sm:$0xff]  ;;  %v1064_v24 = vld [vmem:[%s4829_s6 + $0x18] sm:$0xff]  ;;  %s2582_s20 = sadd.s32 4294967168, %s2581_s7  ;;  %s4867_s24 = smov %s4866_s26 }
  0x5c   : > { %1029 = vperm.xlu1 %2852, %v1015_v17   ;;  %1019 = vperm.xlu0 %2851, %v1013_v18   ;;  %v1062_v23 = vld [vmem:[%s4829_s6 + $0x8] sm:$0xff]  ;;  %v1063_v25 = vld [vmem:[%s4829_s6 + $0x10] sm:$0xff]  ;;  %v634_v27 = vand.u32 127, %v633_v26  ;;  %v640_v33 = vstv %s2582_s20  ;;  %s2984_s28 = smov 127   ;;  %s2985_s22 = smov 126  }
  0x5d   : > { %2853 = vset.pattern.permute.xlu2 %v2983_v19  ;;  %s2987_s30 = smov 109   ;;  %s2988_s11 = smov 108  }
  0x5e   : > { %1067 = vperm.xlu2 %2853, %v1061_v20   ;;  %v635_v28 = vadd.s32 128, %v634_v27  ;;  %v636_v29 = vadd.s32 256, %v634_v27  ;;  %v637_v30 = vadd.s32 384, %v634_v27  ;;  %v638_v31 = vadd.s32 512, %v634_v27  ;;  %s2989_s13 = smov 92   ;;  %s2990_s8 = smov 91  }
  0x5f   : > { %v639_v32 = vadd.s32 640, %v634_v27  ;;  %v3202_v34 = vadd.s32 %v640_v33, %v634_v27  ;;  %s2991_s27 = smov 90   ;;  %s2992_s19 = smov 19  }
  0x60   : > { %v3204_v35 = vadd.s32 %v640_v33, %v635_v28  ;;  %v3206_v36 = vadd.s32 %v640_v33, %v636_v29  ;;  %v3208_v37 = vadd.s32 %v640_v33, %v637_v30  ;;  %v3210_v38 = vadd.s32 %v640_v33, %v638_v31  ;;  %p2651_p3 = scmp.ne.s32.totalorder %s3083_s16, 1 }
  0x61   : > { %v3212_v39 = vadd.s32 %v640_v33, %v639_v32  ;;  %vm665_vm1 = vcmp.gt.s32.totalorder %v3202_v34, 0 }
  0x62   : > { %vm667_vm2 = vcmp.gt.s32.totalorder %v3204_v35, 0  ;;  %vm669_vm3 = vcmp.gt.s32.totalorder %v3206_v36, 0  ;;  %vm671_vm4 = vcmp.gt.s32.totalorder %v3208_v37, 0  ;;  %v666_v40 = vsel %vm665_vm1, %v3202_v34, 0 }
  0x63   : > { %v668_v41 = vsel %vm667_vm2, %v3204_v35, 0  ;;  %v670_v42 = vsel %vm669_vm3, %v3206_v36, 0  ;;  %v672_v43 = vsel %vm671_vm4, %v3208_v37, 0  ;;  %vm673_vm5 = vcmp.gt.s32.totalorder %v3210_v38, 0 }
  0x64   : > { %1034 = vperm.xlu1 %2852, %v1016_v21   ;;  %1024 = vperm.xlu0 %2851, %v1014_v22   ;;  %vm675_vm6 = vcmp.gt.s32.totalorder %v3212_v39, 0  ;;  %vm677_vm7 = vcmp.lt.s32.totalorder %v666_v40, 647  ;;  %vm679_vm8 = vcmp.lt.s32.totalorder %v668_v41, 647  ;;  %v674_v44 = vsel %vm673_vm5, %v3210_v38, 0 }
  0x65   : > { %v676_v45 = vsel %vm675_vm6, %v3212_v39, 0  ;;  %v678_v46 = vsel %vm677_vm7, %v666_v40, 647  ;;  %v680_v47 = vsel %vm679_vm8, %v668_v41, 647  ;;  %vm681_vm9 = vcmp.lt.s32.totalorder %v670_v42, 647 }
  0x66   : > { %1072 = vperm.xlu2 %2853, %v1062_v23   ;;  %vm683_vm10 = vcmp.lt.s32.totalorder %v672_v43, 647  ;;  %vm685_vm11 = vcmp.lt.s32.totalorder %v674_v44, 647  ;;  %vm687_vm12 = vcmp.lt.s32.totalorder %v676_v45, 647  ;;  %v682_v48 = vsel %vm681_vm9, %v670_v42, 647 }
  0x67   : > { %v684_v49 = vsel %vm683_vm10, %v672_v43, 647  ;;  %v686_v50 = vsel %vm685_vm11, %v674_v44, 647  ;;  %v688_v51 = vsel %vm687_vm12, %v676_v45, 647  ;;  %v689_v52 = vcvt.s32.f32 %v678_v46 }
  0x68   : > { %v690_v53 = vcvt.s32.f32 %v680_v47  ;;  %v691_v54 = vcvt.s32.f32 %v682_v48  ;;  %v692_v55 = vcvt.s32.f32 %v684_v49  ;;  %v693_v56 = vcvt.s32.f32 %v686_v50 }
  0x69   : > { %v694_v57 = vcvt.s32.f32 %v688_v51  ;;  %v695_v58 = vmul.f32 0.0030864198, %v689_v52 }
  0x6a   : > { %v696_v59 = vmul.f32 0.0030864198, %v690_v53  ;;  %v697_v60 = vmul.f32 0.0030864198, %v691_v54  ;;  %v698_v61 = vmul.f32 0.0030864198, %v692_v55 }
  0x6b   : > { %v699_v62 = vmul.f32 0.0030864198, %v693_v56  ;;  %v700_v63 = vmul.f32 0.0030864198, %v694_v57  ;;  %vm2708_vm13 = vcmp.lt.s32.totalorder %v695_v58, 0  ;;  %v2709_v0 = vceil.f32 %v695_v58 }
  0x6c   : > { %1082 = vperm.xlu1 %2852, %v1064_v24   ;;  %1077 = vperm.xlu0 %2851, %v1063_v25   ;;  %v2710_v1 = vfloor.f32 %v695_v58  ;;  %vm2713_vm14 = vcmp.lt.s32.totalorder %v696_v59, 0  ;;  %v2714_v2 = vceil.f32 %v696_v59  ;;  %v2715_v3 = vfloor.f32 %v696_v59 }
  0x6d   : > { %vm2718_vm15 = vcmp.lt.s32.totalorder %v697_v60, 0  ;;  %v2719_v4 = vceil.f32 %v697_v60  ;;  %v2720_v6 = vfloor.f32 %v697_v60  ;;  %vm2723_vm0 = vcmp.lt.s32.totalorder %v698_v61, 0 }
  0x6e   : > { %v2711_v5 = vsel %vm2708_vm13, %v2709_v0, %v2710_v1  ;;  %v2724_v7 = vceil.f32 %v698_v61  ;;  %v2716_v9 = vsel %vm2713_vm14, %v2714_v2, %v2715_v3  ;;  %v2725_v10 = vfloor.f32 %v698_v61 }
  0x6f   : > { %v2712_v8 = vcvt.f32.s32 %v2711_v5  ;;  %vm2728_vm1 = vcmp.lt.s32.totalorder %v699_v62, 0  ;;  %v2717_v11 = vcvt.f32.s32 %v2716_v9  ;;  %v2721_v12 = vsel %vm2718_vm15, %v2719_v4, %v2720_v6 }
  0x70   : > { %v2729_v13 = vceil.f32 %v699_v62  ;;  %v2730_v14 = vfloor.f32 %v699_v62  ;;  %v2722_v15 = vcvt.f32.s32 %v2721_v12  ;;  %v2726_v16 = vsel %vm2723_vm0, %v2724_v7, %v2725_v10 }
  0x71   : > { %vm2733_vm2 = vcmp.lt.s32.totalorder %v700_v63, 0  ;;  %v2734_v17 = vceil.f32 %v700_v63  ;;  %v2727_v18 = vcvt.f32.s32 %v2726_v16  ;;  %v2735_v20 = vfloor.f32 %v700_v63 }
  0x72   : > { %v2731_v19 = vsel %vm2728_vm1, %v2729_v13, %v2730_v14  ;;  %v707_v21 = vmul.u32 324, %v2712_v8  ;;  %v708_v23 = vmul.u32 324, %v2717_v11  ;;  %v709_v24 = vmul.u32 324, %v2722_v15 }
  0x73   : > { %v2732_v22 = vcvt.f32.s32 %v2731_v19  ;;  %v2736_v25 = vsel %vm2733_vm2, %v2734_v17, %v2735_v20  ;;  %v710_v26 = vmul.u32 324, %v2727_v18 }
  0x74   : > { %v713_v27 = vsub.s32 %v678_v46, %v707_v21  ;;  %v2737_v28 = vcvt.f32.s32 %v2736_v25  ;;  %v714_v30 = vsub.s32 %v680_v47, %v708_v23  ;;  %v715_v31 = vsub.s32 %v682_v48, %v709_v24 }
  0x75   : > { %v711_v29 = vmul.u32 324, %v2732_v22  ;;  %v716_v32 = vsub.s32 %v684_v49, %v710_v26 }
  0x76   : > { %vm719_vm3 = vcmp.lt.s32.totalorder %v713_v27, 0  ;;  %v725_v33 = vadd.s32 324, %v713_v27  ;;  %v712_v40 = vmul.u32 324, %v2737_v28  ;;  %vm720_vm4 = vcmp.lt.s32.totalorder %v714_v30, 0 }
  0x77   : > { %v717_v41 = vsub.s32 %v686_v50, %v711_v29  ;;  %vm721_vm5 = vcmp.lt.s32.totalorder %v715_v31, 0  ;;  %vm722_vm6 = vcmp.lt.s32.totalorder %v716_v32, 0  ;;  %v726_v42 = vadd.s32 324, %v714_v30 }
  0x78   : > { %v727_v43 = vadd.s32 324, %v715_v31  ;;  %v728_v44 = vadd.s32 324, %v716_v32  ;;  %v718_v45 = vsub.s32 %v688_v51, %v712_v40  ;;  %v731_v53 = vsel %vm719_vm3, %v725_v33, %v713_v27 }
  0x79   : > { %vm723_vm7 = vcmp.lt.s32.totalorder %v717_v41, 0  ;;  %v729_v52 = vadd.s32 324, %v717_v41  ;;  %v732_v46 = vsel %vm720_vm4, %v726_v42, %v714_v30  ;;  %vm737_vm8 = vcmp.ge.s32.totalorder %v731_v53, 324 }
  0x7a   : > { %v733_v54 = vsel %vm721_vm5, %v727_v43, %v715_v31  ;;  %v734_v55 = vsel %vm722_vm6, %v728_v44, %v716_v32  ;;  %vm724_vm9 = vcmp.lt.s32.totalorder %v718_v45, 0  ;;  %v730_v47 = vadd.s32 324, %v718_v45 }
  0x7b   : > { %v735_v48 = vsel %vm723_vm7, %v729_v52, %v717_v41  ;;  %vm738_vm10 = vcmp.ge.s32.totalorder %v732_v46, 324  ;;  %vm739_vm11 = vcmp.ge.s32.totalorder %v733_v54, 324  ;;  %vm740_vm12 = vcmp.ge.s32.totalorder %v734_v55, 324 }
  0x7c   : > { %vm741_vm13 = vcmp.ge.s32.totalorder %v735_v48, 324  ;;  %v2583_v49 = vadd.s32 4294966972, %v731_v53  ;;  %v736_v50 = vsel %vm724_vm9, %v730_v47, %v718_v45  ;;  %v2584_v56 = vadd.s32 4294966972, %v732_v46 }
  0x7d   : > { %v2585_v57 = vadd.s32 4294966972, %v733_v54  ;;  %v2586_v58 = vadd.s32 4294966972, %v734_v55  ;;  %vm742_vm14 = vcmp.ge.s32.totalorder %v736_v50, 324  ;;  %v2587_v51 = vadd.s32 4294966972, %v735_v48 }
  0x7e   : > { %v2588_v59 = vadd.s32 4294966972, %v736_v50  ;;  %v749_v60 = vsel %vm737_vm8, %v2583_v49, %v731_v53  ;;  %v750_v61 = vsel %vm738_vm10, %v2584_v56, %v732_v46  ;;  %v2684_v49 = vld [vmem:[%s3171_s21 + $0x24] sm:$0xf] }
  0x7f   : > { %v751_v62 = vsel %vm739_vm11, %v2585_v57, %v733_v54  ;;  %v752_v63 = vsel %vm740_vm12, %v2586_v58, %v734_v55  ;;  %vm755_vm15 = vcmp.lt.s32.totalorder %v749_v60, 0  ;;  %v753_v0 = vsel %vm741_vm13, %v2587_v51, %v735_v48 }
  0x80   : > { %v754_v1 = vsel %vm742_vm14, %v2588_v59, %v736_v50  ;;  %vm756_vm0 = vcmp.lt.s32.totalorder %v750_v61, 0  ;;  %vm757_vm1 = vcmp.lt.s32.totalorder %v751_v62, 0  ;;  %vm758_vm2 = vcmp.lt.s32.totalorder %v752_v63, 0  ;;  %v2561_v50 = vld [vmem:[%s3171_s21 + $0x30] sm:$0xf0] }
  0x81   : > { %vm759_vm3 = vcmp.lt.s32.totalorder %v753_v0, 0  ;;  %vm760_vm4 = vcmp.lt.s32.totalorder %v754_v1, 0  ;;  %v761_v2 = vadd.s32 324, %v749_v60  ;;  %v762_v3 = vadd.s32 324, %v750_v61  ;;  %v2559_v59 = vld [vmem:[%s3171_s21 + $0x20] sm:$0xf] }
  0x82   : > { %v763_v4 = vadd.s32 324, %v751_v62  ;;  %v764_v5 = vadd.s32 324, %v752_v63  ;;  %v765_v6 = vadd.s32 324, %v753_v0  ;;  %v766_v7 = vadd.s32 324, %v754_v1 }
  0x83   : > { %v767_v8 = vsel %vm755_vm15, %v761_v2, %v749_v60  ;;  %v768_v9 = vsel %vm756_vm0, %v762_v3, %v750_v61  ;;  %v2680_v60 = vld [vmem:[%s3171_s21 + $0x4] sm:$0xf]  ;;  %v2545_v61 = vld [vmem:[%s3171_s21 + $0x10] sm:$0xf0]  ;;  %v2686_v2 = vld [vmem:[%s3171_s21 + $0x2c] sm:$0xf0]  ;;  %v3258_v3 = vor.u32 %v2684_v49, %v2561_v50 }
  0x84   : > { %v769_v10 = vsel %vm757_vm1, %v763_v4, %v751_v62  ;;  %v770_v11 = vsel %vm758_vm2, %v764_v5, %v752_v63  ;;  %v771_v12 = vsel %vm759_vm3, %v765_v6, %v753_v0  ;;  %v772_v13 = vsel %vm760_vm4, %v766_v7, %v754_v1  ;;  %v3254_v0 = vld [vmem:[%s474_s23 + $0x8] sm:$0xff] }
  0x85   : > { %vm773_vm5 = vcmp.ge.s32.totalorder %v767_v8, 324  ;;  %vm774_vm6 = vcmp.ge.s32.totalorder %v768_v9, 324  ;;  %vm775_vm7 = vcmp.ge.s32.totalorder %v769_v10, 324  ;;  %vm776_vm8 = vcmp.ge.s32.totalorder %v770_v11, 324  ;;  %v2685_v1 = vld [vmem:[%s3171_s21 + $0x2c] sm:$0xf] }
  0x86   : > { %vm777_vm9 = vcmp.ge.s32.totalorder %v771_v12, 324  ;;  %v2589_v14 = vadd.s32 4294966972, %v767_v8  ;;  %v2590_v15 = vadd.s32 4294966972, %v768_v9  ;;  %v2591_v16 = vadd.s32 4294966972, %v769_v10  ;;  %v2567_v5 = vld [vmem:[%s3171_s21 + $0x28] sm:$0xf] }
  0x87   : > { %v2592_v17 = vadd.s32 4294966972, %v770_v11  ;;  %v2593_v18 = vadd.s32 4294966972, %v771_v12  ;;  %vm778_vm10 = vcmp.ge.s32.totalorder %v772_v13, 324  ;;  %v2594_v19 = vadd.s32 4294966972, %v772_v13  ;;  %v2569_v6 = vld [vmem:[%s3171_s21 + $0x38] sm:$0xf0] }
  0x88   : > { %v3227_v20 = vsel %vm773_vm5, %v2589_v14, %v767_v8  ;;  %v3229_v21 = vsel %vm774_vm6, %v2590_v15, %v768_v9  ;;  %v3231_v22 = vsel %vm775_vm7, %v2591_v16, %v769_v10  ;;  %v2687_v7 = vld [vmem:[%s3171_s21 + $0x34] sm:$0xf0]  ;;  %v3263_v14 = vor.u32 %v2686_v2, %v2559_v59  ;;  %v2543_v15 = vld [vmem:[%s3171_s21] sm:$0xf]  ;;  %v2682_v16 = vld [vmem:[%s3171_s21 + $0xc] sm:$0xf0] }
  0x89   : > { %v3233_v23 = vsel %vm776_vm8, %v2592_v17, %v770_v11  ;;  %v3235_v24 = vsel %vm777_vm9, %v2593_v18, %v771_v12  ;;  %v791_v25 = vcvt.s32.f32 %v3227_v20  ;;  %v792_v26 = vcvt.s32.f32 %v3229_v21 }
  0x8a   : > { %v793_v27 = vcvt.s32.f32 %v3231_v22  ;;  %v794_v28 = vcvt.s32.f32 %v3233_v23  ;;  %v795_v29 = vcvt.s32.f32 %v3235_v24  ;;  %v3242_v30 = vsel %vm778_vm10, %v2594_v19, %v772_v13 }
  0x8b   : > { %v797_v31 = vmul.f32 0.055555556, %v791_v25  ;;  %v798_v32 = vmul.f32 0.055555556, %v792_v26  ;;  %v796_v42 = vcvt.s32.f32 %v3242_v30  ;;  %v3267_v17 = vor.u32 %v2680_v60, %v2545_v61 }
  0x8c   : > { %v799_v33 = vmul.f32 0.055555556, %v793_v27  ;;  %v800_v40 = vmul.f32 0.055555556, %v794_v28  ;;  %v801_v41 = vmul.f32 0.055555556, %v795_v29  ;;  %v3269_v18 = vor.u32 %v2687_v7, %v2567_v5 }
  0x8d   : > { %vm2738_vm11 = vcmp.lt.s32.totalorder %v797_v31, 0  ;;  %v2739_v43 = vceil.f32 %v797_v31  ;;  %v2740_v44 = vfloor.f32 %v797_v31  ;;  %vm2743_vm12 = vcmp.lt.s32.totalorder %v798_v32, 0 }
  0x8e   : > { %v2744_v45 = vceil.f32 %v798_v32  ;;  %v2745_v52 = vfloor.f32 %v798_v32  ;;  %vm2748_vm13 = vcmp.lt.s32.totalorder %v799_v33, 0  ;;  %v2749_v53 = vceil.f32 %v799_v33  ;;  %v2681_v32 = vld [vmem:[%s3171_s21 + $0xc] sm:$0xf] }
  0x8f   : > { %v2750_v46 = vfloor.f32 %v799_v33  ;;  %v2754_v54 = vceil.f32 %v800_v40  ;;  %v2755_v55 = vfloor.f32 %v800_v40  ;;  %v2759_v47 = vceil.f32 %v801_v41  ;;  %v2553_v33 = vld [vmem:[%s3171_s21 + $0x18] sm:$0xf0] }
  0x90   : > { %v2760_v48 = vfloor.f32 %v801_v41  ;;  %vm2753_vm14 = vcmp.lt.s32.totalorder %v800_v40, 0  ;;  %vm2758_vm15 = vcmp.lt.s32.totalorder %v801_v41, 0  ;;  %v802_v56 = vmul.f32 0.055555556, %v796_v42 }
  0x91   : > { %v2741_v57 = vsel %vm2738_vm11, %v2739_v43, %v2740_v44  ;;  %v2746_v58 = vsel %vm2743_vm12, %v2744_v45, %v2745_v52  ;;  %v2751_v51 = vsel %vm2748_vm13, %v2749_v53, %v2750_v46  ;;  %v2756_v62 = vsel %vm2753_vm14, %v2754_v54, %v2755_v55 }
  0x92   : > { %v2761_v63 = vsel %vm2758_vm15, %v2759_v47, %v2760_v48  ;;  %v2742_v4 = vcvt.f32.s32 %v2741_v57  ;;  %v2747_v8 = vcvt.f32.s32 %v2746_v58  ;;  %v2752_v9 = vcvt.f32.s32 %v2751_v51 }
  0x93   : > { %v2764_v10 = vceil.f32 %v802_v56  ;;  %v2765_v11 = vfloor.f32 %v802_v56  ;;  %v2757_v12 = vcvt.f32.s32 %v2756_v62  ;;  %v2762_v13 = vcvt.f32.s32 %v2761_v63 }
  0x94   : > { %vm2763_vm0 = vcmp.lt.s32.totalorder %v802_v56, 0  ;;  %v3271_v19 = vor.u32 %v2685_v1, %v2569_v6  ;;  %v1001_v25 = vunpack.c.l.bf16 %v3254_v0  ;;  %v1003_v26 = vunpack.c.l.bf16 %v3258_v3 }
  0x95   : > { %v2766_v27 = vsel %vm2763_vm0, %v2764_v10, %v2765_v11  ;;  %v809_v28 = vmul.u32 18, %v2742_v4  ;;  %v810_v29 = vmul.u32 18, %v2747_v8  ;;  %v811_v31 = vmul.u32 18, %v2752_v9 }
  0x96   : > { %v3277_v40 = vor.u32 %v2682_v16, %v2543_v15  ;;  %v2767_v41 = vcvt.f32.s32 %v2766_v27  ;;  %v812_v42 = vmul.u32 18, %v2757_v12  ;;  %v813_v43 = vmul.u32 18, %v2762_v13 }
  0x97   : > { %v815_v44 = vsub.s32 %v3227_v20, %v809_v28  ;;  %v816_v45 = vsub.s32 %v3229_v21, %v810_v29  ;;  %v817_v52 = vsub.s32 %v3231_v22, %v811_v31  ;;  %v2595_v53 = vadd.s32 4294967295, %v2742_v4 }
  0x98   : > { %v814_v46 = vmul.u32 18, %v2767_v41  ;;  %v818_v54 = vsub.s32 %v3233_v23, %v812_v42  ;;  %v819_v55 = vsub.s32 %v3235_v24, %v813_v43  ;;  %v2596_v47 = vadd.s32 4294967295, %v2747_v8 }
  0x99   : > { %v1002_v48 = vunpack.c.l.bf16 %v3263_v14  ;;  %v3285_v49 = vor.u32 %v2681_v32, %v2553_v33  ;;  %vm821_vm1 = vcmp.lt.s32.totalorder %v815_v44, 0  ;;  %vm822_vm2 = vcmp.lt.s32.totalorder %v816_v45, 0 }
  0x9a   : > { %v1004_v50 = vunpack.c.l.bf16 %v3269_v18  ;;  %v820_v20 = vsub.s32 %v3242_v30, %v814_v46  ;;  %vm823_vm3 = vcmp.lt.s32.totalorder %v817_v52, 0  ;;  %v2597_v21 = vadd.s32 4294967295, %v2752_v9 }
  0x9b   : > { %vm824_vm4 = vcmp.lt.s32.totalorder %v818_v54, 0  ;;  %vm825_vm5 = vcmp.lt.s32.totalorder %v819_v55, 0  ;;  %v2598_v22 = vadd.s32 4294967295, %v2757_v12  ;;  %v2599_v56 = vadd.s32 4294967295, %v2762_v13 }
  0x9c   : > { %v2600_v23 = vadd.s32 4294967295, %v2767_v41  ;;  %v833_v24 = vsel %vm821_vm1, %v2595_v53, %v2742_v4  ;;  %v834_v57 = vsel %vm822_vm2, %v2596_v47, %v2747_v8  ;;  %v839_v58 = vadd.s32 18, %v815_v44 }
  0x9d   : > { %vm826_vm6 = vcmp.lt.s32.totalorder %v820_v20, 0  ;;  %v840_v51 = vadd.s32 18, %v816_v45  ;;  %v841_v59 = vadd.s32 18, %v817_v52  ;;  %v842_v60 = vadd.s32 18, %v818_v54 }
  0x9e   : > { %v835_v61 = vsel %vm823_vm3, %v2597_v21, %v2752_v9  ;;  %v843_v30 = vadd.s32 18, %v819_v55  ;;  %v844_v62 = vadd.s32 18, %v820_v20  ;;  %v845_v63 = vsel %vm821_vm1, %v839_v58, %v815_v44 }
  0x9f   : > { %v836_v1 = vsel %vm824_vm4, %v2598_v22, %v2757_v12  ;;  %v846_v2 = vsel %vm822_vm2, %v840_v51, %v816_v45  ;;  %v847_v4 = vsel %vm823_vm3, %v841_v59, %v817_v52  ;;  %v848_v5 = vsel %vm824_vm4, %v842_v60, %v818_v54  ;;  %v3303_v12 = vld [vmem:[%s4866_s26 + $0x8] sm:$0xff] }
  0xa0   : > { %v837_v6 = vsel %vm825_vm5, %v2599_v56, %v2762_v13  ;;  %v849_v7 = vsel %vm825_vm5, %v843_v30, %v819_v55  ;;  %v850_v8 = vsel %vm826_vm6, %v844_v62, %v820_v20  ;;  %v857_v9 = vadd.s32 1, %v833_v24 }
  0xa1   : > { %v838_v10 = vsel %vm826_vm6, %v2600_v23, %v2767_v41  ;;  %vm851_vm7 = vcmp.ge.s32.totalorder %v845_v63, 18  ;;  %vm852_vm8 = vcmp.ge.s32.totalorder %v846_v2, 18  ;;  %v858_v11 = vadd.s32 1, %v834_v57 }
  0xa2   : > { %vm853_vm9 = vcmp.ge.s32.totalorder %v847_v4, 18  ;;  %vm854_vm10 = vcmp.ge.s32.totalorder %v848_v5, 18  ;;  %vm855_vm11 = vcmp.ge.s32.totalorder %v849_v7, 18  ;;  %vm856_vm12 = vcmp.ge.s32.totalorder %v850_v8, 18 }
  0xa3   : > { %v859_v15 = vadd.s32 1, %v835_v61  ;;  %v860_v16 = vadd.s32 1, %v836_v1  ;;  %v2601_v13 = vadd.s32 4294967278, %v845_v63  ;;  %v2602_v27 = vadd.s32 4294967278, %v846_v2 }
  0xa4   : > { %v861_v28 = vadd.s32 1, %v837_v6  ;;  %v862_v29 = vadd.s32 1, %v838_v10  ;;  %v863_v31 = vsel %vm851_vm7, %v857_v9, %v833_v24  ;;  %v864_v32 = vsel %vm852_vm8, %v858_v11, %v834_v57 }
  0xa5   : > { %v2603_v33 = vadd.s32 4294967278, %v847_v4  ;;  %v2604_v41 = vadd.s32 4294967278, %v848_v5  ;;  %v2605_v42 = vadd.s32 4294967278, %v849_v7  ;;  %v2606_v43 = vadd.s32 4294967278, %v850_v8 }
  0xa6   : > { %v1005_v44 = vunpack.c.l.bf16 %v3271_v19  ;;  %v1006_v45 = vunpack.c.l.bf16 %v3303_v12  ;;  %v875_v52 = vsel %vm851_vm7, %v2601_v13, %v845_v63  ;;  %v876_v53 = vsel %vm852_vm8, %v2602_v27, %v846_v2 }
  0xa7   : > { %v865_v46 = vsel %vm853_vm9, %v859_v15, %v835_v61  ;;  %v866_v54 = vsel %vm854_vm10, %v860_v16, %v836_v1  ;;  %v877_v55 = vsel %vm853_vm9, %v2603_v33, %v847_v4  ;;  %v878_v47 = vsel %vm854_vm10, %v2604_v41, %v848_v5  ;;  %v2551_v16 = vld [vmem:[%s3171_s21 + $0x8] sm:$0xf] }
  0xa8   : > { %v867_v20 = vsel %vm855_vm11, %v861_v28, %v837_v6  ;;  %v868_v21 = vsel %vm856_vm12, %v862_v29, %v838_v10  ;;  %v2607_v22 = vadd.s32 4294967295, %v863_v31  ;;  %v2608_v56 = vadd.s32 4294967295, %v864_v32  ;;  %v2683_v29 = vld [vmem:[%s3171_s21 + $0x14] sm:$0xf0] }
  0xa9   : > { %v879_v23 = vsel %vm855_vm11, %v2605_v42, %v849_v7  ;;  %v880_v24 = vsel %vm856_vm12, %v2606_v43, %v850_v8  ;;  %vm881_vm13 = vcmp.lt.s32.totalorder %v875_v52, 0  ;;  %vm882_vm14 = vcmp.lt.s32.totalorder %v876_v53, 0 }
  0xaa   : > { %vm883_vm15 = vcmp.lt.s32.totalorder %v877_v55, 0  ;;  %vm884_vm0 = vcmp.lt.s32.totalorder %v878_v47, 0  ;;  %v2609_v57 = vadd.s32 4294967295, %v865_v46  ;;  %v2610_v58 = vadd.s32 4294967295, %v866_v54 }
  0xab   : > { %v2611_v51 = vadd.s32 4294967295, %v867_v20  ;;  %v2612_v59 = vadd.s32 4294967295, %v868_v21  ;;  %v899_v60 = vadd.s32 18, %v875_v52  ;;  %v900_v61 = vadd.s32 18, %v876_v53 }
  0xac   : > { %vm885_vm1 = vcmp.lt.s32.totalorder %v879_v23, 0  ;;  %vm886_vm2 = vcmp.lt.s32.totalorder %v880_v24, 0  ;;  %v901_v30 = vadd.s32 18, %v877_v55  ;;  %v902_v62 = vadd.s32 18, %v878_v47 }
  0xad   : > { %v903_v63 = vadd.s32 18, %v879_v23  ;;  %v904_v1 = vadd.s32 18, %v880_v24  ;;  %v905_v2 = vsel %vm881_vm13, %v899_v60, %v875_v52  ;;  %v906_v4 = vsel %vm882_vm14, %v900_v61, %v876_v53 }
  0xae   : > { %v893_v5 = vsel %vm881_vm13, %v2607_v22, %v863_v31  ;;  %v894_v6 = vsel %vm882_vm14, %v2608_v56, %v864_v32  ;;  %v907_v7 = vsel %vm883_vm15, %v901_v30, %v877_v55  ;;  %v908_v8 = vsel %vm884_vm0, %v902_v62, %v878_v47  ;;  %v3372_v62 = vld [vmem:[%s474_s23] sm:$0xff]  ;;  %s2986_s23 = smov 110  }
  0xaf   : > { %v895_v9 = vsel %vm883_vm15, %v2609_v57, %v865_v46  ;;  %v896_v10 = vsel %vm884_vm0, %v2610_v58, %v866_v54  ;;  %v897_v11 = vsel %vm885_vm1, %v2611_v51, %v867_v20  ;;  %v898_v15 = vsel %vm886_vm2, %v2612_v59, %v868_v21 }
  0xb0   : > { %v909_v13 = vsel %vm885_vm1, %v903_v63, %v879_v23  ;;  %v910_v27 = vsel %vm886_vm2, %v904_v1, %v880_v24  ;;  %vm911_vm3 = vcmp.ge.s32.totalorder %v905_v2, 18  ;;  %vm912_vm4 = vcmp.ge.s32.totalorder %v906_v4, 18  ;;  %v3378_v63 = vld [vmem:[%s4867_s24] sm:$0xff] }
  0xb1   : > { %vm913_vm5 = vcmp.ge.s32.totalorder %v907_v7, 18  ;;  %vm914_vm6 = vcmp.ge.s32.totalorder %v908_v8, 18  ;;  %vm915_vm7 = vcmp.ge.s32.totalorder %v909_v13, 18  ;;  %vm916_vm8 = vcmp.ge.s32.totalorder %v910_v27, 18 }
  0xb2   : > { %v917_v31 = vadd.s32 1, %v893_v5  ;;  %v918_v32 = vadd.s32 1, %v894_v6  ;;  %v919_v33 = vadd.s32 1, %v895_v9  ;;  %v920_v41 = vadd.s32 1, %v896_v10 }
  0xb3   : > { %v921_v42 = vadd.s32 1, %v897_v11  ;;  %v922_v43 = vadd.s32 1, %v898_v15  ;;  %v2613_v52 = vadd.s32 4294967278, %v905_v2  ;;  %v2614_v53 = vadd.s32 4294967278, %v906_v4 }
  0xb4   : > { %v3340_v54 = vor.u32 %v2683_v29, %v2551_v16  ;;  %v923_v55 = vsel %vm911_vm3, %v917_v31, %v893_v5  ;;  %v924_v47 = vsel %vm912_vm4, %v918_v32, %v894_v6  ;;  %v925_v20 = vsel %vm913_vm5, %v919_v33, %v895_v9 }
  0xb5   : > { %v926_v21 = vsel %vm914_vm6, %v920_v41, %v896_v10  ;;  %v2615_v22 = vadd.s32 4294967278, %v907_v7  ;;  %v2616_v56 = vadd.s32 4294967278, %v908_v8  ;;  %v927_v23 = vsel %vm915_vm7, %v921_v42, %v897_v11 }
  0xb6   : > { %v2617_v24 = vadd.s32 4294967278, %v909_v13  ;;  %v2618_v57 = vadd.s32 4294967278, %v910_v27  ;;  %v935_v58 = vsel %vm911_vm3, %v2613_v52, %v905_v2  ;;  %v936_v51 = vsel %vm912_vm4, %v2614_v53, %v906_v4 }
  0xb7   : > { %v3355_v59 = vsel %vm913_vm5, %v2615_v22, %v907_v7  ;;  %v3358_v60 = vsel %vm914_vm6, %v2616_v56, %v908_v8  ;;  %vm941_vm15 = vcmp.ge.s32.totalorder %v923_v55, 1  ;;  %vm942_vm0 = vcmp.ge.s32.totalorder %v924_v47, 1 }
  0xb8   : > { %v3363_v61 = vsel %vm915_vm7, %v2617_v24, %v909_v13  ;;  %v3366_v30 = vsel %vm916_vm8, %v2618_v57, %v910_v27  ;;  %vm943_vm3 = vcmp.ge.s32.totalorder %v925_v20, 1  ;;  %vm947_vm5 = vcmp.lt.s32.totalorder %v923_v55, 17  ;;  %v1068_v27 = vpop.permute.xlu2 %1067 }
  0xb9   : > { %vm948_vm6 = vcmp.lt.s32.totalorder %v924_v47, 17  ;;  %vm949_vm11 = vcmp.lt.s32.totalorder %v925_v20, 17  ;;  %vm950_vm12 = vcmp.lt.s32.totalorder %v926_v21, 17  ;;  %vm951_vm9 = vcmp.lt.s32.totalorder %v927_v23, 17  ;;  %vm3383_vm4 = vmand %vm941_vm15, %vm947_vm5 }
  0xba   : > { %vm3391_vm14 = vmand %vm942_vm0, %vm948_vm6  ;;  %vm965_vm7 = vcmp.lt.s32.totalorder %v935_v58, 17  ;;  %vm966_vm10 = vcmp.lt.s32.totalorder %v936_v51, 17  ;;  %vm967_vm0 = vcmp.lt.s32.totalorder %v3355_v59, 17  ;;  %vm4874_vm1 = vcmp.ge.s32.totalorder %v926_v21, 1 }
  0xbb   : > { %vm3401_vm13 = vmand %vm943_vm3, %vm949_vm11  ;;  %v989_v8 = vunpack.c.l.bf16 %v3372_v62  ;;  %v990_v9 = vunpack.c.l.bf16 %v3277_v40  ;;  %v991_v10 = vunpack.c.l.bf16 %v3267_v17  ;;  %v992_v11 = vunpack.c.l.bf16 %v3340_v54 }
  0xbc   : > { %vm4877_vm11 = vcmp.ge.s32.totalorder %v927_v23, 1  ;;  %v993_v16 = vunpack.c.l.bf16 %v3285_v49  ;;  %v994_v13 = vunpack.c.l.bf16 %v3378_v63  ;;  %v4882_v29 = vmov 0 }
  0xbd   : > { %vm3419_vm3 = vmand %vm4877_vm11, %vm951_vm9  ;;  %vm4884_vm9 = vcmp.ge.s32.totalorder %v935_v58, 1  ;;  %vm4888_vm5 = vcmp.ge.s32.totalorder %v3202_v34, 0  ;;  %v1009_v47 = vunpack.c.h.bf16 %v3258_v3  ;;  %v1010_v20 = vunpack.c.h.bf16 %v3269_v18 }
  0xbe   : > { %vm3435_vm11 = vmand %vm4884_vm9, %vm965_vm7  ;;  %vm4894_vm7 = vcmp.lt.s32.totalorder %v3204_v35, 648  ;;  %vm4895_vm9 = vcmp.ge.s32.totalorder %v3204_v35, 0  ;;  %v4903_v35 = vmov 0  ;;  %v4937_v1 = vmov 0 }
  0xbf   : > { %v4942_v5 = vmov 0  ;;  %v4947_v6 = vmov 0  ;;  %v4952_v24 = vmov 0 }
  0xce   : > { %v3332_v28 = vpop.permute.xlu1 %1029  ;;  %v1020_v4 = vpop.permute.xlu0 %1019 }
  0xcf   : > { %v3338_v46 = vsub.f32 %v1001_v25, %v3332_v28  ;;  %v928_v25 = vsel %vm916_vm8, %v922_v43, %v898_v15  ;;  %vm3409_vm8 = vmand %vm4874_vm1, %vm950_vm12  ;;  %v4878_v15 = vmov 0  ;;  %v1037_v32 = vsub.f32 %v989_v8, %v1020_v4 }
  0xd0   : > { %v4879_v15 = vsel %vm3419_vm3, 4294967295, %v4878_v15  ;;  %vm4880_vm1 = vcmp.lt.s32.totalorder %v928_v25, 17  ;;  %vm4881_vm15 = vcmp.ge.s32.totalorder %v928_v25, 1  ;;  %v1038_v33 = vsub.f32 %v990_v9, %v1020_v4 }
  0xd1   : > { %vm3429_vm2 = vmand %vm4881_vm15, %vm4880_vm1  ;;  %v1039_v41 = vsub.f32 %v991_v10, %v1020_v4  ;;  %v1040_v42 = vsub.f32 %v992_v11, %v1020_v4  ;;  %vm4887_vm12 = vcmp.lt.s32.totalorder %v3202_v34, 648  ;;  %v4889_v43 = vmov 0 }
  0xd2   : > { %v4883_v29 = vsel %vm3429_vm2, 4294967295, %v4882_v29  ;;  %vm3443_vm6 = vmand %vm4888_vm5, %vm4887_vm12  ;;  %vm4891_vm15 = vcmp.ge.s32.totalorder %v936_v51, 1  ;;  %v1041_v53 = vsub.f32 %v993_v16, %v1020_v4  ;;  %v1042_v55 = vsub.f32 %v994_v13, %v1020_v4 }
  0xd3   : > { %v4890_v43 = vsel %vm3443_vm6, 4294967295, %v4889_v43  ;;  %vm3449_vm1 = vmand %vm4891_vm15, %vm966_vm10  ;;  %v4896_v34 = vmov 0  ;;  %vm4898_vm10 = vcmp.ge.s32.totalorder %v3355_v59, 1  ;;  %v3471_v22 = vmul.f32 %v1068_v27, %v1037_v32 }
  0xd4   : > { %vm3459_vm5 = vmand %vm4895_vm9, %vm4894_vm7  ;;  %v3473_v56 = vmul.f32 %v1068_v27, %v1038_v33  ;;  %v3475_v23 = vmul.f32 %v1068_v27, %v1039_v41  ;;  %v3477_v25 = vmul.f32 %v1068_v27, %v1040_v42  ;;  %vm4901_vm15 = vcmp.lt.s32.totalorder %v3206_v36, 648 }
  0xd5   : > { %v4897_v34 = vsel %vm3459_vm5, 4294967295, %v4896_v34  ;;  %vm3467_vm12 = vmand %vm4898_vm10, %vm967_vm0  ;;  %vm4902_vm7 = vcmp.ge.s32.totalorder %v3206_v36, 0  ;;  %vm4905_vm0 = vcmp.lt.s32.totalorder %v3358_v60, 17  ;;  %vm4906_vm10 = vcmp.ge.s32.totalorder %v3358_v60, 1 }
  0xd6   : > { %v3387_v2 = vpop.permute.xlu1 %1034  ;;  %vm3483_vm9 = vmand %vm4902_vm7, %vm4901_vm15  ;;  %v3495_v57 = vmul.f32 %v1068_v27, %v1041_v53  ;;  %v3497_v58 = vmul.f32 %v1068_v27, %v1042_v55  ;;  %v1011_v51 = vunpack.c.h.bf16 %v3271_v19  ;;  %v1012_v36 = vunpack.c.h.bf16 %v3303_v12  ;;  %v1025_v33 = vpop.permute.xlu0 %1024 }
  0xd7   : > { %v4904_v35 = vsel %vm3483_vm9, 4294967295, %v4903_v35  ;;  %vm3491_vm5 = vmand %vm4906_vm10, %vm4905_vm0  ;;  %v3504_v59 = vsub.f32 %v1002_v48, %v3332_v28  ;;  %v3509_v60 = vsub.f32 %v1003_v26, %v3332_v28  ;;  %vm4909_vm15 = vcmp.lt.s32.totalorder %v3208_v37, 648 }
  0xd8   : > { %vm4910_vm7 = vcmp.ge.s32.totalorder %v3208_v37, 0  ;;  %v4911_v4 = vmov 0  ;;  %vm4913_vm10 = vcmp.lt.s32.totalorder %v3363_v61, 17  ;;  %vm4914_vm9 = vcmp.ge.s32.totalorder %v3363_v61, 1 }
  0xd9   : > { %vm3515_vm0 = vmand %vm4910_vm7, %vm4909_vm15  ;;  %v1109_v3 = vmax.f32 %v3471_v22, 0.0  ;;  %v1110_v26 = vmax.f32 %v3473_v56, 0.0  ;;  %vm4917_vm2 = vcmp.lt.s32.totalorder %v3210_v38, 648  ;;  %vm4918_vm3 = vcmp.ge.s32.totalorder %v3210_v38, 0 }
  0xda   : > { %v4912_v4 = vsel %vm3515_vm0, 4294967295, %v4911_v4  ;;  %vm3523_vm6 = vmand %vm4914_vm9, %vm4913_vm10  ;;  %v4919_v37 = vmov 0  ;;  %vm4921_vm7 = vcmp.lt.s32.totalorder %v3366_v30, 17  ;;  %vm4922_vm0 = vcmp.ge.s32.totalorder %v3366_v30, 1 }
  0xdb   : > { %vm3533_vm15 = vmand %vm4918_vm3, %vm4917_vm2  ;;  %v4923_v61 = vmov 0  ;;  %v1111_v8 = vmax.f32 %v3475_v23, 0.0  ;;  %v1112_v9 = vmax.f32 %v3477_v25, 0.0  ;;  %v1113_v10 = vmax.f32 %v3495_v57, 0.0 }
  0xdc   : > { %v4920_v37 = vsel %vm3533_vm15, 4294967295, %v4919_v37  ;;  %vm3541_vm9 = vmand %vm4922_vm0, %vm4921_vm7  ;;  %v1114_v38 = vmax.f32 %v3497_v58, 0.0  ;;  %vm4925_vm2 = vcmp.lt.s32.totalorder %v3212_v39, 648  ;;  %vm4926_vm3 = vcmp.ge.s32.totalorder %v3212_v39, 0 }
  0xdd   : > { %v4924_v61 = vsel %vm3541_vm9, 4294967295, %v4923_v61  ;;  %vm3555_vm10 = vmand %vm4926_vm3, %vm4925_vm2  ;;  %v4927_v30 = vmov 0  ;;  %v1057_v16 = vsub.f32 %v1009_v47, %v3387_v2  ;;  %v1058_v13 = vsub.f32 %v1010_v20, %v3387_v2 }
  0xde   : > { %v3549_v11 = vpop.permute.xlu1 %1082  ;;  %v4928_v30 = vsel %vm3555_vm10, 4294967295, %v4927_v30  ;;  %v1059_v27 = vsub.f32 %v1011_v51, %v3387_v2  ;;  %v1060_v32 = vsub.f32 %v1012_v36, %v3387_v2  ;;  %v995_v39 = vunpack.c.h.bf16 %v3372_v62  ;;  %vm4931_vm7 = vmand %vm3383_vm4, %vm3435_vm11 }
  0xdf   : > { %v996_v41 = vunpack.c.h.bf16 %v3277_v40  ;;  %v997_v42 = vunpack.c.h.bf16 %v3267_v17  ;;  %v998_v53 = vunpack.c.h.bf16 %v3340_v54  ;;  %v999_v55 = vunpack.c.h.bf16 %v3285_v49  ;;  %v1073_v49 = vpop.permute.xlu2 %1072  ;;  %vm4935_vm0 = vmand %vm3391_vm14, %vm3449_vm1 }
  0xe0   : > { %v1000_v47 = vunpack.c.h.bf16 %v3378_v63  ;;  %v3582_v20 = vmul.f32 %v3549_v11, %v1057_v16  ;;  %v3585_v62 = vmul.f32 %v3549_v11, %v1058_v13  ;;  %v1043_v17 = vsub.f32 %v995_v39, %v1025_v33  ;;  %vm4940_vm11 = vmand %vm3401_vm13, %vm3467_vm12 }
  0xe1   : > { %v1044_v40 = vsub.f32 %v996_v41, %v1025_v33  ;;  %v1045_v54 = vsub.f32 %v997_v42, %v1025_v33  ;;  %v1046_v22 = vsub.f32 %v998_v53, %v1025_v33  ;;  %vm4929_vm2 = vnez %v4879_v15  ;;  %vm4945_vm1 = vmand %vm3409_vm8, %vm3491_vm5 }
  0xe2   : > { %v1047_v63 = vsub.f32 %v999_v55, %v1025_v33  ;;  %v1048_v56 = vsub.f32 %v1000_v47, %v1025_v33  ;;  %v3596_v23 = vmul.f32 %v3549_v11, %v1059_v27  ;;  %v3599_v25 = vmul.f32 %v3549_v11, %v1060_v32  ;;  %vm4950_vm8 = vmand %vm4929_vm2, %vm3523_vm6 }
  0xe3   : > { %vm4930_vm3 = vnez %v4883_v29  ;;  %v1091_v57 = vmul.f32 %v1073_v49, %v1043_v17  ;;  %v1092_v51 = vmul.f32 %v1073_v49, %v1044_v40  ;;  %v1093_v36 = vmul.f32 %v1073_v49, %v1045_v54 }
  0xe4   : > { %v1094_v16 = vmul.f32 %v1073_v49, %v1046_v22  ;;  %vm4932_vm10 = vnez %v4890_v43  ;;  %v1095_v27 = vmul.f32 %v1073_v49, %v1047_v63  ;;  %v1096_v32 = vmul.f32 %v1073_v49, %v1048_v56  ;;  %v1078_v63 = vpop.permute.xlu0 %1077 }
  0xe5   : > { %vm3612_vm15 = vmand %vm4932_vm10, %vm4931_vm7  ;;  %v1129_v33 = vmax.f32 %v3582_v20, 0.0  ;;  %v1130_v39 = vmax.f32 %v3585_v62, 0.0  ;;  %vm4936_vm9 = vnez %v4897_v34  ;;  %v1115_v43 = vmax.f32 %v1091_v57, 0.0 }
  0xe6   : > { %vm3625_vm4 = vmand %vm4936_vm9, %vm4935_vm0  ;;  %v1145_v31 = vsel %vm3612_vm15, %v1109_v3, 0.0  ;;  %v1116_v41 = vmax.f32 %v1092_v51, 0.0  ;;  %v1117_v42 = vmax.f32 %v1093_v36, 0.0  ;;  %vm4941_vm10 = vnez %v4904_v35 }
  0xe7   : > { %v4938_v1 = vsel %vm3625_vm4, 4294967295, %v4937_v1  ;;  %vm3638_vm14 = vmand %vm4941_vm10, %vm4940_vm11  ;;  %v1146_v52 = vsel %vm3625_vm4, %v1110_v26, 0.0  ;;  %v1118_v34 = vmax.f32 %v1094_v16, 0.0  ;;  %v1119_v53 = vmax.f32 %v1095_v27, 0.0 }
  0xe8   : > { %4939 = vst [vmem:[#allocation14_spill] sm:$0xff] %v4938_v1  ;;  %v4943_v5 = vsel %vm3638_vm14, 4294967295, %v4942_v5  ;;  %v1120_v3 = vmax.f32 %v1096_v32, 0.0  ;;  %vm4946_vm9 = vnez %v4912_v4  ;;  %v1147_v21 = vsel %vm3638_vm14, %v1111_v8, 0.0 }
  0xe9   : > { %4944 = vst [vmem:[#allocation15_spill] sm:$0xff] %v4943_v5  ;;  %vm3651_vm13 = vmand %vm4946_vm9, %vm4945_vm1  ;;  %v3657_v35 = vpack.c.bf16 %v1146_v52, %v1145_v31  ;;  %v1151_v26 = vsel %vm3612_vm15, %v1115_v43, 0.0  ;;  %v1152_v7 = vsel %vm3625_vm4, %v1116_v41, 0.0  ;;  %vm4951_vm5 = vnez %v4920_v37 }
  0xea   : > { %v4948_v6 = vsel %vm3651_vm13, 4294967295, %v4947_v6  ;;  %vm3670_vm12 = vmand %vm4951_vm5, %vm4950_vm8  ;;  %v1148_v4 = vsel %vm3651_vm13, %v1112_v9, 0.0  ;;  %v1153_v8 = vsel %vm3638_vm14, %v1117_v42, 0.0  ;;  %v1154_v55 = vsel %vm3651_vm13, %v1118_v34, 0.0 }
  0xeb   : > { %4949 = vst [vmem:[#allocation16_spill] sm:$0xff] %v4948_v6  ;;  %v4953_v24 = vsel %vm3670_vm12, 4294967295, %v4952_v24  ;;  %v1172_v47 = vpack.c.bf16 %v1152_v7, %v1151_v26  ;;  %vm4955_vm6 = vnez %v4924_v61  ;;  %vm4957_vm7 = vnez %v4928_v30 }
  0xec   : > { %4954 = vst [vmem:[#allocation17_spill] sm:$0xff] %v4953_v24  ;;  %vm4956_vm0 = vmand %vm4930_vm3, %vm4955_vm6  ;;  %v1149_v48 = vsel %vm3670_vm12, %v1113_v10, 0.0  ;;  %v3693_v37 = vpack.c.bf16 %v1148_v4, %v1147_v21  ;;  %v1194_v9 = vunpack.c.h.b16 %v3657_v35  ;;  %v1155_v20 = vsel %vm3670_vm12, %v1119_v53, 0.0 }
  0xed   : > { %vm3687_vm2 = vmand %vm4957_vm7, %vm4956_vm0  ;;  %v3704_v30 = vpack.c.bf16 %v1154_v55, %v1153_v8  ;;  %v1199_v62 = vunpack.c.h.b16 %v1172_v47  ;;  %v1007_v10 = vunpack.c.h.bf16 %v3254_v0  ;;  %v1008_v40 = vunpack.c.h.bf16 %v3263_v14 }
  0xee   : > { %v1150_v29 = vsel %vm3687_vm2, %v1114_v38, 0.0  ;;  %v1156_v61 = vsel %vm3687_vm2, %v1120_v3, 0.0  ;;  %v1195_v22 = vunpack.c.l.b16 %v3693_v37  ;;  %v1131_v38 = vmax.f32 %v3596_v23, 0.0 }
  0xef   : > { %v3706_v17 = vpack.c.bf16 %v1150_v29, %v1149_v48  ;;  %v3710_v54 = vpack.c.bf16 %v1156_v61, %v1155_v20  ;;  %v1200_v58 = vunpack.c.l.b16 %v3704_v30  ;;  %v3714_v49 = vpack.c.b16 %v1199_v62, %v1194_v9 }
  0xf0   : > { %v1052_v56 = vsub.f32 %v1004_v50, %v3332_v28  ;;  %v1053_v0 = vsub.f32 %v1005_v44, %v3332_v28  ;;  %v1132_v57 = vmax.f32 %v3599_v25, 0.0  ;;  %v1054_v51 = vsub.f32 %v1006_v45, %v3332_v28 }
  0xf1   : > { %v1202_v14 = vunpack.c.l.b16 %v3710_v54  ;;  %v3728_v36 = vpack.c.b16 %v1200_v58, %v1195_v22  ;;  %v1165_v23 = vsel %vm3638_vm14, %v1129_v33, 0.0  ;;  %v1166_v18 = vsel %vm3651_vm13, %v1130_v39, 0.0  ;;  %1225 = vrot.lane.b32.xlu0 %v3714_v49, %s2984_s28 }
  0xf2   : > { %v1197_v19 = vunpack.c.l.b16 %v3706_v17  ;;  %v1055_v50 = vsub.f32 %v1007_v10, %v3387_v2  ;;  %v1056_v44 = vsub.f32 %v1008_v40, %v3387_v2  ;;  %v1099_v12 = vmul.f32 %v1078_v63, %v3509_v60 }
  0xf3   : > { %v1167_v45 = vsel %vm3670_vm12, %v1131_v38, 0.0  ;;  %v1100_v28 = vmul.f32 %v1078_v63, %v1052_v56  ;;  %v1101_v25 = vmul.f32 %v1078_v63, %v1053_v0  ;;  %v1102_v16 = vmul.f32 %v1078_v63, %v1054_v51  ;;  %1227 = vrot.lane.b32.xlu1 %v3728_v36, %s2984_s28 }
  0xf4   : > { %v3744_v27 = vpack.c.b16 %v1202_v14, %v1197_v19  ;;  %v1168_v32 = vsel %vm3687_vm2, %v1132_v57, 0.0  ;;  %v1179_v33 = vpack.c.bf16 %v1166_v18, %v1165_v23  ;;  %v1123_v39 = vmax.f32 %v1099_v12, 0.0 }
  0xf5   : > { %v1124_v31 = vmax.f32 %v1100_v28, 0.0  ;;  %v1125_v2 = vmax.f32 %v1101_v25, 0.0  ;;  %v1126_v43 = vmax.f32 %v1102_v16, 0.0  ;;  %v1193_v60 = vunpack.c.l.b16 %v3657_v35 }
  0xf6   : > { %4960 = vst [vmem:[#allocation18_spill] sm:$0xff] %v3744_v27  ;;  %v1159_v41 = vsel %vm3638_vm14, %v1123_v39, 0.0  ;;  %v1198_v42 = vunpack.c.l.b16 %v1172_v47  ;;  %v1097_v52 = vmul.f32 %v1078_v63, %v3338_v46  ;;  %v1098_v34 = vmul.f32 %v1078_v63, %v3504_v59 }
  0xf7   : > { %v1160_v53 = vsel %vm3651_vm13, %v1124_v31, 0.0  ;;  %v1161_v3 = vsel %vm3670_vm12, %v1125_v2, 0.0  ;;  %v1162_v21 = vsel %vm3687_vm2, %v1126_v43, 0.0  ;;  %v1103_v26 = vmul.f32 %v3549_v11, %v1055_v50 }
  0xf8   : > { %v1180_v35 = vpack.c.bf16 %v1168_v32, %v1167_v45  ;;  %v1176_v7 = vpack.c.bf16 %v1160_v53, %v1159_v41  ;;  %v3760_v4 = vpack.c.b16 %v1198_v42, %v1193_v60  ;;  %v1104_v8 = vmul.f32 %v3549_v11, %v1056_v44 }
  0xf9   : > { %v1177_v46 = vpack.c.bf16 %v1162_v21, %v1161_v3  ;;  %v1121_v55 = vmax.f32 %v1097_v52, 0.0  ;;  %v1122_v59 = vmax.f32 %v1098_v34, 0.0  ;;  %v1127_v47 = vmax.f32 %v1103_v26, 0.0  ;;  %1231 = vrot.lane.b32.xlu0 %v3744_v27, %s2984_s28 }
  0xfa   : > { %4961 = vst [vmem:[#allocation19_spill] sm:$0xff] %v3760_v4  ;;  %v1210_v48 = vunpack.c.l.b16 %v1179_v33  ;;  %v1205_v9 = vunpack.c.l.b16 %v1176_v7  ;;  %1223 = vrot.lane.b32.xlu2 %v3760_v4, %s2984_s28  ;;  %v1128_v15 = vmax.f32 %v1104_v8, 0.0  ;;  %v1333_v20 = vunpack.c.h.b16 %v3706_v17 }
  0xfb   : > { %v1157_v29 = vsel %vm3612_vm15, %v1121_v55, 0.0  ;;  %v1158_v11 = vsel %vm3625_vm4, %v1122_v59, 0.0  ;;  %v1163_v61 = vsel %vm3612_vm15, %v1127_v47, 0.0  ;;  %v1334_v62 = vunpack.c.h.b16 %v3710_v54 }
  0xfc   : > { %v1201_v10 = vunpack.c.h.b16 %v3704_v30  ;;  %v1164_v40 = vsel %vm3625_vm4, %v1128_v15, 0.0  ;;  %v1175_v22 = vpack.c.bf16 %v1158_v11, %v1157_v29  ;;  %v1335_v17 = vunpack.c.h.b16 %v1177_v46 }
  0xfd   : > { %v1178_v58 = vpack.c.bf16 %v1164_v40, %v1163_v61  ;;  %v3778_v38 = vpack.c.b16 %v1334_v62, %v1333_v20  ;;  %v1196_v63 = vunpack.c.h.b16 %v3693_v37  ;;  %v1336_v56 = vunpack.c.h.b16 %v1180_v35 }
  0xfe   : > { %v3781_v0 = vpack.c.b16 %v1210_v48, %v1205_v9  ;;  %v1203_v14 = vunpack.c.l.b16 %v1175_v22  ;;  %v1204_v37 = vunpack.c.h.b16 %v1175_v22  ;;  %v1211_v23 = vunpack.c.h.b16 %v1179_v33 }
  0xff   : > { %4962 = vst [vmem:[#allocation20_spill] sm:$0xff] %v3778_v38  ;;  %v1208_v13 = vunpack.c.l.b16 %v1178_v58  ;;  %v3783_v57 = vpack.c.b16 %v1201_v10, %v1196_v63  ;;  %v3785_v54 = vpack.c.b16 %v1336_v56, %v1335_v17  ;;  %v1209_v51 = vunpack.c.h.b16 %v1178_v58 }
 0x100   : > { %v1206_v18 = vunpack.c.h.b16 %v1176_v7  ;;  %v1212_v44 = vunpack.c.l.b16 %v1180_v35  ;;  %v1207_v12 = vunpack.c.l.b16 %v1177_v46  ;;  %vm1301_vm15 = vcmask 900096  }
 0x101   : > { %4963 = vst [vmem:[#allocation21_spill] sm:$0xff] %v3783_v57  ;;  %v3787_v30 = vpack.c.b16 %v1208_v13, %v1203_v14  ;;  %1237 = vrot.lane.b32.xlu0 %v3781_v0, %s2984_s28  ;;  %v3795_v19 = vpack.c.b16 %v1209_v51, %v1204_v37  ;;  %vm1326_vm3 = vcmask 891904   ;;  %vm1359_vm11 = vcmask 883712  }
 0x102   : > { %4964 = vst [vmem:[#allocation22_spill] sm:$0xff] %v3785_v54  ;;  %1229 = vrot.lane.b32.xlu2 %v3783_v57, %s2984_s28  ;;  %v3797_v50 = vpack.c.b16 %v1211_v23, %v1206_v18  ;;  %v3804_v45 = vpack.c.b16 %v1212_v44, %v1207_v12  ;;  %vm1388_vm10 = vcmask 752640   ;;  %vm1417_vm1 = vcmask 744448  }
 0x103   : > { %4965 = vst [vmem:[#allocation23_spill] sm:$0xff] %v3787_v30  ;;  %1233 = vrot.lane.b32.xlu1 %v3787_v30, %s2984_s28  ;;  %vm1272_vm9 = vcmask 1031168   ;;  %vm1446_vm8 = vcmask 736256   ;;  %vm1243_vm5 = vcmask 1039360   ;;  %vm1697_vm6 = vcmask 154624  }
 0x104   : > { %vm1842_vm0 = vcmask 261120  }
 0x109   : > { %1252 = vrot.lane.b32.xlu0 %v3760_v4, %s2985_s22 }
 0x10a   : > { %1235 = vrot.lane.b32.xlu2 %v3795_v19, %s2984_s28 }
 0x10b   : > { %1239 = vrot.lane.b32.xlu1 %v3797_v50, %s2984_s28 }
 0x111   : > { %1258 = vrot.lane.b32.xlu0 %v3783_v57, %s2985_s22 }
 0x112   : > { %1241 = vrot.lane.b32.xlu2 %v3804_v45, %s2984_s28 }
 0x113   : > { %1254 = vrot.lane.b32.xlu1 %v3714_v49, %s2985_s22 }
 0x119   : > { %1264 = vrot.lane.b32.xlu0 %v3795_v19, %s2985_s22 }
 0x11a   : > { %1256 = vrot.lane.b32.xlu2 %v3728_v36, %s2985_s22 }
 0x11b   : > { %1260 = vrot.lane.b32.xlu1 %v3744_v27, %s2985_s22 }
 0x121   : > { %1270 = vrot.lane.b32.xlu0 %v3804_v45, %s2985_s22 }
 0x122   : > { %1262 = vrot.lane.b32.xlu2 %v3787_v30, %s2985_s22 }
 0x123   : > { %1266 = vrot.lane.b32.xlu1 %v3781_v0, %s2985_s22 }
 0x129   : > { %1285 = vrot.lane.b32.xlu0 %v3728_v36, %s2986_s23 }
 0x12a   : > { %1268 = vrot.lane.b32.xlu2 %v3797_v50, %s2985_s22 }
 0x12b   : > { %1281 = vrot.lane.b32.xlu1 %v3760_v4, %s2986_s23 }
 0x131   : > { %1291 = vrot.lane.b32.xlu0 %v3787_v30, %s2986_s23 }
 0x132   : > { %1283 = vrot.lane.b32.xlu2 %v3714_v49, %s2986_s23 }
 0x133   : > { %1287 = vrot.lane.b32.xlu1 %v3783_v57, %s2986_s23 }
 0x139   : > { %1297 = vrot.lane.b32.xlu0 %v3797_v50, %s2986_s23 }
 0x13a   : > { %1289 = vrot.lane.b32.xlu2 %v3744_v27, %s2986_s23 }
 0x13b   : > { %1293 = vrot.lane.b32.xlu1 %v3795_v19, %s2986_s23 }
 0x141   : > { %1312 = vrot.lane.b32.xlu0 %v3728_v36, %s2987_s30 }
 0x142   : > { %1295 = vrot.lane.b32.xlu2 %v3781_v0, %s2986_s23 }
 0x143   : > { %1299 = vrot.lane.b32.xlu1 %v3804_v45, %s2986_s23 }
 0x149   : > { %1318 = vrot.lane.b32.xlu0 %v3795_v19, %s2987_s30 }
 0x14a   : > { %1310 = vrot.lane.b32.xlu2 %v3714_v49, %s2987_s30 }
 0x14b   : > { %1314 = vrot.lane.b32.xlu1 %v3783_v57, %s2987_s30 }
 0x151   : > { %1324 = vrot.lane.b32.xlu0 %v3804_v45, %s2987_s30 }
 0x152   : > { %1316 = vrot.lane.b32.xlu2 %v3744_v27, %s2987_s30 }
 0x153   : > { %1320 = vrot.lane.b32.xlu1 %v3781_v0, %s2987_s30 }
 0x154   : > { %v3834_v28 = vpop.permute.xlu2 %1223 }
 0x159   : > { %1343 = vrot.lane.b32.xlu0 %v3783_v57, %s2988_s11 }
 0x15a   : > { %1322 = vrot.lane.b32.xlu2 %v3797_v50, %s2987_s30 }
 0x15b   : > { %1339 = vrot.lane.b32.xlu1 %v3714_v49, %s2988_s11 }
 0x15c   : > { %v3839_v25 = vpop.permute.xlu2 %1229 }
 0x161   : > { %1349 = vrot.lane.b32.xlu0 %v3795_v19, %s2988_s11 }
 0x162   : > { %1341 = vrot.lane.b32.xlu2 %v3728_v36, %s2988_s11 }
 0x163   : > { %1345 = vrot.lane.b32.xlu1 %v3744_v27, %s2988_s11  ;;  %v3844_v16 = vpop.permute.xlu0 %1225 }
 0x164   : > { %v3846_v32 = vpop.permute.xlu2 %1235 }
 0x165   : > { %v3851_v33 = vpop.permute.xlu1 %1227 }
 0x169   : > { %1355 = vrot.lane.b32.xlu0 %v3804_v45, %s2988_s11 }
 0x16a   : > { %1347 = vrot.lane.b32.xlu2 %v3778_v38, %s2988_s11 }
 0x16b   : > { %1351 = vrot.lane.b32.xlu1 %v3781_v0, %s2988_s11  ;;  %v3853_v39 = vpop.permute.xlu0 %1231 }
 0x16c   : > { %4966 = vst [vmem:[#allocation24_spill] sm:$0xff] %v3853_v39  ;;  %v3855_v31 = vpop.permute.xlu2 %1241 }
 0x16d   : > { %4967 = vst [vmem:[#allocation25_spill] sm:$0xff] %v3855_v31 }
 0x171   : > { %1370 = vrot.lane.b32.xlu0 %v3728_v36, %s2989_s13 }
 0x172   : > { %1353 = vrot.lane.b32.xlu2 %v3797_v50, %s2988_s11 }
 0x173   : > { %1357 = vrot.lane.b32.xlu1 %v3785_v54, %s2988_s11  ;;  %v3860_v2 = vpop.permute.xlu0 %1237 }
 0x174   : > { %v3862_v43 = vpop.permute.xlu2 %1256 }
 0x175   : > { %v3864_v60 = vpop.permute.xlu1 %1233 }
 0x179   : > { %1376 = vrot.lane.b32.xlu0 %v3778_v38, %s2989_s13 }
 0x17a   : > { %1368 = vrot.lane.b32.xlu2 %v3714_v49, %s2989_s13 }
 0x17b   : > { %1372 = vrot.lane.b32.xlu1 %v3783_v57, %s2989_s13  ;;  %v3869_v41 = vpop.permute.xlu0 %1252 }
 0x17c   : > { %v3871_v42 = vpop.permute.xlu2 %1262 }
 0x17d   : > { %v3873_v52 = vpop.permute.xlu1 %1239 }
 0x181   : > { %1382 = vrot.lane.b32.xlu0 %v3797_v50, %s2989_s13 }
 0x182   : > { %1374 = vrot.lane.b32.xlu2 %v3744_v27, %s2989_s13 }
 0x183   : > { %1378 = vrot.lane.b32.xlu1 %v3795_v19, %s2989_s13  ;;  %v3878_v34 = vpop.permute.xlu0 %1258 }
 0x184   : > { %v3880_v53 = vpop.permute.xlu2 %1268 }
 0x185   : > { %v3882_v3 = vpop.permute.xlu1 %1254 }
 0x189   : > { %1397 = vrot.lane.b32.xlu0 %v3714_v49, %s2990_s8 }
 0x18a   : > { %1380 = vrot.lane.b32.xlu2 %v3781_v0, %s2989_s13 }
 0x18b   : > { %1384 = vrot.lane.b32.xlu1 %v3804_v45, %s2989_s13  ;;  %v3888_v21 = vpop.permute.xlu0 %1264 }
 0x18c   : > { %v3890_v26 = vpop.permute.xlu2 %1283 }
 0x18d   : > { %v3892_v35 = vpop.permute.xlu1 %1260 }
 0x18e   : > { %4968 = vst [vmem:[#allocation26_spill] sm:$0xff] %v3892_v35 }
 0x191   : > { %1403 = vrot.lane.b32.xlu0 %v3744_v27, %s2990_s8 }
 0x192   : > { %1386 = vrot.lane.b32.xlu2 %v3785_v54, %s2989_s13 }
 0x193   : > { %1399 = vrot.lane.b32.xlu1 %v3728_v36, %s2990_s8  ;;  %v3899_v7 = vpop.permute.xlu0 %1270 }
 0x194   : > { %4969 = vst [vmem:[#allocation27_spill] sm:$0xff] %v3899_v7  ;;  %v3901_v8 = vpop.permute.xlu2 %1289 }
 0x195   : > { %4970 = vst [vmem:[#allocation28_spill] sm:$0xff] %v3901_v8  ;;  %v3903_v46 = vpop.permute.xlu1 %1266 }
 0x199   : > { %1436 = vrot.lane.b32.xlu0 %v3795_v19, %s2991_s27 }
 0x19a   : > { %1401 = vrot.lane.b32.xlu2 %v3783_v57, %s2990_s8 }
 0x19b   : > { %1407 = vrot.lane.b32.xlu1 %v3795_v19, %s2990_s8  ;;  %v3911_v55 = vpop.permute.xlu0 %1285 }
 0x19c   : > { %v3913_v59 = vpop.permute.xlu2 %1295  ;;  %v1303_v40 = vsel %vm1301_vm15, %v3890_v26, %v3911_v55 }
 0x19d   : > { %v3915_v47 = vpop.permute.xlu1 %1281 }
 0x1a1   : > { %1428 = vrot.lane.b32.xlu0 %v3728_v36, %s2991_s27 }
 0x1a2   : > { %1409 = vrot.lane.b32.xlu2 %v3781_v0, %s2990_s8 }
 0x1a3   : > { %1438 = vrot.lane.b32.xlu1 %v3781_v0, %s2991_s27  ;;  %v3923_v48 = vpop.permute.xlu0 %1291 }
 0x1a4   : > { %v3925_v9 = vpop.permute.xlu2 %1310 }
 0x1a5   : > { %v3927_v15 = vpop.permute.xlu1 %1287 }
 0x1a9   : > { %1413 = vrot.lane.b32.xlu0 %v3804_v45, %s2990_s8 }
 0x1aa   : > { %1426 = vrot.lane.b32.xlu2 %v3714_v49, %s2991_s27 }
 0x1ab   : > { %1411 = vrot.lane.b32.xlu1 %v3797_v50, %s2990_s8  ;;  %v3935_v20 = vpop.permute.xlu0 %1297 }
 0x1ac   : > { %v3937_v29 = vpop.permute.xlu2 %1316 }
 0x1ad   : > { %4971 = vst [vmem:[#allocation29_spill] sm:$0xff] %v3937_v29  ;;  %v3939_v11 = vpop.permute.xlu1 %1293 }
 0x1b1   : > { %1432 = vrot.lane.b32.xlu0 %v3744_v27, %s2991_s27 }
 0x1b2   : > { %1405 = vrot.lane.b32.xlu2 %v3778_v38, %s2990_s8 }
 0x1b3   : > { %1415 = vrot.lane.b32.xlu1 %v3785_v54, %s2990_s8  ;;  %v3947_v61 = vpop.permute.xlu0 %1312 }
 0x1b4   : > { %v3949_v62 = vpop.permute.xlu2 %1322 }
 0x1b5   : > { %4972 = vst [vmem:[#allocation30_spill] sm:$0xff] %v3949_v62  ;;  %v3951_v10 = vpop.permute.xlu1 %1299 }
 0x1b9   : > { %1579 = vrot.lane.b32.xlu0 %v1303_v40, %s2992_s19 }
 0x1ba   : > { %1430 = vrot.lane.b32.xlu2 %v3783_v57, %s2991_s27 }
 0x1bb   : > { %v3959_v22 = vpop.permute.xlu0 %1318 }
 0x1bc   : > { %v3961_v58 = vpop.permute.xlu2 %1341 }
 0x1bd   : > { %v3963_v17 = vpop.permute.xlu1 %1314 }
 0x1be   : > { %4973 = vst [vmem:[#allocation31_spill] sm:$0xff] %v3963_v17  ;;  %v3968_v63 = vsel %vm1326_vm3, %v3963_v17, %v3937_v29 }
 0x1bf   : > { %4974 = vst [vmem:[#allocation32_spill] sm:$0xff] %v3968_v63 }
 0x1c3   : > { %v3970_v56 = vpop.permute.xlu0 %1324 }
 0x1c4   : > { %4975 = vst [vmem:[#allocation33_spill] sm:$0xff] %v3970_v56  ;;  %v1348_v14 = vpop.permute.xlu2 %1347 }
 0x1c5   : > { %v3972_v13 = vpop.permute.xlu1 %1320 }
 0x1c6   : > { %v3977_v37 = vsel %vm1326_vm3, %v3972_v13, %v3949_v62 }
 0x1cb   : > { %v1344_v51 = vpop.permute.xlu0 %1343 }
 0x1cc   : > { %v1354_v23 = vpop.permute.xlu2 %1353  ;;  %v3981_v18 = vsel %vm1359_vm11, %v3961_v58, %v1344_v51 }
 0x1cd   : > { %v3983_v44 = vpop.permute.xlu1 %1339 }
 0x1d3   : > { %v3985_v12 = vpop.permute.xlu0 %1349 }
 0x1d4   : > { %v3987_v40 = vpop.permute.xlu2 %1368 }
 0x1d5   : > { %v1346_v24 = vpop.permute.xlu1 %1345 }
 0x1d6   : > { %v3990_v6 = vsel %vm1359_vm11, %v1346_v24, %v1348_v14  ;;  %v3993_v5 = vsel %vm1359_vm11, %v1344_v51, %v1346_v24 }
 0x1d7   : > { %4976 = vst [vmem:[#allocation34_spill] sm:$0xff] %v3990_v6 }
 0x1d8   : > { %4977 = vst [vmem:[#allocation35_spill] sm:$0xff] %v3993_v5 }
 0x1db   : > { %v1356_v1 = vpop.permute.xlu0 %1355 }
 0x1dc   : > { %v1375_v27 = vpop.permute.xlu2 %1374  ;;  %v3996_v29 = vsel %vm1359_vm11, %v1354_v23, %v1356_v1 }
 0x1dd   : > { %4978 = vst [vmem:[#allocation36_spill] sm:$0xff] %v3996_v29  ;;  %v3998_v63 = vpop.permute.xlu1 %1351 }
 0x1de   : > { %v4002_v57 = vsel %vm1359_vm11, %v3998_v63, %v1354_v23 }
 0x1e3   : > { %v4004_v39 = vpop.permute.xlu0 %1370 }
 0x1e4   : > { %v1381_v38 = vpop.permute.xlu2 %1380 }
 0x1e5   : > { %v1358_v62 = vpop.permute.xlu1 %1357 }
 0x1e6   : > { %v4007_v14 = vsel %vm1359_vm11, %v1356_v1, %v1358_v62 }
 0x1e7   : > { %4979 = vst [vmem:[#allocation37_spill] sm:$0xff] %v4007_v14 }
 0x1eb   : > { %v1377_v24 = vpop.permute.xlu0 %1376 }
 0x1ec   : > { %v1387_v51 = vpop.permute.xlu2 %1386  ;;  %v4010_v6 = vsel %vm1388_vm10, %v1375_v27, %v1377_v24 }
 0x1ed   : > { %4980 = vst [vmem:[#allocation38_spill] sm:$0xff] %v4010_v6  ;;  %v1373_v5 = vpop.permute.xlu1 %1372 }
 0x1ee   : > { %v4014_v56 = vsel %vm1388_vm10, %v4004_v39, %v1373_v5  ;;  %v4017_v23 = vsel %vm1388_vm10, %v1373_v5, %v1375_v27 }
 0x1ef   : > { %4981 = vst [vmem:[#allocation39_spill] sm:$0xff] %v4017_v23 }
 0x1f3   : > { %v1383_v29 = vpop.permute.xlu0 %1382 }
 0x1f4   : > { %v4019_v31 = vpop.permute.xlu2 %1401  ;;  %v4022_v1 = vsel %vm1388_vm10, %v1381_v38, %v1383_v29 }
 0x1f5   : > { %v1379_v62 = vpop.permute.xlu1 %1378 }
 0x1fb   : > { %v1398_v14 = vpop.permute.xlu0 %1397 }
 0x1fc   : > { %v1410_v54 = vpop.permute.xlu2 %1409 }
 0x1fd   : > { %v1385_v4 = vpop.permute.xlu1 %1384 }
 0x1fe   : > { %v4025_v24 = vsel %vm1388_vm10, %v1385_v4, %v1387_v51  ;;  %v4028_v6 = vsel %vm1388_vm10, %v1383_v29, %v1385_v4  ;;  %v1307_v51 = vsel %vm1301_vm15, %v3939_v11, %v3913_v59 }
 0x1ff   : > { %4982 = vst [vmem:[#allocation40_spill] sm:$0xff] %v4025_v24 }
 0x200   : > { %4983 = vst [vmem:[#allocation41_spill] sm:$0xff] %v4028_v6 }
 0x203   : > { %v1404_v35 = vpop.permute.xlu0 %1403 }
 0x204   : > { %v1427_v5 = vpop.permute.xlu2 %1426  ;;  %v4032_v27 = vsel %vm1417_vm1, %v4019_v31, %v1404_v35 }
 0x205   : > { %v1400_v7 = vpop.permute.xlu1 %1399 }
 0x20b   : > { %v1437_v30 = vpop.permute.xlu0 %1436 }
 0x20c   : > { %v1406_v23 = vpop.permute.xlu2 %1405  ;;  %1687 = vrot.lane.b32.xlu1 %v1437_v30, %s2992_s19 }
 0x20d   : > { %v1408_v17 = vpop.permute.xlu1 %1407  ;;  %v4036_v8 = vsel %vm1417_vm1, %v1404_v35, %v1406_v23  ;;  %v1278_v35 = vsel %vm1272_vm9, %v3888_v21, %v3903_v46  ;;  %v1304_v23 = vsel %vm1301_vm15, %v3911_v55, %v3927_v15  ;;  %v1279_v55 = vsel %vm1272_vm9, %v3903_v46, %v3880_v53 }
 0x20e   : > { %4984 = vst [vmem:[#allocation42_spill] sm:$0xff] %v4036_v8  ;;  %1667 = vrot.lane.b32.xlu2 %v1408_v17, %s2992_s19  ;;  %v1422_v4 = vsel %vm1417_vm1, %v1408_v17, %v1410_v54  ;;  %v1418_v8 = vsel %vm1417_vm1, %v1398_v14, %v1400_v7 }
 0x20f   : > { %1669 = vrot.lane.b32.xlu0 %v1422_v4, %s2992_s19 }
 0x213   : > { %v4041_v29 = vpop.permute.xlu0 %1428 }
 0x214   : > { %1589 = vrot.lane.b32.xlu1 %v1307_v51, %s2992_s19  ;;  %v1308_v51 = vsel %vm1301_vm15, %v3913_v59, %v3935_v20  ;;  %v1447_v46 = vsel %vm1446_vm8, %v1427_v5, %v4041_v29 }
 0x215   : > { %v4047_v24 = vpop.permute.xlu1 %1438 }
 0x216   : > { %1657 = vrot.lane.b32.xlu2 %v1398_v14, %s2992_s19  ;;  %v1451_v59 = vsel %vm1446_vm8, %v1437_v30, %v4047_v24  ;;  %v1393_v30 = vsel %vm1388_vm10, %v1379_v62, %v1381_v38  ;;  %v1275_v14 = vsel %vm1272_vm9, %v3862_v43, %v3878_v34  ;;  %v1249_v38 = vsel %vm1243_vm5, %v3846_v32, %v3860_v2 }
 0x217   : > { %1569 = vrot.lane.b32.xlu0 %v1278_v35, %s2992_s19 }
 0x21b   : > { %v1414_v17 = vpop.permute.xlu0 %1413 }
 0x21c   : > { %1581 = vrot.lane.b32.xlu1 %v1304_v23, %s2992_s19 }
 0x21d   : > { %v1412_v4 = vpop.permute.xlu1 %1411 }
 0x21e   : > { %1591 = vrot.lane.b32.xlu2 %v1308_v51, %s2992_s19  ;;  %v4064_v6 = vsel %vm1417_vm1, %v1412_v4, %v1414_v17 }
 0x21f   : > { %1659 = vrot.lane.b32.xlu0 %v1418_v8, %s2992_s19  ;;  %v1274_v8 = vsel %vm1272_vm9, %v3882_v3, %v3862_v43  ;;  %v1419_v43 = vsel %vm1417_vm1, %v1400_v7, %v4019_v31  ;;  %v1306_v31 = vsel %vm1301_vm15, %v3923_v48, %v3939_v11  ;;  %v1245_v7 = vsel %vm1243_vm5, %v3844_v16, %v3851_v33  ;;  %v4141_v48 = vpop.permute.xlu2 %1430 }
 0x224   : > { %1571 = vrot.lane.b32.xlu1 %v1279_v55, %s2992_s19  ;;  %v4986_v55 = vld [vmem:[#allocation28_spill] sm:$0xff] }
 0x225   : > { %v1416_v35 = vpop.permute.xlu1 %1415 }
 0x226   : > { %v4074_v23 = vsel %vm1417_vm1, %v1414_v17, %v1416_v35  ;;  %1689 = vrot.lane.b32.xlu2 %v1451_v59, %s2992_s19  ;;  %v1250_v17 = vsel %vm1243_vm5, %v3860_v2, %v3873_v52  ;;  %v1246_v2 = vsel %vm1243_vm5, %v3851_v33, %v3839_v25  ;;  %v1302_v33 = vsel %vm1301_vm15, %v3915_v47, %v3890_v26  ;;  %v4157_v47 = vpop.permute.xlu0 %1432 }
 0x227   : > { %1559 = vrot.lane.b32.xlu0 %v1274_v8, %s2992_s19  ;;  %v4988_v8 = vld [vmem:[#allocation39_spill] sm:$0xff] }
 0x22c   : > { %1677 = vrot.lane.b32.xlu1 %v1427_v5, %s2992_s19  ;;  %v1423_v5 = vsel %vm1417_vm1, %v1410_v54, %v1412_v4  ;;  %v1389_v54 = vsel %vm1388_vm10, %v3987_v40, %v4004_v39  ;;  %v1364_v39 = vsel %vm1359_vm11, %v3985_v12, %v3998_v63  ;;  %v1330_v63 = vsel %vm1326_vm3, %v3959_v22, %v3972_v13 }
 0x22e   : > { %1679 = vrot.lane.b32.xlu2 %v1447_v46, %s2992_s19 }
 0x22f   : > { %1649 = vrot.lane.b32.xlu0 %v1393_v30, %s2992_s19 }
 0x234   : > { %1561 = vrot.lane.b32.xlu1 %v1275_v14, %s2992_s19 }
 0x236   : > { %1647 = vrot.lane.b32.xlu2 %v1379_v62, %s2992_s19 }
 0x237   : > { %1551 = vrot.lane.b32.xlu0 %v1250_v17, %s2992_s19  ;;  %v4989_v17 = vld [vmem:[#allocation23_spill] sm:$0xff] }
 0x23c   : > { %1671 = vrot.lane.b32.xlu1 %v1423_v5, %s2992_s19 }
 0x23e   : > { %1549 = vrot.lane.b32.xlu2 %v1249_v38, %s2992_s19  ;;  %v4991_v38 = vld [vmem:[#allocation26_spill] sm:$0xff] }
 0x23f   : > { %1661 = vrot.lane.b32.xlu0 %v1419_v43, %s2992_s19  ;;  %v1276_v43 = vsel %vm1272_vm9, %v3878_v34, %v4991_v38  ;;  %v4993_v34 = vld [vmem:[#allocation22_spill] sm:$0xff] }
 0x244   : > { %1637 = vrot.lane.b32.xlu1 %v3987_v40, %s2992_s19 }
 0x246   : > { %1639 = vrot.lane.b32.xlu2 %v1389_v54, %s2992_s19 }
 0x247   : > { %1541 = vrot.lane.b32.xlu0 %v1246_v2, %s2992_s19 }
 0x24c   : > { %1587 = vrot.lane.b32.xlu1 %v1306_v31, %s2992_s19 }
 0x24e   : > { %1539 = vrot.lane.b32.xlu2 %v1245_v7, %s2992_s19 }
 0x24f   : > { %1651 = vrot.lane.b32.xlu0 %v4022_v1, %s2992_s19 }
 0x254   : > { %1627 = vrot.lane.b32.xlu1 %v3985_v12, %s2992_s19 }
 0x256   : > { %1629 = vrot.lane.b32.xlu2 %v1364_v39, %s2992_s19  ;;  %v4992_v39 = vld [vmem:[#allocation19_spill] sm:$0xff] }
 0x257   : > { %1531 = vrot.lane.b32.xlu0 %v3781_v0, %s2992_s19  ;;  %v1360_v0 = vsel %vm1359_vm11, %v3983_v44, %v3961_v58  ;;  %v4171_v58 = vpop.permute.xlu0 %1579 }
 0x25c   : > { %1577 = vrot.lane.b32.xlu1 %v1302_v33, %s2992_s19  ;;  %v4994_v33 = vld [vmem:[#allocation25_spill] sm:$0xff] }
 0x25e   : > { %1529 = vrot.lane.b32.xlu2 %v3795_v19, %s2992_s19  ;;  %v1277_v19 = vsel %vm1272_vm9, %v3871_v42, %v3888_v21  ;;  %v1273_v42 = vsel %vm1272_vm9, %v3869_v41, %v3882_v3 }
 0x25f   : > { %1641 = vrot.lane.b32.xlu0 %v4014_v56, %s2992_s19  ;;  %v1309_v56 = vsel %vm1301_vm15, %v3935_v20, %v3951_v10  ;;  %v1244_v20 = vsel %vm1243_vm5, %v3834_v28, %v3844_v16  ;;  %v4985_v16 = vld [vmem:[#allocation41_spill] sm:$0xff] }
 0x264   : > { %1617 = vrot.lane.b32.xlu1 %v3983_v44, %s2992_s19 }
 0x266   : > { %1619 = vrot.lane.b32.xlu2 %v1360_v0, %s2992_s19  ;;  %v1251_v0 = vsel %vm1243_vm5, %v3873_v52, %v4994_v33  ;;  %v4996_v52 = vld [vmem:[#allocation33_spill] sm:$0xff] }
 0x267   : > { %1442 = vrot.lane.b32.xlu0 %v3804_v45, %s2991_s27 }
 0x268   : > { %v1668_v26 = vpop.permute.xlu2 %1667 }
 0x26c   : > { %1567 = vrot.lane.b32.xlu1 %v1277_v19, %s2992_s19 }
 0x26e   : > { %1440 = vrot.lane.b32.xlu2 %v3797_v50, %s2991_s27 }
 0x26f   : > { %1607 = vrot.lane.b32.xlu0 %v3959_v22, %s2992_s19 }
 0x270   : > { %v1658_v11 = vpop.permute.xlu2 %1657 }
 0x274   : > { %1519 = vrot.lane.b32.xlu1 %v3714_v49, %s2992_s19 }
 0x276   : > { %1521 = vrot.lane.b32.xlu2 %v3728_v36, %s2992_s19 }
 0x277   : > { %1557 = vrot.lane.b32.xlu0 %v1273_v42, %s2992_s19 }
 0x278   : > { %v4169_v21 = vpop.permute.xlu2 %1591 }
 0x27c   : > { %1609 = vrot.lane.b32.xlu1 %v1330_v63, %s2992_s19 }
 0x27e   : > { %1631 = vrot.lane.b32.xlu2 %v4002_v57, %s2992_s19  ;;  %v1688_v49 = vpop.permute.xlu1 %1687  ;;  %v1327_v57 = vsel %vm1326_vm3, %v3925_v9, %v3947_v61 }
 0x27f   : > { %1621 = vrot.lane.b32.xlu0 %v3981_v18, %s2992_s19 }
 0x280   : > { %v4181_v36 = vpop.permute.xlu2 %1689 }
 0x281   : > { %v4183_v41 = vpop.permute.xlu0 %1669  ;;  %v1766_v3 = vsel %vm1697_vm6, %v1688_v49, %v4181_v36  ;;  %v4995_v49 = vld [vmem:[#allocation36_spill] sm:$0xff] }
 0x282   : > { %v1758_v22 = vsel %vm1697_vm6, %v1668_v26, %v4183_v41  ;;  %1893 = vmatpush.bf16.msra.mxu2 %v1766_v3  ;;  %v4997_v3 = vld [vmem:[#allocation30_spill] sm:$0xff] }
 0x283   : > { %1868 = vmatpush.bf16.msra.mxu1 %v1758_v22  ;;  %v1332_v22 = vsel %vm1326_vm3, %v4997_v3, %v4996_v52 }
 0x284   : > { %1597 = vrot.lane.b32.xlu1 %v3925_v9, %s2992_s19  ;;  %v1248_v9 = vsel %vm1243_vm5, %v3864_v60, %v3846_v32 }
 0x286   : > { %1599 = vrot.lane.b32.xlu2 %v1327_v57, %s2992_s19  ;;  %v4198_v13 = vpop.permute.xlu1 %1589  ;;  %v4998_v57 = vld [vmem:[#allocation20_spill] sm:$0xff] }
 0x287   : > { %1593 = vrot.lane.b32.xlu0 %v1309_v56, %s2992_s19  ;;  %v1727_v18 = vsel %vm1697_vm6, %v4198_v13, %v4169_v21 }
 0x288   : > { %v4204_v44 = vpop.permute.xlu2 %1679  ;;  %1906 = vmatpush.bf16.msra.mxu3 %v1727_v18 }
 0x289   : > { %v4206_v12 = vpop.permute.xlu0 %1569 }
 0x28c   : > { %1673 = vrot.lane.b32.xlu1 %v4064_v6, %s2992_s19 }
 0x28e   : > { %1547 = vrot.lane.b32.xlu2 %v1248_v9, %s2992_s19  ;;  %v4217_v40 = vpop.permute.xlu1 %1581 }
 0x28f   : > { %1537 = vrot.lane.b32.xlu0 %v1244_v20, %s2992_s19  ;;  %v1723_v1 = vsel %vm1697_vm6, %v4171_v58, %v4217_v40 }
 0x290   : > { %v1648_v62 = vpop.permute.xlu2 %1647  ;;  %1907 = vmatpush.bf16.msra.mxu3 %v1723_v1  ;;  %v4999_v1 = vld [vmem:[#allocation35_spill] sm:$0xff] }
 0x291   : > { %v1660_v6 = vpop.permute.xlu0 %1659 }
 0x292   : > { %v1754_v4 = vsel %vm1697_vm6, %v1658_v11, %v1660_v6 }
 0x293   : > { %1869 = vmatpush.bf16.msra.mxu1 %v1754_v4 }
 0x294   : > { %1611 = vrot.lane.b32.xlu1 %v3977_v37, %s2992_s19  ;;  %v1305_v37 = vsel %vm1301_vm15, %v3927_v15, %v4986_v55 }
 0x296   : > { %1663 = vrot.lane.b32.xlu2 %v4032_v27, %s2992_s19  ;;  %v4228_v28 = vpop.permute.xlu1 %1571  ;;  %v4987_v27 = vld [vmem:[#allocation31_spill] sm:$0xff] }
 0x297   : > { %1653 = vrot.lane.b32.xlu0 %v4985_v16, %s2992_s19  ;;  %v1719_v32 = vsel %vm1697_vm6, %v4206_v12, %v4228_v28  ;;  %v1328_v35 = vsel %vm1326_vm3, %v3947_v61, %v4987_v27  ;;  %v4990_v61 = vld [vmem:[#allocation27_spill] sm:$0xff]  ;;  %v5001_v16 = vld [vmem:[#allocation21_spill] sm:$0xff] }
 0x298   : > { %v4235_v60 = vpop.permute.xlu2 %1549  ;;  %1908 = vmatpush.bf16.msra.mxu3 %v1719_v32  ;;  %v1280_v5 = vsel %vm1272_vm9, %v3880_v53, %v4990_v61 }
 0x299   : > { %v4237_v51 = vpop.permute.xlu0 %1559 }
 0x29c   : > { %1583 = vrot.lane.b32.xlu1 %v1305_v37, %s2992_s19 }
 0x29e   : > { %1601 = vrot.lane.b32.xlu2 %v1328_v35, %s2992_s19  ;;  %v1678_v59 = vpop.permute.xlu1 %1677 }
 0x29f   : > { %1643 = vrot.lane.b32.xlu0 %v4988_v8, %s2992_s19  ;;  %v1762_v46 = vsel %vm1697_vm6, %v1678_v59, %v4204_v44 }
 0x2a0   : > { %v4251_v30 = vpop.permute.xlu2 %1639  ;;  %1894 = vmatpush.bf16.msra.mxu2 %v1762_v46 }
 0x2a1   : > { %v1650_v14 = vpop.permute.xlu0 %1649 }
 0x2a2   : > { %v1750_v15 = vsel %vm1697_vm6, %v1648_v62, %v1650_v14  ;;  %v5000_v62 = vld [vmem:[#allocation24_spill] sm:$0xff] }
 0x2a3   : > { %1870 = vmatpush.bf16.msra.mxu1 %v1750_v15 }
 0x2a4   : > { %1527 = vrot.lane.b32.xlu1 %v4989_v17, %s2992_s19 }
 0x2a6   : > { %1573 = vrot.lane.b32.xlu2 %v1280_v5, %s2992_s19  ;;  %v4263_v54 = vpop.permute.xlu1 %1561 }
 0x2a7   : > { %1563 = vrot.lane.b32.xlu0 %v1276_v43, %s2992_s19  ;;  %v1715_v2 = vsel %vm1697_vm6, %v4237_v51, %v4263_v54 }
 0x2a8   : > { %v4269_v31 = vpop.permute.xlu2 %1539  ;;  %1909 = vmatpush.bf16.msra.mxu3 %v1715_v2 }
 0x2a9   : > { %v4271_v7 = vpop.permute.xlu0 %1551 }
 0x2aa   : > { %v1711_v53 = vsel %vm1697_vm6, %v4235_v60, %v4271_v7 }
 0x2ac   : > { %1517 = vrot.lane.b32.xlu1 %v4992_v39, %s2992_s19  ;;  %1910 = vmatpush.bf16.msra.mxu3 %v1711_v53 }
 0x2ae   : > { %1444 = vrot.lane.b32.xlu2 %v4993_v34, %s2991_s27  ;;  %v4283_v26 = vpop.permute.xlu1 %1671 }
 0x2af   : > { %1553 = vrot.lane.b32.xlu0 %v1251_v0, %s2992_s19  ;;  %v1759_v19 = vsel %vm1697_vm6, %v4183_v41, %v4283_v26  ;;  %v2629_v0 = vld [vmem:[%s4826_s3 + $0x8] sm:$0xf] }
 0x2b0   : > { %v1630_v11 = vpop.permute.xlu2 %1629  ;;  %1925 = vmatpush.bf16.msrb.mxu2 %v1759_v19 }
 0x2b1   : > { %v4289_v42 = vpop.permute.xlu0 %1661 }
 0x2b2   : > { %v1755_v63 = vsel %vm1697_vm6, %v1660_v6, %v4289_v42  ;;  %v1247_v6 = vsel %vm1243_vm5, %v3839_v25, %v5000_v62  ;;  %v5002_v25 = vld [vmem:[#allocation32_spill] sm:$0xff] }
 0x2b4   : > { %1633 = vrot.lane.b32.xlu1 %v4995_v49, %s2992_s19  ;;  %1926 = vmatpush.bf16.msrb.mxu2 %v1755_v63 }
 0x2b6   : > { %1434 = vrot.lane.b32.xlu2 %v4998_v57, %s2991_s27  ;;  %v1638_v56 = vpop.permute.xlu1 %1637 }
 0x2b7   : > { %1613 = vrot.lane.b32.xlu0 %v1332_v22, %s2992_s19  ;;  %v1746_v41 = vsel %vm1697_vm6, %v1638_v56, %v4251_v30  ;;  %v1449_v56 = vsel %vm1446_vm8, %v4141_v48, %v4157_v47 }
 0x2b8   : > { %v4303_v18 = vpop.permute.xlu2 %1529  ;;  %1871 = vmatpush.bf16.msra.mxu1 %v1746_v41  ;;  %v2621_v41 = vld [vmem:[%s4826_s3] sm:$0xf] }
 0x2b9   : > { %v4305_v9 = vpop.permute.xlu0 %1541 }
 0x2ba   : > { %v1707_v20 = vsel %vm1697_vm6, %v4269_v31, %v4305_v9 }
 0x2bb   : > { %1911 = vmatpush.bf16.msra.mxu3 %v1707_v20 }
 0x2bc   : > { %1623 = vrot.lane.b32.xlu1 %v4999_v1, %s2992_s19 }
 0x2be   : > { %1543 = vrot.lane.b32.xlu2 %v1247_v6, %s2992_s19  ;;  %v1588_v4 = vpop.permute.xlu1 %1587 }
 0x2bf   : > { %1523 = vrot.lane.b32.xlu0 %v5001_v16, %s2992_s19  ;;  %v1726_v32 = vsel %vm1697_vm6, %v1588_v4, %v4198_v13  ;;  %v2641_v16 = vld [vmem:[%s4826_s3 + $0x20] sm:$0xf] }
 0x2c0   : > { %v4320_v37 = vpop.permute.xlu2 %1619  ;;  %1849 = vmatpush.bf16.msra.mxu0 %v1726_v32  ;;  %v2695_v32 = vld [vmem:[%s4826_s3 + $0x28] sm:$0xf0] }
 0x2c1   : > { %v4322_v27 = vpop.permute.xlu0 %1651 }
 0x2c2   : > { %v1751_v35 = vsel %vm1697_vm6, %v1650_v14, %v4322_v27 }
 0x2c3   : > { %1927 = vmatpush.bf16.msrb.mxu2 %v1751_v35  ;;  %v4414_v35 = vor.u32 %v2695_v32, %v2641_v16 }
 0x2c4   : > { %1533 = vrot.lane.b32.xlu1 %v3797_v50, %s2992_s19 }
 0x2c6   : > { %1603 = vrot.lane.b32.xlu2 %v5002_v25, %s2992_s19  ;;  %v1628_v59 = vpop.permute.xlu1 %1627  ;;  %v5006_v25 = vld [vmem:[#allocation34_spill] sm:$0xff] }
 0x2c7   : > { %v1742_v8 = vsel %vm1697_vm6, %v1628_v59, %v1630_v11 }
 0x2c8   : > { %v1441_v46 = vpop.permute.xlu2 %1440  ;;  %1872 = vmatpush.bf16.msra.mxu1 %v1742_v8 }
 0x2c9   : > { %v4331_v13 = vpop.permute.xlu0 %1531  ;;  %v1452_v50 = vsel %vm1446_vm8, %v4047_v24, %v1441_v46  ;;  %v1448_v24 = vsel %vm1446_vm8, %v4041_v29, %v4141_v48  ;;  %v2692_v29 = vld [vmem:[%s4826_s3 + $0x10] sm:$0xf0] }
 0x2ca   : > { %v1703_v15 = vsel %vm1697_vm6, %v4303_v18, %v4331_v13  ;;  %v4372_v63 = vor.u32 %v2692_v29, %v2629_v0 }
 0x2cb   : > { %1912 = vmatpush.bf16.msra.mxu3 %v1703_v15  ;;  %v5007_v15 = vld [vmem:[#allocation37_spill] sm:$0xff] }
 0x2cc   : > { %1675 = vrot.lane.b32.xlu1 %v4074_v23, %s2992_s19  ;;  %v5003_v23 = vld [vmem:[#allocation42_spill] sm:$0xff]  ;;  %2643 = vmatmul.msk.bf16.vlgmr.msra.gmra.mxu2 %vm1842_vm0, %v4372_v63 }
 0x2ce   : > { %1691 = vrot.lane.b32.xlu2 %v1452_v50, %s2992_s19  ;;  %v1578_v14 = vpop.permute.xlu1 %1577  ;;  %v2694_v50 = vld [vmem:[%s4826_s3 + $0x20] sm:$0xf0] }
 0x2cf   : > { %v1722_v17 = vsel %vm1697_vm6, %v1578_v14, %v4171_v58 }
 0x2d0   : > { %v4343_v5 = vpop.permute.xlu2 %1521  ;;  %1850 = vmatpush.bf16.msra.mxu0 %v1722_v17 }
 0x2d1   : > { %v4345_v43 = vpop.permute.xlu0 %1641 }
 0x2d2   : > { %v1747_v2 = vsel %vm1697_vm6, %v4251_v30, %v4345_v43 }
 0x2d3   : > { %1928 = vmatpush.bf16.msrb.mxu2 %v1747_v2 }
 0x2d4   : > { %1665 = vrot.lane.b32.xlu1 %v5003_v23, %s2992_s19  ;;  %v2690_v23 = vld [vmem:[%s4826_s3 + $0x4] sm:$0xf] }
 0x2d6   : > { %1681 = vrot.lane.b32.xlu2 %v1448_v24, %s2992_s19  ;;  %v1618_v58 = vpop.permute.xlu1 %1617  ;;  %v2623_v24 = vld [vmem:[%s4826_s3 + $0xc] sm:$0xf0] }
 0x2d7   : > { %v1738_v53 = vsel %vm1697_vm6, %v1618_v58, %v4320_v37  ;;  %v4464_v58 = vor.u32 %v2690_v23, %v2623_v24 }
 0x2d8   : > { %v4358_v39 = vpop.permute.xlu2 %1631  ;;  %1873 = vmatpush.bf16.msra.mxu1 %v1738_v53  ;;  %v5008_v53 = vld [vmem:[#allocation29_spill] sm:$0xff] }
 0x2d9   : > { %v4360_v34 = vpop.permute.xlu0 %1442  ;;  %v1743_v30 = vsel %vm1697_vm6, %v1630_v11, %v4358_v39  ;;  %v5004_v11 = vld [vmem:[#allocation40_spill] sm:$0xff] }
 0x2da   : > { %v1453_v19 = vsel %vm1446_vm8, %v1441_v46, %v4360_v34  ;;  %1929 = vmatpush.bf16.msrb.mxu2 %v1743_v30 }
 0x2db   : > { %1693 = vrot.lane.b32.xlu0 %v1453_v19, %s2992_s19 }
 0x2dc   : > { %1595 = vrot.lane.b32.xlu1 %v3951_v10, %s2992_s19  ;;  %v5005_v10 = vld [vmem:[#allocation38_spill] sm:$0xff]  ;;  %2644 = vmatmul.msk.bf16.gmra.mxu2 %vm1842_vm0, %v4414_v35 }
 0x2de   : > { %1655 = vrot.lane.b32.xlu2 %v5004_v11, %s2992_s19  ;;  %v1568_v49 = vpop.permute.xlu1 %1567 }
 0x2df   : > { %v1718_v3 = vsel %vm1697_vm6, %v1568_v49, %v4206_v12  ;;  %v2691_v12 = vld [vmem:[%s4826_s3 + $0x8] sm:$0xf0]  ;;  %v5009_v49 = vld [vmem:[#allocation18_spill] sm:$0xff] }
 0x2e0   : > { %v4383_v22 = vpop.permute.xlu2 %1599  ;;  %1851 = vmatpush.bf16.msra.mxu0 %v1718_v3  ;;  %v4404_v6 = vor.u32 %v2691_v12, %v2621_v41  ;;  %v2635_v41 = vld [vmem:[%s4826_s3 + $0x24] sm:$0xf0]  ;;  %v1466_v12 = vld [vmem:[%s4827_s4 + $0x18] sm:$0xff] }
 0x2e1   : > { %v1608_v57 = vpop.permute.xlu0 %1607 }
 0x2e3   : > { %1683 = vrot.lane.b32.xlu0 %v1449_v56, %s2992_s19 }
 0x2e4   : > { %1645 = vrot.lane.b32.xlu1 %v5005_v10, %s2992_s19  ;;  %v2693_v10 = vld [vmem:[%s4826_s3 + $0x1c] sm:$0xf] }
 0x2e6   : > { %1575 = vrot.lane.b32.xlu2 %v4990_v61, %s2992_s19  ;;  %v4399_v20 = vpop.permute.xlu1 %1519 }
 0x2e7   : > { %v1699_v48 = vsel %vm1697_vm6, %v4399_v20, %v4343_v5 }
 0x2e8   : > { %v1548_v1 = vpop.permute.xlu2 %1547  ;;  %1913 = vmatpush.bf16.msra.mxu3 %v1699_v48 }
 0x2e9   : > { %v1558_v4 = vpop.permute.xlu0 %1557 }
 0x2ea   : > { %v1714_v61 = vsel %vm1697_vm6, %v1558_v4, %v4237_v51  ;;  %v1710_v51 = vsel %vm1697_vm6, %v1548_v1, %v4235_v60  ;;  %v2633_v60 = vld [vmem:[%s4826_s3 + $0x18] sm:$0xf]  ;;  %v4516_v1 = vor.u32 %v2693_v10, %v2635_v41 }
 0x2eb   : > { %1585 = vrot.lane.b32.xlu0 %v4986_v55, %s2992_s19  ;;  %1852 = vmatpush.bf16.msra.mxu0 %v1714_v61  ;;  %v4451_v2 = vor.u32 %v2694_v50, %v2633_v60 }
 0x2ec   : > { %1914 = vmatmul.bf16.vlgmr.msra.gmra.mxu3 %v4404_v6  ;;  %1565 = vrot.lane.b32.xlu1 %v4991_v38, %s2992_s19 }
 0x2ee   : > { %1625 = vrot.lane.b32.xlu2 %v5006_v25, %s2992_s19  ;;  %v1610_v59 = vpop.permute.xlu1 %1609 }
 0x2ef   : > { %1853 = vmatpush.bf16.msra.mxu0 %v1710_v51  ;;  %v1734_v8 = vsel %vm1697_vm6, %v1608_v57, %v1610_v59 }
 0x2f0   : > { %v4428_v55 = vpop.permute.xlu2 %1663  ;;  %1874 = vmatpush.bf16.msra.mxu1 %v1734_v8 }
 0x2f1   : > { %v4430_v46 = vpop.permute.xlu0 %1621  ;;  %v1756_v11 = vsel %vm1697_vm6, %v4289_v42, %v4428_v55  ;;  %v1465_v42 = vld [vmem:[%s4827_s4 + $0x10] sm:$0xff] }
 0x2f2   : > { %v1739_v38 = vsel %vm1697_vm6, %v4320_v37, %v4430_v46 }
 0x2f3   : > { %1635 = vrot.lane.b32.xlu0 %v5007_v15, %s2992_s19  ;;  %1930 = vmatpush.bf16.msrb.mxu2 %v1739_v38 }
 0x2f4   : > { %1555 = vrot.lane.b32.xlu1 %v4994_v33, %s2992_s19 }
 0x2f6   : > { %1615 = vrot.lane.b32.xlu2 %v4996_v52, %s2992_s19  ;;  %v1598_v14 = vpop.permute.xlu1 %1597 }
 0x2f7   : > { %v1730_v37 = vsel %vm1697_vm6, %v1598_v14, %v4383_v22 }
 0x2f8   : > { %v4449_v17 = vpop.permute.xlu2 %1601  ;;  %1875 = vmatpush.bf16.msra.mxu1 %v1730_v37 }
 0x2f9   : > { %v4453_v33 = vpop.permute.xlu0 %1593  ;;  %v1731_v48 = vsel %vm1697_vm6, %v4383_v22, %v4449_v17 }
 0x2fa   : > { %v1728_v52 = vsel %vm1697_vm6, %v4169_v21, %v4453_v33 }
 0x2fb   : > { %1876 = vmatmul.bf16.vlgmr.msra.gmra.mxu1 %v4464_v58 }
 0x2fc   : > { %1963 = vmatpush.bf16.msrb.mxu1 %v1728_v52  ;;  %1919 = vmatmul.bf16.gmra.mxu3 %v4451_v2 }
 0x2fd   : > { %1545 = vrot.lane.b32.xlu1 %v5000_v62, %s2992_s19  ;;  %v1463_v62 = vld [vmem:[%s4827_s4] sm:$0xff] }
 0x2fe   : > { %1605 = vrot.lane.b32.xlu2 %v5008_v53, %s2992_s19  ;;  %v4472_v30 = vpop.permute.xlu1 %1673 }
 0x2ff   : > { %v1760_v0 = vsel %vm1697_vm6, %v4283_v26, %v4472_v30 }
 0x300   : > { %v4477_v21 = vpop.permute.xlu2 %1573  ;;  %1982 = vmatpush.bf16.msrb.mxu3 %v1760_v0 }
 0x301   : > { %v1538_v29 = vpop.permute.xlu0 %1537  ;;  %v1720_v25 = vsel %vm1697_vm6, %v4228_v28, %v4477_v21  ;;  %v1464_v28 = vld [vmem:[%s4827_s4 + $0x8] sm:$0xff] }
 0x302   : > { %v1706_v19 = vsel %vm1697_vm6, %v1538_v29, %v4269_v31 }
 0x303   : > { %1854 = vmatpush.bf16.msra.mxu0 %v1706_v19 }
 0x304   : > { %1983 = vmatpush.bf16.msrb.mxu3 %v1756_v11 }
 0x305   : > { %1525 = vrot.lane.b32.xlu1 %v5009_v49, %s2992_s19 }
 0x306   : > { %1469 = vperm.xlu2 %2853, %v1463_v62   ;;  %v4489_v26 = vpop.permute.xlu1 %1611 }
 0x307   : > { %v1735_v3 = vsel %vm1697_vm6, %v1610_v59, %v4489_v26 }
 0x308   : > { %v1445_v31 = vpop.permute.xlu2 %1444  ;;  %1931 = vmatpush.bf16.msrb.mxu2 %v1735_v3 }
 0x309   : > { %v1454_v57 = vsel %vm1446_vm8, %v4360_v34, %v1445_v31  ;;  %v4495_v56 = vpop.permute.xlu0 %1653 }
 0x30a   : > { %1695 = vrot.lane.b32.xlu0 %v1454_v57, %s2992_s19  ;;  %v1752_v34 = vsel %vm1697_vm6, %v4322_v27, %v4495_v56 }
 0x30b   : > { %1984 = vmatpush.bf16.msrb.mxu3 %v1752_v34  ;;  %1881 = vmatmul.bf16.gmra.mxu1 %v4516_v1 }
 0x30c   : > { %1932 = vmatpush.bf16.msrb.mxu2 %v1731_v48 }
 0x30d   : > { %1479 = vperm.xlu1 %2852, %v1465_v42  }
 0x30e   : > { %1484 = vperm.xlu2 %2853, %v1466_v12   ;;  %v4519_v4 = vpop.permute.xlu1 %1583 }
 0x30f   : > { %1933 = vmatmul.bf16.vlgmr.msrb.gmra.mxu2 %v4464_v58  ;;  %v1724_v27 = vsel %vm1697_vm6, %v4217_v40, %v4519_v4 }
 0x310   : > { %v1435_v16 = vpop.permute.xlu2 %1434  ;;  %1964 = vmatpush.bf16.msrb.mxu1 %v1724_v27 }
 0x311   : > { %v1450_v22 = vsel %vm1446_vm8, %v4157_v47, %v1435_v16  ;;  %v4527_v32 = vpop.permute.xlu0 %1643 }
 0x312   : > { %1685 = vrot.lane.b32.xlu0 %v1450_v22, %s2992_s19  ;;  %v1748_v61 = vsel %vm1697_vm6, %v4345_v43, %v4527_v32 }
 0x313   : > { %1985 = vmatpush.bf16.msrb.mxu3 %v1748_v61 }
 0x314   : > { %1965 = vmatpush.bf16.msrb.mxu1 %v1720_v25 }
 0x316   : > { %v1528_v40 = vpop.permute.xlu1 %1527 }
 0x317   : > { %v1702_v51 = vsel %vm1697_vm6, %v1528_v40, %v4303_v18 }
 0x318   : > { %v4538_v59 = vpop.permute.xlu2 %1543  ;;  %1855 = vmatpush.bf16.msra.mxu0 %v1702_v51 }
 0x319   : > { %v4540_v47 = vpop.permute.xlu0 %1563 }
 0x31a   : > { %1535 = vrot.lane.b32.xlu0 %v3804_v45, %s2992_s19  ;;  %v1716_v43 = vsel %vm1697_vm6, %v4263_v54, %v4540_v47  ;;  %v1708_v54 = vsel %vm1697_vm6, %v4305_v9, %v4538_v59 }
 0x31b   : > { %1966 = vmatpush.bf16.msrb.mxu1 %v1716_v43 }
 0x31e   : > { %v1518_v8 = vpop.permute.xlu1 %1517 }
 0x31f   : > { %1938 = vmatmul.bf16.gmra.mxu2 %v4516_v1  ;;  %v1698_v18 = vsel %vm1697_vm6, %v1518_v8, %v4399_v20 }
 0x320   : > { %v4553_v38 = vpop.permute.xlu2 %1603  ;;  %1856 = vmatpush.bf16.msra.mxu0 %v1698_v18 }
 0x321   : > { %v4555_v15 = vpop.permute.xlu0 %1553 }
 0x322   : > { %1474 = vperm.xlu0 %2851, %v1464_v28   ;;  %v1712_v45 = vsel %vm1697_vm6, %v4271_v7, %v4555_v15 }
 0x323   : > { %1967 = vmatpush.bf16.msrb.mxu1 %v1712_v45  ;;  %1857 = vmatmul.bf16.vlgmr.msra.gmra.mxu0 %v4404_v6 }
 0x326   : > { %v4564_v60 = vpop.permute.xlu1 %1633 }
 0x327   : > { %1968 = vmatpush.bf16.msrb.mxu1 %v1708_v54  ;;  %v1744_v20 = vsel %vm1697_vm6, %v4358_v39, %v4564_v60 }
 0x328   : > { %v1692_v50 = vpop.permute.xlu2 %1691  ;;  %1986 = vmatpush.bf16.msrb.mxu3 %v1744_v20 }
 0x329   : > { %v1767_v14 = vsel %vm1697_vm6, %v4181_v36, %v1692_v50  ;;  %v4571_v7 = vpop.permute.xlu0 %1613 }
 0x32a   : > { %1950 = vmatpush.bf16.msrb.mxu0 %v1767_v14  ;;  %v1736_v36 = vsel %vm1697_vm6, %v4489_v26, %v4571_v7 }
 0x32e   : > { %v4573_v37 = vpop.permute.xlu1 %1623 }
 0x32f   : > { %v1740_v9 = vsel %vm1697_vm6, %v4430_v46, %v4573_v37  ;;  %v1732_v46 = vsel %vm1697_vm6, %v4449_v17, %v4553_v38 }
 0x330   : > { %v1682_v23 = vpop.permute.xlu2 %1681  ;;  %1987 = vmatpush.bf16.msrb.mxu3 %v1740_v9  ;;  %v555_v9 = vld [vmem:[%s3171_s21] sm:$0xff] }
 0x331   : > { %v1763_v24 = vsel %vm1697_vm6, %v4204_v44, %v1682_v23  ;;  %v4592_v53 = vpop.permute.xlu0 %1523 }
 0x332   : > { %1951 = vmatpush.bf16.msrb.mxu0 %v1763_v24  ;;  %v1700_v44 = vsel %vm1697_vm6, %v4343_v5, %v4592_v53 }
 0x333   : > { %1862 = vmatmul.bf16.gmra.mxu0 %v4451_v2 }
 0x334   : > { %1988 = vmatpush.bf16.msrb.mxu3 %v1736_v36 }
 0x336   : > { %v4584_v39 = vpop.permute.xlu1 %1533 }
 0x337   : > { %v1704_v52 = vsel %vm1697_vm6, %v4331_v13, %v4584_v39 }
 0x338   : > { %1969 = vmatpush.bf16.msrb.mxu1 %v1704_v52  ;;  %1989 = vmatpush.bf16.msrb.mxu3 %v1732_v46  ;;  %v1656_v17 = vpop.permute.xlu2 %1655 }
 0x339   : > { %v1753_v5 = vsel %vm1697_vm6, %v4495_v56, %v1656_v17 }
 0x33b   : > { %1990 = vmatmul.bf16.vlgmr.msrb.gmra.mxu3 %v4464_v58 }
 0x33c   : > { %1970 = vmatpush.bf16.msrb.mxu1 %v1700_v44 }
 0x33e   : > { %v1676_v0 = vpop.permute.xlu1 %1675 }
 0x33f   : > { %v1761_v29 = vsel %vm1697_vm6, %v4472_v30, %v1676_v0  ;;  %1971 = vmatmul.bf16.vlgmr.msrb.gmra.mxu1 %v4404_v6  ;;  %v2078_v0 = vunpack.c.h.bf16 %v555_v9 }
 0x340   : > { %2039 = vmatpush.bf16.msra.mxu1 %v1761_v29  ;;  %v1576_v26 = vpop.permute.xlu2 %1575 }
 0x341   : > { %v1721_v41 = vsel %vm1697_vm6, %v4477_v21, %v1576_v26 }
 0x343   : > { %2645 = vmatmul.msk.bf16.vlgmr.msrb.gmra.mxu0 %vm1842_vm0, %v4372_v63 }
 0x346   : > { %v1666_v13 = vpop.permute.xlu1 %1665 }
 0x347   : > { %v1757_v19 = vsel %vm1697_vm6, %v4428_v55, %v1666_v13  ;;  %v557_v13 = vld [vmem:[%s3171_s21 + $0x10] sm:$0xff] }
 0x348   : > { %2040 = vmatpush.bf16.msra.mxu1 %v1757_v19 }
 0x34b   : > { %1995 = vmatmul.bf16.gmra.mxu3 %v4516_v1 }
 0x34c   : > { %2041 = vmatpush.bf16.msra.mxu1 %v1753_v5 }
 0x34d   : > { %v1694_v62 = vpop.permute.xlu0 %1693 }
 0x34e   : > { %v1768_v30 = vsel %vm1697_vm6, %v1692_v50, %v1694_v62  ;;  %v1596_v11 = vpop.permute.xlu1 %1595 }
 0x34f   : > { %2007 = vmatpush.bf16.msra.mxu2 %v1768_v30  ;;  %v1729_v49 = vsel %vm1697_vm6, %v4453_v33, %v1596_v11  ;;  %1976 = vmatmul.bf16.gmra.mxu1 %v4451_v2  ;;  %v1626_v33 = vpop.permute.xlu2 %1625  ;;  %v1896_v18 = vpop.f32.mrf.mxu2  ;;  %v2081_v30 = vunpack.c.l.bf16 %v557_v13 }
 0x350   : > { %2020 = vmatpush.bf16.msra.mxu0 %v1729_v49  ;;  %v1741_v21 = vsel %vm1697_vm6, %v4573_v37, %v1626_v33 }
 0x353   : > { %2646 = vmatmul.msk.bf16.gmra.mxu0 %vm1842_vm0, %v4414_v35 }
 0x355   : > { %v1684_v55 = vpop.permute.xlu0 %1683 }
 0x356   : > { %v1764_v3 = vsel %vm1697_vm6, %v1682_v23, %v1684_v55  ;;  %v1646_v31 = vpop.permute.xlu1 %1645 }
 0x357   : > { %2008 = vmatpush.bf16.msra.mxu2 %v1764_v3  ;;  %v1749_v57 = vsel %vm1697_vm6, %v4527_v32, %v1646_v31  ;;  %v1616_v12 = vpop.permute.xlu2 %1615 }
 0x358   : > { %2042 = vmatpush.bf16.msra.mxu1 %v1749_v57  ;;  %v1737_v22 = vsel %vm1697_vm6, %v4571_v7, %v1616_v12 }
 0x35a   : > { %2647 = vmatmul.msk.bf16.vlgmr.msra.gmra.mxu2 %vm1842_vm0, %v4372_v63 }
 0x35b   : > { %2700 = vmatpush.bf16.msrb.mxu2 %v1729_v49 }
 0x35d   : > { %v1586_v56 = vpop.permute.xlu0 %1585 }
 0x35e   : > { %v1725_v42 = vsel %vm1697_vm6, %v4519_v4, %v1586_v56  ;;  %v1566_v10 = vpop.permute.xlu1 %1565 }
 0x35f   : > { %2021 = vmatpush.bf16.msra.mxu0 %v1725_v42  ;;  %2701 = vmatpush.bf16.msrb.mxu2 %v1725_v42  ;;  %v1717_v34 = vsel %vm1697_vm6, %v4540_v47, %v1566_v10  ;;  %v1606_v61 = vpop.permute.xlu2 %1605 }
 0x360   : > { %v1733_v40 = vsel %vm1697_vm6, %v4553_v38, %v1606_v61 }
 0x363   : > { %2022 = vmatpush.bf16.msra.mxu0 %v1721_v41  ;;  %2702 = vmatpush.bf16.msrb.mxu2 %v1721_v41 }
 0x365   : > { %v1636_v48 = vpop.permute.xlu0 %1635 }
 0x366   : > { %v1745_v27 = vsel %vm1697_vm6, %v4564_v60, %v1636_v48  ;;  %v1556_v16 = vpop.permute.xlu1 %1555 }
 0x367   : > { %2043 = vmatpush.bf16.msra.mxu1 %v1745_v27  ;;  %2023 = vmatpush.bf16.msra.mxu0 %v1717_v34  ;;  %v1713_v4 = vsel %vm1697_vm6, %v4555_v15, %v1556_v16  ;;  %v4655_v50 = vpop.permute.xlu2 %1469  ;;  %v2082_v27 = vunpack.c.h.bf16 %v557_v13 }
 0x368   : > { %2703 = vmatpush.bf16.msrb.mxu2 %v1717_v34 }
 0x36a   : > { %2648 = vmatmul.msk.bf16.gmra.mxu2 %vm1842_vm0, %v4414_v35 }
 0x36b   : > { %2044 = vmatpush.bf16.msra.mxu1 %v1741_v21  ;;  %2024 = vmatpush.bf16.msra.mxu0 %v1713_v4 }
 0x36c   : > { %2704 = vmatpush.bf16.msrb.mxu2 %v1713_v4  ;;  %v559_v4 = vld [vmem:[%s3171_s21 + $0x20] sm:$0xff] }
 0x36f   : > { %v1546_v32 = vpop.permute.xlu1 %1545  ;;  %2045 = vmatpush.bf16.msra.mxu1 %v1737_v22  ;;  %v1915_v7 = vpop.f32.mrf.mxu3 }
 0x370   : > { %v1709_v25 = vsel %vm1697_vm6, %v4538_v59, %v1546_v32  ;;  %v1916_v52 = vadd.f32 %v1915_v7, %v4655_v50 }
 0x371   : > { %2025 = vmatpush.bf16.msra.mxu0 %v1709_v25  ;;  %2705 = vmatpush.bf16.msrb.mxu2 %v1709_v25  ;;  %v4678_v25 = vpop.permute.xlu2 %1484 }
 0x373   : > { %2046 = vmatpush.bf16.msra.mxu1 %v1733_v40 }
 0x376   : > { %2047 = vmatmul.bf16.vlgmr.msra.gmra.mxu1 %v4464_v58 }
 0x377   : > { %v1526_v38 = vpop.permute.xlu1 %1525  ;;  %v1917_v46 = vpop.f32.mrf.mxu3 }
 0x378   : > { %v1701_v58 = vsel %vm1697_vm6, %v4592_v53, %v1526_v38  ;;  %v1877_v60 = vpop.f32.mrf.mxu1 }
 0x37c   : > { %v1696_v51 = vpop.permute.xlu0 %1695 }
 0x37d   : > { %v1769_v47 = vsel %vm1697_vm6, %v1694_v62, %v1696_v51  ;;  %v2085_v51 = vunpack.c.l.bf16 %v559_v4 }
 0x37e   : > { %2064 = vmatpush.bf16.msra.mxu3 %v1769_v47 }
 0x37f   : > { %v4664_v62 = vpop.permute.xlu1 %1479  ;;  %v1920_v21 = vpop.f32.mrf.mxu3 }
 0x384   : > { %v1686_v43 = vpop.permute.xlu0 %1685 }
 0x385   : > { %v1765_v8 = vsel %vm1697_vm6, %v1684_v55, %v1686_v43 }
 0x386   : > { %2065 = vmatpush.bf16.msra.mxu3 %v1765_v8  ;;  %2052 = vmatmul.bf16.gmra.mxu1 %v4516_v1  ;;  %v1898_v1 = vpop.f32.mrf.mxu2 }
 0x389   : > { %2649 = vmatmul.msk.bf16.vlgmr.msra.gmra.mxu3 %vm1842_vm0, %v4372_v63 }
 0x38c   : > { %v1536_v59 = vpop.permute.xlu0 %1535 }
 0x38d   : > { %v1705_v28 = vsel %vm1697_vm6, %v4584_v39, %v1536_v59  ;;  %v2077_v39 = vunpack.c.l.bf16 %v555_v9  ;;  %v1922_v9 = vpop.f32.mrf.mxu3 }
 0x38e   : > { %2026 = vmatpush.bf16.msra.mxu0 %v1705_v28  ;;  %2706 = vmatpush.bf16.msrb.mxu2 %v1705_v28  ;;  %v1901_v15 = vpop.f32.mrf.mxu2  ;;  %v1921_v28 = vadd.f32 %v1920_v21, %v4664_v62 }
 0x392   : > { %2027 = vmatpush.bf16.msra.mxu0 %v1701_v58  ;;  %2707 = vmatpush.bf16.msrb.mxu2 %v1701_v58 }
 0x394   : > { %v4659_v23 = vpop.permute.xlu0 %1474 }
 0x395   : > { %2028 = vmatmul.bf16.vlgmr.msra.gmra.mxu0 %v4404_v6  ;;  %2033 = vmatmul.bf16.vlgmr.msrb.gmra.mxu2 %v4451_v2  ;;  %v1918_v57 = vadd.f32 %v1917_v46, %v4659_v23  ;;  %v1923_v46 = vadd.f32 %v1922_v9, %v4678_v25 }
 0x396   : > { %v4653_v54 = vpop.f32.mrf.mxu2 }
 0x399   : > { %2650 = vmatmul.msk.bf16.gmra.mxu3 %vm1842_vm0, %v4414_v35  ;;  %v1879_v35 = vpop.f32.mrf.mxu1 }
 0x39e   : > { %v1934_v6 = vpop.f32.mrf.mxu2 }
 0x39f   : > { %v1935_v53 = vadd.f32 %v1934_v6, %v1916_v52  ;;  %v561_v6 = vld [vmem:[%s3171_s21 + $0x30] sm:$0xff] }
 0x3a0   : > { %v1858_v63 = vpop.f32.mrf.mxu0 }
 0x3a1   : > { %v1859_v14 = vadd.f32 %v1858_v63, %v4655_v50  ;;  %v1882_v31 = vpop.f32.mrf.mxu1 }
 0x3a3   : > { %v1878_v37 = vadd.f32 %v1877_v60, %v1859_v14 }
 0x3a5   : > { %v1897_v24 = vadd.f32 %v1896_v18, %v1878_v37 }
 0x3a6   : > { %v1936_v17 = vpop.f32.mrf.mxu2 }
 0x3a7   : > { %v2093_v29 = vadd.f32 %v2077_v39, %v1897_v24  ;;  %v1937_v12 = vadd.f32 %v1936_v17, %v1918_v57  ;;  %v2089_v39 = vunpack.c.l.bf16 %v561_v6 }
 0x3a8   : > { %v1860_v45 = vpop.f32.mrf.mxu0 }
 0x3a9   : > { %v1861_v36 = vadd.f32 %v1860_v45, %v4659_v23  ;;  %v2109_v3 = vsel %vm3625_vm4, %v2093_v29, 0.0  ;;  %v1884_v38 = vpop.f32.mrf.mxu1 }
 0x3aa   : > { %v2178_v34 = vmul.f32 %v2109_v3, %v2109_v3 }
 0x3ab   : > { %v1880_v44 = vadd.f32 %v1879_v35, %v1861_v36 }
 0x3ad   : > { %v1899_v11 = vadd.f32 %v1898_v1, %v1880_v44 }
 0x3ae   : > { %v1939_v40 = vpop.f32.mrf.mxu2 }
 0x3af   : > { %v2097_v16 = vadd.f32 %v2081_v30, %v1899_v11  ;;  %v1940_v60 = vadd.f32 %v1939_v40, %v1921_v28 }
 0x3b0   : > { %v1863_v20 = vpop.f32.mrf.mxu0 }
 0x3b1   : > { %v1864_v49 = vadd.f32 %v1863_v20, %v4664_v62  ;;  %v2113_v59 = vsel %vm3625_vm4, %v2097_v16, 0.0  ;;  %v2086_v20 = vunpack.c.h.bf16 %v559_v4 }
 0x3b2   : > { %v2182_v45 = vmul.f32 %v2113_v59, %v2113_v59 }
 0x3b3   : > { %v1883_v48 = vadd.f32 %v1882_v31, %v1864_v49 }
 0x3b5   : > { %v1902_v47 = vadd.f32 %v1901_v15, %v1883_v48 }
 0x3b6   : > { %v1941_v52 = vpop.f32.mrf.mxu2 }
 0x3b7   : > { %v2101_v14 = vadd.f32 %v2085_v51, %v1902_v47  ;;  %v1942_v17 = vadd.f32 %v1941_v52, %v1923_v46  ;;  %v556_v47 = vld [vmem:[%s3171_s21 + $0x8] sm:$0xff] }
 0x3b8   : > { %v1865_v2 = vpop.f32.mrf.mxu0 }
 0x3b9   : > { %v1866_v43 = vadd.f32 %v1865_v2, %v4678_v25  ;;  %v2117_v36 = vsel %vm3625_vm4, %v2101_v14, 0.0  ;;  %v558_v14 = vld [vmem:[%s3171_s21 + $0x18] sm:$0xff] }
 0x3ba   : > { %v2186_v13 = vmul.f32 %v2117_v36, %v2117_v36  ;;  %v2083_v46 = vunpack.c.l.bf16 %v558_v14 }
 0x3bb   : > { %v1885_v15 = vadd.f32 %v1884_v38, %v1866_v43  ;;  %v2079_v38 = vunpack.c.l.bf16 %v556_v47 }
 0x3bc   : > { %v1972_v31 = vpop.f32.mrf.mxu1 }
 0x3bd   : > { %v1904_v35 = vadd.f32 %v4653_v54, %v1885_v15  ;;  %v1973_v51 = vadd.f32 %v1972_v31, %v4655_v50 }
 0x3bf   : > { %v2105_v54 = vadd.f32 %v2089_v39, %v1904_v35  ;;  %v2080_v35 = vunpack.c.h.bf16 %v556_v47 }
 0x3c0   : > { %v1953_v19 = vpop.f32.mrf.mxu0 }
 0x3c1   : > { %v1954_v5 = vadd.f32 %v1953_v19, %v1935_v53  ;;  %v2090_v19 = vunpack.c.h.bf16 %v561_v6 }
 0x3c3   : > { %v2094_v26 = vadd.f32 %v2078_v0, %v1954_v5 }
 0x3c4   : > { %v1974_v48 = vpop.f32.mrf.mxu1 }
 0x3c5   : > { %v2110_v56 = vsel %vm3638_vm14, %v2094_v26, 0.0  ;;  %v2121_v26 = vsel %vm3625_vm4, %v2105_v54, 0.0  ;;  %vm2169_vm4 = vcmask 7168  }
 0x3c6   : > { %v2125_v42 = vpack.c.bf16 %v2110_v56, %v2109_v3  ;;  %v4672_v10 = vadd.f32 %v2110_v56, %v2109_v3  ;;  %v2179_v41 = vmul.f32 %v2110_v56, %v2110_v56 }
 0x3c8   : > { %2133 = vst [vmem:[%s3174_s15] sm:$0xff] %v2125_v42  ;;  %v1955_v22 = vpop.f32.mrf.mxu0  ;;  %v4676_v32 = vadd.f32 %v2179_v41, %v2178_v34  ;;  %v2190_v41 = vmul.f32 %v2121_v26, %v2121_v26 }
 0x3c9   : > { %v1956_v61 = vadd.f32 %v1955_v22, %v1937_v12  ;;  %v1991_v12 = vpop.f32.mrf.mxu3 }
 0x3cb   : > { %v2098_v8 = vadd.f32 %v2082_v27, %v1956_v61 }
 0x3cc   : > { %v1977_v16 = vpop.f32.mrf.mxu1 }
 0x3cd   : > { %v2114_v18 = vsel %vm3638_vm14, %v2098_v8, 0.0  ;;  %v1992_v8 = vadd.f32 %v1991_v12, %v1973_v51  ;;  %v1978_v28 = vadd.f32 %v1977_v16, %v4664_v62 }
 0x3ce   : > { %v2127_v58 = vpack.c.bf16 %v2114_v18, %v2113_v59  ;;  %v4686_v1 = vadd.f32 %v2114_v18, %v2113_v59  ;;  %v2183_v63 = vmul.f32 %v2114_v18, %v2114_v18 }
 0x3d0   : > { %2135 = vst [vmem:[%s3174_s15 + $0x10] sm:$0xff] %v2127_v58  ;;  %v1958_v7 = vpop.f32.mrf.mxu0  ;;  %v4690_v37 = vadd.f32 %v2183_v63, %v2182_v45  ;;  %v1975_v58 = vadd.f32 %v1974_v48, %v4659_v23  ;;  %v560_v45 = vld [vmem:[%s3171_s21 + $0x28] sm:$0xff] }
 0x3d1   : > { %v1959_v2 = vadd.f32 %v1958_v7, %v1940_v60  ;;  %v1993_v27 = vpop.f32.mrf.mxu3  ;;  %v2088_v12 = vunpack.c.h.bf16 %v560_v45 }
 0x3d2   : > { %v1994_v6 = vadd.f32 %v1993_v27, %v1975_v58 }
 0x3d3   : > { %v2102_v24 = vadd.f32 %v2086_v20, %v1959_v2 }
 0x3d4   : > { %v1979_v21 = vpop.f32.mrf.mxu1 }
 0x3d5   : > { %v2118_v53 = vsel %vm3638_vm14, %v2102_v24, 0.0  ;;  %v1980_v2 = vadd.f32 %v1979_v21, %v4678_v25  ;;  %v2084_v21 = vunpack.c.h.bf16 %v558_v14 }
 0x3d6   : > { %v2129_v44 = vpack.c.bf16 %v2118_v53, %v2117_v36  ;;  %v4698_v0 = vadd.f32 %v2118_v53, %v2117_v36  ;;  %v2187_v29 = vmul.f32 %v2118_v53, %v2118_v53  ;;  %v2087_v36 = vunpack.c.l.bf16 %v560_v45 }
 0x3d8   : > { %2137 = vst [vmem:[%s3174_s15 + $0x20] sm:$0xff] %v2129_v44  ;;  %v1960_v5 = vpop.f32.mrf.mxu0  ;;  %v4701_v30 = vadd.f32 %v2187_v29, %v2186_v13  ;;  %v562_v29 = vld [vmem:[%s3171_s21 + $0x38] sm:$0xff] }
 0x3d9   : > { %v1961_v11 = vadd.f32 %v1960_v5, %v1942_v17  ;;  %v1996_v55 = vpop.f32.mrf.mxu3 }
 0x3da   : > { %v1997_v15 = vadd.f32 %v1996_v55, %v1978_v28 }
 0x3db   : > { %v2106_v49 = vadd.f32 %v2090_v19, %v1961_v11 }
 0x3dd   : > { %v2122_v3 = vsel %vm3638_vm14, %v2106_v49, 0.0  ;;  %v2010_v4 = vpop.f32.mrf.mxu2 }
 0x3de   : > { %v2131_v57 = vpack.c.bf16 %v2122_v3, %v2121_v26  ;;  %v4707_v56 = vadd.f32 %v2122_v3, %v2121_v26  ;;  %v2191_v42 = vmul.f32 %v2122_v3, %v2122_v3  ;;  %v2011_v18 = vadd.f32 %v2010_v4, %v1992_v8 }
 0x3df   : > { %v2091_v3 = vunpack.c.l.bf16 %v562_v29 }
 0x3e0   : > { %2139 = vst [vmem:[%s3174_s15 + $0x30] sm:$0xff] %v2131_v57  ;;  %v4710_v34 = vadd.f32 %v2191_v42, %v2190_v41  ;;  %v2095_v20 = vadd.f32 %v2079_v38, %v2011_v18 }
 0x3e1   : > { %v1998_v22 = vpop.f32.mrf.mxu3 }
 0x3e2   : > { %v2111_v44 = vsel %vm3651_vm13, %v2095_v20, 0.0  ;;  %v1999_v17 = vadd.f32 %v1998_v22, %v1980_v2 }
 0x3e3   : > { %v2146_v57 = vadd.f32 %v4672_v10, %v2111_v44 }
 0x3e5   : > { %v2012_v33 = vpop.f32.mrf.mxu2 }
 0x3e6   : > { %v2013_v52 = vadd.f32 %v2012_v33, %v1994_v6 }
 0x3e8   : > { %v2099_v49 = vadd.f32 %v2083_v46, %v2013_v52 }
 0x3ed   : > { %v2015_v40 = vpop.f32.mrf.mxu2 }
 0x3ee   : > { %v2016_v24 = vadd.f32 %v2015_v40, %v1997_v15 }
 0x3f0   : > { %v2103_v5 = vadd.f32 %v2087_v36, %v2016_v24 }
 0x3f3   : > { %v2048_v61 = vpop.f32.mrf.mxu1 }
 0x3f5   : > { %v2017_v63 = vpop.f32.mrf.mxu2 }
 0x3f6   : > { %v2018_v26 = vadd.f32 %v2017_v63, %v1999_v17 }
 0x3f8   : > { %v2107_v10 = vadd.f32 %v2091_v3, %v2018_v26  ;;  %v2142_v26 = vld [vmem:[#allocation2 + $0x8] sm:$0xff]  ;;  %v2174_v3 = vld [vmem:[#allocation3] sm:$0xff] }
 0x3fa   : > { %v2123_v15 = vsel %vm3651_vm13, %v2107_v10, 0.0 }
 0x3fb   : > { %v2050_v59 = vpop.f32.mrf.mxu1  ;;  %v2161_v24 = vadd.f32 %v4707_v56, %v2123_v15 }
 0x403   : > { %v2053_v54 = vpop.f32.mrf.mxu1 }
 0x40b   : > { %v2055_v58 = vpop.f32.mrf.mxu1 }
 0x40c   : > { %v2067_v43 = vpop.f32.mrf.mxu3 }
 0x412   : > { %v2029_v60 = vpop.f32.mrf.mxu0 }
 0x413   : > { %v2030_v7 = vadd.f32 %v2029_v60, %v4655_v50 }
 0x414   : > { %v2069_v9 = vpop.f32.mrf.mxu3 }
 0x415   : > { %v2049_v39 = vadd.f32 %v2048_v61, %v2030_v7  ;;  %v2180_v61 = vmul.f32 %v2111_v44, %v2111_v44 }
 0x417   : > { %v2068_v13 = vadd.f32 %v2067_v43, %v2049_v39  ;;  %v2195_v60 = vadd.f32 %v4676_v32, %v2180_v61 }
 0x418   : > { %v2034_v19 = vpop.f32.mrf.mxu2 }
 0x419   : > { %v2096_v50 = vadd.f32 %v2080_v35, %v2068_v13  ;;  %v2035_v11 = vadd.f32 %v2034_v19, %v4664_v62  ;;  %v2119_v62 = vsel %vm3651_vm13, %v2103_v5, 0.0  ;;  %v2192_v35 = vmul.f32 %v2123_v15, %v2123_v15 }
 0x41a   : > { %v2031_v31 = vpop.f32.mrf.mxu0  ;;  %v2156_v43 = vadd.f32 %v4698_v0, %v2119_v62  ;;  %v2092_v0 = vunpack.c.h.bf16 %v562_v29  ;;  %v2188_v13 = vmul.f32 %v2119_v62, %v2119_v62 }
 0x41b   : > { %v2032_v42 = vadd.f32 %v2031_v31, %v4659_v23  ;;  %v2054_v41 = vadd.f32 %v2053_v54, %v2035_v11  ;;  %v2112_v27 = vsel %vm3670_vm12, %v2096_v50, 0.0  ;;  %v2115_v23 = vsel %vm3651_vm13, %v2099_v49, 0.0  ;;  %v2141_v50 = vld [vmem:[#allocation2] sm:$0xff]  ;;  %v2143_v49 = vld [vmem:[#allocation2 + $0x10] sm:$0xff] }
 0x41c   : > { %v2072_v16 = vpop.f32.mrf.mxu3  ;;  %v2126_v4 = vpack.c.bf16 %v2112_v27, %v2111_v44  ;;  %v2147_v55 = vadd.f32 %v2146_v57, %v2112_v27  ;;  %v2181_v8 = vmul.f32 %v2112_v27, %v2112_v27  ;;  %v2151_v45 = vadd.f32 %v4686_v1, %v2115_v23  ;;  %v2175_v27 = vld [vmem:[#allocation3 + $0x8] sm:$0xff] }
 0x41d   : > { %v2051_v33 = vadd.f32 %v2050_v59, %v2032_v42  ;;  %v2073_v22 = vadd.f32 %v2072_v16, %v2054_v41  ;;  %v2210_v29 = vadd.f32 %v4710_v34, %v2192_v35  ;;  %v2205_v56 = vadd.f32 %v4701_v30, %v2188_v13  ;;  %v2144_v30 = vld [vmem:[#allocation2 + $0x18] sm:$0xff] }
 0x41e   : > { %2134 = vst [vmem:[%s3174_s15 + $0x8] sm:$0xff] %v2126_v4  ;;  %2148 = vadd.xlane.f32.xlu0 %v2147_v55  ;;  %v2196_v2 = vadd.f32 %v2195_v60, %v2181_v8  ;;  %v2177_v16 = vld [vmem:[#allocation3 + $0x18] sm:$0xff] }
 0x41f   : > { %v2070_v40 = vadd.f32 %v2069_v9, %v2051_v33  ;;  %v2104_v51 = vadd.f32 %v2088_v12, %v2073_v22  ;;  %v2184_v9 = vmul.f32 %v2115_v23, %v2115_v23  ;;  %v2176_v22 = vld [vmem:[#allocation3 + $0x10] sm:$0xff] }
 0x420   : > { %v2036_v47 = vpop.f32.mrf.mxu2 }
 0x421   : > { %v2100_v28 = vadd.f32 %v2084_v21, %v2070_v40  ;;  %v2120_v18 = vsel %vm3670_vm12, %v2104_v51, 0.0  ;;  %v2037_v59 = vadd.f32 %v2036_v47, %v4678_v25  ;;  %v2200_v52 = vadd.f32 %v4690_v37, %v2184_v9 }
 0x422   : > { %v2130_v38 = vpack.c.bf16 %v2120_v18, %v2119_v62  ;;  %v2157_v63 = vadd.f32 %v2156_v43, %v2120_v18  ;;  %v2189_v54 = vmul.f32 %v2120_v18, %v2120_v18 }
 0x423   : > { %v2056_v20 = vadd.f32 %v2055_v58, %v2037_v59  ;;  %v2116_v14 = vsel %vm3670_vm12, %v2100_v28, 0.0 }
 0x424   : > { %2138 = vst [vmem:[%s3174_s15 + $0x28] sm:$0xff] %v2130_v38  ;;  %v2074_v7 = vpop.f32.mrf.mxu3  ;;  %2158 = vadd.xlane.f32.xlu2 %v2157_v63  ;;  %v2152_v25 = vadd.f32 %v2151_v45, %v2116_v14  ;;  %v2128_v6 = vpack.c.bf16 %v2116_v14, %v2115_v23  ;;  %v2185_v36 = vmul.f32 %v2116_v14, %v2116_v14 }
 0x425   : > { %v2075_v1 = vadd.f32 %v2074_v7, %v2056_v20  ;;  %v2206_v5 = vadd.f32 %v2205_v56, %v2189_v54 }
 0x426   : > { %2153 = vadd.xlane.f32.xlu1 %v2152_v25  ;;  %2136 = vst [vmem:[%s3174_s15 + $0x18] sm:$0xff] %v2128_v6  ;;  %2197 = vadd.xlane.f32.xlu0 %v2196_v2  ;;  %v2201_v17 = vadd.f32 %v2200_v52, %v2185_v36 }
 0x427   : > { %v2108_v32 = vadd.f32 %v2092_v0, %v2075_v1 }
 0x429   : > { %v2124_v39 = vsel %vm3670_vm12, %v2108_v32, 0.0 }
 0x42a   : > { %v2132_v46 = vpack.c.bf16 %v2124_v39, %v2123_v15  ;;  %v2162_v53 = vadd.f32 %v2161_v24, %v2124_v39  ;;  %v2193_v44 = vmul.f32 %v2124_v39, %v2124_v39 }
 0x42c   : > { %2140 = vst [vmem:[%s3174_s15 + $0x38] sm:$0xff] %v2132_v46  ;;  %2163 = vadd.xlane.f32.xlu2 %v2162_v53  ;;  %v2211_v19 = vadd.f32 %v2210_v29, %v2193_v44 }
 0x42e   : > { %2202 = vadd.xlane.f32.xlu1 %v2201_v17  ;;  %2212 = vadd.xlane.f32.xlu0 %v2211_v19 }
 0x434   : > { %2207 = vadd.xlane.f32.xlu2 %v2206_v5 }
 0x491   : > { %v2149_v37 = vpop.xlane.xlu0 %2148 }
 0x492   : > { %v2165_v11 = vadd.f32 %v2149_v37, %v2141_v50 }
 0x494   : > { %2170 = vst.msk [vmem:[#allocation2] sm:$0xff] %vm2169_vm4, %v2165_v11 }
 0x497   : > { %v2159_v34 = vpop.xlane.xlu2 %2158 }
 0x498   : > { %v2167_v31 = vadd.f32 %v2159_v34, %v2143_v49 }
 0x499   : > { %v2154_v57 = vpop.xlane.xlu1 %2153  ;;  %v2198_v42 = vpop.xlane.xlu0 %2197 }
 0x49a   : > { %2172 = vst.msk [vmem:[#allocation2 + $0x10] sm:$0xff] %vm2169_vm4, %v2167_v31  ;;  %v2166_v41 = vadd.f32 %v2154_v57, %v2142_v26  ;;  %v2214_v12 = vadd.f32 %v2198_v42, %v2174_v3 }
 0x49c   : > { %2171 = vst.msk [vmem:[#allocation2 + $0x8] sm:$0xff] %vm2169_vm4, %v2166_v41 }
 0x49d   : > { %2218 = vst.msk [vmem:[#allocation3] sm:$0xff] %vm2169_vm4, %v2214_v12 }
 0x49f   : > { %v2164_v48 = vpop.xlane.xlu2 %2163 }
 0x4a0   : > { %v2168_v4 = vadd.f32 %v2164_v48, %v2144_v30 }
 0x4a1   : > { %v2203_v55 = vpop.xlane.xlu1 %2202  ;;  %v2213_v21 = vpop.xlane.xlu0 %2212 }
 0x4a2   : > { %2173 = vst.msk [vmem:[#allocation2 + $0x18] sm:$0xff] %vm2169_vm4, %v2168_v4  ;;  %v2215_v62 = vadd.f32 %v2203_v55, %v2175_v27  ;;  %v2217_v33 = vadd.f32 %v2213_v21, %v2177_v16 }
 0x4a4   : > { %2219 = vst.msk [vmem:[#allocation3 + $0x8] sm:$0xff] %vm2169_vm4, %v2215_v62 }
 0x4a5   : > { %2221 = vst.msk [vmem:[#allocation3 + $0x18] sm:$0xff] %vm2169_vm4, %v2217_v33 }
 0x4a6   : > { %2225 = sbr.rel (%p2651_p3) target bundleno = 1230 (0x4ce), region = 161 }
 0x4a7   : > { %v2208_v61 = vpop.xlane.xlu2 %2207 }
 0x4a8   : > { %v2216_v23 = vadd.f32 %v2208_v61, %v2176_v22 }
 0x4aa   : > { %2220 = vst.msk [vmem:[#allocation3 + $0x10] sm:$0xff] %vm2169_vm4, %v2216_v23 }
 0x4ab   : > { %v2226_v10 = vld [vmem:[#allocation2] sm:$0xff]  ;;  %v2227_v51 = vld [vmem:[#allocation2 + $0x8] sm:$0xff]  ;;  %v2228_v18 = vld [vmem:[#allocation2 + $0x10] sm:$0xff] }
 0x4ac   : > { %v2234_v40 = vld [vmem:[#allocation3] sm:$0xff]  ;;  %v2230_v47 = vmul.f32 0.001953125, %v2226_v10  ;;  %v2231_v8 = vmul.f32 0.001953125, %v2227_v51  ;;  %v2235_v28 = vld [vmem:[#allocation3 + $0x8] sm:$0xff]  ;;  %v2232_v58 = vmul.f32 0.001953125, %v2228_v18  ;;  %v2229_v45 = vld [vmem:[#allocation2 + $0x18] sm:$0xff] }
 0x4ad   : > { %v2238_v43 = vmul.f32 0.001953125, %v2234_v40  ;;  %v2239_v38 = vmul.f32 0.001953125, %v2235_v28  ;;  %v2237_v60 = vld [vmem:[#allocation3 + $0x18] sm:$0xff]  ;;  %v2233_v0 = vmul.f32 0.001953125, %v2229_v45 }
 0x4ae   : > { %v2242_v15 = vmul.f32 %v2230_v47, %v2230_v47  ;;  %2254 = vst.msk [vmem:[#allocation8] sm:$0xff] %vm2169_vm4, %v2230_v47  ;;  %v2243_v20 = vmul.f32 %v2231_v8, %v2231_v8  ;;  %v2241_v14 = vmul.f32 0.001953125, %v2237_v60  ;;  %v2244_v7 = vmul.f32 %v2232_v58, %v2232_v58 }
 0x4af   : > { %2255 = vst.msk [vmem:[#allocation8 + $0x8] sm:$0xff] %vm2169_vm4, %v2231_v8  ;;  %v2245_v2 = vmul.f32 %v2233_v0, %v2233_v0 }
 0x4b0   : > { %v2246_v25 = vsub.f32 %v2238_v43, %v2242_v15  ;;  %v2247_v6 = vsub.f32 %v2239_v38, %v2243_v20  ;;  %2256 = vst.msk [vmem:[#allocation8 + $0x10] sm:$0xff] %vm2169_vm4, %v2232_v58 }
 0x4b1   : > { %v2236_v59 = vld [vmem:[#allocation3 + $0x10] sm:$0xff]  ;;  %2257 = vst.msk [vmem:[#allocation8 + $0x18] sm:$0xff] %vm2169_vm4, %v2233_v0  ;;  %v2249_v32 = vsub.f32 %v2241_v14, %v2245_v2 }
 0x4b2   : > { %v2240_v63 = vmul.f32 0.001953125, %v2236_v59  ;;  %v2250_v1 = vmax.f32 %v2246_v25, 0.0  ;;  %v2251_v35 = vmax.f32 %v2247_v6, 0.0 }
 0x4b3   : > { %v2253_v52 = vmax.f32 %v2249_v32, 0.0 }
 0x4b4   : > { %v2248_v9 = vsub.f32 %v2240_v63, %v2244_v7  ;;  %v2258_v36 = vadd.f32 1e-05, %v2250_v1  ;;  %v2259_v39 = vadd.f32 1e-05, %v2251_v35 }
 0x4b5   : > { %v2261_v53 = vadd.f32 1e-05, %v2253_v52 }
 0x4b6   : > { %v2252_v24 = vmax.f32 %v2248_v9, 0.0  ;;  %2854 = vrsqrt.f32 %v2258_v36  ;;  %vm2268_vm14 = vweird.f32 %v2258_v36  ;;  %vm2278_vm12 = vweird.f32 %v2259_v39 }
 0x4b7   : > { %2856 = vrsqrt.f32 %v2259_v39  ;;  %vm2298_vm11 = vweird.f32 %v2261_v53 }
 0x4b8   : > { %v2260_v46 = vadd.f32 1e-05, %v2252_v24 }
 0x4ba   : > { %2858 = vrsqrt.f32 %v2260_v46  ;;  %vm2288_vm2 = vweird.f32 %v2260_v46 }
 0x4bb   : > { %2860 = vrsqrt.f32 %v2261_v53 }
 0x4bc   : > { %v2855_v44 = vpop.eup %2854 }
 0x4bd   : > { %v2857_v29 = vpop.eup %2856  ;;  %v2263_v13 = vmul.f32 %v2855_v44, %v2258_v36  ;;  %vm2269_vm13 = vweird.f32 %v2855_v44 }
 0x4be   : > { %v2273_v19 = vmul.f32 %v2857_v29, %v2259_v39  ;;  %vm2279_vm7 = vweird.f32 %v2857_v29  ;;  %vm2270_vm3 = vmor %vm2268_vm14, %vm2269_vm13 }
 0x4bf   : > { %v2264_v56 = vmul.f32 %v2855_v44, %v2263_v13  ;;  %vm2280_vm1 = vmor %vm2278_vm12, %vm2279_vm7 }
 0x4c0   : > { %v2859_v17 = vpop.eup %2858  ;;  %v2274_v50 = vmul.f32 %v2857_v29, %v2273_v19 }
 0x4c1   : > { %v2861_v54 = vpop.eup %2860  ;;  %v2283_v5 = vmul.f32 %v2859_v17, %v2260_v46  ;;  %v2265_v11 = vmul.f32 0.5, %v2264_v56  ;;  %vm2289_vm15 = vweird.f32 %v2859_v17 }
 0x4c2   : > { %v2293_v37 = vmul.f32 %v2861_v54, %v2261_v53  ;;  %v2275_v34 = vmul.f32 0.5, %v2274_v50  ;;  %vm2299_vm10 = vweird.f32 %v2861_v54  ;;  %vm2290_vm9 = vmor %vm2288_vm2, %vm2289_vm15 }
 0x4c3   : > { %v2284_v49 = vmul.f32 %v2859_v17, %v2283_v5  ;;  %v2266_v3 = vsub.f32 1.5, %v2265_v11  ;;  %vm2300_vm8 = vmor %vm2298_vm11, %vm2299_vm10 }
 0x4c4   : > { %v2294_v26 = vmul.f32 %v2861_v54, %v2293_v37  ;;  %v2276_v57 = vsub.f32 1.5, %v2275_v34 }
 0x4c5   : > { %v2285_v31 = vmul.f32 0.5, %v2284_v49  ;;  %v2267_v41 = vmul.f32 %v2855_v44, %v2266_v3 }
 0x4c6   : > { %v2295_v42 = vmul.f32 0.5, %v2294_v26  ;;  %v2277_v30 = vmul.f32 %v2857_v29, %v2276_v57 }
 0x4c7   : > { %v2286_v12 = vsub.f32 1.5, %v2285_v31  ;;  %v2271_v27 = vsel %vm2270_vm3, %v2855_v44, %v2267_v41 }
 0x4c8   : > { %v2296_v48 = vsub.f32 1.5, %v2295_v42  ;;  %2302 = vst.msk [vmem:[#allocation10] sm:$0xff] %vm2169_vm4, %v2271_v27  ;;  %v2281_v4 = vsel %vm2280_vm1, %v2857_v29, %v2277_v30 }
 0x4c9   : > { %v2287_v16 = vmul.f32 %v2859_v17, %v2286_v12  ;;  %2303 = vst.msk [vmem:[#allocation10 + $0x8] sm:$0xff] %vm2169_vm4, %v2281_v4 }
 0x4ca   : > { %v2297_v55 = vmul.f32 %v2861_v54, %v2296_v48 }
 0x4cb   : > { %v2291_v21 = vsel %vm2290_vm9, %v2859_v17, %v2287_v16 }
 0x4cc   : > { %2304 = vst.msk [vmem:[#allocation10 + $0x10] sm:$0xff] %vm2169_vm4, %v2291_v21  ;;  %v2301_v62 = vsel %vm2300_vm8, %v2861_v54, %v2297_v55 }
 0x4cd   : > { %2305 = vst.msk [vmem:[#allocation10 + $0x18] sm:$0xff] %vm2169_vm4, %v2301_v62 }
 0x4ce PF: > { %2312 = sbr.rel (!%p3136_p11) target bundleno = 1246 (0x4de), region = 165  ;;  %s2653_s21 = sshll.u32 (%p3136_p11), %s3083_s16, 4  ;;  %v2329_v33 = vld [vmem:[%s3174_s15] sm:$0xff] (%p3136_p11)  ;;  %v2331_v22 = vld [vmem:[%s3174_s15 + $0x8] sm:$0xff] (%p3136_p11)  ;;  %v2333_v61 = vld [vmem:[%s3174_s15 + $0x10] sm:$0xff] (%p3136_p11) }
 0x4cf   : > { %s5014_s13 = sld [smem:[#allocation43_spill]] (%p3136_p11)  ;;  %v2335_v23 = vld [vmem:[%s3174_s15 + $0x18] sm:$0xff] (%p3136_p11)  ;;  %v2337_v10 = vld [vmem:[%s3174_s15 + $0x20] sm:$0xff] (%p3136_p11)  ;;  %v2339_v40 = vld [vmem:[%s3174_s15 + $0x28] sm:$0xff] (%p3136_p11) }
 0x4d0   : > { %v2341_v51 = vld [vmem:[%s3174_s15 + $0x30] sm:$0xff] (%p3136_p11)  ;;  %v2343_v47 = vld [vmem:[%s3174_s15 + $0x38] sm:$0xff] (%p3136_p11) }
 0x4d5   : > { %s2433_s8 = scalar_lea.vmem %s5014_s13, %s2653_s21 }
 0x4d6   : > { %2654 = vst [vmem:[%s2433_s8 + $0x10] sm:$0xff] %v2329_v33 }
 0x4d7   : > { %2655 = vst [vmem:[%s2433_s8 + $0x18] sm:$0xff] %v2331_v22 }
 0x4d8   : > { %2656 = vst [vmem:[%s2433_s8 + $0x50] sm:$0xff] %v2333_v61 }
 0x4d9   : > { %2657 = vst [vmem:[%s2433_s8 + $0x58] sm:$0xff] %v2335_v23 }
 0x4da   : > { %2658 = vst [vmem:[%s2433_s8 + $0x90] sm:$0xff] %v2337_v10 }
 0x4db   : > { %2659 = vst [vmem:[%s2433_s8 + $0x98] sm:$0xff] %v2339_v40 }
 0x4dc   : > { %2660 = vst [vmem:[%s2433_s8 + $0xd0] sm:$0xff] %v2341_v51 }
 0x4dd   : > { %2661 = vst [vmem:[%s2433_s8 + $0xd8] sm:$0xff] %v2343_v47 }
 0x4de PF: > { %s5015_s7 = sld [smem:[#allocation44_spill]]  ;;  %s2993_s26 = smov [#allocation8]  }
 0x4df   : > { %s2353_s24 = sshll.u32 %s2993_s26, 4  ;;  %s2994_s28 = smov 128   ;;  %s2354_s24 = int_to_ptr.vmem [resolvable:$true] %s2353_s24 }
 0x4e0   : > { %s2995_s22 = smov 8   ;;  %s2996_s15 = smov [#allocation10]  }
 0x4e1   : > { %s2367_s23 = sshll.u32 %s2996_s15, 4  ;;  %s5016_s19 = sld [smem:[#allocation45_spill]]  ;;  %s2368_s23 = int_to_ptr.vmem [resolvable:$true] %s2367_s23 }
 0x4e4   : > { %s2355_s20 = sshll.u32 %s5015_s7, 4  ;;  %s2356_s20 = int_to_ptr.hbm [resolvable:$true] %s2355_s20 }
 0x4e5   : > { %2769 = dma.vmem_to_hbm [thread:$0]  (%p216_p9), %s2354_s24, 512, %s2356_s20, [#allocation9], %s2994_s28, %s2994_s28, %s2995_s22  }
 0x4e7   : > { %s2369_s11 = sshll.u32 %s5016_s19, 4  ;;  %s2370_s11 = int_to_ptr.hbm [resolvable:$true] %s2369_s11 }
 0x4e8   : > { %2771 = dma.vmem_to_hbm [thread:$0]  (%p216_p9), %s2368_s23, 512, %s2370_s11, [#allocation11], %s2994_s28, %s2994_s28, %s2995_s22  }
 0x4e9   : > { %2947 = dma.done.wait (%p216_p9), [#allocation9], 512  }
 0x4ea   : > { %2949 = vsyncadd (%p216_p9), [#allocation9], 4294966784 }
 0x4eb   : > { %2951 = dma.done.wait (%p216_p9), [#allocation11], 512  }
 0x4ec   : > { %2953 = vsyncadd (%p216_p9), [#allocation11], 4294966784 }
 0x4ed PF: > { %p19_p4 = scmp.ge.s32.totalorder %s3086_s17, 4   ;;  %s5017_s30 = smov %s2960_s10 }
 0x4ee   : > { %s5018_s10 = smov %s3126_s25  ;;  %s5019_s11 = smov %s2968_s12 }
 0x4ef   : > { %s5020_s12 = smov %s3113_s9  ;;  %s5021_s13 = smov %s2976_s14 }
 0x4f0   : > { %s5022_s14 = smov %s3107_s29  ;;  %s5023_s15 = smov %s3086_s17 }
 0x4f1   :  { %21 = sbr.rel (!%p19_p4) target bundleno = 9 (0x9), region = 252 }
 0x4f6   :  { %2398 = vsyncpa [#allocation9], 1 }
 0x4f7   :  { %2400 = vsyncpa [#allocation9 + $0x1], 1 }
 0x4f8   :  { %2401 = vsyncpa [#allocation11], 1 }

// kernel: res_blocks_forward.4
= control target key start
LH: loop header
LB: loop body
LE: loop exit
PB: predicated region body
PF: predicated region fallthrough
CT: control target
= control target key end

     0   :  { %s4695_s0 = inlined_call_operand.vmem [shape: bf16[32,2048], index: 0, kind: input, shape index: {}, may-alias: {0,1,2}]   ;;  %s4696_s1 = inlined_call_operand.vmem [shape: bf16[32,2048], index: 1, kind: input, shape index: {}, may-alias: {0,1,2}]   ;;  %s4697_s2 = inlined_call_operand.vmem [shape: bf16[32,2048], index: 2, kind: input, shape index: {}, may-alias: {0,1,2}]   ;;  %s4698_s3 = inlined_call_operand.vmem [shape: bf16[32,288], index: 3, kind: input, shape index: {}]   ;;  %s4699_s4 = inlined_call_operand.vmem [shape: f32[32,1], index: 4, kind: input, shape index: {}]   ;;  %s4700_s5 = inlined_call_operand.vmem [shape: f32[32,1], index: 5, kind: input, shape index: {}]   ;;  %s4701_s6 = inlined_call_operand.vmem [shape: f32[32,1], index: 6, kind: input, shape index: {}]   ;;  %s4702_s7 = inlined_call_operand.vmem [shape: bf16[32,2048], index: 7, kind: output, shape index: {0}]   ;;  %s4703_s8 = inlined_call_operand.vmem [shape: f32[32,1], index: 8, kind: output, shape index: {1}]   ;;  %s4704_s9 = inlined_call_operand.vmem [shape: f32[32,1], index: 9, kind: output, shape index: {2}]  }
   0x1   :  { %4733 = sst [smem:[#allocation37_spill]] %s4702_s7 }
   0x2   :  { %4734 = sst [smem:[#allocation38_spill]] %s4703_s8 }
   0x3   :  { %4735 = sst [smem:[#allocation39_spill]] %s4704_s9 }
   0x4   :  { %s2915_s30 = smov 0   ;;  %s2917_s10 = smov 0  }
   0x5   :  { %s2919_s11 = smov 0   ;;  %s2921_s12 = smov 0  }
   0x6   :  { %s2923_s13 = smov 0   ;;  %s2925_s14 = smov 0  }
   0x7   :  { %s2927_s15 = smov 0  }
   0x8 LB: > { %s2951_s16 = sadd.s32 4294967295, %s2852_s15   ;;  %s2954_s17 = sadd.s32 1, %s2852_s15   ;;  %s2852_s15 = sphi %s2927_s15, %s4898_s15   ;;  %s2848_s14 = sphi %s2925_s14, %s4897_s14   ;;  %s2844_s13 = sphi %s2923_s13, %s4896_s13   ;;  %s2840_s12 = sphi %s2921_s12, %s4895_s12   ;;  %s2836_s11 = sphi %s2919_s11, %s4894_s11   ;;  %s2832_s10 = sphi %s2917_s10, %s4893_s10   ;;  %s2828_s30 = sphi %s2915_s30, %s4892_s30  }
   0x9   : > { %s2620_s18 = sshll.u32 %s2852_s15, 2  ;;  %s33_s19 = sadd.s32 1, %s2848_s14 }
   0xa   : > { %s2958_s20 = sadd.s32 4, %s2620_s18  ;;  %p40_p0 = scmp.ne.s32.totalorder %s2848_s14, %s2844_s13 }
   0xb   : > { %s2456_s21 = sadd.s32 4294967295, %s2958_s20  ;;  %s2623_s22 = sadd.s32 4, %s2958_s20 }
   0xc   : > { %s2458_s23 = sadd.s32 4294967295, %s2623_s22  ;;  %p41_p1 = scmp.eq.s32.totalorder %s2852_s15, 0 }
   0xd   : > { %s30_s24 = ssub.s32 %s2456_s21, %s2458_s23  ;;  %s57_s25 = sadd.s32 1, %s2954_s17 }
   0xe   : > { %p31_p2 = scmp.eq.s32.totalorder %s30_s24, 0  ;;  %p2968_p3 = por %p41_p1, %p40_p0 }
   0xf   : > { %s58_s27 = ssub.s32 %s2954_s17, %s57_s25  ;;  %s61_s28 = sadd.s32 1, %s2840_s12 }
  0x10   : > { %s2975_s29 = scalar_select %p31_p2, %s2848_s14, %s33_s19  }
  0x11   : > { %p59_p4 = scmp.eq.s32.totalorder %s58_s27, 0  ;;  %p68_p5 = scmp.ne.s32.totalorder %s2840_s12, %s2836_s11 }
  0x12   : > { %s2625_s22 = sadd.s32 8, %s2620_s18  ;;  %s2627_s23 = sadd.s32 8, %s2958_s20 }
  0x13   : > { %s2981_s7 = scalar_select %p59_p4, %s2840_s12, %s61_s28  }
  0x14   : > { %p2985_p6 = por %p68_p5, %p41_p1  ;;  %s88_s9 = ssub.s32 %s2625_s22, %s2627_s23 }
  0x15   : > { %p89_p7 = scmp.eq.s32.totalorder %s88_s9, 0  ;;  %s91_s8 = sadd.s32 1, %s2832_s10 }
  0x16   : > { %p98_p8 = scmp.ne.s32.totalorder %s2832_s10, %s2828_s30  ;;  %p214_p9 = scmp.eq.s32.totalorder %s2951_s16, 1 }
  0x17   : > { %s2994_s25 = scalar_select %p89_p7, %s2832_s10, %s91_s8  }
  0x18   : > { %p2998_p10 = por %p98_p8, %p41_p1  ;;  %p3002_p11 = por %p214_p9, %p68_p5 }
  0x19   : > { %p2462_p12 = scmp.ge.s32.totalorder %s2852_s15, 2 }
  0x1b   : > { %290 = sbr.rel (%p2462_p12) target bundleno = 60 (0x3c), region = 32 }
  0x20   : > { %293 = sbr.rel (!%p2968_p3) target bundleno = 40 (0x28), region = 36  ;;  %s295_s9 = sand.u32 (%p2968_p3), 1, %s2848_s14  }
  0x21   : > { %s2466_s20 = sshll.u32 (%p2968_p3), %s2456_s21, 2  ;;  %s2463_s8 = sshll.u32 (%p2968_p3), %s295_s9, 4 }
  0x22   : > { %s302_s22 = scalar_lea.vmem (%p2968_p3), %s4695_s0, %s2466_s20  ;;  %s297_s23 = scalar_lea.vmem (%p2968_p3), [#allocation4], %s2463_s8 }
  0x23   : > { %v319_v0 = vld [vmem:[%s302_s22] sm:$0xf] (%p2968_p3) }
  0x24   : > { %v321_v1 = vld [vmem:[%s302_s22 + $0x40] sm:$0xf] (%p2968_p3)  ;;  %320 = vst [vmem:[%s297_s23] sm:$0xf] (%p2968_p3), %v319_v0 }
  0x25   : > { %v323_v2 = vld [vmem:[%s302_s22 + $0x80] sm:$0xf]  ;;  %322 = vst [vmem:[%s297_s23 + $0x4] sm:$0xf] %v321_v1 }
  0x26   : > { %v325_v3 = vld [vmem:[%s302_s22 + $0xc0] sm:$0xf]  ;;  %324 = vst [vmem:[%s297_s23 + $0x8] sm:$0xf] %v323_v2 }
  0x27   : > { %326 = vst [vmem:[%s297_s23 + $0xc] sm:$0xf] %v325_v3 }
  0x28 PF: > { %358 = sbr.rel (!%p2985_p6) target bundleno = 52 (0x34), region = 77  ;;  %s360_s21 = sand.u32 (%p2985_p6), 1, %s2840_s12  }
  0x29   : > { %s2468_s26 = sshll.u32 (%p2985_p6), %s2852_s15, 4  ;;  %s2467_s9 = sshll.u32 (%p2985_p6), %s360_s21, 6 }
  0x2a   : > { %s2377_s28 = scalar_lea.vmem (%p2985_p6), %s4696_s1, %s2468_s26  ;;  %s362_s8 = scalar_lea.vmem (%p2985_p6), [#allocation5], %s2467_s9 }
  0x2b   : > { %v2469_v4 = vld [vmem:[%s2377_s28 + $0x10] sm:$0xff] (%p2985_p6)  ;;  %v2470_v5 = vld [vmem:[%s2377_s28 + $0x18] sm:$0xff] (%p2985_p6) }
  0x2c   : > { %v2471_v6 = vld [vmem:[%s2377_s28 + $0x50] sm:$0xff] (%p2985_p6)  ;;  %380 = vst [vmem:[%s362_s8] sm:$0xff] (%p2985_p6), %v2469_v4  ;;  %v2472_v7 = vld [vmem:[%s2377_s28 + $0x58] sm:$0xff] (%p2985_p6) }
  0x2d   : > { %382 = vst [vmem:[%s362_s8 + $0x8] sm:$0xff] %v2470_v5  ;;  %v2473_v8 = vld [vmem:[%s2377_s28 + $0x90] sm:$0xff]  ;;  %v2474_v9 = vld [vmem:[%s2377_s28 + $0x98] sm:$0xff] }
  0x2e   : > { %384 = vst [vmem:[%s362_s8 + $0x10] sm:$0xff] %v2471_v6  ;;  %v2475_v10 = vld [vmem:[%s2377_s28 + $0xd0] sm:$0xff]  ;;  %v2476_v11 = vld [vmem:[%s2377_s28 + $0xd8] sm:$0xff] }
  0x2f   : > { %386 = vst [vmem:[%s362_s8 + $0x18] sm:$0xff] %v2472_v7 }
  0x30   : > { %388 = vst [vmem:[%s362_s8 + $0x20] sm:$0xff] %v2473_v8 }
  0x31   : > { %390 = vst [vmem:[%s362_s8 + $0x28] sm:$0xff] %v2474_v9 }
  0x32   : > { %392 = vst [vmem:[%s362_s8 + $0x30] sm:$0xff] %v2475_v10 }
  0x33   : > { %394 = vst [vmem:[%s362_s8 + $0x38] sm:$0xff] %v2476_v11 }
  0x34 PF: > { %400 = sbr.rel (!%p2998_p10) target bundleno = 60 (0x3c), region = 100  ;;  %s402_s24 = sand.u32 (%p2998_p10), 1, %s2832_s10  }
  0x35   : > { %s2478_s22 = sshll.u32 (%p2998_p10), %s2852_s15, 4  ;;  %s2477_s23 = sshll.u32 (%p2998_p10), %s402_s24, 4 }
  0x36   : > { %s2382_s9 = scalar_lea.vmem (%p2998_p10), %s4697_s2, %s2478_s22  ;;  %s404_s27 = scalar_lea.vmem (%p2998_p10), [#allocation6], %s2477_s23 }
  0x37   : > { %v2479_v12 = vld [vmem:[%s2382_s9 + $0x20] sm:$0xf] (%p2998_p10) }
  0x38   : > { %v2480_v13 = vld [vmem:[%s2382_s9 + $0x60] sm:$0xf] (%p2998_p10)  ;;  %426 = vst [vmem:[%s404_s27] sm:$0xf] (%p2998_p10), %v2479_v12 }
  0x39   : > { %v2481_v14 = vld [vmem:[%s2382_s9 + $0xa0] sm:$0xf]  ;;  %428 = vst [vmem:[%s404_s27 + $0x4] sm:$0xf] %v2480_v13 }
  0x3a   : > { %v2482_v15 = vld [vmem:[%s2382_s9 + $0xe0] sm:$0xf]  ;;  %430 = vst [vmem:[%s404_s27 + $0x8] sm:$0xf] %v2481_v14 }
  0x3b   : > { %432 = vst [vmem:[%s404_s27 + $0xc] sm:$0xf] %v2482_v15 }
  0x3c PF: > { %p2483_p13 = scmp.ge.s32.totalorder %s2852_s15, 1  ;;  %p463_p0 = scmp.lt.s32.totalorder %s2852_s15, 3 }
  0x3e   : > { %p464_p1 = pnand %p2483_p13, %p463_p0 }
  0x40   : > { %467 = sbr.rel (%p464_p1) target bundleno = 1245 (0x4dd), region = 141 }
  0x45   : > { %s470_s19 = sand.u32 1, %s2844_s13   ;;  %s477_s20 = sand.u32 1, %s2836_s11  }
  0x46   : > { %s3031_s28 = sshll.u32 %s470_s19, 4  ;;  %s2485_s8 = sshll.u32 %s477_s20, 6 }
  0x47   : > { %s484_s24 = sand.u32 1, %s2828_s30   ;;  %s472_s23 = scalar_lea.vmem [#allocation4], %s3031_s28 }
  0x48   : > { %s3034_s22 = sshll.u32 %s484_s24, 4  ;;  %s3037_s21 = scalar_lea.vmem [#allocation5], %s2485_s8 }
  0x49   : > { %s3040_s15 = scalar_lea.vmem [#allocation7], %s2485_s8  ;;  %p2488_p2 = scmp.ne.s32.totalorder %s2951_s16, 0 }
  0x4b   : > { %539 = sbr.rel (%p2488_p2) target bundleno = 89 (0x59), region = 157 }
  0x50   : > { %vm540_vm0 = vcmask 7168   ;;  %v2854_v16 = vmov 0.0  }
  0x51   : > { %541 = vst.msk [vmem:[#allocation2] sm:$0xff] %vm540_vm0, %v2854_v16 }
  0x52   : > { %542 = vst.msk [vmem:[#allocation2 + $0x8] sm:$0xff] %vm540_vm0, %v2854_v16 }
  0x53   : > { %543 = vst.msk [vmem:[#allocation2 + $0x10] sm:$0xff] %vm540_vm0, %v2854_v16 }
  0x54   : > { %544 = vst.msk [vmem:[#allocation2 + $0x18] sm:$0xff] %vm540_vm0, %v2854_v16 }
  0x55   : > { %545 = vst.msk [vmem:[#allocation3] sm:$0xff] %vm540_vm0, %v2854_v16 }
  0x56   : > { %546 = vst.msk [vmem:[#allocation3 + $0x8] sm:$0xff] %vm540_vm0, %v2854_v16 }
  0x57   : > { %547 = vst.msk [vmem:[#allocation3 + $0x10] sm:$0xff] %vm540_vm0, %v2854_v16 }
  0x58   : > { %548 = vst.msk [vmem:[#allocation3 + $0x18] sm:$0xff] %vm540_vm0, %v2854_v16 }
  0x59 PF: > { %v1013_v17 = vld [vmem:[%s4700_s5 + $0x10] sm:$0xff]  ;;  %v1011_v18 = vld [vmem:[%s4700_s5] sm:$0xff]  ;;  %v2855_v19 = vmov 0   ;;  %v1014_v21 = vld [vmem:[%s4700_s5 + $0x18] sm:$0xff]  ;;  %s2537_s20 = sshll.u32 %s2951_s16, 9  ;;  %v631_v26 = vlaneseq  ;;  %s4740_s26 = scalar_lea.vmem [#allocation6], %s3034_s22 }
  0x5a   : > { %2788 = vset.pattern.permute.xlu1 %v2855_v19  ;;  %2787 = vset.pattern.permute.xlu0 %v2855_v19  ;;  %v1059_v20 = vld [vmem:[%s4701_s6] sm:$0xff]  ;;  %v1012_v22 = vld [vmem:[%s4700_s5 + $0x8] sm:$0xff]  ;;  %v1062_v24 = vld [vmem:[%s4701_s6 + $0x18] sm:$0xff]  ;;  %s2538_s8 = sadd.s32 4294967168, %s2537_s20  ;;  %s4741_s24 = smov %s4740_s26 }
  0x5b   : > { %1027 = vperm.xlu1 %2788, %v1013_v17   ;;  %1017 = vperm.xlu0 %2787, %v1011_v18   ;;  %v1060_v23 = vld [vmem:[%s4701_s6 + $0x8] sm:$0xff]  ;;  %v1061_v25 = vld [vmem:[%s4701_s6 + $0x10] sm:$0xff]  ;;  %v632_v27 = vand.u32 127, %v631_v26  ;;  %v638_v33 = vstv %s2538_s8  ;;  %s2856_s28 = smov 127   ;;  %s2857_s22 = smov 126  }
  0x5c   : > { %2789 = vset.pattern.permute.xlu2 %v2855_v19  ;;  %s2859_s30 = smov 109   ;;  %s2860_s11 = smov 108  }
  0x5d   : > { %1065 = vperm.xlu2 %2789, %v1059_v20   ;;  %v633_v28 = vadd.s32 128, %v632_v27  ;;  %v634_v29 = vadd.s32 256, %v632_v27  ;;  %v635_v30 = vadd.s32 384, %v632_v27  ;;  %v636_v31 = vadd.s32 512, %v632_v27  ;;  %s2861_s13 = smov 92   ;;  %s2862_s9 = smov 91  }
  0x5e   : > { %v637_v32 = vadd.s32 640, %v632_v27  ;;  %v3068_v34 = vadd.s32 %v638_v33, %v632_v27  ;;  %s2863_s27 = smov 90   ;;  %s2864_s19 = smov 19  }
  0x5f   : > { %v3070_v35 = vadd.s32 %v638_v33, %v633_v28  ;;  %v3072_v36 = vadd.s32 %v638_v33, %v634_v29  ;;  %v3074_v37 = vadd.s32 %v638_v33, %v635_v30  ;;  %v3076_v38 = vadd.s32 %v638_v33, %v636_v31  ;;  %p2607_p3 = scmp.ne.s32.totalorder %s2951_s16, 1 }
  0x60   : > { %v3078_v39 = vadd.s32 %v638_v33, %v637_v32  ;;  %vm663_vm1 = vcmp.gt.s32.totalorder %v3068_v34, 0 }
  0x61   : > { %vm665_vm2 = vcmp.gt.s32.totalorder %v3070_v35, 0  ;;  %vm667_vm3 = vcmp.gt.s32.totalorder %v3072_v36, 0  ;;  %vm669_vm4 = vcmp.gt.s32.totalorder %v3074_v37, 0  ;;  %v664_v40 = vsel %vm663_vm1, %v3068_v34, 0 }
  0x62   : > { %v666_v41 = vsel %vm665_vm2, %v3070_v35, 0  ;;  %v668_v42 = vsel %vm667_vm3, %v3072_v36, 0  ;;  %v670_v43 = vsel %vm669_vm4, %v3074_v37, 0  ;;  %vm671_vm5 = vcmp.gt.s32.totalorder %v3076_v38, 0 }
  0x63   : > { %1032 = vperm.xlu1 %2788, %v1014_v21   ;;  %1022 = vperm.xlu0 %2787, %v1012_v22   ;;  %vm673_vm6 = vcmp.gt.s32.totalorder %v3078_v39, 0  ;;  %vm675_vm7 = vcmp.lt.s32.totalorder %v664_v40, 647  ;;  %vm677_vm8 = vcmp.lt.s32.totalorder %v666_v41, 647  ;;  %v672_v44 = vsel %vm671_vm5, %v3076_v38, 0 }
  0x64   : > { %v674_v45 = vsel %vm673_vm6, %v3078_v39, 0  ;;  %v676_v46 = vsel %vm675_vm7, %v664_v40, 647  ;;  %v678_v47 = vsel %vm677_vm8, %v666_v41, 647  ;;  %vm679_vm9 = vcmp.lt.s32.totalorder %v668_v42, 647 }
  0x65   : > { %1070 = vperm.xlu2 %2789, %v1060_v23   ;;  %vm681_vm10 = vcmp.lt.s32.totalorder %v670_v43, 647  ;;  %vm683_vm11 = vcmp.lt.s32.totalorder %v672_v44, 647  ;;  %vm685_vm12 = vcmp.lt.s32.totalorder %v674_v45, 647  ;;  %v680_v48 = vsel %vm679_vm9, %v668_v42, 647 }
  0x66   : > { %v682_v49 = vsel %vm681_vm10, %v670_v43, 647  ;;  %v684_v50 = vsel %vm683_vm11, %v672_v44, 647  ;;  %v686_v51 = vsel %vm685_vm12, %v674_v45, 647  ;;  %v687_v52 = vcvt.s32.f32 %v676_v46 }
  0x67   : > { %v688_v53 = vcvt.s32.f32 %v678_v47  ;;  %v689_v54 = vcvt.s32.f32 %v680_v48  ;;  %v690_v55 = vcvt.s32.f32 %v682_v49  ;;  %v691_v56 = vcvt.s32.f32 %v684_v50 }
  0x68   : > { %v692_v57 = vcvt.s32.f32 %v686_v51  ;;  %v693_v58 = vmul.f32 0.0030864198, %v687_v52 }
  0x69   : > { %v694_v59 = vmul.f32 0.0030864198, %v688_v53  ;;  %v695_v60 = vmul.f32 0.0030864198, %v689_v54  ;;  %v696_v61 = vmul.f32 0.0030864198, %v690_v55 }
  0x6a   : > { %v697_v62 = vmul.f32 0.0030864198, %v691_v56  ;;  %v698_v63 = vmul.f32 0.0030864198, %v692_v57  ;;  %vm2660_vm13 = vcmp.lt.s32.totalorder %v693_v58, 0  ;;  %v2661_v0 = vceil.f32 %v693_v58 }
  0x6b   : > { %1080 = vperm.xlu1 %2788, %v1062_v24   ;;  %1075 = vperm.xlu0 %2787, %v1061_v25   ;;  %v2662_v1 = vfloor.f32 %v693_v58  ;;  %vm2665_vm14 = vcmp.lt.s32.totalorder %v694_v59, 0  ;;  %v2666_v2 = vceil.f32 %v694_v59  ;;  %v2667_v3 = vfloor.f32 %v694_v59 }
  0x6c   : > { %vm2670_vm15 = vcmp.lt.s32.totalorder %v695_v60, 0  ;;  %v2671_v4 = vceil.f32 %v695_v60  ;;  %v2672_v6 = vfloor.f32 %v695_v60  ;;  %vm2675_vm0 = vcmp.lt.s32.totalorder %v696_v61, 0 }
  0x6d   : > { %v2663_v5 = vsel %vm2660_vm13, %v2661_v0, %v2662_v1  ;;  %v2676_v7 = vceil.f32 %v696_v61  ;;  %v2668_v9 = vsel %vm2665_vm14, %v2666_v2, %v2667_v3  ;;  %v2677_v10 = vfloor.f32 %v696_v61 }
  0x6e   : > { %v2664_v8 = vcvt.f32.s32 %v2663_v5  ;;  %vm2680_vm1 = vcmp.lt.s32.totalorder %v697_v62, 0  ;;  %v2669_v11 = vcvt.f32.s32 %v2668_v9  ;;  %v2673_v12 = vsel %vm2670_vm15, %v2671_v4, %v2672_v6 }
  0x6f   : > { %v2681_v13 = vceil.f32 %v697_v62  ;;  %v2682_v14 = vfloor.f32 %v697_v62  ;;  %v2674_v15 = vcvt.f32.s32 %v2673_v12  ;;  %v2678_v16 = vsel %vm2675_vm0, %v2676_v7, %v2677_v10 }
  0x70   : > { %vm2685_vm2 = vcmp.lt.s32.totalorder %v698_v63, 0  ;;  %v2686_v17 = vceil.f32 %v698_v63  ;;  %v2679_v18 = vcvt.f32.s32 %v2678_v16  ;;  %v2687_v20 = vfloor.f32 %v698_v63 }
  0x71   : > { %v2683_v19 = vsel %vm2680_vm1, %v2681_v13, %v2682_v14  ;;  %v705_v21 = vmul.u32 324, %v2664_v8  ;;  %v706_v23 = vmul.u32 324, %v2669_v11  ;;  %v707_v24 = vmul.u32 324, %v2674_v15 }
  0x72   : > { %v2684_v22 = vcvt.f32.s32 %v2683_v19  ;;  %v2688_v25 = vsel %vm2685_vm2, %v2686_v17, %v2687_v20  ;;  %v708_v26 = vmul.u32 324, %v2679_v18 }
  0x73   : > { %v711_v27 = vsub.s32 %v676_v46, %v705_v21  ;;  %v2689_v28 = vcvt.f32.s32 %v2688_v25  ;;  %v712_v30 = vsub.s32 %v678_v47, %v706_v23  ;;  %v713_v31 = vsub.s32 %v680_v48, %v707_v24 }
  0x74   : > { %v709_v29 = vmul.u32 324, %v2684_v22  ;;  %v714_v32 = vsub.s32 %v682_v49, %v708_v26 }
  0x75   : > { %vm717_vm3 = vcmp.lt.s32.totalorder %v711_v27, 0  ;;  %v723_v33 = vadd.s32 324, %v711_v27  ;;  %v710_v40 = vmul.u32 324, %v2689_v28  ;;  %vm718_vm4 = vcmp.lt.s32.totalorder %v712_v30, 0 }
  0x76   : > { %v715_v41 = vsub.s32 %v684_v50, %v709_v29  ;;  %vm719_vm5 = vcmp.lt.s32.totalorder %v713_v31, 0  ;;  %vm720_vm6 = vcmp.lt.s32.totalorder %v714_v32, 0  ;;  %v724_v42 = vadd.s32 324, %v712_v30 }
  0x77   : > { %v725_v43 = vadd.s32 324, %v713_v31  ;;  %v726_v44 = vadd.s32 324, %v714_v32  ;;  %v716_v45 = vsub.s32 %v686_v51, %v710_v40  ;;  %v729_v53 = vsel %vm717_vm3, %v723_v33, %v711_v27 }
  0x78   : > { %vm721_vm7 = vcmp.lt.s32.totalorder %v715_v41, 0  ;;  %v727_v52 = vadd.s32 324, %v715_v41  ;;  %v730_v46 = vsel %vm718_vm4, %v724_v42, %v712_v30  ;;  %vm735_vm8 = vcmp.ge.s32.totalorder %v729_v53, 324 }
  0x79   : > { %v731_v54 = vsel %vm719_vm5, %v725_v43, %v713_v31  ;;  %v732_v55 = vsel %vm720_vm6, %v726_v44, %v714_v32  ;;  %vm722_vm9 = vcmp.lt.s32.totalorder %v716_v45, 0  ;;  %v728_v47 = vadd.s32 324, %v716_v45 }
  0x7a   : > { %v733_v48 = vsel %vm721_vm7, %v727_v52, %v715_v41  ;;  %vm736_vm10 = vcmp.ge.s32.totalorder %v730_v46, 324  ;;  %vm737_vm11 = vcmp.ge.s32.totalorder %v731_v54, 324  ;;  %vm738_vm12 = vcmp.ge.s32.totalorder %v732_v55, 324 }
  0x7b   : > { %vm739_vm13 = vcmp.ge.s32.totalorder %v733_v48, 324  ;;  %v2539_v49 = vadd.s32 4294966972, %v729_v53  ;;  %v734_v50 = vsel %vm722_vm9, %v728_v47, %v716_v45  ;;  %v2540_v56 = vadd.s32 4294966972, %v730_v46 }
  0x7c   : > { %v2541_v57 = vadd.s32 4294966972, %v731_v54  ;;  %v2542_v58 = vadd.s32 4294966972, %v732_v55  ;;  %vm740_vm14 = vcmp.ge.s32.totalorder %v734_v50, 324  ;;  %v2543_v51 = vadd.s32 4294966972, %v733_v48 }
  0x7d   : > { %v2544_v59 = vadd.s32 4294966972, %v734_v50  ;;  %v747_v60 = vsel %vm735_vm8, %v2539_v49, %v729_v53  ;;  %v748_v61 = vsel %vm736_vm10, %v2540_v56, %v730_v46  ;;  %v2636_v49 = vld [vmem:[%s3037_s21 + $0x24] sm:$0xf] }
  0x7e   : > { %v749_v62 = vsel %vm737_vm11, %v2541_v57, %v731_v54  ;;  %v750_v63 = vsel %vm738_vm12, %v2542_v58, %v732_v55  ;;  %vm753_vm15 = vcmp.lt.s32.totalorder %v747_v60, 0  ;;  %v751_v0 = vsel %vm739_vm13, %v2543_v51, %v733_v48 }
  0x7f   : > { %v752_v1 = vsel %vm740_vm14, %v2544_v59, %v734_v50  ;;  %vm754_vm0 = vcmp.lt.s32.totalorder %v748_v61, 0  ;;  %vm755_vm1 = vcmp.lt.s32.totalorder %v749_v62, 0  ;;  %vm756_vm2 = vcmp.lt.s32.totalorder %v750_v63, 0  ;;  %v2517_v50 = vld [vmem:[%s3037_s21 + $0x30] sm:$0xf0] }
  0x80   : > { %vm757_vm3 = vcmp.lt.s32.totalorder %v751_v0, 0  ;;  %vm758_vm4 = vcmp.lt.s32.totalorder %v752_v1, 0  ;;  %v759_v2 = vadd.s32 324, %v747_v60  ;;  %v760_v3 = vadd.s32 324, %v748_v61  ;;  %v2515_v59 = vld [vmem:[%s3037_s21 + $0x20] sm:$0xf] }
  0x81   : > { %v761_v4 = vadd.s32 324, %v749_v62  ;;  %v762_v5 = vadd.s32 324, %v750_v63  ;;  %v763_v6 = vadd.s32 324, %v751_v0  ;;  %v764_v7 = vadd.s32 324, %v752_v1 }
  0x82   : > { %v765_v8 = vsel %vm753_vm15, %v759_v2, %v747_v60  ;;  %v766_v9 = vsel %vm754_vm0, %v760_v3, %v748_v61  ;;  %v2632_v60 = vld [vmem:[%s3037_s21 + $0x4] sm:$0xf]  ;;  %v2501_v61 = vld [vmem:[%s3037_s21 + $0x10] sm:$0xf0]  ;;  %v2638_v2 = vld [vmem:[%s3037_s21 + $0x2c] sm:$0xf0]  ;;  %v3124_v3 = vor.u32 %v2636_v49, %v2517_v50 }
  0x83   : > { %v767_v10 = vsel %vm755_vm1, %v761_v4, %v749_v62  ;;  %v768_v11 = vsel %vm756_vm2, %v762_v5, %v750_v63  ;;  %v769_v12 = vsel %vm757_vm3, %v763_v6, %v751_v0  ;;  %v770_v13 = vsel %vm758_vm4, %v764_v7, %v752_v1  ;;  %v3120_v0 = vld [vmem:[%s472_s23 + $0x8] sm:$0xff] }
  0x84   : > { %vm771_vm5 = vcmp.ge.s32.totalorder %v765_v8, 324  ;;  %vm772_vm6 = vcmp.ge.s32.totalorder %v766_v9, 324  ;;  %vm773_vm7 = vcmp.ge.s32.totalorder %v767_v10, 324  ;;  %vm774_vm8 = vcmp.ge.s32.totalorder %v768_v11, 324  ;;  %v2637_v1 = vld [vmem:[%s3037_s21 + $0x2c] sm:$0xf] }
  0x85   : > { %vm775_vm9 = vcmp.ge.s32.totalorder %v769_v12, 324  ;;  %v2545_v14 = vadd.s32 4294966972, %v765_v8  ;;  %v2546_v15 = vadd.s32 4294966972, %v766_v9  ;;  %v2547_v16 = vadd.s32 4294966972, %v767_v10  ;;  %v2523_v5 = vld [vmem:[%s3037_s21 + $0x28] sm:$0xf] }
  0x86   : > { %v2548_v17 = vadd.s32 4294966972, %v768_v11  ;;  %v2549_v18 = vadd.s32 4294966972, %v769_v12  ;;  %vm776_vm10 = vcmp.ge.s32.totalorder %v770_v13, 324  ;;  %v2550_v19 = vadd.s32 4294966972, %v770_v13  ;;  %v2525_v6 = vld [vmem:[%s3037_s21 + $0x38] sm:$0xf0] }
  0x87   : > { %v3093_v20 = vsel %vm771_vm5, %v2545_v14, %v765_v8  ;;  %v3095_v21 = vsel %vm772_vm6, %v2546_v15, %v766_v9  ;;  %v3097_v22 = vsel %vm773_vm7, %v2547_v16, %v767_v10  ;;  %v2639_v7 = vld [vmem:[%s3037_s21 + $0x34] sm:$0xf0]  ;;  %v3129_v14 = vor.u32 %v2638_v2, %v2515_v59  ;;  %v2499_v15 = vld [vmem:[%s3037_s21] sm:$0xf]  ;;  %v2634_v16 = vld [vmem:[%s3037_s21 + $0xc] sm:$0xf0] }
  0x88   : > { %v3099_v23 = vsel %vm774_vm8, %v2548_v17, %v768_v11  ;;  %v3101_v24 = vsel %vm775_vm9, %v2549_v18, %v769_v12  ;;  %v789_v25 = vcvt.s32.f32 %v3093_v20  ;;  %v790_v26 = vcvt.s32.f32 %v3095_v21 }
  0x89   : > { %v791_v27 = vcvt.s32.f32 %v3097_v22  ;;  %v792_v28 = vcvt.s32.f32 %v3099_v23  ;;  %v793_v29 = vcvt.s32.f32 %v3101_v24  ;;  %v3108_v30 = vsel %vm776_vm10, %v2550_v19, %v770_v13 }
  0x8a   : > { %v795_v31 = vmul.f32 0.055555556, %v789_v25  ;;  %v796_v32 = vmul.f32 0.055555556, %v790_v26  ;;  %v794_v42 = vcvt.s32.f32 %v3108_v30  ;;  %v3133_v17 = vor.u32 %v2632_v60, %v2501_v61 }
  0x8b   : > { %v797_v33 = vmul.f32 0.055555556, %v791_v27  ;;  %v798_v40 = vmul.f32 0.055555556, %v792_v28  ;;  %v799_v41 = vmul.f32 0.055555556, %v793_v29  ;;  %v3135_v18 = vor.u32 %v2639_v7, %v2523_v5 }
  0x8c   : > { %vm2690_vm11 = vcmp.lt.s32.totalorder %v795_v31, 0  ;;  %v2691_v43 = vceil.f32 %v795_v31  ;;  %v2692_v44 = vfloor.f32 %v795_v31  ;;  %vm2695_vm12 = vcmp.lt.s32.totalorder %v796_v32, 0 }
  0x8d   : > { %v2696_v45 = vceil.f32 %v796_v32  ;;  %v2697_v52 = vfloor.f32 %v796_v32  ;;  %vm2700_vm13 = vcmp.lt.s32.totalorder %v797_v33, 0  ;;  %v2701_v53 = vceil.f32 %v797_v33  ;;  %v2633_v32 = vld [vmem:[%s3037_s21 + $0xc] sm:$0xf] }
  0x8e   : > { %v2702_v46 = vfloor.f32 %v797_v33  ;;  %v2706_v54 = vceil.f32 %v798_v40  ;;  %v2707_v55 = vfloor.f32 %v798_v40  ;;  %v2711_v47 = vceil.f32 %v799_v41  ;;  %v2509_v33 = vld [vmem:[%s3037_s21 + $0x18] sm:$0xf0] }
  0x8f   : > { %v2712_v48 = vfloor.f32 %v799_v41  ;;  %vm2705_vm14 = vcmp.lt.s32.totalorder %v798_v40, 0  ;;  %vm2710_vm15 = vcmp.lt.s32.totalorder %v799_v41, 0  ;;  %v800_v56 = vmul.f32 0.055555556, %v794_v42 }
  0x90   : > { %v2693_v57 = vsel %vm2690_vm11, %v2691_v43, %v2692_v44  ;;  %v2698_v58 = vsel %vm2695_vm12, %v2696_v45, %v2697_v52  ;;  %v2703_v51 = vsel %vm2700_vm13, %v2701_v53, %v2702_v46  ;;  %v2708_v62 = vsel %vm2705_vm14, %v2706_v54, %v2707_v55 }
  0x91   : > { %v2713_v63 = vsel %vm2710_vm15, %v2711_v47, %v2712_v48  ;;  %v2694_v4 = vcvt.f32.s32 %v2693_v57  ;;  %v2699_v8 = vcvt.f32.s32 %v2698_v58  ;;  %v2704_v9 = vcvt.f32.s32 %v2703_v51 }
  0x92   : > { %v2716_v10 = vceil.f32 %v800_v56  ;;  %v2717_v11 = vfloor.f32 %v800_v56  ;;  %v2709_v12 = vcvt.f32.s32 %v2708_v62  ;;  %v2714_v13 = vcvt.f32.s32 %v2713_v63 }
  0x93   : > { %vm2715_vm0 = vcmp.lt.s32.totalorder %v800_v56, 0  ;;  %v3137_v19 = vor.u32 %v2637_v1, %v2525_v6  ;;  %v999_v25 = vunpack.c.l.bf16 %v3120_v0  ;;  %v1001_v26 = vunpack.c.l.bf16 %v3124_v3 }
  0x94   : > { %v2718_v27 = vsel %vm2715_vm0, %v2716_v10, %v2717_v11  ;;  %v807_v28 = vmul.u32 18, %v2694_v4  ;;  %v808_v29 = vmul.u32 18, %v2699_v8  ;;  %v809_v31 = vmul.u32 18, %v2704_v9 }
  0x95   : > { %v3143_v40 = vor.u32 %v2634_v16, %v2499_v15  ;;  %v2719_v41 = vcvt.f32.s32 %v2718_v27  ;;  %v810_v42 = vmul.u32 18, %v2709_v12  ;;  %v811_v43 = vmul.u32 18, %v2714_v13 }
  0x96   : > { %v813_v44 = vsub.s32 %v3093_v20, %v807_v28  ;;  %v814_v45 = vsub.s32 %v3095_v21, %v808_v29  ;;  %v815_v52 = vsub.s32 %v3097_v22, %v809_v31  ;;  %v2551_v53 = vadd.s32 4294967295, %v2694_v4 }
  0x97   : > { %v812_v46 = vmul.u32 18, %v2719_v41  ;;  %v816_v54 = vsub.s32 %v3099_v23, %v810_v42  ;;  %v817_v55 = vsub.s32 %v3101_v24, %v811_v43  ;;  %v2552_v47 = vadd.s32 4294967295, %v2699_v8 }
  0x98   : > { %v1000_v48 = vunpack.c.l.bf16 %v3129_v14  ;;  %v3151_v49 = vor.u32 %v2633_v32, %v2509_v33  ;;  %vm819_vm1 = vcmp.lt.s32.totalorder %v813_v44, 0  ;;  %vm820_vm2 = vcmp.lt.s32.totalorder %v814_v45, 0 }
  0x99   : > { %v1002_v50 = vunpack.c.l.bf16 %v3135_v18  ;;  %v818_v20 = vsub.s32 %v3108_v30, %v812_v46  ;;  %vm821_vm3 = vcmp.lt.s32.totalorder %v815_v52, 0  ;;  %v2553_v21 = vadd.s32 4294967295, %v2704_v9 }
  0x9a   : > { %vm822_vm4 = vcmp.lt.s32.totalorder %v816_v54, 0  ;;  %vm823_vm5 = vcmp.lt.s32.totalorder %v817_v55, 0  ;;  %v2554_v22 = vadd.s32 4294967295, %v2709_v12  ;;  %v2555_v56 = vadd.s32 4294967295, %v2714_v13 }
  0x9b   : > { %v2556_v23 = vadd.s32 4294967295, %v2719_v41  ;;  %v831_v24 = vsel %vm819_vm1, %v2551_v53, %v2694_v4  ;;  %v832_v57 = vsel %vm820_vm2, %v2552_v47, %v2699_v8  ;;  %v837_v58 = vadd.s32 18, %v813_v44 }
  0x9c   : > { %vm824_vm6 = vcmp.lt.s32.totalorder %v818_v20, 0  ;;  %v838_v51 = vadd.s32 18, %v814_v45  ;;  %v839_v59 = vadd.s32 18, %v815_v52  ;;  %v840_v60 = vadd.s32 18, %v816_v54 }
  0x9d   : > { %v833_v61 = vsel %vm821_vm3, %v2553_v21, %v2704_v9  ;;  %v841_v30 = vadd.s32 18, %v817_v55  ;;  %v842_v62 = vadd.s32 18, %v818_v20  ;;  %v843_v63 = vsel %vm819_vm1, %v837_v58, %v813_v44 }
  0x9e   : > { %v834_v1 = vsel %vm822_vm4, %v2554_v22, %v2709_v12  ;;  %v844_v2 = vsel %vm820_vm2, %v838_v51, %v814_v45  ;;  %v845_v4 = vsel %vm821_vm3, %v839_v59, %v815_v52  ;;  %v846_v5 = vsel %vm822_vm4, %v840_v60, %v816_v54  ;;  %v3169_v12 = vld [vmem:[%s4740_s26 + $0x8] sm:$0xff] }
  0x9f   : > { %v835_v6 = vsel %vm823_vm5, %v2555_v56, %v2714_v13  ;;  %v847_v7 = vsel %vm823_vm5, %v841_v30, %v817_v55  ;;  %v848_v8 = vsel %vm824_vm6, %v842_v62, %v818_v20  ;;  %v855_v9 = vadd.s32 1, %v831_v24 }
  0xa0   : > { %v836_v10 = vsel %vm824_vm6, %v2556_v23, %v2719_v41  ;;  %vm849_vm7 = vcmp.ge.s32.totalorder %v843_v63, 18  ;;  %vm850_vm8 = vcmp.ge.s32.totalorder %v844_v2, 18  ;;  %v856_v11 = vadd.s32 1, %v832_v57 }
  0xa1   : > { %vm851_vm9 = vcmp.ge.s32.totalorder %v845_v4, 18  ;;  %vm852_vm10 = vcmp.ge.s32.totalorder %v846_v5, 18  ;;  %vm853_vm11 = vcmp.ge.s32.totalorder %v847_v7, 18  ;;  %vm854_vm12 = vcmp.ge.s32.totalorder %v848_v8, 18 }
  0xa2   : > { %v857_v15 = vadd.s32 1, %v833_v61  ;;  %v858_v16 = vadd.s32 1, %v834_v1  ;;  %v2557_v13 = vadd.s32 4294967278, %v843_v63  ;;  %v2558_v27 = vadd.s32 4294967278, %v844_v2 }
  0xa3   : > { %v859_v28 = vadd.s32 1, %v835_v6  ;;  %v860_v29 = vadd.s32 1, %v836_v10  ;;  %v861_v31 = vsel %vm849_vm7, %v855_v9, %v831_v24  ;;  %v862_v32 = vsel %vm850_vm8, %v856_v11, %v832_v57 }
  0xa4   : > { %v2559_v33 = vadd.s32 4294967278, %v845_v4  ;;  %v2560_v41 = vadd.s32 4294967278, %v846_v5  ;;  %v2561_v42 = vadd.s32 4294967278, %v847_v7  ;;  %v2562_v43 = vadd.s32 4294967278, %v848_v8 }
  0xa5   : > { %v1003_v44 = vunpack.c.l.bf16 %v3137_v19  ;;  %v1004_v45 = vunpack.c.l.bf16 %v3169_v12  ;;  %v873_v52 = vsel %vm849_vm7, %v2557_v13, %v843_v63  ;;  %v874_v53 = vsel %vm850_vm8, %v2558_v27, %v844_v2 }
  0xa6   : > { %v863_v46 = vsel %vm851_vm9, %v857_v15, %v833_v61  ;;  %v864_v54 = vsel %vm852_vm10, %v858_v16, %v834_v1  ;;  %v875_v55 = vsel %vm851_vm9, %v2559_v33, %v845_v4  ;;  %v876_v47 = vsel %vm852_vm10, %v2560_v41, %v846_v5  ;;  %v2507_v16 = vld [vmem:[%s3037_s21 + $0x8] sm:$0xf] }
  0xa7   : > { %v865_v20 = vsel %vm853_vm11, %v859_v28, %v835_v6  ;;  %v866_v21 = vsel %vm854_vm12, %v860_v29, %v836_v10  ;;  %v2563_v22 = vadd.s32 4294967295, %v861_v31  ;;  %v2564_v56 = vadd.s32 4294967295, %v862_v32  ;;  %v2635_v29 = vld [vmem:[%s3037_s21 + $0x14] sm:$0xf0] }
  0xa8   : > { %v877_v23 = vsel %vm853_vm11, %v2561_v42, %v847_v7  ;;  %v878_v24 = vsel %vm854_vm12, %v2562_v43, %v848_v8  ;;  %vm879_vm13 = vcmp.lt.s32.totalorder %v873_v52, 0  ;;  %vm880_vm14 = vcmp.lt.s32.totalorder %v874_v53, 0 }
  0xa9   : > { %vm881_vm15 = vcmp.lt.s32.totalorder %v875_v55, 0  ;;  %vm882_vm0 = vcmp.lt.s32.totalorder %v876_v47, 0  ;;  %v2565_v57 = vadd.s32 4294967295, %v863_v46  ;;  %v2566_v58 = vadd.s32 4294967295, %v864_v54 }
  0xaa   : > { %v2567_v51 = vadd.s32 4294967295, %v865_v20  ;;  %v2568_v59 = vadd.s32 4294967295, %v866_v21  ;;  %v897_v60 = vadd.s32 18, %v873_v52  ;;  %v898_v61 = vadd.s32 18, %v874_v53 }
  0xab   : > { %vm883_vm1 = vcmp.lt.s32.totalorder %v877_v23, 0  ;;  %vm884_vm2 = vcmp.lt.s32.totalorder %v878_v24, 0  ;;  %v899_v30 = vadd.s32 18, %v875_v55  ;;  %v900_v62 = vadd.s32 18, %v876_v47 }
  0xac   : > { %v901_v63 = vadd.s32 18, %v877_v23  ;;  %v902_v1 = vadd.s32 18, %v878_v24  ;;  %v903_v2 = vsel %vm879_vm13, %v897_v60, %v873_v52  ;;  %v904_v4 = vsel %vm880_vm14, %v898_v61, %v874_v53 }
  0xad   : > { %v891_v5 = vsel %vm879_vm13, %v2563_v22, %v861_v31  ;;  %v892_v6 = vsel %vm880_vm14, %v2564_v56, %v862_v32  ;;  %v905_v7 = vsel %vm881_vm15, %v899_v30, %v875_v55  ;;  %v906_v8 = vsel %vm882_vm0, %v900_v62, %v876_v47  ;;  %v3238_v62 = vld [vmem:[%s472_s23] sm:$0xff]  ;;  %s2858_s23 = smov 110  }
  0xae   : > { %v893_v9 = vsel %vm881_vm15, %v2565_v57, %v863_v46  ;;  %v894_v10 = vsel %vm882_vm0, %v2566_v58, %v864_v54  ;;  %v895_v11 = vsel %vm883_vm1, %v2567_v51, %v865_v20  ;;  %v896_v15 = vsel %vm884_vm2, %v2568_v59, %v866_v21 }
  0xaf   : > { %v907_v13 = vsel %vm883_vm1, %v901_v63, %v877_v23  ;;  %v908_v27 = vsel %vm884_vm2, %v902_v1, %v878_v24  ;;  %vm909_vm3 = vcmp.ge.s32.totalorder %v903_v2, 18  ;;  %vm910_vm4 = vcmp.ge.s32.totalorder %v904_v4, 18  ;;  %v3244_v63 = vld [vmem:[%s4741_s24] sm:$0xff] }
  0xb0   : > { %vm911_vm5 = vcmp.ge.s32.totalorder %v905_v7, 18  ;;  %vm912_vm6 = vcmp.ge.s32.totalorder %v906_v8, 18  ;;  %vm913_vm7 = vcmp.ge.s32.totalorder %v907_v13, 18  ;;  %vm914_vm8 = vcmp.ge.s32.totalorder %v908_v27, 18 }
  0xb1   : > { %v915_v31 = vadd.s32 1, %v891_v5  ;;  %v916_v32 = vadd.s32 1, %v892_v6  ;;  %v917_v33 = vadd.s32 1, %v893_v9  ;;  %v918_v41 = vadd.s32 1, %v894_v10 }
  0xb2   : > { %v919_v42 = vadd.s32 1, %v895_v11  ;;  %v920_v43 = vadd.s32 1, %v896_v15  ;;  %v2569_v52 = vadd.s32 4294967278, %v903_v2  ;;  %v2570_v53 = vadd.s32 4294967278, %v904_v4 }
  0xb3   : > { %v3206_v54 = vor.u32 %v2635_v29, %v2507_v16  ;;  %v921_v55 = vsel %vm909_vm3, %v915_v31, %v891_v5  ;;  %v922_v47 = vsel %vm910_vm4, %v916_v32, %v892_v6  ;;  %v923_v20 = vsel %vm911_vm5, %v917_v33, %v893_v9 }
  0xb4   : > { %v924_v21 = vsel %vm912_vm6, %v918_v41, %v894_v10  ;;  %v2571_v22 = vadd.s32 4294967278, %v905_v7  ;;  %v2572_v56 = vadd.s32 4294967278, %v906_v8  ;;  %v925_v23 = vsel %vm913_vm7, %v919_v42, %v895_v11 }
  0xb5   : > { %v2573_v24 = vadd.s32 4294967278, %v907_v13  ;;  %v2574_v57 = vadd.s32 4294967278, %v908_v27  ;;  %v933_v58 = vsel %vm909_vm3, %v2569_v52, %v903_v2  ;;  %v934_v51 = vsel %vm910_vm4, %v2570_v53, %v904_v4 }
  0xb6   : > { %v3221_v59 = vsel %vm911_vm5, %v2571_v22, %v905_v7  ;;  %v3224_v60 = vsel %vm912_vm6, %v2572_v56, %v906_v8  ;;  %vm939_vm15 = vcmp.ge.s32.totalorder %v921_v55, 1  ;;  %vm940_vm0 = vcmp.ge.s32.totalorder %v922_v47, 1 }
  0xb7   : > { %v3229_v61 = vsel %vm913_vm7, %v2573_v24, %v907_v13  ;;  %v3232_v30 = vsel %vm914_vm8, %v2574_v57, %v908_v27  ;;  %vm941_vm3 = vcmp.ge.s32.totalorder %v923_v20, 1  ;;  %vm945_vm5 = vcmp.lt.s32.totalorder %v921_v55, 17  ;;  %v1066_v27 = vpop.permute.xlu2 %1065 }
  0xb8   : > { %vm946_vm6 = vcmp.lt.s32.totalorder %v922_v47, 17  ;;  %vm947_vm11 = vcmp.lt.s32.totalorder %v923_v20, 17  ;;  %vm948_vm12 = vcmp.lt.s32.totalorder %v924_v21, 17  ;;  %vm949_vm9 = vcmp.lt.s32.totalorder %v925_v23, 17  ;;  %vm3249_vm4 = vmand %vm939_vm15, %vm945_vm5 }
  0xb9   : > { %vm3257_vm14 = vmand %vm940_vm0, %vm946_vm6  ;;  %vm963_vm7 = vcmp.lt.s32.totalorder %v933_v58, 17  ;;  %vm964_vm10 = vcmp.lt.s32.totalorder %v934_v51, 17  ;;  %vm965_vm0 = vcmp.lt.s32.totalorder %v3221_v59, 17  ;;  %vm4748_vm1 = vcmp.ge.s32.totalorder %v924_v21, 1 }
  0xba   : > { %vm3267_vm13 = vmand %vm941_vm3, %vm947_vm11  ;;  %v987_v8 = vunpack.c.l.bf16 %v3238_v62  ;;  %v988_v9 = vunpack.c.l.bf16 %v3143_v40  ;;  %v989_v10 = vunpack.c.l.bf16 %v3133_v17  ;;  %v990_v11 = vunpack.c.l.bf16 %v3206_v54 }
  0xbb   : > { %vm4751_vm11 = vcmp.ge.s32.totalorder %v925_v23, 1  ;;  %v991_v16 = vunpack.c.l.bf16 %v3151_v49  ;;  %v992_v13 = vunpack.c.l.bf16 %v3244_v63  ;;  %v4756_v29 = vmov 0 }
  0xbc   : > { %vm3285_vm3 = vmand %vm4751_vm11, %vm949_vm9  ;;  %vm4758_vm9 = vcmp.ge.s32.totalorder %v933_v58, 1  ;;  %vm4762_vm5 = vcmp.ge.s32.totalorder %v3068_v34, 0  ;;  %v1007_v47 = vunpack.c.h.bf16 %v3124_v3  ;;  %v1008_v20 = vunpack.c.h.bf16 %v3135_v18 }
  0xbd   : > { %vm3301_vm11 = vmand %vm4758_vm9, %vm963_vm7  ;;  %vm4768_vm7 = vcmp.lt.s32.totalorder %v3070_v35, 648  ;;  %vm4769_vm9 = vcmp.ge.s32.totalorder %v3070_v35, 0  ;;  %v4777_v35 = vmov 0  ;;  %v4811_v1 = vmov 0 }
  0xbe   : > { %v4816_v5 = vmov 0  ;;  %v4821_v6 = vmov 0  ;;  %v4826_v24 = vmov 0 }
  0xcd   : > { %v3198_v28 = vpop.permute.xlu1 %1027  ;;  %v1018_v4 = vpop.permute.xlu0 %1017 }
  0xce   : > { %v3204_v46 = vsub.f32 %v999_v25, %v3198_v28  ;;  %v926_v25 = vsel %vm914_vm8, %v920_v43, %v896_v15  ;;  %vm3275_vm8 = vmand %vm4748_vm1, %vm948_vm12  ;;  %v4752_v15 = vmov 0  ;;  %v1035_v32 = vsub.f32 %v987_v8, %v1018_v4 }
  0xcf   : > { %v4753_v15 = vsel %vm3285_vm3, 4294967295, %v4752_v15  ;;  %vm4754_vm1 = vcmp.lt.s32.totalorder %v926_v25, 17  ;;  %vm4755_vm15 = vcmp.ge.s32.totalorder %v926_v25, 1  ;;  %v1036_v33 = vsub.f32 %v988_v9, %v1018_v4 }
  0xd0   : > { %vm3295_vm2 = vmand %vm4755_vm15, %vm4754_vm1  ;;  %v1037_v41 = vsub.f32 %v989_v10, %v1018_v4  ;;  %v1038_v42 = vsub.f32 %v990_v11, %v1018_v4  ;;  %vm4761_vm12 = vcmp.lt.s32.totalorder %v3068_v34, 648  ;;  %v4763_v43 = vmov 0 }
  0xd1   : > { %v4757_v29 = vsel %vm3295_vm2, 4294967295, %v4756_v29  ;;  %vm3309_vm6 = vmand %vm4762_vm5, %vm4761_vm12  ;;  %vm4765_vm15 = vcmp.ge.s32.totalorder %v934_v51, 1  ;;  %v1039_v53 = vsub.f32 %v991_v16, %v1018_v4  ;;  %v1040_v55 = vsub.f32 %v992_v13, %v1018_v4 }
  0xd2   : > { %v4764_v43 = vsel %vm3309_vm6, 4294967295, %v4763_v43  ;;  %vm3315_vm1 = vmand %vm4765_vm15, %vm964_vm10  ;;  %v4770_v34 = vmov 0  ;;  %vm4772_vm10 = vcmp.ge.s32.totalorder %v3221_v59, 1  ;;  %v3337_v22 = vmul.f32 %v1066_v27, %v1035_v32 }
  0xd3   : > { %vm3325_vm5 = vmand %vm4769_vm9, %vm4768_vm7  ;;  %v3339_v56 = vmul.f32 %v1066_v27, %v1036_v33  ;;  %v3341_v23 = vmul.f32 %v1066_v27, %v1037_v41  ;;  %v3343_v25 = vmul.f32 %v1066_v27, %v1038_v42  ;;  %vm4775_vm15 = vcmp.lt.s32.totalorder %v3072_v36, 648 }
  0xd4   : > { %v4771_v34 = vsel %vm3325_vm5, 4294967295, %v4770_v34  ;;  %vm3333_vm12 = vmand %vm4772_vm10, %vm965_vm0  ;;  %vm4776_vm7 = vcmp.ge.s32.totalorder %v3072_v36, 0  ;;  %vm4779_vm0 = vcmp.lt.s32.totalorder %v3224_v60, 17  ;;  %vm4780_vm10 = vcmp.ge.s32.totalorder %v3224_v60, 1 }
  0xd5   : > { %v3253_v2 = vpop.permute.xlu1 %1032  ;;  %vm3349_vm9 = vmand %vm4776_vm7, %vm4775_vm15  ;;  %v3361_v57 = vmul.f32 %v1066_v27, %v1039_v53  ;;  %v3363_v58 = vmul.f32 %v1066_v27, %v1040_v55  ;;  %v1009_v51 = vunpack.c.h.bf16 %v3137_v19  ;;  %v1010_v36 = vunpack.c.h.bf16 %v3169_v12  ;;  %v1023_v33 = vpop.permute.xlu0 %1022 }
  0xd6   : > { %v4778_v35 = vsel %vm3349_vm9, 4294967295, %v4777_v35  ;;  %vm3357_vm5 = vmand %vm4780_vm10, %vm4779_vm0  ;;  %v3370_v59 = vsub.f32 %v1000_v48, %v3198_v28  ;;  %v3375_v60 = vsub.f32 %v1001_v26, %v3198_v28  ;;  %vm4783_vm15 = vcmp.lt.s32.totalorder %v3074_v37, 648 }
  0xd7   : > { %vm4784_vm7 = vcmp.ge.s32.totalorder %v3074_v37, 0  ;;  %v4785_v4 = vmov 0  ;;  %vm4787_vm10 = vcmp.lt.s32.totalorder %v3229_v61, 17  ;;  %vm4788_vm9 = vcmp.ge.s32.totalorder %v3229_v61, 1 }
  0xd8   : > { %vm3381_vm0 = vmand %vm4784_vm7, %vm4783_vm15  ;;  %v1107_v3 = vmax.f32 %v3337_v22, 0.0  ;;  %v1108_v26 = vmax.f32 %v3339_v56, 0.0  ;;  %vm4791_vm2 = vcmp.lt.s32.totalorder %v3076_v38, 648  ;;  %vm4792_vm3 = vcmp.ge.s32.totalorder %v3076_v38, 0 }
  0xd9   : > { %v4786_v4 = vsel %vm3381_vm0, 4294967295, %v4785_v4  ;;  %vm3389_vm6 = vmand %vm4788_vm9, %vm4787_vm10  ;;  %v4793_v37 = vmov 0  ;;  %vm4795_vm7 = vcmp.lt.s32.totalorder %v3232_v30, 17  ;;  %vm4796_vm0 = vcmp.ge.s32.totalorder %v3232_v30, 1 }
  0xda   : > { %vm3399_vm15 = vmand %vm4792_vm3, %vm4791_vm2  ;;  %v4797_v61 = vmov 0  ;;  %v1109_v8 = vmax.f32 %v3341_v23, 0.0  ;;  %v1110_v9 = vmax.f32 %v3343_v25, 0.0  ;;  %v1111_v10 = vmax.f32 %v3361_v57, 0.0 }
  0xdb   : > { %v4794_v37 = vsel %vm3399_vm15, 4294967295, %v4793_v37  ;;  %vm3407_vm9 = vmand %vm4796_vm0, %vm4795_vm7  ;;  %v1112_v38 = vmax.f32 %v3363_v58, 0.0  ;;  %vm4799_vm2 = vcmp.lt.s32.totalorder %v3078_v39, 648  ;;  %vm4800_vm3 = vcmp.ge.s32.totalorder %v3078_v39, 0 }
  0xdc   : > { %v4798_v61 = vsel %vm3407_vm9, 4294967295, %v4797_v61  ;;  %vm3421_vm10 = vmand %vm4800_vm3, %vm4799_vm2  ;;  %v4801_v30 = vmov 0  ;;  %v1055_v16 = vsub.f32 %v1007_v47, %v3253_v2  ;;  %v1056_v13 = vsub.f32 %v1008_v20, %v3253_v2 }
  0xdd   : > { %v3415_v11 = vpop.permute.xlu1 %1080  ;;  %v4802_v30 = vsel %vm3421_vm10, 4294967295, %v4801_v30  ;;  %v1057_v27 = vsub.f32 %v1009_v51, %v3253_v2  ;;  %v1058_v32 = vsub.f32 %v1010_v36, %v3253_v2  ;;  %v993_v39 = vunpack.c.h.bf16 %v3238_v62  ;;  %vm4805_vm7 = vmand %vm3249_vm4, %vm3301_vm11 }
  0xde   : > { %v994_v41 = vunpack.c.h.bf16 %v3143_v40  ;;  %v995_v42 = vunpack.c.h.bf16 %v3133_v17  ;;  %v996_v53 = vunpack.c.h.bf16 %v3206_v54  ;;  %v997_v55 = vunpack.c.h.bf16 %v3151_v49  ;;  %v1071_v49 = vpop.permute.xlu2 %1070  ;;  %vm4809_vm0 = vmand %vm3257_vm14, %vm3315_vm1 }
  0xdf   : > { %v998_v47 = vunpack.c.h.bf16 %v3244_v63  ;;  %v3448_v20 = vmul.f32 %v3415_v11, %v1055_v16  ;;  %v3451_v62 = vmul.f32 %v3415_v11, %v1056_v13  ;;  %v1041_v17 = vsub.f32 %v993_v39, %v1023_v33  ;;  %vm4814_vm11 = vmand %vm3267_vm13, %vm3333_vm12 }
  0xe0   : > { %v1042_v40 = vsub.f32 %v994_v41, %v1023_v33  ;;  %v1043_v54 = vsub.f32 %v995_v42, %v1023_v33  ;;  %v1044_v22 = vsub.f32 %v996_v53, %v1023_v33  ;;  %vm4803_vm2 = vnez %v4753_v15  ;;  %vm4819_vm1 = vmand %vm3275_vm8, %vm3357_vm5 }
  0xe1   : > { %v1045_v63 = vsub.f32 %v997_v55, %v1023_v33  ;;  %v1046_v56 = vsub.f32 %v998_v47, %v1023_v33  ;;  %v3462_v23 = vmul.f32 %v3415_v11, %v1057_v27  ;;  %v3465_v25 = vmul.f32 %v3415_v11, %v1058_v32  ;;  %vm4824_vm8 = vmand %vm4803_vm2, %vm3389_vm6 }
  0xe2   : > { %vm4804_vm3 = vnez %v4757_v29  ;;  %v1089_v57 = vmul.f32 %v1071_v49, %v1041_v17  ;;  %v1090_v51 = vmul.f32 %v1071_v49, %v1042_v40  ;;  %v1091_v36 = vmul.f32 %v1071_v49, %v1043_v54 }
  0xe3   : > { %v1092_v16 = vmul.f32 %v1071_v49, %v1044_v22  ;;  %vm4806_vm10 = vnez %v4764_v43  ;;  %v1093_v27 = vmul.f32 %v1071_v49, %v1045_v63  ;;  %v1094_v32 = vmul.f32 %v1071_v49, %v1046_v56  ;;  %v1076_v63 = vpop.permute.xlu0 %1075 }
  0xe4   : > { %vm3478_vm15 = vmand %vm4806_vm10, %vm4805_vm7  ;;  %v1127_v33 = vmax.f32 %v3448_v20, 0.0  ;;  %v1128_v39 = vmax.f32 %v3451_v62, 0.0  ;;  %vm4810_vm9 = vnez %v4771_v34  ;;  %v1113_v43 = vmax.f32 %v1089_v57, 0.0 }
  0xe5   : > { %vm3491_vm4 = vmand %vm4810_vm9, %vm4809_vm0  ;;  %v1143_v31 = vsel %vm3478_vm15, %v1107_v3, 0.0  ;;  %v1114_v41 = vmax.f32 %v1090_v51, 0.0  ;;  %v1115_v42 = vmax.f32 %v1091_v36, 0.0  ;;  %vm4815_vm10 = vnez %v4778_v35 }
  0xe6   : > { %v4812_v1 = vsel %vm3491_vm4, 4294967295, %v4811_v1  ;;  %vm3504_vm14 = vmand %vm4815_vm10, %vm4814_vm11  ;;  %v1144_v52 = vsel %vm3491_vm4, %v1108_v26, 0.0  ;;  %v1116_v34 = vmax.f32 %v1092_v16, 0.0  ;;  %v1117_v53 = vmax.f32 %v1093_v27, 0.0 }
  0xe7   : > { %4813 = vst [vmem:[#allocation8_spill] sm:$0xff] %v4812_v1  ;;  %v4817_v5 = vsel %vm3504_vm14, 4294967295, %v4816_v5  ;;  %v1118_v3 = vmax.f32 %v1094_v32, 0.0  ;;  %vm4820_vm9 = vnez %v4786_v4  ;;  %v1145_v21 = vsel %vm3504_vm14, %v1109_v8, 0.0 }
  0xe8   : > { %4818 = vst [vmem:[#allocation9_spill] sm:$0xff] %v4817_v5  ;;  %vm3517_vm13 = vmand %vm4820_vm9, %vm4819_vm1  ;;  %v3523_v35 = vpack.c.bf16 %v1144_v52, %v1143_v31  ;;  %v1149_v26 = vsel %vm3478_vm15, %v1113_v43, 0.0  ;;  %v1150_v7 = vsel %vm3491_vm4, %v1114_v41, 0.0  ;;  %vm4825_vm5 = vnez %v4794_v37 }
  0xe9   : > { %v4822_v6 = vsel %vm3517_vm13, 4294967295, %v4821_v6  ;;  %vm3536_vm12 = vmand %vm4825_vm5, %vm4824_vm8  ;;  %v1146_v4 = vsel %vm3517_vm13, %v1110_v9, 0.0  ;;  %v1151_v8 = vsel %vm3504_vm14, %v1115_v42, 0.0  ;;  %v1152_v55 = vsel %vm3517_vm13, %v1116_v34, 0.0 }
  0xea   : > { %4823 = vst [vmem:[#allocation10_spill] sm:$0xff] %v4822_v6  ;;  %v4827_v24 = vsel %vm3536_vm12, 4294967295, %v4826_v24  ;;  %v1170_v47 = vpack.c.bf16 %v1150_v7, %v1149_v26  ;;  %vm4829_vm6 = vnez %v4798_v61  ;;  %vm4831_vm7 = vnez %v4802_v30 }
  0xeb   : > { %4828 = vst [vmem:[#allocation11_spill] sm:$0xff] %v4827_v24  ;;  %vm4830_vm0 = vmand %vm4804_vm3, %vm4829_vm6  ;;  %v1147_v48 = vsel %vm3536_vm12, %v1111_v10, 0.0  ;;  %v3559_v37 = vpack.c.bf16 %v1146_v4, %v1145_v21  ;;  %v1192_v9 = vunpack.c.h.b16 %v3523_v35  ;;  %v1153_v20 = vsel %vm3536_vm12, %v1117_v53, 0.0 }
  0xec   : > { %vm3553_vm2 = vmand %vm4831_vm7, %vm4830_vm0  ;;  %v3570_v30 = vpack.c.bf16 %v1152_v55, %v1151_v8  ;;  %v1197_v62 = vunpack.c.h.b16 %v1170_v47  ;;  %v1005_v10 = vunpack.c.h.bf16 %v3120_v0  ;;  %v1006_v40 = vunpack.c.h.bf16 %v3129_v14 }
  0xed   : > { %v1148_v29 = vsel %vm3553_vm2, %v1112_v38, 0.0  ;;  %v1154_v61 = vsel %vm3553_vm2, %v1118_v3, 0.0  ;;  %v1193_v22 = vunpack.c.l.b16 %v3559_v37  ;;  %v1129_v38 = vmax.f32 %v3462_v23, 0.0 }
  0xee   : > { %v3572_v17 = vpack.c.bf16 %v1148_v29, %v1147_v48  ;;  %v3576_v54 = vpack.c.bf16 %v1154_v61, %v1153_v20  ;;  %v1198_v58 = vunpack.c.l.b16 %v3570_v30  ;;  %v3580_v49 = vpack.c.b16 %v1197_v62, %v1192_v9 }
  0xef   : > { %v1050_v56 = vsub.f32 %v1002_v50, %v3198_v28  ;;  %v1051_v0 = vsub.f32 %v1003_v44, %v3198_v28  ;;  %v1130_v57 = vmax.f32 %v3465_v25, 0.0  ;;  %v1052_v51 = vsub.f32 %v1004_v45, %v3198_v28 }
  0xf0   : > { %v1200_v14 = vunpack.c.l.b16 %v3576_v54  ;;  %v3594_v36 = vpack.c.b16 %v1198_v58, %v1193_v22  ;;  %v1163_v23 = vsel %vm3504_vm14, %v1127_v33, 0.0  ;;  %v1164_v18 = vsel %vm3517_vm13, %v1128_v39, 0.0  ;;  %1223 = vrot.lane.b32.xlu0 %v3580_v49, %s2856_s28 }
  0xf1   : > { %v1195_v19 = vunpack.c.l.b16 %v3572_v17  ;;  %v1053_v50 = vsub.f32 %v1005_v10, %v3253_v2  ;;  %v1054_v44 = vsub.f32 %v1006_v40, %v3253_v2  ;;  %v1097_v12 = vmul.f32 %v1076_v63, %v3375_v60 }
  0xf2   : > { %v1165_v45 = vsel %vm3536_vm12, %v1129_v38, 0.0  ;;  %v1098_v28 = vmul.f32 %v1076_v63, %v1050_v56  ;;  %v1099_v25 = vmul.f32 %v1076_v63, %v1051_v0  ;;  %v1100_v16 = vmul.f32 %v1076_v63, %v1052_v51  ;;  %1225 = vrot.lane.b32.xlu1 %v3594_v36, %s2856_s28 }
  0xf3   : > { %v3610_v27 = vpack.c.b16 %v1200_v14, %v1195_v19  ;;  %v1166_v32 = vsel %vm3553_vm2, %v1130_v57, 0.0  ;;  %v1177_v33 = vpack.c.bf16 %v1164_v18, %v1163_v23  ;;  %v1121_v39 = vmax.f32 %v1097_v12, 0.0 }
  0xf4   : > { %v1122_v31 = vmax.f32 %v1098_v28, 0.0  ;;  %v1123_v2 = vmax.f32 %v1099_v25, 0.0  ;;  %v1124_v43 = vmax.f32 %v1100_v16, 0.0  ;;  %v1191_v60 = vunpack.c.l.b16 %v3523_v35 }
  0xf5   : > { %4834 = vst [vmem:[#allocation12_spill] sm:$0xff] %v3610_v27  ;;  %v1157_v41 = vsel %vm3504_vm14, %v1121_v39, 0.0  ;;  %v1196_v42 = vunpack.c.l.b16 %v1170_v47  ;;  %v1095_v52 = vmul.f32 %v1076_v63, %v3204_v46  ;;  %v1096_v34 = vmul.f32 %v1076_v63, %v3370_v59 }
  0xf6   : > { %v1158_v53 = vsel %vm3517_vm13, %v1122_v31, 0.0  ;;  %v1159_v3 = vsel %vm3536_vm12, %v1123_v2, 0.0  ;;  %v1160_v21 = vsel %vm3553_vm2, %v1124_v43, 0.0  ;;  %v1101_v26 = vmul.f32 %v3415_v11, %v1053_v50 }
  0xf7   : > { %v1178_v35 = vpack.c.bf16 %v1166_v32, %v1165_v45  ;;  %v1174_v7 = vpack.c.bf16 %v1158_v53, %v1157_v41  ;;  %v3626_v4 = vpack.c.b16 %v1196_v42, %v1191_v60  ;;  %v1102_v8 = vmul.f32 %v3415_v11, %v1054_v44 }
  0xf8   : > { %v1175_v46 = vpack.c.bf16 %v1160_v21, %v1159_v3  ;;  %v1119_v55 = vmax.f32 %v1095_v52, 0.0  ;;  %v1120_v59 = vmax.f32 %v1096_v34, 0.0  ;;  %v1125_v47 = vmax.f32 %v1101_v26, 0.0  ;;  %1229 = vrot.lane.b32.xlu0 %v3610_v27, %s2856_s28 }
  0xf9   : > { %4835 = vst [vmem:[#allocation13_spill] sm:$0xff] %v3626_v4  ;;  %v1208_v48 = vunpack.c.l.b16 %v1177_v33  ;;  %v1203_v9 = vunpack.c.l.b16 %v1174_v7  ;;  %1221 = vrot.lane.b32.xlu2 %v3626_v4, %s2856_s28  ;;  %v1126_v15 = vmax.f32 %v1102_v8, 0.0  ;;  %v1331_v20 = vunpack.c.h.b16 %v3572_v17 }
  0xfa   : > { %v1155_v29 = vsel %vm3478_vm15, %v1119_v55, 0.0  ;;  %v1156_v11 = vsel %vm3491_vm4, %v1120_v59, 0.0  ;;  %v1161_v61 = vsel %vm3478_vm15, %v1125_v47, 0.0  ;;  %v1332_v62 = vunpack.c.h.b16 %v3576_v54 }
  0xfb   : > { %v1199_v10 = vunpack.c.h.b16 %v3570_v30  ;;  %v1162_v40 = vsel %vm3491_vm4, %v1126_v15, 0.0  ;;  %v1173_v22 = vpack.c.bf16 %v1156_v11, %v1155_v29  ;;  %v1333_v17 = vunpack.c.h.b16 %v1175_v46 }
  0xfc   : > { %v1176_v58 = vpack.c.bf16 %v1162_v40, %v1161_v61  ;;  %v3644_v38 = vpack.c.b16 %v1332_v62, %v1331_v20  ;;  %v1194_v63 = vunpack.c.h.b16 %v3559_v37  ;;  %v1334_v56 = vunpack.c.h.b16 %v1178_v35 }
  0xfd   : > { %v3647_v0 = vpack.c.b16 %v1208_v48, %v1203_v9  ;;  %v1201_v14 = vunpack.c.l.b16 %v1173_v22  ;;  %v1202_v37 = vunpack.c.h.b16 %v1173_v22  ;;  %v1209_v23 = vunpack.c.h.b16 %v1177_v33 }
  0xfe   : > { %4836 = vst [vmem:[#allocation14_spill] sm:$0xff] %v3644_v38  ;;  %v1206_v13 = vunpack.c.l.b16 %v1176_v58  ;;  %v3649_v57 = vpack.c.b16 %v1199_v10, %v1194_v63  ;;  %v3651_v54 = vpack.c.b16 %v1334_v56, %v1333_v17  ;;  %v1207_v51 = vunpack.c.h.b16 %v1176_v58 }
  0xff   : > { %v1204_v18 = vunpack.c.h.b16 %v1174_v7  ;;  %v1210_v44 = vunpack.c.l.b16 %v1178_v35  ;;  %v1205_v12 = vunpack.c.l.b16 %v1175_v46  ;;  %vm1299_vm15 = vcmask 900096  }
 0x100   : > { %4837 = vst [vmem:[#allocation15_spill] sm:$0xff] %v3649_v57  ;;  %v3653_v30 = vpack.c.b16 %v1206_v13, %v1201_v14  ;;  %1235 = vrot.lane.b32.xlu0 %v3647_v0, %s2856_s28  ;;  %v3661_v19 = vpack.c.b16 %v1207_v51, %v1202_v37  ;;  %vm1324_vm3 = vcmask 891904   ;;  %vm1357_vm11 = vcmask 883712  }
 0x101   : > { %4838 = vst [vmem:[#allocation16_spill] sm:$0xff] %v3651_v54  ;;  %1227 = vrot.lane.b32.xlu2 %v3649_v57, %s2856_s28  ;;  %v3663_v50 = vpack.c.b16 %v1209_v23, %v1204_v18  ;;  %v3670_v45 = vpack.c.b16 %v1210_v44, %v1205_v12  ;;  %vm1386_vm10 = vcmask 752640   ;;  %vm1415_vm1 = vcmask 744448  }
 0x102   : > { %4839 = vst [vmem:[#allocation17_spill] sm:$0xff] %v3653_v30  ;;  %1231 = vrot.lane.b32.xlu1 %v3653_v30, %s2856_s28  ;;  %vm1270_vm9 = vcmask 1031168   ;;  %vm1444_vm8 = vcmask 736256   ;;  %vm1241_vm5 = vcmask 1039360   ;;  %vm1695_vm6 = vcmask 154624  }
 0x103   : > { %vm1840_vm0 = vcmask 261120  }
 0x108   : > { %1250 = vrot.lane.b32.xlu0 %v3626_v4, %s2857_s22 }
 0x109   : > { %1233 = vrot.lane.b32.xlu2 %v3661_v19, %s2856_s28 }
 0x10a   : > { %1237 = vrot.lane.b32.xlu1 %v3663_v50, %s2856_s28 }
 0x110   : > { %1256 = vrot.lane.b32.xlu0 %v3649_v57, %s2857_s22 }
 0x111   : > { %1239 = vrot.lane.b32.xlu2 %v3670_v45, %s2856_s28 }
 0x112   : > { %1252 = vrot.lane.b32.xlu1 %v3580_v49, %s2857_s22 }
 0x118   : > { %1262 = vrot.lane.b32.xlu0 %v3661_v19, %s2857_s22 }
 0x119   : > { %1254 = vrot.lane.b32.xlu2 %v3594_v36, %s2857_s22 }
 0x11a   : > { %1258 = vrot.lane.b32.xlu1 %v3610_v27, %s2857_s22 }
 0x120   : > { %1268 = vrot.lane.b32.xlu0 %v3670_v45, %s2857_s22 }
 0x121   : > { %1260 = vrot.lane.b32.xlu2 %v3653_v30, %s2857_s22 }
 0x122   : > { %1264 = vrot.lane.b32.xlu1 %v3647_v0, %s2857_s22 }
 0x128   : > { %1283 = vrot.lane.b32.xlu0 %v3594_v36, %s2858_s23 }
 0x129   : > { %1266 = vrot.lane.b32.xlu2 %v3663_v50, %s2857_s22 }
 0x12a   : > { %1279 = vrot.lane.b32.xlu1 %v3626_v4, %s2858_s23 }
 0x130   : > { %1289 = vrot.lane.b32.xlu0 %v3653_v30, %s2858_s23 }
 0x131   : > { %1281 = vrot.lane.b32.xlu2 %v3580_v49, %s2858_s23 }
 0x132   : > { %1285 = vrot.lane.b32.xlu1 %v3649_v57, %s2858_s23 }
 0x138   : > { %1295 = vrot.lane.b32.xlu0 %v3663_v50, %s2858_s23 }
 0x139   : > { %1287 = vrot.lane.b32.xlu2 %v3610_v27, %s2858_s23 }
 0x13a   : > { %1291 = vrot.lane.b32.xlu1 %v3661_v19, %s2858_s23 }
 0x140   : > { %1310 = vrot.lane.b32.xlu0 %v3594_v36, %s2859_s30 }
 0x141   : > { %1293 = vrot.lane.b32.xlu2 %v3647_v0, %s2858_s23 }
 0x142   : > { %1297 = vrot.lane.b32.xlu1 %v3670_v45, %s2858_s23  ;;  %s4890_s23 = sld [smem:[#allocation39_spill]] (!%p2607_p3) }
 0x148   : > { %1316 = vrot.lane.b32.xlu0 %v3661_v19, %s2859_s30 }
 0x149   : > { %1308 = vrot.lane.b32.xlu2 %v3580_v49, %s2859_s30 }
 0x14a   : > { %1312 = vrot.lane.b32.xlu1 %v3649_v57, %s2859_s30 }
 0x150   : > { %1322 = vrot.lane.b32.xlu0 %v3670_v45, %s2859_s30 }
 0x151   : > { %1314 = vrot.lane.b32.xlu2 %v3610_v27, %s2859_s30 }
 0x152   : > { %1318 = vrot.lane.b32.xlu1 %v3647_v0, %s2859_s30 }
 0x153   : > { %v3700_v28 = vpop.permute.xlu2 %1221 }
 0x158   : > { %1341 = vrot.lane.b32.xlu0 %v3649_v57, %s2860_s11 }
 0x159   : > { %1320 = vrot.lane.b32.xlu2 %v3663_v50, %s2859_s30 }
 0x15a   : > { %1337 = vrot.lane.b32.xlu1 %v3580_v49, %s2860_s11 }
 0x15b   : > { %v3705_v25 = vpop.permute.xlu2 %1227 }
 0x160   : > { %1347 = vrot.lane.b32.xlu0 %v3661_v19, %s2860_s11 }
 0x161   : > { %1339 = vrot.lane.b32.xlu2 %v3594_v36, %s2860_s11 }
 0x162   : > { %1343 = vrot.lane.b32.xlu1 %v3610_v27, %s2860_s11  ;;  %v3710_v16 = vpop.permute.xlu0 %1223 }
 0x163   : > { %v3712_v32 = vpop.permute.xlu2 %1233 }
 0x164   : > { %v3717_v33 = vpop.permute.xlu1 %1225 }
 0x168   : > { %1353 = vrot.lane.b32.xlu0 %v3670_v45, %s2860_s11 }
 0x169   : > { %1345 = vrot.lane.b32.xlu2 %v3644_v38, %s2860_s11 }
 0x16a   : > { %1349 = vrot.lane.b32.xlu1 %v3647_v0, %s2860_s11  ;;  %v3719_v39 = vpop.permute.xlu0 %1229 }
 0x16b   : > { %4840 = vst [vmem:[#allocation18_spill] sm:$0xff] %v3719_v39  ;;  %v3721_v31 = vpop.permute.xlu2 %1239 }
 0x16c   : > { %4841 = vst [vmem:[#allocation19_spill] sm:$0xff] %v3721_v31 }
 0x170   : > { %1368 = vrot.lane.b32.xlu0 %v3594_v36, %s2861_s13 }
 0x171   : > { %1351 = vrot.lane.b32.xlu2 %v3663_v50, %s2860_s11 }
 0x172   : > { %1355 = vrot.lane.b32.xlu1 %v3651_v54, %s2860_s11  ;;  %v3726_v2 = vpop.permute.xlu0 %1235  ;;  %s4888_s11 = sld [smem:[#allocation38_spill]] (!%p2607_p3) }
 0x173   : > { %v3728_v43 = vpop.permute.xlu2 %1254 }
 0x174   : > { %v3730_v60 = vpop.permute.xlu1 %1231 }
 0x178   : > { %1374 = vrot.lane.b32.xlu0 %v3644_v38, %s2861_s13 }
 0x179   : > { %1366 = vrot.lane.b32.xlu2 %v3580_v49, %s2861_s13 }
 0x17a   : > { %1370 = vrot.lane.b32.xlu1 %v3649_v57, %s2861_s13  ;;  %v3735_v41 = vpop.permute.xlu0 %1250 }
 0x17b   : > { %v3737_v42 = vpop.permute.xlu2 %1260 }
 0x17c   : > { %v3739_v52 = vpop.permute.xlu1 %1237 }
 0x180   : > { %1380 = vrot.lane.b32.xlu0 %v3663_v50, %s2861_s13 }
 0x181   : > { %1372 = vrot.lane.b32.xlu2 %v3610_v27, %s2861_s13 }
 0x182   : > { %1376 = vrot.lane.b32.xlu1 %v3661_v19, %s2861_s13  ;;  %v3744_v34 = vpop.permute.xlu0 %1256 }
 0x183   : > { %v3746_v53 = vpop.permute.xlu2 %1266 }
 0x184   : > { %v3748_v3 = vpop.permute.xlu1 %1252 }
 0x188   : > { %1395 = vrot.lane.b32.xlu0 %v3580_v49, %s2862_s9 }
 0x189   : > { %1378 = vrot.lane.b32.xlu2 %v3647_v0, %s2861_s13 }
 0x18a   : > { %1382 = vrot.lane.b32.xlu1 %v3670_v45, %s2861_s13  ;;  %v3754_v21 = vpop.permute.xlu0 %1262 }
 0x18b   : > { %v3756_v26 = vpop.permute.xlu2 %1281 }
 0x18c   : > { %v3758_v35 = vpop.permute.xlu1 %1258 }
 0x18d   : > { %4842 = vst [vmem:[#allocation20_spill] sm:$0xff] %v3758_v35 }
 0x190   : > { %1401 = vrot.lane.b32.xlu0 %v3610_v27, %s2862_s9 }
 0x191   : > { %1384 = vrot.lane.b32.xlu2 %v3651_v54, %s2861_s13 }
 0x192   : > { %1397 = vrot.lane.b32.xlu1 %v3594_v36, %s2862_s9  ;;  %v3765_v7 = vpop.permute.xlu0 %1268 }
 0x193   : > { %4843 = vst [vmem:[#allocation21_spill] sm:$0xff] %v3765_v7  ;;  %v3767_v8 = vpop.permute.xlu2 %1287 }
 0x194   : > { %4844 = vst [vmem:[#allocation22_spill] sm:$0xff] %v3767_v8  ;;  %v3769_v46 = vpop.permute.xlu1 %1264 }
 0x198   : > { %1434 = vrot.lane.b32.xlu0 %v3661_v19, %s2863_s27 }
 0x199   : > { %1399 = vrot.lane.b32.xlu2 %v3649_v57, %s2862_s9 }
 0x19a   : > { %1405 = vrot.lane.b32.xlu1 %v3661_v19, %s2862_s9  ;;  %v3777_v55 = vpop.permute.xlu0 %1283 }
 0x19b   : > { %v3779_v59 = vpop.permute.xlu2 %1293  ;;  %v1301_v40 = vsel %vm1299_vm15, %v3756_v26, %v3777_v55 }
 0x19c   : > { %v3781_v47 = vpop.permute.xlu1 %1279 }
 0x1a0   : > { %1426 = vrot.lane.b32.xlu0 %v3594_v36, %s2863_s27 }
 0x1a1   : > { %1407 = vrot.lane.b32.xlu2 %v3647_v0, %s2862_s9 }
 0x1a2   : > { %1436 = vrot.lane.b32.xlu1 %v3647_v0, %s2863_s27  ;;  %v3789_v48 = vpop.permute.xlu0 %1289 }
 0x1a3   : > { %v3791_v9 = vpop.permute.xlu2 %1308 }
 0x1a4   : > { %v3793_v15 = vpop.permute.xlu1 %1285 }
 0x1a8   : > { %1411 = vrot.lane.b32.xlu0 %v3670_v45, %s2862_s9 }
 0x1a9   : > { %1424 = vrot.lane.b32.xlu2 %v3580_v49, %s2863_s27 }
 0x1aa   : > { %1409 = vrot.lane.b32.xlu1 %v3663_v50, %s2862_s9  ;;  %v3801_v20 = vpop.permute.xlu0 %1295 }
 0x1ab   : > { %v3803_v29 = vpop.permute.xlu2 %1314 }
 0x1ac   : > { %4845 = vst [vmem:[#allocation23_spill] sm:$0xff] %v3803_v29  ;;  %v3805_v11 = vpop.permute.xlu1 %1291 }
 0x1b0   : > { %1430 = vrot.lane.b32.xlu0 %v3610_v27, %s2863_s27 }
 0x1b1   : > { %1403 = vrot.lane.b32.xlu2 %v3644_v38, %s2862_s9 }
 0x1b2   : > { %1413 = vrot.lane.b32.xlu1 %v3651_v54, %s2862_s9  ;;  %v3813_v61 = vpop.permute.xlu0 %1310  ;;  %s4889_s9 = smov (!%p2607_p3), %s4888_s11 }
 0x1b3   : > { %v3815_v62 = vpop.permute.xlu2 %1320 }
 0x1b4   : > { %4846 = vst [vmem:[#allocation24_spill] sm:$0xff] %v3815_v62  ;;  %v3817_v10 = vpop.permute.xlu1 %1297 }
 0x1b8   : > { %1577 = vrot.lane.b32.xlu0 %v1301_v40, %s2864_s19 }
 0x1b9   : > { %1428 = vrot.lane.b32.xlu2 %v3649_v57, %s2863_s27 }
 0x1ba   : > { %v3825_v22 = vpop.permute.xlu0 %1316 }
 0x1bb   : > { %v3827_v58 = vpop.permute.xlu2 %1339 }
 0x1bc   : > { %v3829_v17 = vpop.permute.xlu1 %1312 }
 0x1bd   : > { %4847 = vst [vmem:[#allocation25_spill] sm:$0xff] %v3829_v17  ;;  %v3834_v63 = vsel %vm1324_vm3, %v3829_v17, %v3803_v29 }
 0x1be   : > { %4848 = vst [vmem:[#allocation26_spill] sm:$0xff] %v3834_v63 }
 0x1c2   : > { %v3836_v56 = vpop.permute.xlu0 %1322 }
 0x1c3   : > { %4849 = vst [vmem:[#allocation27_spill] sm:$0xff] %v3836_v56  ;;  %v1346_v14 = vpop.permute.xlu2 %1345 }
 0x1c4   : > { %v3838_v13 = vpop.permute.xlu1 %1318 }
 0x1c5   : > { %v3843_v37 = vsel %vm1324_vm3, %v3838_v13, %v3815_v62 }
 0x1ca   : > { %v1342_v51 = vpop.permute.xlu0 %1341 }
 0x1cb   : > { %v1352_v23 = vpop.permute.xlu2 %1351  ;;  %v3847_v18 = vsel %vm1357_vm11, %v3827_v58, %v1342_v51 }
 0x1cc   : > { %v3849_v44 = vpop.permute.xlu1 %1337 }
 0x1d2   : > { %v3851_v12 = vpop.permute.xlu0 %1347 }
 0x1d3   : > { %v3853_v40 = vpop.permute.xlu2 %1366 }
 0x1d4   : > { %v1344_v24 = vpop.permute.xlu1 %1343 }
 0x1d5   : > { %v3856_v6 = vsel %vm1357_vm11, %v1344_v24, %v1346_v14  ;;  %v3859_v5 = vsel %vm1357_vm11, %v1342_v51, %v1344_v24 }
 0x1d6   : > { %4850 = vst [vmem:[#allocation28_spill] sm:$0xff] %v3856_v6 }
 0x1d7   : > { %4851 = vst [vmem:[#allocation29_spill] sm:$0xff] %v3859_v5 }
 0x1da   : > { %v1354_v1 = vpop.permute.xlu0 %1353 }
 0x1db   : > { %v1373_v27 = vpop.permute.xlu2 %1372  ;;  %v3862_v29 = vsel %vm1357_vm11, %v1352_v23, %v1354_v1 }
 0x1dc   : > { %4852 = vst [vmem:[#allocation30_spill] sm:$0xff] %v3862_v29  ;;  %v3864_v63 = vpop.permute.xlu1 %1349 }
 0x1dd   : > { %v3868_v57 = vsel %vm1357_vm11, %v3864_v63, %v1352_v23 }
 0x1e2   : > { %v3870_v39 = vpop.permute.xlu0 %1368 }
 0x1e3   : > { %v1379_v38 = vpop.permute.xlu2 %1378 }
 0x1e4   : > { %v1356_v62 = vpop.permute.xlu1 %1355 }
 0x1e5   : > { %v3873_v14 = vsel %vm1357_vm11, %v1354_v1, %v1356_v62 }
 0x1e6   : > { %4853 = vst [vmem:[#allocation31_spill] sm:$0xff] %v3873_v14 }
 0x1ea   : > { %v1375_v24 = vpop.permute.xlu0 %1374 }
 0x1eb   : > { %v1385_v51 = vpop.permute.xlu2 %1384  ;;  %v3876_v6 = vsel %vm1386_vm10, %v1373_v27, %v1375_v24 }
 0x1ec   : > { %4854 = vst [vmem:[#allocation32_spill] sm:$0xff] %v3876_v6  ;;  %v1371_v5 = vpop.permute.xlu1 %1370 }
 0x1ed   : > { %v3880_v56 = vsel %vm1386_vm10, %v3870_v39, %v1371_v5  ;;  %v3883_v23 = vsel %vm1386_vm10, %v1371_v5, %v1373_v27 }
 0x1ee   : > { %4855 = vst [vmem:[#allocation33_spill] sm:$0xff] %v3883_v23 }
 0x1f2   : > { %v1381_v29 = vpop.permute.xlu0 %1380 }
 0x1f3   : > { %v3885_v31 = vpop.permute.xlu2 %1399  ;;  %v3888_v1 = vsel %vm1386_vm10, %v1379_v38, %v1381_v29 }
 0x1f4   : > { %v1377_v62 = vpop.permute.xlu1 %1376 }
 0x1fa   : > { %v1396_v14 = vpop.permute.xlu0 %1395 }
 0x1fb   : > { %v1408_v54 = vpop.permute.xlu2 %1407 }
 0x1fc   : > { %v1383_v4 = vpop.permute.xlu1 %1382 }
 0x1fd   : > { %v3891_v24 = vsel %vm1386_vm10, %v1383_v4, %v1385_v51  ;;  %v3894_v6 = vsel %vm1386_vm10, %v1381_v29, %v1383_v4  ;;  %v1305_v51 = vsel %vm1299_vm15, %v3805_v11, %v3779_v59 }
 0x1fe   : > { %4856 = vst [vmem:[#allocation34_spill] sm:$0xff] %v3891_v24 }
 0x1ff   : > { %4857 = vst [vmem:[#allocation35_spill] sm:$0xff] %v3894_v6 }
 0x202   : > { %v1402_v35 = vpop.permute.xlu0 %1401 }
 0x203   : > { %v1425_v5 = vpop.permute.xlu2 %1424  ;;  %v3898_v27 = vsel %vm1415_vm1, %v3885_v31, %v1402_v35 }
 0x204   : > { %v1398_v7 = vpop.permute.xlu1 %1397 }
 0x20a   : > { %v1435_v30 = vpop.permute.xlu0 %1434 }
 0x20b   : > { %v1404_v23 = vpop.permute.xlu2 %1403  ;;  %1685 = vrot.lane.b32.xlu1 %v1435_v30, %s2864_s19 }
 0x20c   : > { %v1406_v17 = vpop.permute.xlu1 %1405  ;;  %v3902_v8 = vsel %vm1415_vm1, %v1402_v35, %v1404_v23  ;;  %v1276_v35 = vsel %vm1270_vm9, %v3754_v21, %v3769_v46  ;;  %v1302_v23 = vsel %vm1299_vm15, %v3777_v55, %v3793_v15  ;;  %v1277_v55 = vsel %vm1270_vm9, %v3769_v46, %v3746_v53 }
 0x20d   : > { %4858 = vst [vmem:[#allocation36_spill] sm:$0xff] %v3902_v8  ;;  %1665 = vrot.lane.b32.xlu2 %v1406_v17, %s2864_s19  ;;  %v1420_v4 = vsel %vm1415_vm1, %v1406_v17, %v1408_v54  ;;  %v1416_v8 = vsel %vm1415_vm1, %v1396_v14, %v1398_v7 }
 0x20e   : > { %1667 = vrot.lane.b32.xlu0 %v1420_v4, %s2864_s19 }
 0x212   : > { %v3907_v29 = vpop.permute.xlu0 %1426 }
 0x213   : > { %1587 = vrot.lane.b32.xlu1 %v1305_v51, %s2864_s19  ;;  %v1306_v51 = vsel %vm1299_vm15, %v3779_v59, %v3801_v20  ;;  %v1445_v46 = vsel %vm1444_vm8, %v1425_v5, %v3907_v29 }
 0x214   : > { %v3913_v24 = vpop.permute.xlu1 %1436 }
 0x215   : > { %1655 = vrot.lane.b32.xlu2 %v1396_v14, %s2864_s19  ;;  %v1449_v59 = vsel %vm1444_vm8, %v1435_v30, %v3913_v24  ;;  %v1391_v30 = vsel %vm1386_vm10, %v1377_v62, %v1379_v38  ;;  %v1273_v14 = vsel %vm1270_vm9, %v3728_v43, %v3744_v34  ;;  %v1247_v38 = vsel %vm1241_vm5, %v3712_v32, %v3726_v2 }
 0x216   : > { %1567 = vrot.lane.b32.xlu0 %v1276_v35, %s2864_s19 }
 0x21a   : > { %v1412_v17 = vpop.permute.xlu0 %1411 }
 0x21b   : > { %1579 = vrot.lane.b32.xlu1 %v1302_v23, %s2864_s19 }
 0x21c   : > { %v1410_v4 = vpop.permute.xlu1 %1409 }
 0x21d   : > { %1589 = vrot.lane.b32.xlu2 %v1306_v51, %s2864_s19  ;;  %v3930_v6 = vsel %vm1415_vm1, %v1410_v4, %v1412_v17 }
 0x21e   : > { %1657 = vrot.lane.b32.xlu0 %v1416_v8, %s2864_s19  ;;  %v1272_v8 = vsel %vm1270_vm9, %v3748_v3, %v3728_v43  ;;  %v1417_v43 = vsel %vm1415_vm1, %v1398_v7, %v3885_v31  ;;  %v1304_v31 = vsel %vm1299_vm15, %v3789_v48, %v3805_v11  ;;  %v1243_v7 = vsel %vm1241_vm5, %v3710_v16, %v3717_v33  ;;  %v4007_v48 = vpop.permute.xlu2 %1428 }
 0x223   : > { %1569 = vrot.lane.b32.xlu1 %v1277_v55, %s2864_s19  ;;  %v4860_v55 = vld [vmem:[#allocation22_spill] sm:$0xff] }
 0x224   : > { %v1414_v35 = vpop.permute.xlu1 %1413 }
 0x225   : > { %v3940_v23 = vsel %vm1415_vm1, %v1412_v17, %v1414_v35  ;;  %1687 = vrot.lane.b32.xlu2 %v1449_v59, %s2864_s19  ;;  %v1248_v17 = vsel %vm1241_vm5, %v3726_v2, %v3739_v52  ;;  %v1244_v2 = vsel %vm1241_vm5, %v3717_v33, %v3705_v25  ;;  %v1300_v33 = vsel %vm1299_vm15, %v3781_v47, %v3756_v26  ;;  %v4023_v47 = vpop.permute.xlu0 %1430 }
 0x226   : > { %1557 = vrot.lane.b32.xlu0 %v1272_v8, %s2864_s19  ;;  %v4862_v8 = vld [vmem:[#allocation33_spill] sm:$0xff] }
 0x22b   : > { %1675 = vrot.lane.b32.xlu1 %v1425_v5, %s2864_s19  ;;  %v1421_v5 = vsel %vm1415_vm1, %v1408_v54, %v1410_v4  ;;  %v1387_v54 = vsel %vm1386_vm10, %v3853_v40, %v3870_v39  ;;  %v1362_v39 = vsel %vm1357_vm11, %v3851_v12, %v3864_v63  ;;  %v1328_v63 = vsel %vm1324_vm3, %v3825_v22, %v3838_v13 }
 0x22d   : > { %1677 = vrot.lane.b32.xlu2 %v1445_v46, %s2864_s19 }
 0x22e   : > { %1647 = vrot.lane.b32.xlu0 %v1391_v30, %s2864_s19 }
 0x233   : > { %1559 = vrot.lane.b32.xlu1 %v1273_v14, %s2864_s19 }
 0x235   : > { %1645 = vrot.lane.b32.xlu2 %v1377_v62, %s2864_s19 }
 0x236   : > { %1549 = vrot.lane.b32.xlu0 %v1248_v17, %s2864_s19  ;;  %v4863_v17 = vld [vmem:[#allocation17_spill] sm:$0xff] }
 0x23b   : > { %1669 = vrot.lane.b32.xlu1 %v1421_v5, %s2864_s19 }
 0x23d   : > { %1547 = vrot.lane.b32.xlu2 %v1247_v38, %s2864_s19  ;;  %v4865_v38 = vld [vmem:[#allocation20_spill] sm:$0xff] }
 0x23e   : > { %1659 = vrot.lane.b32.xlu0 %v1417_v43, %s2864_s19  ;;  %v1274_v43 = vsel %vm1270_vm9, %v3744_v34, %v4865_v38  ;;  %v4867_v34 = vld [vmem:[#allocation16_spill] sm:$0xff] }
 0x243   : > { %1635 = vrot.lane.b32.xlu1 %v3853_v40, %s2864_s19 }
 0x245   : > { %1637 = vrot.lane.b32.xlu2 %v1387_v54, %s2864_s19 }
 0x246   : > { %1539 = vrot.lane.b32.xlu0 %v1244_v2, %s2864_s19 }
 0x24b   : > { %1585 = vrot.lane.b32.xlu1 %v1304_v31, %s2864_s19 }
 0x24d   : > { %1537 = vrot.lane.b32.xlu2 %v1243_v7, %s2864_s19 }
 0x24e   : > { %1649 = vrot.lane.b32.xlu0 %v3888_v1, %s2864_s19 }
 0x253   : > { %1625 = vrot.lane.b32.xlu1 %v3851_v12, %s2864_s19 }
 0x255   : > { %1627 = vrot.lane.b32.xlu2 %v1362_v39, %s2864_s19  ;;  %v4866_v39 = vld [vmem:[#allocation13_spill] sm:$0xff] }
 0x256   : > { %1529 = vrot.lane.b32.xlu0 %v3647_v0, %s2864_s19  ;;  %v1358_v0 = vsel %vm1357_vm11, %v3849_v44, %v3827_v58  ;;  %v4037_v58 = vpop.permute.xlu0 %1577 }
 0x25b   : > { %1575 = vrot.lane.b32.xlu1 %v1300_v33, %s2864_s19  ;;  %v4868_v33 = vld [vmem:[#allocation19_spill] sm:$0xff] }
 0x25d   : > { %1527 = vrot.lane.b32.xlu2 %v3661_v19, %s2864_s19  ;;  %v1275_v19 = vsel %vm1270_vm9, %v3737_v42, %v3754_v21  ;;  %v1271_v42 = vsel %vm1270_vm9, %v3735_v41, %v3748_v3 }
 0x25e   : > { %1639 = vrot.lane.b32.xlu0 %v3880_v56, %s2864_s19  ;;  %v1307_v56 = vsel %vm1299_vm15, %v3801_v20, %v3817_v10  ;;  %v1242_v20 = vsel %vm1241_vm5, %v3700_v28, %v3710_v16  ;;  %v4859_v16 = vld [vmem:[#allocation35_spill] sm:$0xff] }
 0x263   : > { %1615 = vrot.lane.b32.xlu1 %v3849_v44, %s2864_s19 }
 0x265   : > { %1617 = vrot.lane.b32.xlu2 %v1358_v0, %s2864_s19  ;;  %v1249_v0 = vsel %vm1241_vm5, %v3739_v52, %v4868_v33  ;;  %v4870_v52 = vld [vmem:[#allocation27_spill] sm:$0xff] }
 0x266   : > { %1440 = vrot.lane.b32.xlu0 %v3670_v45, %s2863_s27 }
 0x267   : > { %v1666_v26 = vpop.permute.xlu2 %1665 }
 0x26b   : > { %1565 = vrot.lane.b32.xlu1 %v1275_v19, %s2864_s19 }
 0x26d   : > { %1438 = vrot.lane.b32.xlu2 %v3663_v50, %s2863_s27 }
 0x26e   : > { %1605 = vrot.lane.b32.xlu0 %v3825_v22, %s2864_s19 }
 0x26f   : > { %v1656_v11 = vpop.permute.xlu2 %1655 }
 0x273   : > { %1517 = vrot.lane.b32.xlu1 %v3580_v49, %s2864_s19 }
 0x275   : > { %1519 = vrot.lane.b32.xlu2 %v3594_v36, %s2864_s19 }
 0x276   : > { %1555 = vrot.lane.b32.xlu0 %v1271_v42, %s2864_s19 }
 0x277   : > { %v4035_v21 = vpop.permute.xlu2 %1589 }
 0x27b   : > { %1607 = vrot.lane.b32.xlu1 %v1328_v63, %s2864_s19 }
 0x27d   : > { %1629 = vrot.lane.b32.xlu2 %v3868_v57, %s2864_s19  ;;  %v1686_v49 = vpop.permute.xlu1 %1685  ;;  %v1325_v57 = vsel %vm1324_vm3, %v3791_v9, %v3813_v61 }
 0x27e   : > { %1619 = vrot.lane.b32.xlu0 %v3847_v18, %s2864_s19 }
 0x27f   : > { %v4047_v36 = vpop.permute.xlu2 %1687 }
 0x280   : > { %v4049_v41 = vpop.permute.xlu0 %1667  ;;  %v1764_v3 = vsel %vm1695_vm6, %v1686_v49, %v4047_v36  ;;  %v4869_v49 = vld [vmem:[#allocation30_spill] sm:$0xff] }
 0x281   : > { %v1756_v22 = vsel %vm1695_vm6, %v1666_v26, %v4049_v41  ;;  %1891 = vmatpush.bf16.msra.mxu2 %v1764_v3  ;;  %v4871_v3 = vld [vmem:[#allocation24_spill] sm:$0xff] }
 0x282   : > { %1866 = vmatpush.bf16.msra.mxu1 %v1756_v22  ;;  %v1330_v22 = vsel %vm1324_vm3, %v4871_v3, %v4870_v52 }
 0x283   : > { %1595 = vrot.lane.b32.xlu1 %v3791_v9, %s2864_s19  ;;  %v1246_v9 = vsel %vm1241_vm5, %v3730_v60, %v3712_v32 }
 0x285   : > { %1597 = vrot.lane.b32.xlu2 %v1325_v57, %s2864_s19  ;;  %v4064_v13 = vpop.permute.xlu1 %1587  ;;  %v4872_v57 = vld [vmem:[#allocation14_spill] sm:$0xff] }
 0x286   : > { %1591 = vrot.lane.b32.xlu0 %v1307_v56, %s2864_s19  ;;  %v1725_v18 = vsel %vm1695_vm6, %v4064_v13, %v4035_v21 }
 0x287   : > { %v4070_v44 = vpop.permute.xlu2 %1677  ;;  %1904 = vmatpush.bf16.msra.mxu3 %v1725_v18 }
 0x288   : > { %v4072_v12 = vpop.permute.xlu0 %1567 }
 0x28b   : > { %1671 = vrot.lane.b32.xlu1 %v3930_v6, %s2864_s19 }
 0x28d   : > { %1545 = vrot.lane.b32.xlu2 %v1246_v9, %s2864_s19  ;;  %v4083_v40 = vpop.permute.xlu1 %1579 }
 0x28e   : > { %1535 = vrot.lane.b32.xlu0 %v1242_v20, %s2864_s19  ;;  %v1721_v1 = vsel %vm1695_vm6, %v4037_v58, %v4083_v40 }
 0x28f   : > { %v1646_v62 = vpop.permute.xlu2 %1645  ;;  %1905 = vmatpush.bf16.msra.mxu3 %v1721_v1  ;;  %v4873_v1 = vld [vmem:[#allocation29_spill] sm:$0xff] }
 0x290   : > { %v1658_v6 = vpop.permute.xlu0 %1657 }
 0x291   : > { %v1752_v4 = vsel %vm1695_vm6, %v1656_v11, %v1658_v6 }
 0x292   : > { %1867 = vmatpush.bf16.msra.mxu1 %v1752_v4 }
 0x293   : > { %1609 = vrot.lane.b32.xlu1 %v3843_v37, %s2864_s19  ;;  %v1303_v37 = vsel %vm1299_vm15, %v3793_v15, %v4860_v55 }
 0x295   : > { %1661 = vrot.lane.b32.xlu2 %v3898_v27, %s2864_s19  ;;  %v4094_v28 = vpop.permute.xlu1 %1569  ;;  %v4861_v27 = vld [vmem:[#allocation25_spill] sm:$0xff] }
 0x296   : > { %1651 = vrot.lane.b32.xlu0 %v4859_v16, %s2864_s19  ;;  %v1717_v32 = vsel %vm1695_vm6, %v4072_v12, %v4094_v28  ;;  %v1326_v35 = vsel %vm1324_vm3, %v3813_v61, %v4861_v27  ;;  %v4864_v61 = vld [vmem:[#allocation21_spill] sm:$0xff]  ;;  %v4875_v16 = vld [vmem:[#allocation15_spill] sm:$0xff] }
 0x297   : > { %v4101_v60 = vpop.permute.xlu2 %1547  ;;  %1906 = vmatpush.bf16.msra.mxu3 %v1717_v32  ;;  %v1278_v5 = vsel %vm1270_vm9, %v3746_v53, %v4864_v61 }
 0x298   : > { %v4103_v51 = vpop.permute.xlu0 %1557 }
 0x29b   : > { %1581 = vrot.lane.b32.xlu1 %v1303_v37, %s2864_s19 }
 0x29d   : > { %1599 = vrot.lane.b32.xlu2 %v1326_v35, %s2864_s19  ;;  %v1676_v59 = vpop.permute.xlu1 %1675 }
 0x29e   : > { %1641 = vrot.lane.b32.xlu0 %v4862_v8, %s2864_s19  ;;  %v1760_v46 = vsel %vm1695_vm6, %v1676_v59, %v4070_v44 }
 0x29f   : > { %v4117_v30 = vpop.permute.xlu2 %1637  ;;  %1892 = vmatpush.bf16.msra.mxu2 %v1760_v46 }
 0x2a0   : > { %v1648_v14 = vpop.permute.xlu0 %1647 }
 0x2a1   : > { %v1748_v15 = vsel %vm1695_vm6, %v1646_v62, %v1648_v14  ;;  %v4874_v62 = vld [vmem:[#allocation18_spill] sm:$0xff] }
 0x2a2   : > { %1868 = vmatpush.bf16.msra.mxu1 %v1748_v15 }
 0x2a3   : > { %1525 = vrot.lane.b32.xlu1 %v4863_v17, %s2864_s19 }
 0x2a5   : > { %1571 = vrot.lane.b32.xlu2 %v1278_v5, %s2864_s19  ;;  %v4129_v54 = vpop.permute.xlu1 %1559 }
 0x2a6   : > { %1561 = vrot.lane.b32.xlu0 %v1274_v43, %s2864_s19  ;;  %v1713_v2 = vsel %vm1695_vm6, %v4103_v51, %v4129_v54 }
 0x2a7   : > { %v4135_v31 = vpop.permute.xlu2 %1537  ;;  %1907 = vmatpush.bf16.msra.mxu3 %v1713_v2 }
 0x2a8   : > { %v4137_v7 = vpop.permute.xlu0 %1549 }
 0x2a9   : > { %v1709_v53 = vsel %vm1695_vm6, %v4101_v60, %v4137_v7 }
 0x2ab   : > { %1515 = vrot.lane.b32.xlu1 %v4866_v39, %s2864_s19  ;;  %1908 = vmatpush.bf16.msra.mxu3 %v1709_v53 }
 0x2ad   : > { %1442 = vrot.lane.b32.xlu2 %v4867_v34, %s2863_s27  ;;  %v4149_v26 = vpop.permute.xlu1 %1669 }
 0x2ae   : > { %1551 = vrot.lane.b32.xlu0 %v1249_v0, %s2864_s19  ;;  %v1757_v19 = vsel %vm1695_vm6, %v4049_v41, %v4149_v26  ;;  %v2585_v0 = vld [vmem:[%s4698_s3 + $0x8] sm:$0xf] }
 0x2af   : > { %v1628_v11 = vpop.permute.xlu2 %1627  ;;  %1923 = vmatpush.bf16.msrb.mxu2 %v1757_v19 }
 0x2b0   : > { %v4155_v42 = vpop.permute.xlu0 %1659 }
 0x2b1   : > { %v1753_v63 = vsel %vm1695_vm6, %v1658_v6, %v4155_v42  ;;  %v1245_v6 = vsel %vm1241_vm5, %v3705_v25, %v4874_v62  ;;  %v4876_v25 = vld [vmem:[#allocation26_spill] sm:$0xff] }
 0x2b3   : > { %1631 = vrot.lane.b32.xlu1 %v4869_v49, %s2864_s19  ;;  %1924 = vmatpush.bf16.msrb.mxu2 %v1753_v63 }
 0x2b5   : > { %1432 = vrot.lane.b32.xlu2 %v4872_v57, %s2863_s27  ;;  %v1636_v56 = vpop.permute.xlu1 %1635 }
 0x2b6   : > { %1611 = vrot.lane.b32.xlu0 %v1330_v22, %s2864_s19  ;;  %v1744_v41 = vsel %vm1695_vm6, %v1636_v56, %v4117_v30  ;;  %v1447_v56 = vsel %vm1444_vm8, %v4007_v48, %v4023_v47 }
 0x2b7   : > { %v4169_v18 = vpop.permute.xlu2 %1527  ;;  %1869 = vmatpush.bf16.msra.mxu1 %v1744_v41  ;;  %v2577_v41 = vld [vmem:[%s4698_s3] sm:$0xf] }
 0x2b8   : > { %v4171_v9 = vpop.permute.xlu0 %1539 }
 0x2b9   : > { %v1705_v20 = vsel %vm1695_vm6, %v4135_v31, %v4171_v9 }
 0x2ba   : > { %1909 = vmatpush.bf16.msra.mxu3 %v1705_v20 }
 0x2bb   : > { %1621 = vrot.lane.b32.xlu1 %v4873_v1, %s2864_s19 }
 0x2bd   : > { %1541 = vrot.lane.b32.xlu2 %v1245_v6, %s2864_s19  ;;  %v1586_v4 = vpop.permute.xlu1 %1585 }
 0x2be   : > { %1521 = vrot.lane.b32.xlu0 %v4875_v16, %s2864_s19  ;;  %v1724_v32 = vsel %vm1695_vm6, %v1586_v4, %v4064_v13  ;;  %v2597_v16 = vld [vmem:[%s4698_s3 + $0x20] sm:$0xf] }
 0x2bf   : > { %v4186_v37 = vpop.permute.xlu2 %1617  ;;  %1847 = vmatpush.bf16.msra.mxu0 %v1724_v32  ;;  %v2647_v32 = vld [vmem:[%s4698_s3 + $0x28] sm:$0xf0] }
 0x2c0   : > { %v4188_v27 = vpop.permute.xlu0 %1649 }
 0x2c1   : > { %v1749_v35 = vsel %vm1695_vm6, %v1648_v14, %v4188_v27 }
 0x2c2   : > { %1925 = vmatpush.bf16.msrb.mxu2 %v1749_v35  ;;  %v4280_v35 = vor.u32 %v2647_v32, %v2597_v16 }
 0x2c3   : > { %1531 = vrot.lane.b32.xlu1 %v3663_v50, %s2864_s19 }
 0x2c5   : > { %1601 = vrot.lane.b32.xlu2 %v4876_v25, %s2864_s19  ;;  %v1626_v59 = vpop.permute.xlu1 %1625  ;;  %v4880_v25 = vld [vmem:[#allocation28_spill] sm:$0xff] }
 0x2c6   : > { %v1740_v8 = vsel %vm1695_vm6, %v1626_v59, %v1628_v11 }
 0x2c7   : > { %v1439_v46 = vpop.permute.xlu2 %1438  ;;  %1870 = vmatpush.bf16.msra.mxu1 %v1740_v8 }
 0x2c8   : > { %v4197_v13 = vpop.permute.xlu0 %1529  ;;  %v1450_v50 = vsel %vm1444_vm8, %v3913_v24, %v1439_v46  ;;  %v1446_v24 = vsel %vm1444_vm8, %v3907_v29, %v4007_v48  ;;  %v2644_v29 = vld [vmem:[%s4698_s3 + $0x10] sm:$0xf0] }
 0x2c9   : > { %v1701_v15 = vsel %vm1695_vm6, %v4169_v18, %v4197_v13  ;;  %v4238_v63 = vor.u32 %v2644_v29, %v2585_v0 }
 0x2ca   : > { %1910 = vmatpush.bf16.msra.mxu3 %v1701_v15  ;;  %v4881_v15 = vld [vmem:[#allocation31_spill] sm:$0xff] }
 0x2cb   : > { %1673 = vrot.lane.b32.xlu1 %v3940_v23, %s2864_s19  ;;  %v4877_v23 = vld [vmem:[#allocation36_spill] sm:$0xff]  ;;  %2599 = vmatmul.msk.bf16.vlgmr.msra.gmra.mxu2 %vm1840_vm0, %v4238_v63 }
 0x2cd   : > { %1689 = vrot.lane.b32.xlu2 %v1450_v50, %s2864_s19  ;;  %v1576_v14 = vpop.permute.xlu1 %1575  ;;  %v2646_v50 = vld [vmem:[%s4698_s3 + $0x20] sm:$0xf0] }
 0x2ce   : > { %v1720_v17 = vsel %vm1695_vm6, %v1576_v14, %v4037_v58 }
 0x2cf   : > { %v4209_v5 = vpop.permute.xlu2 %1519  ;;  %1848 = vmatpush.bf16.msra.mxu0 %v1720_v17 }
 0x2d0   : > { %v4211_v43 = vpop.permute.xlu0 %1639 }
 0x2d1   : > { %v1745_v2 = vsel %vm1695_vm6, %v4117_v30, %v4211_v43 }
 0x2d2   : > { %1926 = vmatpush.bf16.msrb.mxu2 %v1745_v2 }
 0x2d3   : > { %1663 = vrot.lane.b32.xlu1 %v4877_v23, %s2864_s19  ;;  %v2642_v23 = vld [vmem:[%s4698_s3 + $0x4] sm:$0xf] }
 0x2d5   : > { %1679 = vrot.lane.b32.xlu2 %v1446_v24, %s2864_s19  ;;  %v1616_v58 = vpop.permute.xlu1 %1615  ;;  %v2579_v24 = vld [vmem:[%s4698_s3 + $0xc] sm:$0xf0] }
 0x2d6   : > { %v1736_v53 = vsel %vm1695_vm6, %v1616_v58, %v4186_v37  ;;  %v4330_v58 = vor.u32 %v2642_v23, %v2579_v24 }
 0x2d7   : > { %v4224_v39 = vpop.permute.xlu2 %1629  ;;  %1871 = vmatpush.bf16.msra.mxu1 %v1736_v53  ;;  %v4882_v53 = vld [vmem:[#allocation23_spill] sm:$0xff] }
 0x2d8   : > { %v4226_v34 = vpop.permute.xlu0 %1440  ;;  %v1741_v30 = vsel %vm1695_vm6, %v1628_v11, %v4224_v39  ;;  %v4878_v11 = vld [vmem:[#allocation34_spill] sm:$0xff] }
 0x2d9   : > { %v1451_v19 = vsel %vm1444_vm8, %v1439_v46, %v4226_v34  ;;  %1927 = vmatpush.bf16.msrb.mxu2 %v1741_v30 }
 0x2da   : > { %1691 = vrot.lane.b32.xlu0 %v1451_v19, %s2864_s19 }
 0x2db   : > { %1593 = vrot.lane.b32.xlu1 %v3817_v10, %s2864_s19  ;;  %v4879_v10 = vld [vmem:[#allocation32_spill] sm:$0xff]  ;;  %2600 = vmatmul.msk.bf16.gmra.mxu2 %vm1840_vm0, %v4280_v35 }
 0x2dd   : > { %1653 = vrot.lane.b32.xlu2 %v4878_v11, %s2864_s19  ;;  %v1566_v49 = vpop.permute.xlu1 %1565 }
 0x2de   : > { %v1716_v3 = vsel %vm1695_vm6, %v1566_v49, %v4072_v12  ;;  %v2643_v12 = vld [vmem:[%s4698_s3 + $0x8] sm:$0xf0]  ;;  %v4883_v49 = vld [vmem:[#allocation12_spill] sm:$0xff] }
 0x2df   : > { %v4249_v22 = vpop.permute.xlu2 %1597  ;;  %1849 = vmatpush.bf16.msra.mxu0 %v1716_v3  ;;  %v4270_v6 = vor.u32 %v2643_v12, %v2577_v41  ;;  %v2591_v41 = vld [vmem:[%s4698_s3 + $0x24] sm:$0xf0]  ;;  %v1464_v12 = vld [vmem:[%s4699_s4 + $0x18] sm:$0xff] }
 0x2e0   : > { %v1606_v57 = vpop.permute.xlu0 %1605 }
 0x2e2   : > { %1681 = vrot.lane.b32.xlu0 %v1447_v56, %s2864_s19 }
 0x2e3   : > { %1643 = vrot.lane.b32.xlu1 %v4879_v10, %s2864_s19  ;;  %v2645_v10 = vld [vmem:[%s4698_s3 + $0x1c] sm:$0xf] }
 0x2e5   : > { %1573 = vrot.lane.b32.xlu2 %v4864_v61, %s2864_s19  ;;  %v4265_v20 = vpop.permute.xlu1 %1517 }
 0x2e6   : > { %v1697_v48 = vsel %vm1695_vm6, %v4265_v20, %v4209_v5 }
 0x2e7   : > { %v1546_v1 = vpop.permute.xlu2 %1545  ;;  %1911 = vmatpush.bf16.msra.mxu3 %v1697_v48 }
 0x2e8   : > { %v1556_v4 = vpop.permute.xlu0 %1555 }
 0x2e9   : > { %v1712_v61 = vsel %vm1695_vm6, %v1556_v4, %v4103_v51  ;;  %v1708_v51 = vsel %vm1695_vm6, %v1546_v1, %v4101_v60  ;;  %v2589_v60 = vld [vmem:[%s4698_s3 + $0x18] sm:$0xf]  ;;  %v4382_v1 = vor.u32 %v2645_v10, %v2591_v41 }
 0x2ea   : > { %1583 = vrot.lane.b32.xlu0 %v4860_v55, %s2864_s19  ;;  %1850 = vmatpush.bf16.msra.mxu0 %v1712_v61  ;;  %v4317_v2 = vor.u32 %v2646_v50, %v2589_v60 }
 0x2eb   : > { %1912 = vmatmul.bf16.vlgmr.msra.gmra.mxu3 %v4270_v6  ;;  %1563 = vrot.lane.b32.xlu1 %v4865_v38, %s2864_s19 }
 0x2ed   : > { %1623 = vrot.lane.b32.xlu2 %v4880_v25, %s2864_s19  ;;  %v1608_v59 = vpop.permute.xlu1 %1607 }
 0x2ee   : > { %1851 = vmatpush.bf16.msra.mxu0 %v1708_v51  ;;  %v1732_v8 = vsel %vm1695_vm6, %v1606_v57, %v1608_v59 }
 0x2ef   : > { %v4294_v55 = vpop.permute.xlu2 %1661  ;;  %1872 = vmatpush.bf16.msra.mxu1 %v1732_v8 }
 0x2f0   : > { %v4296_v46 = vpop.permute.xlu0 %1619  ;;  %v1754_v11 = vsel %vm1695_vm6, %v4155_v42, %v4294_v55  ;;  %v1463_v42 = vld [vmem:[%s4699_s4 + $0x10] sm:$0xff] }
 0x2f1   : > { %v1737_v38 = vsel %vm1695_vm6, %v4186_v37, %v4296_v46 }
 0x2f2   : > { %1633 = vrot.lane.b32.xlu0 %v4881_v15, %s2864_s19  ;;  %1928 = vmatpush.bf16.msrb.mxu2 %v1737_v38 }
 0x2f3   : > { %1553 = vrot.lane.b32.xlu1 %v4868_v33, %s2864_s19 }
 0x2f5   : > { %1613 = vrot.lane.b32.xlu2 %v4870_v52, %s2864_s19  ;;  %v1596_v14 = vpop.permute.xlu1 %1595 }
 0x2f6   : > { %v1728_v37 = vsel %vm1695_vm6, %v1596_v14, %v4249_v22 }
 0x2f7   : > { %v4315_v17 = vpop.permute.xlu2 %1599  ;;  %1873 = vmatpush.bf16.msra.mxu1 %v1728_v37 }
 0x2f8   : > { %v4319_v33 = vpop.permute.xlu0 %1591  ;;  %v1729_v48 = vsel %vm1695_vm6, %v4249_v22, %v4315_v17 }
 0x2f9   : > { %v1726_v52 = vsel %vm1695_vm6, %v4035_v21, %v4319_v33 }
 0x2fa   : > { %1874 = vmatmul.bf16.vlgmr.msra.gmra.mxu1 %v4330_v58 }
 0x2fb   : > { %1961 = vmatpush.bf16.msrb.mxu1 %v1726_v52  ;;  %1917 = vmatmul.bf16.gmra.mxu3 %v4317_v2 }
 0x2fc   : > { %1543 = vrot.lane.b32.xlu1 %v4874_v62, %s2864_s19  ;;  %v1461_v62 = vld [vmem:[%s4699_s4] sm:$0xff] }
 0x2fd   : > { %1603 = vrot.lane.b32.xlu2 %v4882_v53, %s2864_s19  ;;  %v4338_v30 = vpop.permute.xlu1 %1671 }
 0x2fe   : > { %v1758_v0 = vsel %vm1695_vm6, %v4149_v26, %v4338_v30 }
 0x2ff   : > { %v4343_v21 = vpop.permute.xlu2 %1571  ;;  %1980 = vmatpush.bf16.msrb.mxu3 %v1758_v0 }
 0x300   : > { %v1536_v29 = vpop.permute.xlu0 %1535  ;;  %v1718_v25 = vsel %vm1695_vm6, %v4094_v28, %v4343_v21  ;;  %v1462_v28 = vld [vmem:[%s4699_s4 + $0x8] sm:$0xff] }
 0x301   : > { %v1704_v19 = vsel %vm1695_vm6, %v1536_v29, %v4135_v31 }
 0x302   : > { %1852 = vmatpush.bf16.msra.mxu0 %v1704_v19 }
 0x303   : > { %1981 = vmatpush.bf16.msrb.mxu3 %v1754_v11 }
 0x304   : > { %1523 = vrot.lane.b32.xlu1 %v4883_v49, %s2864_s19 }
 0x305   : > { %1467 = vperm.xlu2 %2789, %v1461_v62   ;;  %v4355_v26 = vpop.permute.xlu1 %1609 }
 0x306   : > { %v1733_v3 = vsel %vm1695_vm6, %v1608_v59, %v4355_v26 }
 0x307   : > { %v1443_v31 = vpop.permute.xlu2 %1442  ;;  %1929 = vmatpush.bf16.msrb.mxu2 %v1733_v3 }
 0x308   : > { %v1452_v57 = vsel %vm1444_vm8, %v4226_v34, %v1443_v31  ;;  %v4361_v56 = vpop.permute.xlu0 %1651 }
 0x309   : > { %1693 = vrot.lane.b32.xlu0 %v1452_v57, %s2864_s19  ;;  %v1750_v34 = vsel %vm1695_vm6, %v4188_v27, %v4361_v56 }
 0x30a   : > { %1982 = vmatpush.bf16.msrb.mxu3 %v1750_v34  ;;  %1879 = vmatmul.bf16.gmra.mxu1 %v4382_v1 }
 0x30b   : > { %1930 = vmatpush.bf16.msrb.mxu2 %v1729_v48 }
 0x30c   : > { %1477 = vperm.xlu1 %2788, %v1463_v42  }
 0x30d   : > { %1482 = vperm.xlu2 %2789, %v1464_v12   ;;  %v4385_v4 = vpop.permute.xlu1 %1581 }
 0x30e   : > { %1931 = vmatmul.bf16.vlgmr.msrb.gmra.mxu2 %v4330_v58  ;;  %v1722_v27 = vsel %vm1695_vm6, %v4083_v40, %v4385_v4 }
 0x30f   : > { %v1433_v16 = vpop.permute.xlu2 %1432  ;;  %1962 = vmatpush.bf16.msrb.mxu1 %v1722_v27 }
 0x310   : > { %v1448_v22 = vsel %vm1444_vm8, %v4023_v47, %v1433_v16  ;;  %v4393_v32 = vpop.permute.xlu0 %1641 }
 0x311   : > { %1683 = vrot.lane.b32.xlu0 %v1448_v22, %s2864_s19  ;;  %v1746_v61 = vsel %vm1695_vm6, %v4211_v43, %v4393_v32 }
 0x312   : > { %1983 = vmatpush.bf16.msrb.mxu3 %v1746_v61 }
 0x313   : > { %1963 = vmatpush.bf16.msrb.mxu1 %v1718_v25 }
 0x315   : > { %v1526_v40 = vpop.permute.xlu1 %1525 }
 0x316   : > { %v1700_v51 = vsel %vm1695_vm6, %v1526_v40, %v4169_v18 }
 0x317   : > { %v4404_v59 = vpop.permute.xlu2 %1541  ;;  %1853 = vmatpush.bf16.msra.mxu0 %v1700_v51 }
 0x318   : > { %v4406_v47 = vpop.permute.xlu0 %1561 }
 0x319   : > { %1533 = vrot.lane.b32.xlu0 %v3670_v45, %s2864_s19  ;;  %v1714_v43 = vsel %vm1695_vm6, %v4129_v54, %v4406_v47  ;;  %v1706_v54 = vsel %vm1695_vm6, %v4171_v9, %v4404_v59 }
 0x31a   : > { %1964 = vmatpush.bf16.msrb.mxu1 %v1714_v43 }
 0x31d   : > { %v1516_v8 = vpop.permute.xlu1 %1515 }
 0x31e   : > { %1936 = vmatmul.bf16.gmra.mxu2 %v4382_v1  ;;  %v1696_v18 = vsel %vm1695_vm6, %v1516_v8, %v4265_v20 }
 0x31f   : > { %v4419_v38 = vpop.permute.xlu2 %1601  ;;  %1854 = vmatpush.bf16.msra.mxu0 %v1696_v18 }
 0x320   : > { %v4421_v15 = vpop.permute.xlu0 %1551 }
 0x321   : > { %1472 = vperm.xlu0 %2787, %v1462_v28   ;;  %v1710_v45 = vsel %vm1695_vm6, %v4137_v7, %v4421_v15 }
 0x322   : > { %1965 = vmatpush.bf16.msrb.mxu1 %v1710_v45  ;;  %1855 = vmatmul.bf16.vlgmr.msra.gmra.mxu0 %v4270_v6 }
 0x325   : > { %v4430_v60 = vpop.permute.xlu1 %1631 }
 0x326   : > { %1966 = vmatpush.bf16.msrb.mxu1 %v1706_v54  ;;  %v1742_v20 = vsel %vm1695_vm6, %v4224_v39, %v4430_v60 }
 0x327   : > { %v1690_v50 = vpop.permute.xlu2 %1689  ;;  %1984 = vmatpush.bf16.msrb.mxu3 %v1742_v20 }
 0x328   : > { %v1765_v14 = vsel %vm1695_vm6, %v4047_v36, %v1690_v50  ;;  %v4437_v7 = vpop.permute.xlu0 %1611 }
 0x329   : > { %1948 = vmatpush.bf16.msrb.mxu0 %v1765_v14  ;;  %v1734_v36 = vsel %vm1695_vm6, %v4355_v26, %v4437_v7 }
 0x32d   : > { %v4439_v37 = vpop.permute.xlu1 %1621 }
 0x32e   : > { %v1738_v9 = vsel %vm1695_vm6, %v4296_v46, %v4439_v37  ;;  %v1730_v46 = vsel %vm1695_vm6, %v4315_v17, %v4419_v38 }
 0x32f   : > { %v1680_v23 = vpop.permute.xlu2 %1679  ;;  %1985 = vmatpush.bf16.msrb.mxu3 %v1738_v9  ;;  %v553_v9 = vld [vmem:[%s3037_s21] sm:$0xff] }
 0x330   : > { %v1761_v24 = vsel %vm1695_vm6, %v4070_v44, %v1680_v23  ;;  %v4458_v53 = vpop.permute.xlu0 %1521 }
 0x331   : > { %1949 = vmatpush.bf16.msrb.mxu0 %v1761_v24  ;;  %v1698_v44 = vsel %vm1695_vm6, %v4209_v5, %v4458_v53 }
 0x332   : > { %1860 = vmatmul.bf16.gmra.mxu0 %v4317_v2 }
 0x333   : > { %1986 = vmatpush.bf16.msrb.mxu3 %v1734_v36 }
 0x335   : > { %v4450_v39 = vpop.permute.xlu1 %1531 }
 0x336   : > { %v1702_v52 = vsel %vm1695_vm6, %v4197_v13, %v4450_v39 }
 0x337   : > { %1967 = vmatpush.bf16.msrb.mxu1 %v1702_v52  ;;  %1987 = vmatpush.bf16.msrb.mxu3 %v1730_v46  ;;  %v1654_v17 = vpop.permute.xlu2 %1653 }
 0x338   : > { %v1751_v5 = vsel %vm1695_vm6, %v4361_v56, %v1654_v17 }
 0x33a   : > { %1988 = vmatmul.bf16.vlgmr.msrb.gmra.mxu3 %v4330_v58 }
 0x33b   : > { %1968 = vmatpush.bf16.msrb.mxu1 %v1698_v44 }
 0x33d   : > { %v1674_v0 = vpop.permute.xlu1 %1673 }
 0x33e   : > { %v1759_v29 = vsel %vm1695_vm6, %v4338_v30, %v1674_v0  ;;  %1969 = vmatmul.bf16.vlgmr.msrb.gmra.mxu1 %v4270_v6  ;;  %v2076_v0 = vunpack.c.h.bf16 %v553_v9 }
 0x33f   : > { %2037 = vmatpush.bf16.msra.mxu1 %v1759_v29  ;;  %v1574_v26 = vpop.permute.xlu2 %1573 }
 0x340   : > { %v1719_v41 = vsel %vm1695_vm6, %v4343_v21, %v1574_v26 }
 0x342   : > { %2601 = vmatmul.msk.bf16.vlgmr.msrb.gmra.mxu0 %vm1840_vm0, %v4238_v63 }
 0x345   : > { %v1664_v13 = vpop.permute.xlu1 %1663 }
 0x346   : > { %v1755_v19 = vsel %vm1695_vm6, %v4294_v55, %v1664_v13  ;;  %v555_v13 = vld [vmem:[%s3037_s21 + $0x10] sm:$0xff] }
 0x347   : > { %2038 = vmatpush.bf16.msra.mxu1 %v1755_v19 }
 0x34a   : > { %1993 = vmatmul.bf16.gmra.mxu3 %v4382_v1 }
 0x34b   : > { %2039 = vmatpush.bf16.msra.mxu1 %v1751_v5 }
 0x34c   : > { %v1692_v62 = vpop.permute.xlu0 %1691 }
 0x34d   : > { %v1766_v30 = vsel %vm1695_vm6, %v1690_v50, %v1692_v62  ;;  %v1594_v11 = vpop.permute.xlu1 %1593 }
 0x34e   : > { %2005 = vmatpush.bf16.msra.mxu2 %v1766_v30  ;;  %v1727_v49 = vsel %vm1695_vm6, %v4319_v33, %v1594_v11  ;;  %1974 = vmatmul.bf16.gmra.mxu1 %v4317_v2  ;;  %v1624_v33 = vpop.permute.xlu2 %1623  ;;  %v1894_v18 = vpop.f32.mrf.mxu2  ;;  %v2079_v30 = vunpack.c.l.bf16 %v555_v13 }
 0x34f   : > { %2018 = vmatpush.bf16.msra.mxu0 %v1727_v49  ;;  %v1739_v21 = vsel %vm1695_vm6, %v4439_v37, %v1624_v33 }
 0x352   : > { %2602 = vmatmul.msk.bf16.gmra.mxu0 %vm1840_vm0, %v4280_v35 }
 0x354   : > { %v1682_v55 = vpop.permute.xlu0 %1681 }
 0x355   : > { %v1762_v3 = vsel %vm1695_vm6, %v1680_v23, %v1682_v55  ;;  %v1644_v31 = vpop.permute.xlu1 %1643 }
 0x356   : > { %2006 = vmatpush.bf16.msra.mxu2 %v1762_v3  ;;  %v1747_v57 = vsel %vm1695_vm6, %v4393_v32, %v1644_v31  ;;  %v1614_v12 = vpop.permute.xlu2 %1613 }
 0x357   : > { %2040 = vmatpush.bf16.msra.mxu1 %v1747_v57  ;;  %v1735_v22 = vsel %vm1695_vm6, %v4437_v7, %v1614_v12 }
 0x359   : > { %2603 = vmatmul.msk.bf16.vlgmr.msra.gmra.mxu2 %vm1840_vm0, %v4238_v63 }
 0x35a   : > { %2652 = vmatpush.bf16.msrb.mxu2 %v1727_v49 }
 0x35c   : > { %v1584_v56 = vpop.permute.xlu0 %1583 }
 0x35d   : > { %v1723_v42 = vsel %vm1695_vm6, %v4385_v4, %v1584_v56  ;;  %v1564_v10 = vpop.permute.xlu1 %1563 }
 0x35e   : > { %2019 = vmatpush.bf16.msra.mxu0 %v1723_v42  ;;  %2653 = vmatpush.bf16.msrb.mxu2 %v1723_v42  ;;  %v1715_v34 = vsel %vm1695_vm6, %v4406_v47, %v1564_v10  ;;  %v1604_v61 = vpop.permute.xlu2 %1603 }
 0x35f   : > { %v1731_v40 = vsel %vm1695_vm6, %v4419_v38, %v1604_v61 }
 0x362   : > { %2020 = vmatpush.bf16.msra.mxu0 %v1719_v41  ;;  %2654 = vmatpush.bf16.msrb.mxu2 %v1719_v41 }
 0x364   : > { %v1634_v48 = vpop.permute.xlu0 %1633 }
 0x365   : > { %v1743_v27 = vsel %vm1695_vm6, %v4430_v60, %v1634_v48  ;;  %v1554_v16 = vpop.permute.xlu1 %1553 }
 0x366   : > { %2041 = vmatpush.bf16.msra.mxu1 %v1743_v27  ;;  %2021 = vmatpush.bf16.msra.mxu0 %v1715_v34  ;;  %v1711_v4 = vsel %vm1695_vm6, %v4421_v15, %v1554_v16  ;;  %v4521_v50 = vpop.permute.xlu2 %1467  ;;  %v2080_v27 = vunpack.c.h.bf16 %v555_v13 }
 0x367   : > { %2655 = vmatpush.bf16.msrb.mxu2 %v1715_v34 }
 0x369   : > { %2604 = vmatmul.msk.bf16.gmra.mxu2 %vm1840_vm0, %v4280_v35 }
 0x36a   : > { %2042 = vmatpush.bf16.msra.mxu1 %v1739_v21  ;;  %2022 = vmatpush.bf16.msra.mxu0 %v1711_v4 }
 0x36b   : > { %2656 = vmatpush.bf16.msrb.mxu2 %v1711_v4  ;;  %v557_v4 = vld [vmem:[%s3037_s21 + $0x20] sm:$0xff] }
 0x36e   : > { %v1544_v32 = vpop.permute.xlu1 %1543  ;;  %2043 = vmatpush.bf16.msra.mxu1 %v1735_v22  ;;  %v1913_v7 = vpop.f32.mrf.mxu3 }
 0x36f   : > { %v1707_v25 = vsel %vm1695_vm6, %v4404_v59, %v1544_v32  ;;  %v1914_v52 = vadd.f32 %v1913_v7, %v4521_v50 }
 0x370   : > { %2023 = vmatpush.bf16.msra.mxu0 %v1707_v25  ;;  %2657 = vmatpush.bf16.msrb.mxu2 %v1707_v25  ;;  %v4544_v25 = vpop.permute.xlu2 %1482 }
 0x372   : > { %2044 = vmatpush.bf16.msra.mxu1 %v1731_v40 }
 0x375   : > { %2045 = vmatmul.bf16.vlgmr.msra.gmra.mxu1 %v4330_v58 }
 0x376   : > { %v1524_v38 = vpop.permute.xlu1 %1523  ;;  %v1915_v46 = vpop.f32.mrf.mxu3 }
 0x377   : > { %v1699_v58 = vsel %vm1695_vm6, %v4458_v53, %v1524_v38  ;;  %v1875_v60 = vpop.f32.mrf.mxu1 }
 0x37b   : > { %v1694_v51 = vpop.permute.xlu0 %1693 }
 0x37c   : > { %v1767_v47 = vsel %vm1695_vm6, %v1692_v62, %v1694_v51  ;;  %v2083_v51 = vunpack.c.l.bf16 %v557_v4 }
 0x37d   : > { %2062 = vmatpush.bf16.msra.mxu3 %v1767_v47 }
 0x37e   : > { %v4530_v62 = vpop.permute.xlu1 %1477  ;;  %v1918_v21 = vpop.f32.mrf.mxu3 }
 0x383   : > { %v1684_v43 = vpop.permute.xlu0 %1683 }
 0x384   : > { %v1763_v8 = vsel %vm1695_vm6, %v1682_v55, %v1684_v43 }
 0x385   : > { %2063 = vmatpush.bf16.msra.mxu3 %v1763_v8  ;;  %2050 = vmatmul.bf16.gmra.mxu1 %v4382_v1  ;;  %v1896_v1 = vpop.f32.mrf.mxu2 }
 0x388   : > { %2605 = vmatmul.msk.bf16.vlgmr.msra.gmra.mxu3 %vm1840_vm0, %v4238_v63 }
 0x38b   : > { %v1534_v59 = vpop.permute.xlu0 %1533 }
 0x38c   : > { %v1703_v28 = vsel %vm1695_vm6, %v4450_v39, %v1534_v59  ;;  %v2075_v39 = vunpack.c.l.bf16 %v553_v9  ;;  %v1920_v9 = vpop.f32.mrf.mxu3 }
 0x38d   : > { %2024 = vmatpush.bf16.msra.mxu0 %v1703_v28  ;;  %2658 = vmatpush.bf16.msrb.mxu2 %v1703_v28  ;;  %v1899_v15 = vpop.f32.mrf.mxu2  ;;  %v1919_v28 = vadd.f32 %v1918_v21, %v4530_v62 }
 0x391   : > { %2025 = vmatpush.bf16.msra.mxu0 %v1699_v58  ;;  %2659 = vmatpush.bf16.msrb.mxu2 %v1699_v58 }
 0x393   : > { %v4525_v23 = vpop.permute.xlu0 %1472 }
 0x394   : > { %2026 = vmatmul.bf16.vlgmr.msra.gmra.mxu0 %v4270_v6  ;;  %2031 = vmatmul.bf16.vlgmr.msrb.gmra.mxu2 %v4317_v2  ;;  %v1916_v57 = vadd.f32 %v1915_v46, %v4525_v23  ;;  %v1921_v46 = vadd.f32 %v1920_v9, %v4544_v25 }
 0x395   : > { %v4519_v54 = vpop.f32.mrf.mxu2 }
 0x398   : > { %2606 = vmatmul.msk.bf16.gmra.mxu3 %vm1840_vm0, %v4280_v35  ;;  %v1877_v35 = vpop.f32.mrf.mxu1 }
 0x39d   : > { %v1932_v6 = vpop.f32.mrf.mxu2 }
 0x39e   : > { %v1933_v53 = vadd.f32 %v1932_v6, %v1914_v52  ;;  %v559_v6 = vld [vmem:[%s3037_s21 + $0x30] sm:$0xff] }
 0x39f   : > { %v1856_v63 = vpop.f32.mrf.mxu0 }
 0x3a0   : > { %v1857_v14 = vadd.f32 %v1856_v63, %v4521_v50  ;;  %v1880_v31 = vpop.f32.mrf.mxu1 }
 0x3a2   : > { %v1876_v37 = vadd.f32 %v1875_v60, %v1857_v14 }
 0x3a4   : > { %v1895_v24 = vadd.f32 %v1894_v18, %v1876_v37 }
 0x3a5   : > { %v1934_v17 = vpop.f32.mrf.mxu2 }
 0x3a6   : > { %v2091_v29 = vadd.f32 %v2075_v39, %v1895_v24  ;;  %v1935_v12 = vadd.f32 %v1934_v17, %v1916_v57  ;;  %v2087_v39 = vunpack.c.l.bf16 %v559_v6 }
 0x3a7   : > { %v1858_v45 = vpop.f32.mrf.mxu0 }
 0x3a8   : > { %v1859_v36 = vadd.f32 %v1858_v45, %v4525_v23  ;;  %v2107_v3 = vsel %vm3491_vm4, %v2091_v29, 0.0  ;;  %v1882_v38 = vpop.f32.mrf.mxu1 }
 0x3a9   : > { %v2176_v34 = vmul.f32 %v2107_v3, %v2107_v3 }
 0x3aa   : > { %v1878_v44 = vadd.f32 %v1877_v35, %v1859_v36 }
 0x3ac   : > { %v1897_v11 = vadd.f32 %v1896_v1, %v1878_v44 }
 0x3ad   : > { %v1937_v40 = vpop.f32.mrf.mxu2 }
 0x3ae   : > { %v2095_v16 = vadd.f32 %v2079_v30, %v1897_v11  ;;  %v1938_v60 = vadd.f32 %v1937_v40, %v1919_v28 }
 0x3af   : > { %v1861_v20 = vpop.f32.mrf.mxu0 }
 0x3b0   : > { %v1862_v49 = vadd.f32 %v1861_v20, %v4530_v62  ;;  %v2111_v59 = vsel %vm3491_vm4, %v2095_v16, 0.0  ;;  %v2084_v20 = vunpack.c.h.bf16 %v557_v4 }
 0x3b1   : > { %v2180_v45 = vmul.f32 %v2111_v59, %v2111_v59 }
 0x3b2   : > { %v1881_v48 = vadd.f32 %v1880_v31, %v1862_v49 }
 0x3b4   : > { %v1900_v47 = vadd.f32 %v1899_v15, %v1881_v48 }
 0x3b5   : > { %v1939_v52 = vpop.f32.mrf.mxu2 }
 0x3b6   : > { %v2099_v14 = vadd.f32 %v2083_v51, %v1900_v47  ;;  %v1940_v17 = vadd.f32 %v1939_v52, %v1921_v46  ;;  %v554_v47 = vld [vmem:[%s3037_s21 + $0x8] sm:$0xff] }
 0x3b7   : > { %v1863_v2 = vpop.f32.mrf.mxu0 }
 0x3b8   : > { %v1864_v43 = vadd.f32 %v1863_v2, %v4544_v25  ;;  %v2115_v36 = vsel %vm3491_vm4, %v2099_v14, 0.0  ;;  %v556_v14 = vld [vmem:[%s3037_s21 + $0x18] sm:$0xff] }
 0x3b9   : > { %v2184_v13 = vmul.f32 %v2115_v36, %v2115_v36  ;;  %v2081_v46 = vunpack.c.l.bf16 %v556_v14 }
 0x3ba   : > { %v1883_v15 = vadd.f32 %v1882_v38, %v1864_v43  ;;  %v2077_v38 = vunpack.c.l.bf16 %v554_v47 }
 0x3bb   : > { %v1970_v31 = vpop.f32.mrf.mxu1 }
 0x3bc   : > { %v1902_v35 = vadd.f32 %v4519_v54, %v1883_v15  ;;  %v1971_v51 = vadd.f32 %v1970_v31, %v4521_v50 }
 0x3be   : > { %v2103_v54 = vadd.f32 %v2087_v39, %v1902_v35  ;;  %v2078_v35 = vunpack.c.h.bf16 %v554_v47 }
 0x3bf   : > { %v1951_v19 = vpop.f32.mrf.mxu0 }
 0x3c0   : > { %v1952_v5 = vadd.f32 %v1951_v19, %v1933_v53  ;;  %v2088_v19 = vunpack.c.h.bf16 %v559_v6 }
 0x3c2   : > { %v2092_v26 = vadd.f32 %v2076_v0, %v1952_v5 }
 0x3c3   : > { %v1972_v48 = vpop.f32.mrf.mxu1 }
 0x3c4   : > { %v2108_v56 = vsel %vm3504_vm14, %v2092_v26, 0.0  ;;  %v2119_v26 = vsel %vm3491_vm4, %v2103_v54, 0.0  ;;  %vm2167_vm4 = vcmask 7168  }
 0x3c5   : > { %v2123_v42 = vpack.c.bf16 %v2108_v56, %v2107_v3  ;;  %v4538_v10 = vadd.f32 %v2108_v56, %v2107_v3  ;;  %v2177_v41 = vmul.f32 %v2108_v56, %v2108_v56 }
 0x3c7   : > { %2131 = vst [vmem:[%s3040_s15] sm:$0xff] %v2123_v42  ;;  %v1953_v22 = vpop.f32.mrf.mxu0  ;;  %v4542_v32 = vadd.f32 %v2177_v41, %v2176_v34  ;;  %v2188_v41 = vmul.f32 %v2119_v26, %v2119_v26 }
 0x3c8   : > { %v1954_v61 = vadd.f32 %v1953_v22, %v1935_v12  ;;  %v1989_v12 = vpop.f32.mrf.mxu3 }
 0x3ca   : > { %v2096_v8 = vadd.f32 %v2080_v27, %v1954_v61 }
 0x3cb   : > { %v1975_v16 = vpop.f32.mrf.mxu1 }
 0x3cc   : > { %v2112_v18 = vsel %vm3504_vm14, %v2096_v8, 0.0  ;;  %v1990_v8 = vadd.f32 %v1989_v12, %v1971_v51  ;;  %v1976_v28 = vadd.f32 %v1975_v16, %v4530_v62 }
 0x3cd   : > { %v2125_v58 = vpack.c.bf16 %v2112_v18, %v2111_v59  ;;  %v4552_v1 = vadd.f32 %v2112_v18, %v2111_v59  ;;  %v2181_v63 = vmul.f32 %v2112_v18, %v2112_v18 }
 0x3cf   : > { %2133 = vst [vmem:[%s3040_s15 + $0x10] sm:$0xff] %v2125_v58  ;;  %v1956_v7 = vpop.f32.mrf.mxu0  ;;  %v4556_v37 = vadd.f32 %v2181_v63, %v2180_v45  ;;  %v1973_v58 = vadd.f32 %v1972_v48, %v4525_v23  ;;  %v558_v45 = vld [vmem:[%s3037_s21 + $0x28] sm:$0xff] }
 0x3d0   : > { %v1957_v2 = vadd.f32 %v1956_v7, %v1938_v60  ;;  %v1991_v27 = vpop.f32.mrf.mxu3  ;;  %v2086_v12 = vunpack.c.h.bf16 %v558_v45 }
 0x3d1   : > { %v1992_v6 = vadd.f32 %v1991_v27, %v1973_v58 }
 0x3d2   : > { %v2100_v24 = vadd.f32 %v2084_v20, %v1957_v2 }
 0x3d3   : > { %v1977_v21 = vpop.f32.mrf.mxu1 }
 0x3d4   : > { %v2116_v53 = vsel %vm3504_vm14, %v2100_v24, 0.0  ;;  %v1978_v2 = vadd.f32 %v1977_v21, %v4544_v25  ;;  %v2082_v21 = vunpack.c.h.bf16 %v556_v14 }
 0x3d5   : > { %v2127_v44 = vpack.c.bf16 %v2116_v53, %v2115_v36  ;;  %v4564_v0 = vadd.f32 %v2116_v53, %v2115_v36  ;;  %v2185_v29 = vmul.f32 %v2116_v53, %v2116_v53  ;;  %v2085_v36 = vunpack.c.l.bf16 %v558_v45 }
 0x3d7   : > { %2135 = vst [vmem:[%s3040_s15 + $0x20] sm:$0xff] %v2127_v44  ;;  %v1958_v5 = vpop.f32.mrf.mxu0  ;;  %v4567_v30 = vadd.f32 %v2185_v29, %v2184_v13  ;;  %v560_v29 = vld [vmem:[%s3037_s21 + $0x38] sm:$0xff] }
 0x3d8   : > { %v1959_v11 = vadd.f32 %v1958_v5, %v1940_v17  ;;  %v1994_v55 = vpop.f32.mrf.mxu3 }
 0x3d9   : > { %v1995_v15 = vadd.f32 %v1994_v55, %v1976_v28 }
 0x3da   : > { %v2104_v49 = vadd.f32 %v2088_v19, %v1959_v11 }
 0x3dc   : > { %v2120_v3 = vsel %vm3504_vm14, %v2104_v49, 0.0  ;;  %v2008_v4 = vpop.f32.mrf.mxu2 }
 0x3dd   : > { %v2129_v57 = vpack.c.bf16 %v2120_v3, %v2119_v26  ;;  %v4573_v56 = vadd.f32 %v2120_v3, %v2119_v26  ;;  %v2189_v42 = vmul.f32 %v2120_v3, %v2120_v3  ;;  %v2009_v18 = vadd.f32 %v2008_v4, %v1990_v8 }
 0x3de   : > { %v2089_v3 = vunpack.c.l.bf16 %v560_v29 }
 0x3df   : > { %2137 = vst [vmem:[%s3040_s15 + $0x30] sm:$0xff] %v2129_v57  ;;  %v4576_v34 = vadd.f32 %v2189_v42, %v2188_v41  ;;  %v2093_v20 = vadd.f32 %v2077_v38, %v2009_v18 }
 0x3e0   : > { %v1996_v22 = vpop.f32.mrf.mxu3 }
 0x3e1   : > { %v2109_v44 = vsel %vm3517_vm13, %v2093_v20, 0.0  ;;  %v1997_v17 = vadd.f32 %v1996_v22, %v1978_v2 }
 0x3e2   : > { %v2144_v57 = vadd.f32 %v4538_v10, %v2109_v44 }
 0x3e4   : > { %v2010_v33 = vpop.f32.mrf.mxu2 }
 0x3e5   : > { %v2011_v52 = vadd.f32 %v2010_v33, %v1992_v6 }
 0x3e7   : > { %v2097_v49 = vadd.f32 %v2081_v46, %v2011_v52 }
 0x3ec   : > { %v2013_v40 = vpop.f32.mrf.mxu2 }
 0x3ed   : > { %v2014_v24 = vadd.f32 %v2013_v40, %v1995_v15 }
 0x3ef   : > { %v2101_v5 = vadd.f32 %v2085_v36, %v2014_v24 }
 0x3f2   : > { %v2046_v61 = vpop.f32.mrf.mxu1 }
 0x3f4   : > { %v2015_v63 = vpop.f32.mrf.mxu2 }
 0x3f5   : > { %v2016_v26 = vadd.f32 %v2015_v63, %v1997_v17 }
 0x3f7   : > { %v2105_v10 = vadd.f32 %v2089_v3, %v2016_v26  ;;  %v2140_v26 = vld [vmem:[#allocation2 + $0x8] sm:$0xff]  ;;  %v2172_v3 = vld [vmem:[#allocation3] sm:$0xff] }
 0x3f9   : > { %v2121_v15 = vsel %vm3517_vm13, %v2105_v10, 0.0 }
 0x3fa   : > { %v2048_v59 = vpop.f32.mrf.mxu1  ;;  %v2159_v24 = vadd.f32 %v4573_v56, %v2121_v15 }
 0x402   : > { %v2051_v54 = vpop.f32.mrf.mxu1 }
 0x40a   : > { %v2053_v58 = vpop.f32.mrf.mxu1 }
 0x40b   : > { %v2065_v43 = vpop.f32.mrf.mxu3 }
 0x411   : > { %v2027_v60 = vpop.f32.mrf.mxu0 }
 0x412   : > { %v2028_v7 = vadd.f32 %v2027_v60, %v4521_v50 }
 0x413   : > { %v2067_v9 = vpop.f32.mrf.mxu3 }
 0x414   : > { %v2047_v39 = vadd.f32 %v2046_v61, %v2028_v7  ;;  %v2178_v61 = vmul.f32 %v2109_v44, %v2109_v44 }
 0x416   : > { %v2066_v13 = vadd.f32 %v2065_v43, %v2047_v39  ;;  %v2193_v60 = vadd.f32 %v4542_v32, %v2178_v61 }
 0x417   : > { %v2032_v19 = vpop.f32.mrf.mxu2 }
 0x418   : > { %v2094_v50 = vadd.f32 %v2078_v35, %v2066_v13  ;;  %v2033_v11 = vadd.f32 %v2032_v19, %v4530_v62  ;;  %v2117_v62 = vsel %vm3517_vm13, %v2101_v5, 0.0  ;;  %v2190_v35 = vmul.f32 %v2121_v15, %v2121_v15 }
 0x419   : > { %v2029_v31 = vpop.f32.mrf.mxu0  ;;  %v2154_v43 = vadd.f32 %v4564_v0, %v2117_v62  ;;  %v2090_v0 = vunpack.c.h.bf16 %v560_v29  ;;  %v2186_v13 = vmul.f32 %v2117_v62, %v2117_v62 }
 0x41a   : > { %v2030_v42 = vadd.f32 %v2029_v31, %v4525_v23  ;;  %v2052_v41 = vadd.f32 %v2051_v54, %v2033_v11  ;;  %v2110_v27 = vsel %vm3536_vm12, %v2094_v50, 0.0  ;;  %v2113_v23 = vsel %vm3517_vm13, %v2097_v49, 0.0  ;;  %v2139_v50 = vld [vmem:[#allocation2] sm:$0xff]  ;;  %v2141_v49 = vld [vmem:[#allocation2 + $0x10] sm:$0xff] }
 0x41b   : > { %v2070_v16 = vpop.f32.mrf.mxu3  ;;  %v2124_v4 = vpack.c.bf16 %v2110_v27, %v2109_v44  ;;  %v2145_v55 = vadd.f32 %v2144_v57, %v2110_v27  ;;  %v2179_v8 = vmul.f32 %v2110_v27, %v2110_v27  ;;  %v2149_v45 = vadd.f32 %v4552_v1, %v2113_v23  ;;  %v2173_v27 = vld [vmem:[#allocation3 + $0x8] sm:$0xff] }
 0x41c   : > { %v2049_v33 = vadd.f32 %v2048_v59, %v2030_v42  ;;  %v2071_v22 = vadd.f32 %v2070_v16, %v2052_v41  ;;  %v2208_v29 = vadd.f32 %v4576_v34, %v2190_v35  ;;  %v2203_v56 = vadd.f32 %v4567_v30, %v2186_v13  ;;  %v2142_v30 = vld [vmem:[#allocation2 + $0x18] sm:$0xff] }
 0x41d   : > { %2132 = vst [vmem:[%s3040_s15 + $0x8] sm:$0xff] %v2124_v4  ;;  %2146 = vadd.xlane.f32.xlu0 %v2145_v55  ;;  %v2194_v2 = vadd.f32 %v2193_v60, %v2179_v8  ;;  %v2175_v16 = vld [vmem:[#allocation3 + $0x18] sm:$0xff] }
 0x41e   : > { %v2068_v40 = vadd.f32 %v2067_v9, %v2049_v33  ;;  %v2102_v51 = vadd.f32 %v2086_v12, %v2071_v22  ;;  %v2182_v9 = vmul.f32 %v2113_v23, %v2113_v23  ;;  %v2174_v22 = vld [vmem:[#allocation3 + $0x10] sm:$0xff] }
 0x41f   : > { %v2034_v47 = vpop.f32.mrf.mxu2 }
 0x420   : > { %v2098_v28 = vadd.f32 %v2082_v21, %v2068_v40  ;;  %v2118_v18 = vsel %vm3536_vm12, %v2102_v51, 0.0  ;;  %v2035_v59 = vadd.f32 %v2034_v47, %v4544_v25  ;;  %v2198_v52 = vadd.f32 %v4556_v37, %v2182_v9 }
 0x421   : > { %v2128_v38 = vpack.c.bf16 %v2118_v18, %v2117_v62  ;;  %v2155_v63 = vadd.f32 %v2154_v43, %v2118_v18  ;;  %v2187_v54 = vmul.f32 %v2118_v18, %v2118_v18 }
 0x422   : > { %v2054_v20 = vadd.f32 %v2053_v58, %v2035_v59  ;;  %v2114_v14 = vsel %vm3536_vm12, %v2098_v28, 0.0 }
 0x423   : > { %2136 = vst [vmem:[%s3040_s15 + $0x28] sm:$0xff] %v2128_v38  ;;  %v2072_v7 = vpop.f32.mrf.mxu3  ;;  %2156 = vadd.xlane.f32.xlu2 %v2155_v63  ;;  %v2150_v25 = vadd.f32 %v2149_v45, %v2114_v14  ;;  %v2126_v6 = vpack.c.bf16 %v2114_v14, %v2113_v23  ;;  %v2183_v36 = vmul.f32 %v2114_v14, %v2114_v14 }
 0x424   : > { %v2073_v1 = vadd.f32 %v2072_v7, %v2054_v20  ;;  %v2204_v5 = vadd.f32 %v2203_v56, %v2187_v54 }
 0x425   : > { %2151 = vadd.xlane.f32.xlu1 %v2150_v25  ;;  %2134 = vst [vmem:[%s3040_s15 + $0x18] sm:$0xff] %v2126_v6  ;;  %2195 = vadd.xlane.f32.xlu0 %v2194_v2  ;;  %v2199_v17 = vadd.f32 %v2198_v52, %v2183_v36 }
 0x426   : > { %v2106_v32 = vadd.f32 %v2090_v0, %v2073_v1 }
 0x428   : > { %v2122_v39 = vsel %vm3536_vm12, %v2106_v32, 0.0 }
 0x429   : > { %v2130_v46 = vpack.c.bf16 %v2122_v39, %v2121_v15  ;;  %v2160_v53 = vadd.f32 %v2159_v24, %v2122_v39  ;;  %v2191_v44 = vmul.f32 %v2122_v39, %v2122_v39 }
 0x42b   : > { %2138 = vst [vmem:[%s3040_s15 + $0x38] sm:$0xff] %v2130_v46  ;;  %2161 = vadd.xlane.f32.xlu2 %v2160_v53  ;;  %v2209_v19 = vadd.f32 %v2208_v29, %v2191_v44 }
 0x42d   : > { %2200 = vadd.xlane.f32.xlu1 %v2199_v17  ;;  %2210 = vadd.xlane.f32.xlu0 %v2209_v19 }
 0x433   : > { %2205 = vadd.xlane.f32.xlu2 %v2204_v5 }
 0x490   : > { %v2147_v37 = vpop.xlane.xlu0 %2146 }
 0x491   : > { %v2163_v11 = vadd.f32 %v2147_v37, %v2139_v50 }
 0x493   : > { %2168 = vst.msk [vmem:[#allocation2] sm:$0xff] %vm2167_vm4, %v2163_v11 }
 0x496   : > { %v2157_v34 = vpop.xlane.xlu2 %2156 }
 0x497   : > { %v2165_v31 = vadd.f32 %v2157_v34, %v2141_v49 }
 0x498   : > { %v2152_v57 = vpop.xlane.xlu1 %2151  ;;  %v2196_v42 = vpop.xlane.xlu0 %2195 }
 0x499   : > { %2170 = vst.msk [vmem:[#allocation2 + $0x10] sm:$0xff] %vm2167_vm4, %v2165_v31  ;;  %v2164_v41 = vadd.f32 %v2152_v57, %v2140_v26  ;;  %v2212_v12 = vadd.f32 %v2196_v42, %v2172_v3 }
 0x49b   : > { %2169 = vst.msk [vmem:[#allocation2 + $0x8] sm:$0xff] %vm2167_vm4, %v2164_v41 }
 0x49c   : > { %2216 = vst.msk [vmem:[#allocation3] sm:$0xff] %vm2167_vm4, %v2212_v12 }
 0x49e   : > { %v2162_v48 = vpop.xlane.xlu2 %2161 }
 0x49f   : > { %v2166_v4 = vadd.f32 %v2162_v48, %v2142_v30 }
 0x4a0   : > { %v2201_v55 = vpop.xlane.xlu1 %2200  ;;  %v2211_v21 = vpop.xlane.xlu0 %2210 }
 0x4a1   : > { %2171 = vst.msk [vmem:[#allocation2 + $0x18] sm:$0xff] %vm2167_vm4, %v2166_v4  ;;  %v2213_v62 = vadd.f32 %v2201_v55, %v2173_v27  ;;  %v2215_v33 = vadd.f32 %v2211_v21, %v2175_v16 }
 0x4a3   : > { %2217 = vst.msk [vmem:[#allocation3 + $0x8] sm:$0xff] %vm2167_vm4, %v2213_v62 }
 0x4a4   : > { %2219 = vst.msk [vmem:[#allocation3 + $0x18] sm:$0xff] %vm2167_vm4, %v2215_v33 }
 0x4a5   : > { %2223 = sbr.rel (%p2607_p3) target bundleno = 1229 (0x4cd), region = 161 }
 0x4a6   : > { %v2206_v61 = vpop.xlane.xlu2 %2205 }
 0x4a7   : > { %v2214_v23 = vadd.f32 %v2206_v61, %v2174_v22 }
 0x4a9   : > { %2218 = vst.msk [vmem:[#allocation3 + $0x10] sm:$0xff] %vm2167_vm4, %v2214_v23 }
 0x4aa   : > { %v2224_v10 = vld [vmem:[#allocation2] sm:$0xff]  ;;  %v2225_v51 = vld [vmem:[#allocation2 + $0x8] sm:$0xff]  ;;  %v2226_v18 = vld [vmem:[#allocation2 + $0x10] sm:$0xff] }
 0x4ab   : > { %v2232_v40 = vld [vmem:[#allocation3] sm:$0xff]  ;;  %v2228_v47 = vmul.f32 0.001953125, %v2224_v10  ;;  %v2229_v8 = vmul.f32 0.001953125, %v2225_v51  ;;  %v2233_v28 = vld [vmem:[#allocation3 + $0x8] sm:$0xff]  ;;  %v2230_v58 = vmul.f32 0.001953125, %v2226_v18  ;;  %v2227_v45 = vld [vmem:[#allocation2 + $0x18] sm:$0xff] }
 0x4ac   : > { %v2236_v43 = vmul.f32 0.001953125, %v2232_v40  ;;  %v2237_v38 = vmul.f32 0.001953125, %v2233_v28  ;;  %v2235_v60 = vld [vmem:[#allocation3 + $0x18] sm:$0xff]  ;;  %v2231_v0 = vmul.f32 0.001953125, %v2227_v45 }
 0x4ad   : > { %v2240_v15 = vmul.f32 %v2228_v47, %v2228_v47  ;;  %2252 = vst.msk [vmem:[%s4888_s11] sm:$0xff] %vm2167_vm4, %v2228_v47  ;;  %v2241_v20 = vmul.f32 %v2229_v8, %v2229_v8  ;;  %v2239_v14 = vmul.f32 0.001953125, %v2235_v60  ;;  %v2242_v7 = vmul.f32 %v2230_v58, %v2230_v58 }
 0x4ae   : > { %2253 = vst.msk [vmem:[%s4889_s9 + $0x8] sm:$0xff] %vm2167_vm4, %v2229_v8  ;;  %v2243_v2 = vmul.f32 %v2231_v0, %v2231_v0 }
 0x4af   : > { %v2244_v25 = vsub.f32 %v2236_v43, %v2240_v15  ;;  %v2245_v6 = vsub.f32 %v2237_v38, %v2241_v20  ;;  %2254 = vst.msk [vmem:[%s4889_s9 + $0x10] sm:$0xff] %vm2167_vm4, %v2230_v58 }
 0x4b0   : > { %v2234_v59 = vld [vmem:[#allocation3 + $0x10] sm:$0xff]  ;;  %2255 = vst.msk [vmem:[%s4889_s9 + $0x18] sm:$0xff] %vm2167_vm4, %v2231_v0  ;;  %v2247_v32 = vsub.f32 %v2239_v14, %v2243_v2 }
 0x4b1   : > { %v2238_v63 = vmul.f32 0.001953125, %v2234_v59  ;;  %v2248_v1 = vmax.f32 %v2244_v25, 0.0  ;;  %v2249_v35 = vmax.f32 %v2245_v6, 0.0 }
 0x4b2   : > { %v2251_v52 = vmax.f32 %v2247_v32, 0.0 }
 0x4b3   : > { %v2246_v9 = vsub.f32 %v2238_v63, %v2242_v7  ;;  %v2256_v36 = vadd.f32 1e-05, %v2248_v1  ;;  %v2257_v39 = vadd.f32 1e-05, %v2249_v35 }
 0x4b4   : > { %v2259_v53 = vadd.f32 1e-05, %v2251_v52 }
 0x4b5   : > { %v2250_v24 = vmax.f32 %v2246_v9, 0.0  ;;  %2790 = vrsqrt.f32 %v2256_v36  ;;  %vm2266_vm14 = vweird.f32 %v2256_v36  ;;  %vm2276_vm12 = vweird.f32 %v2257_v39 }
 0x4b6   : > { %2792 = vrsqrt.f32 %v2257_v39  ;;  %vm2296_vm11 = vweird.f32 %v2259_v53 }
 0x4b7   : > { %v2258_v46 = vadd.f32 1e-05, %v2250_v24 }
 0x4b9   : > { %2794 = vrsqrt.f32 %v2258_v46  ;;  %vm2286_vm2 = vweird.f32 %v2258_v46 }
 0x4ba   : > { %2796 = vrsqrt.f32 %v2259_v53 }
 0x4bb   : > { %v2791_v44 = vpop.eup %2790 }
 0x4bc   : > { %v2793_v29 = vpop.eup %2792  ;;  %v2261_v13 = vmul.f32 %v2791_v44, %v2256_v36  ;;  %vm2267_vm13 = vweird.f32 %v2791_v44 }
 0x4bd   : > { %v2271_v19 = vmul.f32 %v2793_v29, %v2257_v39  ;;  %vm2277_vm7 = vweird.f32 %v2793_v29  ;;  %vm2268_vm3 = vmor %vm2266_vm14, %vm2267_vm13 }
 0x4be   : > { %v2262_v56 = vmul.f32 %v2791_v44, %v2261_v13  ;;  %vm2278_vm1 = vmor %vm2276_vm12, %vm2277_vm7 }
 0x4bf   : > { %v2795_v17 = vpop.eup %2794  ;;  %v2272_v50 = vmul.f32 %v2793_v29, %v2271_v19 }
 0x4c0   : > { %v2797_v54 = vpop.eup %2796  ;;  %v2281_v5 = vmul.f32 %v2795_v17, %v2258_v46  ;;  %v2263_v11 = vmul.f32 0.5, %v2262_v56  ;;  %vm2287_vm15 = vweird.f32 %v2795_v17 }
 0x4c1   : > { %v2291_v37 = vmul.f32 %v2797_v54, %v2259_v53  ;;  %v2273_v34 = vmul.f32 0.5, %v2272_v50  ;;  %vm2297_vm10 = vweird.f32 %v2797_v54  ;;  %vm2288_vm9 = vmor %vm2286_vm2, %vm2287_vm15 }
 0x4c2   : > { %v2282_v49 = vmul.f32 %v2795_v17, %v2281_v5  ;;  %v2264_v3 = vsub.f32 1.5, %v2263_v11  ;;  %vm2298_vm8 = vmor %vm2296_vm11, %vm2297_vm10 }
 0x4c3   : > { %v2292_v26 = vmul.f32 %v2797_v54, %v2291_v37  ;;  %v2274_v57 = vsub.f32 1.5, %v2273_v34 }
 0x4c4   : > { %v2283_v31 = vmul.f32 0.5, %v2282_v49  ;;  %v2265_v41 = vmul.f32 %v2791_v44, %v2264_v3 }
 0x4c5   : > { %v2293_v42 = vmul.f32 0.5, %v2292_v26  ;;  %v2275_v30 = vmul.f32 %v2793_v29, %v2274_v57 }
 0x4c6   : > { %v2284_v12 = vsub.f32 1.5, %v2283_v31  ;;  %v2269_v27 = vsel %vm2268_vm3, %v2791_v44, %v2265_v41 }
 0x4c7   : > { %v2294_v48 = vsub.f32 1.5, %v2293_v42  ;;  %2300 = vst.msk [vmem:[%s4890_s23] sm:$0xff] %vm2167_vm4, %v2269_v27  ;;  %v2279_v4 = vsel %vm2278_vm1, %v2793_v29, %v2275_v30 }
 0x4c8   : > { %v2285_v16 = vmul.f32 %v2795_v17, %v2284_v12  ;;  %2301 = vst.msk [vmem:[%s4890_s23 + $0x8] sm:$0xff] %vm2167_vm4, %v2279_v4 }
 0x4c9   : > { %v2295_v55 = vmul.f32 %v2797_v54, %v2294_v48 }
 0x4ca   : > { %v2289_v21 = vsel %vm2288_vm9, %v2795_v17, %v2285_v16 }
 0x4cb   : > { %2302 = vst.msk [vmem:[%s4890_s23 + $0x10] sm:$0xff] %vm2167_vm4, %v2289_v21  ;;  %v2299_v62 = vsel %vm2298_vm8, %v2797_v54, %v2295_v55 }
 0x4cc   : > { %2303 = vst.msk [vmem:[%s4890_s23 + $0x18] sm:$0xff] %vm2167_vm4, %v2299_v62 }
 0x4cd PF: > { %2310 = sbr.rel (!%p3002_p11) target bundleno = 1245 (0x4dd), region = 165  ;;  %s2609_s20 = sshll.u32 (%p3002_p11), %s2951_s16, 4  ;;  %v2327_v33 = vld [vmem:[%s3040_s15] sm:$0xff] (%p3002_p11)  ;;  %v2329_v22 = vld [vmem:[%s3040_s15 + $0x8] sm:$0xff] (%p3002_p11)  ;;  %v2331_v61 = vld [vmem:[%s3040_s15 + $0x10] sm:$0xff] (%p3002_p11) }
 0x4ce   : > { %s4891_s24 = sld [smem:[#allocation37_spill]] (%p3002_p11)  ;;  %v2333_v23 = vld [vmem:[%s3040_s15 + $0x18] sm:$0xff] (%p3002_p11)  ;;  %v2335_v10 = vld [vmem:[%s3040_s15 + $0x20] sm:$0xff] (%p3002_p11)  ;;  %v2337_v40 = vld [vmem:[%s3040_s15 + $0x28] sm:$0xff] (%p3002_p11) }
 0x4cf   : > { %v2339_v51 = vld [vmem:[%s3040_s15 + $0x30] sm:$0xff] (%p3002_p11)  ;;  %v2341_v47 = vld [vmem:[%s3040_s15 + $0x38] sm:$0xff] (%p3002_p11) }
 0x4d4   : > { %s2401_s28 = scalar_lea.vmem %s4891_s24, %s2609_s20 }
 0x4d5   : > { %2610 = vst [vmem:[%s2401_s28 + $0x10] sm:$0xff] %v2327_v33 }
 0x4d6   : > { %2611 = vst [vmem:[%s2401_s28 + $0x18] sm:$0xff] %v2329_v22 }
 0x4d7   : > { %2612 = vst [vmem:[%s2401_s28 + $0x50] sm:$0xff] %v2331_v61 }
 0x4d8   : > { %2613 = vst [vmem:[%s2401_s28 + $0x58] sm:$0xff] %v2333_v23 }
 0x4d9   : > { %2614 = vst [vmem:[%s2401_s28 + $0x90] sm:$0xff] %v2335_v10 }
 0x4da   : > { %2615 = vst [vmem:[%s2401_s28 + $0x98] sm:$0xff] %v2337_v40 }
 0x4db   : > { %2616 = vst [vmem:[%s2401_s28 + $0xd0] sm:$0xff] %v2339_v51 }
 0x4dc   : > { %2617 = vst [vmem:[%s2401_s28 + $0xd8] sm:$0xff] %v2341_v47 }
 0x4dd PF: > { %p17_p4 = scmp.ge.s32.totalorder %s2954_s17, 4   ;;  %s4892_s30 = smov %s2832_s10 }
 0x4de   : > { %s4893_s10 = smov %s2994_s25  ;;  %s4894_s11 = smov %s2840_s12 }
 0x4df   : > { %s4895_s12 = smov %s2981_s7  ;;  %s4896_s13 = smov %s2848_s14 }
 0x4e0   : > { %s4897_s14 = smov %s2975_s29  ;;  %s4898_s15 = smov %s2954_s17 }
 0x4e1   :  { %19 = sbr.rel (!%p17_p4) target bundleno = 8 (0x8), region = 251 }

</bundles_post_ra>
